<compile_context>
chip_gen: v5e
topology: v5e:2x2
jax: 0.10.0
libtpu: 0.0.40
codegen_flags: <defaults>
</compile_context>

<pallas_src>
import functools

import jax
import jax.numpy as jnp
from jax.experimental import pallas as pl
from jax.experimental.pallas import tpu as pltpu


# ---------------------------------------------------------------------------
# Pallas kernels
# ---------------------------------------------------------------------------
def _qkv_kernel(x_ref, w1_ref, b1_ref, wq_ref, bq_ref, wk_ref, bk_ref,
                wv_ref, bv_ref, q_ref, k_ref, v_ref):
    """x1 = relu(bn1(linear1(x))) ; q/k/v = linear_{q,k,v}(x1). Layout (C, TN)."""
    f32 = jnp.float32
    x = x_ref[...].astype(f32)                                          # (C, TN)
    h = jnp.dot(w1_ref[...], x, preferred_element_type=f32)             # bn1 folded into w1
    h = jnp.maximum(h + b1_ref[...], 0.0)
    q_ref[...] = (jnp.dot(wq_ref[...], h, preferred_element_type=f32) + bq_ref[...]).astype(q_ref.dtype)
    k_ref[...] = (jnp.dot(wk_ref[...], h, preferred_element_type=f32) + bk_ref[...]).astype(k_ref.dtype)
    v_ref[...] = (jnp.dot(wv_ref[...], h, preferred_element_type=f32) + bv_ref[...]).astype(v_ref.dtype)


def _attn_kernel(q_ref, kg_ref, vg_ref, pr_ref, xid_ref,
                 wp1_ref, bp1_ref, wp2_ref, bp2_ref,
                 aw_ref, cw_ref, wl1_ref, bl1_ref, wl2_ref, bl2_ref,
                 a2_ref, c2_ref, w3_ref, c3_ref, o_ref,
                 *, nsample, share_planes):
    """Fused PointTransformerLayer + bn2/relu + linear3/bn3 + residual for one point tile.

    q_ref/xid_ref/o_ref : (C, TN)        kg_ref/vg_ref : (nsample, C, TN)
    pr_ref              : (nsample, 8, TN)   (relative xyz zero-padded 3 -> 8 channels)
    """
    f32 = jnp.float32
    q = q_ref[...].astype(f32)                                          # (C, TN)
    C, TN = q.shape

    wp1, bp1 = wp1_ref[...], bp1_ref[...]                               # (8, 8), (8, 1)
    wp2, bp2 = wp2_ref[...], bp2_ref[...]                               # (C, 8), (C, 1)
    aw, cw = aw_ref[...], cw_ref[...]                                   # (C, 1)  bn in linear_w
    wl1, bl1 = wl1_ref[...], bl1_ref[...]                               # (Cs, C), (Cs, 1)
    wl2, bl2 = wl2_ref[...], bl2_ref[...]                               # (Cs, Cs), (Cs, 1)

    p_emb = []      # positional embedding per neighbour, (C, TN)
    att_list = []   # attention logits per neighbour, (Cs, TN)
    for j in range(nsample):
        prj = pr_ref[j].astype(f32)                                     # (8, TN)
        h = jnp.maximum(jnp.dot(wp1, prj, preferred_element_type=f32) + bp1, 0.0)
        pe = jnp.dot(wp2, h, preferred_element_type=f32) + bp2          # (C, TN)
        p_emb.append(pe)
        wj = kg_ref[j].astype(f32) - q + pe                             # (C, TN)
        wj = jnp.maximum(aw * wj + cw, 0.0)                             # bn + relu
        hj = jnp.maximum(jnp.dot(wl1, wj, preferred_element_type=f32) + bl1, 0.0)
        att_list.append(jnp.dot(wl2, hj, preferred_element_type=f32) + bl2)   # (Cs, TN)

    att = jnp.stack(att_list, axis=0)                                   # (ns, Cs, TN)
    att = att - jnp.max(att, axis=0, keepdims=True)                     # softmax over neighbours
    att = jnp.exp(att)
    att = att / jnp.sum(att, axis=0, keepdims=True)

    agg = jnp.zeros((C, TN), f32)
    for j in range(nsample):
        # share_planes grouping: weight for channel c is att[j, c % Cs, :]
        w_full = jnp.concatenate([att[j]] * share_planes, axis=0)       # (C, TN)
        agg = agg + (vg_ref[j].astype(f32) + p_emb[j]) * w_full

    y = jnp.maximum(a2_ref[...] * agg + c2_ref[...], 0.0)               # bn2 + relu
    z = jnp.dot(w3_ref[...], y, preferred_element_type=f32) + c3_ref[...]   # linear3 + bn3 folded
    o_ref[...] = (z + xid_ref[...].astype(f32)).astype(o_ref.dtype)     # residual


# ---------------------------------------------------------------------------
# Helpers (JAX side)
# ---------------------------------------------------------------------------
def _bn_fold(gamma, beta, mean, var, eps=1e-5):
    s = gamma / jnp.sqrt(var + eps)
    return s, beta - mean * s


def _col(v):
    return jnp.asarray(v, jnp.float32).reshape(-1, 1)


def _knn_indices(p, offsets, nsample):
    """k nearest neighbours (incl. self) restricted to each batch segment (offsets)."""
    n = p.shape[0]
    batch_id = jnp.sum(jnp.arange(n)[:, None] >= offsets[None, :], axis=1)
    d2 = jnp.sum((p[:, None, :] - p[None, :, :]) ** 2, axis=-1)
    same = batch_id[:, None] == batch_id[None, :]
    d2 = jnp.where(same, d2, jnp.inf)
    _, idx = jax.lax.top_k(-d2, nsample)
    return idx                                                          # (N, nsample)


# ---------------------------------------------------------------------------
# Wrapper: full block forward
# ---------------------------------------------------------------------------
@functools.partial(jax.jit, static_argnames=("nsample", "share_planes", "tile_n"))
def point_transformer_block(p, x, offsets, params, *, nsample=16, share_planes=8,
                            tile_n=128):
    """p: (N, 3) xyz, x: (N, C) features, offsets: (B,) cumulative counts. Returns (N, C)."""
    n, c = x.shape

    idx = _knn_indices(p, offsets, nsample)                             # (N, ns)

    # ---- fold every BatchNorm (inference mode) into scale/shift or weights ----
    s1, t1 = _bn_fold(*params["bn1"])
    w1 = s1[:, None] * params["linear1_w"]
    sp, tp = _bn_fold(*params["p_bn"])
    wp1 = sp[:, None] * params["p_conv1_w"]
    bp1 = sp * params["p_conv1_b"] + tp
    aw, cw = _bn_fold(*params["w_bn1"])
    s2, t2 = _bn_fold(*params["w_bn2"])
    wl1 = s2[:, None] * params["w_conv1_w"]
    bl1 = s2 * params["w_conv1_b"] + t2
    a2, c2 = _bn_fold(*params["bn2"])
    a3, c3 = _bn_fold(*params["bn3"])
    w3 = a3[:, None] * params["linear3_w"]

    # pad the 3-channel positional path to 8 channels (sublane alignment)
    wp1_p = jnp.zeros((8, 8), jnp.float32).at[:3, :3].set(wp1)
    bp1_p = jnp.zeros((8,), jnp.float32).at[:3].set(bp1)
    wp2_p = jnp.zeros((c, 8), jnp.float32).at[:, :3].set(params["p_conv2_w"])

    # ---- NCW-native layout: channels on sublanes, points on lanes ----
    n_pad = pl.cdiv(n, tile_n) * tile_n
    xt = jnp.pad(x.astype(jnp.float32).T, ((0, 0), (0, n_pad - n)))     # (C, Npad)

    grid = (n_pad // tile_n,)
    row_spec = pl.BlockSpec((c, tile_n), lambda i: (0, i))

    def _const_spec(a):
        return pl.BlockSpec(a.shape, lambda i, nd=a.ndim: (0,) * nd)

    # ---- kernel A: linear1+bn1+relu and the q/k/v projections ----
    qkv_params = [w1, _col(t1),
                  params["q_w"], _col(params["q_b"]),
                  params["k_w"], _col(params["k_b"]),
                  params["v_w"], _col(params["v_b"])]
    q, k, v = pl.pallas_call(
        _qkv_kernel,
        out_shape=tuple(jax.ShapeDtypeStruct((c, n_pad), jnp.float32) for _ in range(3)),
        grid_spec=pltpu.PrefetchScalarGridSpec(
            num_scalar_prefetch=0,
            grid=grid,
            in_specs=[row_spec] + [_const_spec(a) for a in qkv_params],
            out_specs=[row_spec, row_spec, row_spec],
        ),
        compiler_params=pltpu.CompilerParams(dimension_semantics=("parallel",)),
    )(xt, *qkv_params)

    # ---- neighbour gather (JAX/XLA) ----
    k_g = jnp.transpose(k[:, idx], (2, 0, 1))                           # (ns, C, N)
    v_g = jnp.transpose(v[:, idx], (2, 0, 1))                           # (ns, C, N)
    p_rel = p[idx].astype(jnp.float32) - p[:, None, :].astype(jnp.float32)   # (N, ns, 3)
    p_rel = jnp.transpose(p_rel, (1, 2, 0))                             # (ns, 3, N)
    p_rel = jnp.pad(p_rel, ((0, 0), (0, 5), (0, 0)))                    # 3 -> 8 channels

    pad_n = ((0, 0), (0, 0), (0, n_pad - n))
    k_g = jnp.pad(k_g, pad_n)
    v_g = jnp.pad(v_g, pad_n)
    p_rel = jnp.pad(p_rel, pad_n)

    # ---- kernel B: fused attention + bn2/relu + linear3/bn3 + residual ----
    grp_spec = pl.BlockSpec((nsample, c, tile_n), lambda i: (0, 0, i))
    pr_spec = pl.BlockSpec((nsample, 8, tile_n), lambda i: (0, 0, i))

    attn_params = [wp1_p, _col(bp1_p), wp2_p, _col(params["p_conv2_b"]),
                   _col(aw), _col(cw), wl1, _col(bl1),
                   params["w_conv2_w"], _col(params["w_conv2_b"]),
                   _col(a2), _col(c2), w3, _col(c3)]

    out = pl.pallas_call(
        functools.partial(_attn_kernel, nsample=nsample, share_planes=share_planes),
        out_shape=jax.ShapeDtypeStruct((c, n_pad), jnp.float32),
        grid_spec=pltpu.PrefetchScalarGridSpec(
            num_scalar_prefetch=0,
            grid=grid,
            in_specs=[row_spec, grp_spec, grp_spec, pr_spec, row_spec]
                     + [_const_spec(a) for a in attn_params],
            out_specs=row_spec,
        ),
        compiler_params=pltpu.CompilerParams(dimension_semantics=("parallel",)),
    )(q, k_g, v_g, p_rel, xt, *attn_params)

    return out[:, :n].T.astype(x.dtype)                                 # back to (N, C)


# ---------------------------------------------------------------------------
# Parameter init (PyTorch-like) and pure-JAX reference
# ---------------------------------------------------------------------------
def init_params(key, planes, share_planes=8):
    cs = planes // share_planes

    def linear(k, out_d, in_d, bias=True):
        kw, kb = jax.random.split(k)
        bound = 1.0 / (in_d ** 0.5)
        w = jax.random.uniform(kw, (out_d, in_d), jnp.float32, -bound, bound)
        b = jax.random.uniform(kb, (out_d,), jnp.float32, -bound, bound) if bias else None
        return w, b

    def bn(k, d):
        kg, kb, km, kv = jax.random.split(k, 4)
        gamma = jax.random.uniform(kg, (d,), jnp.float32, 0.5, 1.5)
        beta = jax.random.uniform(kb, (d,), jnp.float32, -0.2, 0.2)
        mean = 0.1 * jax.random.normal(km, (d,), jnp.float32)
        var = jax.random.uniform(kv, (d,), jnp.float32, 0.5, 1.5)
        return gamma, beta, mean, var

    ks = jax.random.split(key, 15)
    w1, _ = linear(ks[0], planes, planes, bias=False)
    qw, qb = linear(ks[1], planes, planes)
    kw_, kb_ = linear(ks[2], planes, planes)
    vw, vb = linear(ks[3], planes, planes)
    pc1w, pc1b = linear(ks[4], 3, 3)
    pc2w, pc2b = linear(ks[5], planes, 3)
    wc1w, wc1b = linear(ks[6], cs, planes)
    wc2w, wc2b = linear(ks[7], cs, cs)
    w3, _ = linear(ks[8], planes, planes, bias=False)
    return {
        "linear1_w": w1, "bn1": bn(ks[9], planes),
        "q_w": qw, "q_b": qb, "k_w": kw_, "k_b": kb_, "v_w": vw, "v_b": vb,
        "p_conv1_w": pc1w, "p_conv1_b": pc1b, "p_bn": bn(ks[10], 3),
        "p_conv2_w": pc2w, "p_conv2_b": pc2b,
        "w_bn1": bn(ks[11], planes),
        "w_conv1_w": wc1w, "w_conv1_b": wc1b, "w_bn2": bn(ks[12], cs),
        "w_conv2_w": wc2w, "w_conv2_b": wc2b,
        "bn2": bn(ks[13], planes),
        "linear3_w": w3, "bn3": bn(ks[14], planes),
    }


def reference_forward(p, x, offsets, params, nsample=16, share_planes=8):
    """Pure-JAX mirror of PointTransformerBlock.forward (BatchNorm in inference mode)."""
    def bn_apply(t, bnp):
        g, b, m, var = bnp
        return g * (t - m) / jnp.sqrt(var + 1e-5) + b

    n, c = x.shape
    cs = c // share_planes
    idx = _knn_indices(p, offsets, nsample)

    x1 = jnp.maximum(bn_apply(x @ params["linear1_w"].T, params["bn1"]), 0.0)
    q = x1 @ params["q_w"].T + params["q_b"]
    k = x1 @ params["k_w"].T + params["k_b"]
    v = x1 @ params["v_w"].T + params["v_b"]

    k_g, v_g = k[idx], v[idx]                                           # (N, ns, C)
    p_r = p[idx] - p[:, None, :]                                        # (N, ns, 3)
    h = jnp.maximum(bn_apply(p_r @ params["p_conv1_w"].T + params["p_conv1_b"],
                             params["p_bn"]), 0.0)
    p_emb = h @ params["p_conv2_w"].T + params["p_conv2_b"]             # (N, ns, C)

    w = k_g - q[:, None, :] + p_emb
    w = jnp.maximum(bn_apply(w, params["w_bn1"]), 0.0)
    w = w @ params["w_conv1_w"].T + params["w_conv1_b"]
    w = jnp.maximum(bn_apply(w, params["w_bn2"]), 0.0)
    w = w @ params["w_conv2_w"].T + params["w_conv2_b"]                 # (N, ns, Cs)
    w = jax.nn.softmax(w, axis=1)

    vp = (v_g + p_emb).reshape(n, nsample, share_planes, cs)
    attn = (vp * w[:, :, None, :]).sum(axis=1).reshape(n, c)

    y = jnp.maximum(bn_apply(attn, params["bn2"]), 0.0)
    z = bn_apply(y @ params["linear3_w"].T, params["bn3"])
    return z + x


# ---------------------------------------------------------------------------
if __name__ == "__main__":
    key = jax.random.PRNGKey(0)
    planes, share_planes, nsample = 64, 8, 16
    n_per_batch, batches = 128, 2
    n = n_per_batch * batches

    kp, kx, kparam = jax.random.split(key, 3)
    p = jax.random.uniform(kp, (n, 3), jnp.float32)
    x = jax.random.normal(kx, (n, planes), jnp.float32)
    offsets = jnp.array([n_per_batch * (i + 1) for i in range(batches)], jnp.int32)
    params = init_params(kparam, planes, share_planes)

    out = point_transformer_block(p, x, offsets, params,
                                  nsample=nsample, share_planes=share_planes, tile_n=128)
    out = jax.block_until_ready(out)

    ref = reference_forward(p, x, offsets, params,
                            nsample=nsample, share_planes=share_planes)
    assert out.shape == (n, planes), out.shape
    assert bool(jnp.all(jnp.isfinite(out)))
    assert jnp.allclose(out, ref, atol=2e-2, rtol=2e-2), float(jnp.max(jnp.abs(out - ref)))

    print("KERNEL_OK")
</pallas_src>

<mosaic_0001>
module attributes {stable_mosaic.version = 11 : i64} {
  func.func @_qkv_kernel(%arg0: i32, %arg1: memref<64x128xf32, #tpu.memory_space<vmem>>, %arg2: memref<64x64xf32, #tpu.memory_space<vmem>>, %arg3: memref<64x1xf32, #tpu.memory_space<vmem>>, %arg4: memref<64x64xf32, #tpu.memory_space<vmem>>, %arg5: memref<64x1xf32, #tpu.memory_space<vmem>>, %arg6: memref<64x64xf32, #tpu.memory_space<vmem>>, %arg7: memref<64x1xf32, #tpu.memory_space<vmem>>, %arg8: memref<64x64xf32, #tpu.memory_space<vmem>>, %arg9: memref<64x1xf32, #tpu.memory_space<vmem>>, %arg10: memref<64x128xf32, #tpu.memory_space<vmem>>, %arg11: memref<64x128xf32, #tpu.memory_space<vmem>>, %arg12: memref<64x128xf32, #tpu.memory_space<vmem>>) attributes {dimension_semantics = [#tpu.dimension_semantics<parallel>], iteration_bounds = array<i64: 2>, scalar_prefetch = 0 : i64, scratch_operands = 0 : i64, tpu.core_type = #tpu.core_type<tc>, window_params = [{transform_indices = @transform_0, window_bounds = array<i64: 64, 128>}, {pipeline_mode = #tpu.pipeline_mode<synchronous>, transform_indices = @transform_1, window_bounds = array<i64: 64, 64>}, {pipeline_mode = #tpu.pipeline_mode<synchronous>, transform_indices = @transform_2, window_bounds = array<i64: 64, 1>}, {pipeline_mode = #tpu.pipeline_mode<synchronous>, transform_indices = @transform_3, window_bounds = array<i64: 64, 64>}, {pipeline_mode = #tpu.pipeline_mode<synchronous>, transform_indices = @transform_4, window_bounds = array<i64: 64, 1>}, {pipeline_mode = #tpu.pipeline_mode<synchronous>, transform_indices = @transform_5, window_bounds = array<i64: 64, 64>}, {pipeline_mode = #tpu.pipeline_mode<synchronous>, transform_indices = @transform_6, window_bounds = array<i64: 64, 1>}, {pipeline_mode = #tpu.pipeline_mode<synchronous>, transform_indices = @transform_7, window_bounds = array<i64: 64, 64>}, {pipeline_mode = #tpu.pipeline_mode<synchronous>, transform_indices = @transform_8, window_bounds = array<i64: 64, 1>}, {transform_indices = @transform_9, window_bounds = array<i64: 64, 128>}, {transform_indices = @transform_10, window_bounds = array<i64: 64, 128>}, {transform_indices = @transform_11, window_bounds = array<i64: 64, 128>}]} {
    %c0 = arith.constant 0 : index
    %c0_0 = arith.constant 0 : index
    %0 = vector.load %arg1[%c0, %c0_0] : memref<64x128xf32, #tpu.memory_space<vmem>>, vector<64x128xf32>
    %c0_1 = arith.constant 0 : index
    %c0_2 = arith.constant 0 : index
    %1 = vector.load %arg2[%c0_1, %c0_2] : memref<64x64xf32, #tpu.memory_space<vmem>>, vector<64x64xf32>
    %cst = arith.constant dense<0.000000e+00> : vector<64x128xf32>
    %2 = tpu.matmul %1, %0, %cst {dimension_numbers = #tpu.dot_dimension_numbers<[1], [0], [0], [1], [0, 0, 1, 1], [], []>} : vector<64x64xf32>, vector<64x128xf32>, vector<64x128xf32> -> vector<64x128xf32>
    %c0_3 = arith.constant 0 : index
    %c0_4 = arith.constant 0 : index
    %3 = vector.load %arg3[%c0_3, %c0_4] : memref<64x1xf32, #tpu.memory_space<vmem>>, vector<64x1xf32>
    %4 = vector.broadcast %3 : vector<64x1xf32> to vector<64x128xf32>
    %5 = arith.addf %2, %4 : vector<64x128xf32>
    %cst_5 = arith.constant 0.000000e+00 : f32
    %6 = vector.broadcast %cst_5 : f32 to vector<64x128xf32>
    %7 = arith.maximumf %5, %6 : vector<64x128xf32>
    %c0_6 = arith.constant 0 : index
    %c0_7 = arith.constant 0 : index
    %8 = vector.load %arg4[%c0_6, %c0_7] : memref<64x64xf32, #tpu.memory_space<vmem>>, vector<64x64xf32>
    %cst_8 = arith.constant dense<0.000000e+00> : vector<64x128xf32>
    %9 = tpu.matmul %8, %7, %cst_8 {dimension_numbers = #tpu.dot_dimension_numbers<[1], [0], [0], [1], [0, 0, 1, 1], [], []>} : vector<64x64xf32>, vector<64x128xf32>, vector<64x128xf32> -> vector<64x128xf32>
    %c0_9 = arith.constant 0 : index
    %c0_10 = arith.constant 0 : index
    %10 = vector.load %arg5[%c0_9, %c0_10] : memref<64x1xf32, #tpu.memory_space<vmem>>, vector<64x1xf32>
    %11 = vector.broadcast %10 : vector<64x1xf32> to vector<64x128xf32>
    %12 = arith.addf %9, %11 : vector<64x128xf32>
    %c0_11 = arith.constant 0 : index
    %c0_12 = arith.constant 0 : index
    %13 = vector.load %arg10[%c0_11, %c0_12] : memref<64x128xf32, #tpu.memory_space<vmem>>, vector<64x128xf32>
    tpu.vector_store %arg10[%c0_11, %c0_12], %12 {strides = array<i32>} : memref<64x128xf32, #tpu.memory_space<vmem>>, vector<64x128xf32>,
    %c0_13 = arith.constant 0 : index
    %c0_14 = arith.constant 0 : index
    %14 = vector.load %arg6[%c0_13, %c0_14] : memref<64x64xf32, #tpu.memory_space<vmem>>, vector<64x64xf32>
    %cst_15 = arith.constant dense<0.000000e+00> : vector<64x128xf32>
    %15 = tpu.matmul %14, %7, %cst_15 {dimension_numbers = #tpu.dot_dimension_numbers<[1], [0], [0], [1], [0, 0, 1, 1], [], []>} : vector<64x64xf32>, vector<64x128xf32>, vector<64x128xf32> -> vector<64x128xf32>
    %c0_16 = arith.constant 0 : index
    %c0_17 = arith.constant 0 : index
    %16 = vector.load %arg7[%c0_16, %c0_17] : memref<64x1xf32, #tpu.memory_space<vmem>>, vector<64x1xf32>
    %17 = vector.broadcast %16 : vector<64x1xf32> to vector<64x128xf32>
    %18 = arith.addf %15, %17 : vector<64x128xf32>
    %c0_18 = arith.constant 0 : index
    %c0_19 = arith.constant 0 : index
    %19 = vector.load %arg11[%c0_18, %c0_19] : memref<64x128xf32, #tpu.memory_space<vmem>>, vector<64x128xf32>
    tpu.vector_store %arg11[%c0_18, %c0_19], %18 {strides = array<i32>} : memref<64x128xf32, #tpu.memory_space<vmem>>, vector<64x128xf32>,
    %c0_20 = arith.constant 0 : index
    %c0_21 = arith.constant 0 : index
    %20 = vector.load %arg8[%c0_20, %c0_21] : memref<64x64xf32, #tpu.memory_space<vmem>>, vector<64x64xf32>
    %cst_22 = arith.constant dense<0.000000e+00> : vector<64x128xf32>
    %21 = tpu.matmul %20, %7, %cst_22 {dimension_numbers = #tpu.dot_dimension_numbers<[1], [0], [0], [1], [0, 0, 1, 1], [], []>} : vector<64x64xf32>, vector<64x128xf32>, vector<64x128xf32> -> vector<64x128xf32>
    %c0_23 = arith.constant 0 : index
    %c0_24 = arith.constant 0 : index
    %22 = vector.load %arg9[%c0_23, %c0_24] : memref<64x1xf32, #tpu.memory_space<vmem>>, vector<64x1xf32>
    %23 = vector.broadcast %22 : vector<64x1xf32> to vector<64x128xf32>
    %24 = arith.addf %21, %23 : vector<64x128xf32>
    %c0_25 = arith.constant 0 : index
    %c0_26 = arith.constant 0 : index
    %25 = vector.load %arg12[%c0_25, %c0_26] : memref<64x128xf32, #tpu.memory_space<vmem>>, vector<64x128xf32>
    tpu.vector_store %arg12[%c0_25, %c0_26], %24 {strides = array<i32>} : memref<64x128xf32, #tpu.memory_space<vmem>>, vector<64x128xf32>,
    return
  }
  func.func @transform_0(%arg0: i32) -> (i32, i32) {
    %c0_i32 = arith.constant 0 : i32
    %c0_i32_0 = arith.constant 0 : i32
    return %c0_i32, %arg0 : i32, i32
  }
  func.func @transform_1(%arg0: i32) -> (i32, i32) {
    %c0_i32 = arith.constant 0 : i32
    %c0_i32_0 = arith.constant 0 : i32
    %c0_i32_1 = arith.constant 0 : i32
    return %c0_i32, %c0_i32_0 : i32, i32
  }
  func.func @transform_2(%arg0: i32) -> (i32, i32) {
    %c0_i32 = arith.constant 0 : i32
    %c0_i32_0 = arith.constant 0 : i32
    %c0_i32_1 = arith.constant 0 : i32
    return %c0_i32, %c0_i32_0 : i32, i32
  }
  func.func @transform_3(%arg0: i32) -> (i32, i32) {
    %c0_i32 = arith.constant 0 : i32
    %c0_i32_0 = arith.constant 0 : i32
    %c0_i32_1 = arith.constant 0 : i32
    return %c0_i32, %c0_i32_0 : i32, i32
  }
  func.func @transform_4(%arg0: i32) -> (i32, i32) {
    %c0_i32 = arith.constant 0 : i32
    %c0_i32_0 = arith.constant 0 : i32
    %c0_i32_1 = arith.constant 0 : i32
    return %c0_i32, %c0_i32_0 : i32, i32
  }
  func.func @transform_5(%arg0: i32) -> (i32, i32) {
    %c0_i32 = arith.constant 0 : i32
    %c0_i32_0 = arith.constant 0 : i32
    %c0_i32_1 = arith.constant 0 : i32
    return %c0_i32, %c0_i32_0 : i32, i32
  }
  func.func @transform_6(%arg0: i32) -> (i32, i32) {
    %c0_i32 = arith.constant 0 : i32
    %c0_i32_0 = arith.constant 0 : i32
    %c0_i32_1 = arith.constant 0 : i32
    return %c0_i32, %c0_i32_0 : i32, i32
  }
  func.func @transform_7(%arg0: i32) -> (i32, i32) {
    %c0_i32 = arith.constant 0 : i32
    %c0_i32_0 = arith.constant 0 : i32
    %c0_i32_1 = arith.constant 0 : i32
    return %c0_i32, %c0_i32_0 : i32, i32
  }
  func.func @transform_8(%arg0: i32) -> (i32, i32) {
    %c0_i32 = arith.constant 0 : i32
    %c0_i32_0 = arith.constant 0 : i32
    %c0_i32_1 = arith.constant 0 : i32
    return %c0_i32, %c0_i32_0 : i32, i32
  }
  func.func @transform_9(%arg0: i32) -> (i32, i32) {
    %c0_i32 = arith.constant 0 : i32
    %c0_i32_0 = arith.constant 0 : i32
    return %c0_i32, %arg0 : i32, i32
  }
  func.func @transform_10(%arg0: i32) -> (i32, i32) {
    %c0_i32 = arith.constant 0 : i32
    %c0_i32_0 = arith.constant 0 : i32
    return %c0_i32, %arg0 : i32, i32
  }
  func.func @transform_11(%arg0: i32) -> (i32, i32) {
    %c0_i32 = arith.constant 0 : i32
    %c0_i32_0 = arith.constant 0 : i32
    return %c0_i32, %arg0 : i32, i32
  }
}

module attributes {stable_mosaic.version = 11 : i64} {
  func.func @_attn_kernel(%arg0: i32, %arg1: memref<64x128xf32, #tpu.memory_space<vmem>>, %arg2: memref<16x64x128xf32, #tpu.memory_space<vmem>>, %arg3: memref<16x64x128xf32, #tpu.memory_space<vmem>>, %arg4: memref<16x8x128xf32, #tpu.memory_space<vmem>>, %arg5: memref<64x128xf32, #tpu.memory_space<vmem>>, %arg6: memref<8x8xf32, #tpu.memory_space<vmem>>, %arg7: memref<8x1xf32, #tpu.memory_space<vmem>>, %arg8: memref<64x8xf32, #tpu.memory_space<vmem>>, %arg9: memref<64x1xf32, #tpu.memory_space<vmem>>, %arg10: memref<64x1xf32, #tpu.memory_space<vmem>>, %arg11: memref<64x1xf32, #tpu.memory_space<vmem>>, %arg12: memref<8x64xf32, #tpu.memory_space<vmem>>, %arg13: memref<8x1xf32, #tpu.memory_space<vmem>>, %arg14: memref<8x8xf32, #tpu.memory_space<vmem>>, %arg15: memref<8x1xf32, #tpu.memory_space<vmem>>, %arg16: memref<64x1xf32, #tpu.memory_space<vmem>>, %arg17: memref<64x1xf32, #tpu.memory_space<vmem>>, %arg18: memref<64x64xf32, #tpu.memory_space<vmem>>, %arg19: memref<64x1xf32, #tpu.memory_space<vmem>>, %arg20: memref<64x128xf32, #tpu.memory_space<vmem>>) attributes {dimension_semantics = [#tpu.dimension_semantics<parallel>], iteration_bounds = array<i64: 2>, scalar_prefetch = 0 : i64, scratch_operands = 0 : i64, tpu.core_type = #tpu.core_type<tc>, window_params = [{transform_indices = @transform_0, window_bounds = array<i64: 64, 128>}, {transform_indices = @transform_1, window_bounds = array<i64: 16, 64, 128>}, {transform_indices = @transform_2, window_bounds = array<i64: 16, 64, 128>}, {transform_indices = @transform_3, window_bounds = array<i64: 16, 8, 128>}, {transform_indices = @transform_4, window_bounds = array<i64: 64, 128>}, {pipeline_mode = #tpu.pipeline_mode<synchronous>, transform_indices = @transform_5, window_bounds = array<i64: 8, 8>}, {pipeline_mode = #tpu.pipeline_mode<synchronous>, transform_indices = @transform_6, window_bounds = array<i64: 8, 1>}, {pipeline_mode = #tpu.pipeline_mode<synchronous>, transform_indices = @transform_7, window_bounds = array<i64: 64, 8>}, {pipeline_mode = #tpu.pipeline_mode<synchronous>, transform_indices = @transform_8, window_bounds = array<i64: 64, 1>}, {pipeline_mode = #tpu.pipeline_mode<synchronous>, transform_indices = @transform_9, window_bounds = array<i64: 64, 1>}, {pipeline_mode = #tpu.pipeline_mode<synchronous>, transform_indices = @transform_10, window_bounds = array<i64: 64, 1>}, {pipeline_mode = #tpu.pipeline_mode<synchronous>, transform_indices = @transform_11, window_bounds = array<i64: 8, 64>}, {pipeline_mode = #tpu.pipeline_mode<synchronous>, transform_indices = @transform_12, window_bounds = array<i64: 8, 1>}, {pipeline_mode = #tpu.pipeline_mode<synchronous>, transform_indices = @transform_13, window_bounds = array<i64: 8, 8>}, {pipeline_mode = #tpu.pipeline_mode<synchronous>, transform_indices = @transform_14, window_bounds = array<i64: 8, 1>}, {pipeline_mode = #tpu.pipeline_mode<synchronous>, transform_indices = @transform_15, window_bounds = array<i64: 64, 1>}, {pipeline_mode = #tpu.pipeline_mode<synchronous>, transform_indices = @transform_16, window_bounds = array<i64: 64, 1>}, {pipeline_mode = #tpu.pipeline_mode<synchronous>, transform_indices = @transform_17, window_bounds = array<i64: 64, 64>}, {pipeline_mode = #tpu.pipeline_mode<synchronous>, transform_indices = @transform_18, window_bounds = array<i64: 64, 1>}, {transform_indices = @transform_19, window_bounds = array<i64: 64, 128>}]} {
    %c0 = arith.constant 0 : index
    %c0_0 = arith.constant 0 : index
    %0 = vector.load %arg1[%c0, %c0_0] : memref<64x128xf32, #tpu.memory_space<vmem>>, vector<64x128xf32>
    %c0_1 = arith.constant 0 : index
    %c0_2 = arith.constant 0 : index
    %1 = vector.load %arg6[%c0_1, %c0_2] : memref<8x8xf32, #tpu.memory_space<vmem>>, vector<8x8xf32>
    %c0_3 = arith.constant 0 : index
    %c0_4 = arith.constant 0 : index
    %2 = vector.load %arg7[%c0_3, %c0_4] : memref<8x1xf32, #tpu.memory_space<vmem>>, vector<8x1xf32>
    %c0_5 = arith.constant 0 : index
    %c0_6 = arith.constant 0 : index
    %3 = vector.load %arg8[%c0_5, %c0_6] : memref<64x8xf32, #tpu.memory_space<vmem>>, vector<64x8xf32>
    %c0_7 = arith.constant 0 : index
    %c0_8 = arith.constant 0 : index
    %4 = vector.load %arg9[%c0_7, %c0_8] : memref<64x1xf32, #tpu.memory_space<vmem>>, vector<64x1xf32>
    %c0_9 = arith.constant 0 : index
    %c0_10 = arith.constant 0 : index
    %5 = vector.load %arg10[%c0_9, %c0_10] : memref<64x1xf32, #tpu.memory_space<vmem>>, vector<64x1xf32>
    %c0_11 = arith.constant 0 : index
    %c0_12 = arith.constant 0 : index
    %6 = vector.load %arg11[%c0_11, %c0_12] : memref<64x1xf32, #tpu.memory_space<vmem>>, vector<64x1xf32>
    %c0_13 = arith.constant 0 : index
    %c0_14 = arith.constant 0 : index
    %7 = vector.load %arg12[%c0_13, %c0_14] : memref<8x64xf32, #tpu.memory_space<vmem>>, vector<8x64xf32>
    %c0_15 = arith.constant 0 : index
    %c0_16 = arith.constant 0 : index
    %8 = vector.load %arg13[%c0_15, %c0_16] : memref<8x1xf32, #tpu.memory_space<vmem>>, vector<8x1xf32>
    %c0_17 = arith.constant 0 : index
    %c0_18 = arith.constant 0 : index
    %9 = vector.load %arg14[%c0_17, %c0_18] : memref<8x8xf32, #tpu.memory_space<vmem>>, vector<8x8xf32>
    %c0_19 = arith.constant 0 : index
    %c0_20 = arith.constant 0 : index
    %10 = vector.load %arg15[%c0_19, %c0_20] : memref<8x1xf32, #tpu.memory_space<vmem>>, vector<8x1xf32>
    %c0_21 = arith.constant 0 : index
    %c0_22 = arith.constant 0 : index
    %c0_23 = arith.constant 0 : index
    %11 = vector.load %arg4[%c0_21, %c0_22, %c0_23] : memref<16x8x128xf32, #tpu.memory_space<vmem>>, vector<1x8x128xf32>
    %12 = vector.shape_cast %11 : vector<1x8x128xf32> to vector<8x128xf32>
    %cst = arith.constant dense<0.000000e+00> : vector<8x128xf32>
    %13 = tpu.matmul %1, %12, %cst {dimension_numbers = #tpu.dot_dimension_numbers<[1], [0], [0], [1], [0, 0, 1, 1], [], []>} : vector<8x8xf32>, vector<8x128xf32>, vector<8x128xf32> -> vector<8x128xf32>
    %14 = vector.broadcast %2 : vector<8x1xf32> to vector<8x128xf32>
    %15 = arith.addf %13, %14 : vector<8x128xf32>
    %cst_24 = arith.constant 0.000000e+00 : f32
    %16 = vector.broadcast %cst_24 : f32 to vector<8x128xf32>
    %17 = arith.maximumf %15, %16 : vector<8x128xf32>
    %cst_25 = arith.constant dense<0.000000e+00> : vector<64x128xf32>
    %18 = tpu.matmul %3, %17, %cst_25 {dimension_numbers = #tpu.dot_dimension_numbers<[1], [0], [0], [1], [0, 0, 1, 1], [], []>} : vector<64x8xf32>, vector<8x128xf32>, vector<64x128xf32> -> vector<64x128xf32>
    %19 = vector.broadcast %4 : vector<64x1xf32> to vector<64x128xf32>
    %20 = arith.addf %18, %19 : vector<64x128xf32>
    %c0_26 = arith.constant 0 : index
    %c0_27 = arith.constant 0 : index
    %c0_28 = arith.constant 0 : index
    %21 = vector.load %arg2[%c0_26, %c0_27, %c0_28] : memref<16x64x128xf32, #tpu.memory_space<vmem>>, vector<1x64x128xf32>
    %22 = vector.shape_cast %21 : vector<1x64x128xf32> to vector<64x128xf32>
    %23 = arith.subf %22, %0 : vector<64x128xf32>
    %24 = arith.addf %23, %20 : vector<64x128xf32>
    %25 = vector.broadcast %5 : vector<64x1xf32> to vector<64x128xf32>
    %26 = arith.mulf %25, %24 : vector<64x128xf32>
    %27 = vector.broadcast %6 : vector<64x1xf32> to vector<64x128xf32>
    %28 = arith.addf %26, %27 : vector<64x128xf32>
    %cst_29 = arith.constant 0.000000e+00 : f32
    %29 = vector.broadcast %cst_29 : f32 to vector<64x128xf32>
    %30 = arith.maximumf %28, %29 : vector<64x128xf32>
    %cst_30 = arith.constant dense<0.000000e+00> : vector<8x128xf32>
    %31 = tpu.matmul %7, %30, %cst_30 {dimension_numbers = #tpu.dot_dimension_numbers<[1], [0], [0], [1], [0, 0, 1, 1], [], []>} : vector<8x64xf32>, vector<64x128xf32>, vector<8x128xf32> -> vector<8x128xf32>
    %32 = vector.broadcast %8 : vector<8x1xf32> to vector<8x128xf32>
    %33 = arith.addf %31, %32 : vector<8x128xf32>
    %cst_31 = arith.constant 0.000000e+00 : f32
    %34 = vector.broadcast %cst_31 : f32 to vector<8x128xf32>
    %35 = arith.maximumf %33, %34 : vector<8x128xf32>
    %cst_32 = arith.constant dense<0.000000e+00> : vector<8x128xf32>
    %36 = tpu.matmul %9, %35, %cst_32 {dimension_numbers = #tpu.dot_dimension_numbers<[1], [0], [0], [1], [0, 0, 1, 1], [], []>} : vector<8x8xf32>, vector<8x128xf32>, vector<8x128xf32> -> vector<8x128xf32>
    %37 = vector.broadcast %10 : vector<8x1xf32> to vector<8x128xf32>
    %38 = arith.addf %36, %37 : vector<8x128xf32>
    %c1 = arith.constant 1 : index
    %c0_33 = arith.constant 0 : index
    %c0_34 = arith.constant 0 : index
    %39 = vector.load %arg4[%c1, %c0_33, %c0_34] : memref<16x8x128xf32, #tpu.memory_space<vmem>>, vector<1x8x128xf32>
    %40 = vector.shape_cast %39 : vector<1x8x128xf32> to vector<8x128xf32>
    %cst_35 = arith.constant dense<0.000000e+00> : vector<8x128xf32>
    %41 = tpu.matmul %1, %40, %cst_35 {dimension_numbers = #tpu.dot_dimension_numbers<[1], [0], [0], [1], [0, 0, 1, 1], [], []>} : vector<8x8xf32>, vector<8x128xf32>, vector<8x128xf32> -> vector<8x128xf32>
    %42 = vector.broadcast %2 : vector<8x1xf32> to vector<8x128xf32>
    %43 = arith.addf %41, %42 : vector<8x128xf32>
    %cst_36 = arith.constant 0.000000e+00 : f32
    %44 = vector.broadcast %cst_36 : f32 to vector<8x128xf32>
    %45 = arith.maximumf %43, %44 : vector<8x128xf32>
    %cst_37 = arith.constant dense<0.000000e+00> : vector<64x128xf32>
    %46 = tpu.matmul %3, %45, %cst_37 {dimension_numbers = #tpu.dot_dimension_numbers<[1], [0], [0], [1], [0, 0, 1, 1], [], []>} : vector<64x8xf32>, vector<8x128xf32>, vector<64x128xf32> -> vector<64x128xf32>
    %47 = vector.broadcast %4 : vector<64x1xf32> to vector<64x128xf32>
    %48 = arith.addf %46, %47 : vector<64x128xf32>
    %c1_38 = arith.constant 1 : index
    %c0_39 = arith.constant 0 : index
    %c0_40 = arith.constant 0 : index
    %49 = vector.load %arg2[%c1_38, %c0_39, %c0_40] : memref<16x64x128xf32, #tpu.memory_space<vmem>>, vector<1x64x128xf32>
    %50 = vector.shape_cast %49 : vector<1x64x128xf32> to vector<64x128xf32>
    %51 = arith.subf %50, %0 : vector<64x128xf32>
    %52 = arith.addf %51, %48 : vector<64x128xf32>
    %53 = vector.broadcast %5 : vector<64x1xf32> to vector<64x128xf32>
    %54 = arith.mulf %53, %52 : vector<64x128xf32>
    %55 = vector.broadcast %6 : vector<64x1xf32> to vector<64x128xf32>
    %56 = arith.addf %54, %55 : vector<64x128xf32>
    %cst_41 = arith.constant 0.000000e+00 : f32
    %57 = vector.broadcast %cst_41 : f32 to vector<64x128xf32>
    %58 = arith.maximumf %56, %57 : vector<64x128xf32>
    %cst_42 = arith.constant dense<0.000000e+00> : vector<8x128xf32>
    %59 = tpu.matmul %7, %58, %cst_42 {dimension_numbers = #tpu.dot_dimension_numbers<[1], [0], [0], [1], [0, 0, 1, 1], [], []>} : vector<8x64xf32>, vector<64x128xf32>, vector<8x128xf32> -> vector<8x128xf32>
    %60 = vector.broadcast %8 : vector<8x1xf32> to vector<8x128xf32>
    %61 = arith.addf %59, %60 : vector<8x128xf32>
    %cst_43 = arith.constant 0.000000e+00 : f32
    %62 = vector.broadcast %cst_43 : f32 to vector<8x128xf32>
    %63 = arith.maximumf %61, %62 : vector<8x128xf32>
    %cst_44 = arith.constant dense<0.000000e+00> : vector<8x128xf32>
    %64 = tpu.matmul %9, %63, %cst_44 {dimension_numbers = #tpu.dot_dimension_numbers<[1], [0], [0], [1], [0, 0, 1, 1], [], []>} : vector<8x8xf32>, vector<8x128xf32>, vector<8x128xf32> -> vector<8x128xf32>
    %65 = vector.broadcast %10 : vector<8x1xf32> to vector<8x128xf32>
    %66 = arith.addf %64, %65 : vector<8x128xf32>
    %c2 = arith.constant 2 : index
    %c0_45 = arith.constant 0 : index
    %c0_46 = arith.constant 0 : index
    %67 = vector.load %arg4[%c2, %c0_45, %c0_46] : memref<16x8x128xf32, #tpu.memory_space<vmem>>, vector<1x8x128xf32>
    %68 = vector.shape_cast %67 : vector<1x8x128xf32> to vector<8x128xf32>
    %cst_47 = arith.constant dense<0.000000e+00> : vector<8x128xf32>
    %69 = tpu.matmul %1, %68, %cst_47 {dimension_numbers = #tpu.dot_dimension_numbers<[1], [0], [0], [1], [0, 0, 1, 1], [], []>} : vector<8x8xf32>, vector<8x128xf32>, vector<8x128xf32> -> vector<8x128xf32>
    %70 = vector.broadcast %2 : vector<8x1xf32> to vector<8x128xf32>
    %71 = arith.addf %69, %70 : vector<8x128xf32>
    %cst_48 = arith.constant 0.000000e+00 : f32
    %72 = vector.broadcast %cst_48 : f32 to vector<8x128xf32>
    %73 = arith.maximumf %71, %72 : vector<8x128xf32>
    %cst_49 = arith.constant dense<0.000000e+00> : vector<64x128xf32>
    %74 = tpu.matmul %3, %73, %cst_49 {dimension_numbers = #tpu.dot_dimension_numbers<[1], [0], [0], [1], [0, 0, 1, 1], [], []>} : vector<64x8xf32>, vector<8x128xf32>, vector<64x128xf32> -> vector<64x128xf32>
    %75 = vector.broadcast %4 : vector<64x1xf32> to vector<64x128xf32>
    %76 = arith.addf %74, %75 : vector<64x128xf32>
    %c2_50 = arith.constant 2 : index
    %c0_51 = arith.constant 0 : index
    %c0_52 = arith.constant 0 : index
    %77 = vector.load %arg2[%c2_50, %c0_51, %c0_52] : memref<16x64x128xf32, #tpu.memory_space<vmem>>, vector<1x64x128xf32>
    %78 = vector.shape_cast %77 : vector<1x64x128xf32> to vector<64x128xf32>
    %79 = arith.subf %78, %0 : vector<64x128xf32>
    %80 = arith.addf %79, %76 : vector<64x128xf32>
    %81 = vector.broadcast %5 : vector<64x1xf32> to vector<64x128xf32>
    %82 = arith.mulf %81, %80 : vector<64x128xf32>
    %83 = vector.broadcast %6 : vector<64x1xf32> to vector<64x128xf32>
    %84 = arith.addf %82, %83 : vector<64x128xf32>
    %cst_53 = arith.constant 0.000000e+00 : f32
    %85 = vector.broadcast %cst_53 : f32 to vector<64x128xf32>
    %86 = arith.maximumf %84, %85 : vector<64x128xf32>
    %cst_54 = arith.constant dense<0.000000e+00> : vector<8x128xf32>
    %87 = tpu.matmul %7, %86, %cst_54 {dimension_numbers = #tpu.dot_dimension_numbers<[1], [0], [0], [1], [0, 0, 1, 1], [], []>} : vector<8x64xf32>, vector<64x128xf32>, vector<8x128xf32> -> vector<8x128xf32>
    %88 = vector.broadcast %8 : vector<8x1xf32> to vector<8x128xf32>
    %89 = arith.addf %87, %88 : vector<8x128xf32>
    %cst_55 = arith.constant 0.000000e+00 : f32
    %90 = vector.broadcast %cst_55 : f32 to vector<8x128xf32>
    %91 = arith.maximumf %89, %90 : vector<8x128xf32>
    %cst_56 = arith.constant dense<0.000000e+00> : vector<8x128xf32>
    %92 = tpu.matmul %9, %91, %cst_56 {dimension_numbers = #tpu.dot_dimension_numbers<[1], [0], [0], [1], [0, 0, 1, 1], [], []>} : vector<8x8xf32>, vector<8x128xf32>, vector<8x128xf32> -> vector<8x128xf32>
    %93 = vector.broadcast %10 : vector<8x1xf32> to vector<8x128xf32>
    %94 = arith.addf %92, %93 : vector<8x128xf32>
    %c3 = arith.constant 3 : index
    %c0_57 = arith.constant 0 : index
    %c0_58 = arith.constant 0 : index
    %95 = vector.load %arg4[%c3, %c0_57, %c0_58] : memref<16x8x128xf32, #tpu.memory_space<vmem>>, vector<1x8x128xf32>
    %96 = vector.shape_cast %95 : vector<1x8x128xf32> to vector<8x128xf32>
    %cst_59 = arith.constant dense<0.000000e+00> : vector<8x128xf32>
    %97 = tpu.matmul %1, %96, %cst_59 {dimension_numbers = #tpu.dot_dimension_numbers<[1], [0], [0], [1], [0, 0, 1, 1], [], []>} : vector<8x8xf32>, vector<8x128xf32>, vector<8x128xf32> -> vector<8x128xf32>
    %98 = vector.broadcast %2 : vector<8x1xf32> to vector<8x128xf32>
    %99 = arith.addf %97, %98 : vector<8x128xf32>
    %cst_60 = arith.constant 0.000000e+00 : f32
    %100 = vector.broadcast %cst_60 : f32 to vector<8x128xf32>
    %101 = arith.maximumf %99, %100 : vector<8x128xf32>
    %cst_61 = arith.constant dense<0.000000e+00> : vector<64x128xf32>
    %102 = tpu.matmul %3, %101, %cst_61 {dimension_numbers = #tpu.dot_dimension_numbers<[1], [0], [0], [1], [0, 0, 1, 1], [], []>} : vector<64x8xf32>, vector<8x128xf32>, vector<64x128xf32> -> vector<64x128xf32>
    %103 = vector.broadcast %4 : vector<64x1xf32> to vector<64x128xf32>
    %104 = arith.addf %102, %103 : vector<64x128xf32>
    %c3_62 = arith.constant 3 : index
    %c0_63 = arith.constant 0 : index
    %c0_64 = arith.constant 0 : index
    %105 = vector.load %arg2[%c3_62, %c0_63, %c0_64] : memref<16x64x128xf32, #tpu.memory_space<vmem>>, vector<1x64x128xf32>
    %106 = vector.shape_cast %105 : vector<1x64x128xf32> to vector<64x128xf32>
    %107 = arith.subf %106, %0 : vector<64x128xf32>
    %108 = arith.addf %107, %104 : vector<64x128xf32>
    %109 = vector.broadcast %5 : vector<64x1xf32> to vector<64x128xf32>
    %110 = arith.mulf %109, %108 : vector<64x128xf32>
    %111 = vector.broadcast %6 : vector<64x1xf32> to vector<64x128xf32>
    %112 = arith.addf %110, %111 : vector<64x128xf32>
    %cst_65 = arith.constant 0.000000e+00 : f32
    %113 = vector.broadcast %cst_65 : f32 to vector<64x128xf32>
    %114 = arith.maximumf %112, %113 : vector<64x128xf32>
    %cst_66 = arith.constant dense<0.000000e+00> : vector<8x128xf32>
    %115 = tpu.matmul %7, %114, %cst_66 {dimension_numbers = #tpu.dot_dimension_numbers<[1], [0], [0], [1], [0, 0, 1, 1], [], []>} : vector<8x64xf32>, vector<64x128xf32>, vector<8x128xf32> -> vector<8x128xf32>
    %116 = vector.broadcast %8 : vector<8x1xf32> to vector<8x128xf32>
    %117 = arith.addf %115, %116 : vector<8x128xf32>
    %cst_67 = arith.constant 0.000000e+00 : f32
    %118 = vector.broadcast %cst_67 : f32 to vector<8x128xf32>
    %119 = arith.maximumf %117, %118 : vector<8x128xf32>
    %cst_68 = arith.constant dense<0.000000e+00> : vector<8x128xf32>
    %120 = tpu.matmul %9, %119, %cst_68 {dimension_numbers = #tpu.dot_dimension_numbers<[1], [0], [0], [1], [0, 0, 1, 1], [], []>} : vector<8x8xf32>, vector<8x128xf32>, vector<8x128xf32> -> vector<8x128xf32>
    %121 = vector.broadcast %10 : vector<8x1xf32> to vector<8x128xf32>
    %122 = arith.addf %120, %121 : vector<8x128xf32>
    %c4 = arith.constant 4 : index
    %c0_69 = arith.constant 0 : index
    %c0_70 = arith.constant 0 : index
    %123 = vector.load %arg4[%c4, %c0_69, %c0_70] : memref<16x8x128xf32, #tpu.memory_space<vmem>>, vector<1x8x128xf32>
    %124 = vector.shape_cast %123 : vector<1x8x128xf32> to vector<8x128xf32>
    %cst_71 = arith.constant dense<0.000000e+00> : vector<8x128xf32>
    %125 = tpu.matmul %1, %124, %cst_71 {dimension_numbers = #tpu.dot_dimension_numbers<[1], [0], [0], [1], [0, 0, 1, 1], [], []>} : vector<8x8xf32>, vector<8x128xf32>, vector<8x128xf32> -> vector<8x128xf32>
    %126 = vector.broadcast %2 : vector<8x1xf32> to vector<8x128xf32>
    %127 = arith.addf %125, %126 : vector<8x128xf32>
    %cst_72 = arith.constant 0.000000e+00 : f32
    %128 = vector.broadcast %cst_72 : f32 to vector<8x128xf32>
    %129 = arith.maximumf %127, %128 : vector<8x128xf32>
    %cst_73 = arith.constant dense<0.000000e+00> : vector<64x128xf32>
    %130 = tpu.matmul %3, %129, %cst_73 {dimension_numbers = #tpu.dot_dimension_numbers<[1], [0], [0], [1], [0, 0, 1, 1], [], []>} : vector<64x8xf32>, vector<8x128xf32>, vector<64x128xf32> -> vector<64x128xf32>
    %131 = vector.broadcast %4 : vector<64x1xf32> to vector<64x128xf32>
    %132 = arith.addf %130, %131 : vector<64x128xf32>
    %c4_74 = arith.constant 4 : index
    %c0_75 = arith.constant 0 : index
    %c0_76 = arith.constant 0 : index
    %133 = vector.load %arg2[%c4_74, %c0_75, %c0_76] : memref<16x64x128xf32, #tpu.memory_space<vmem>>, vector<1x64x128xf32>
    %134 = vector.shape_cast %133 : vector<1x64x128xf32> to vector<64x128xf32>
    %135 = arith.subf %134, %0 : vector<64x128xf32>
    %136 = arith.addf %135, %132 : vector<64x128xf32>
    %137 = vector.broadcast %5 : vector<64x1xf32> to vector<64x128xf32>
    %138 = arith.mulf %137, %136 : vector<64x128xf32>
    %139 = vector.broadcast %6 : vector<64x1xf32> to vector<64x128xf32>
    %140 = arith.addf %138, %139 : vector<64x128xf32>
    %cst_77 = arith.constant 0.000000e+00 : f32
    %141 = vector.broadcast %cst_77 : f32 to vector<64x128xf32>
    %142 = arith.maximumf %140, %141 : vector<64x128xf32>
    %cst_78 = arith.constant dense<0.000000e+00> : vector<8x128xf32>
    %143 = tpu.matmul %7, %142, %cst_78 {dimension_numbers = #tpu.dot_dimension_numbers<[1], [0], [0], [1], [0, 0, 1, 1], [], []>} : vector<8x64xf32>, vector<64x128xf32>, vector<8x128xf32> -> vector<8x128xf32>
    %144 = vector.broadcast %8 : vector<8x1xf32> to vector<8x128xf32>
    %145 = arith.addf %143, %144 : vector<8x128xf32>
    %cst_79 = arith.constant 0.000000e+00 : f32
    %146 = vector.broadcast %cst_79 : f32 to vector<8x128xf32>
    %147 = arith.maximumf %145, %146 : vector<8x128xf32>
    %cst_80 = arith.constant dense<0.000000e+00> : vector<8x128xf32>
    %148 = tpu.matmul %9, %147, %cst_80 {dimension_numbers = #tpu.dot_dimension_numbers<[1], [0], [0], [1], [0, 0, 1, 1], [], []>} : vector<8x8xf32>, vector<8x128xf32>, vector<8x128xf32> -> vector<8x128xf32>
    %149 = vector.broadcast %10 : vector<8x1xf32> to vector<8x128xf32>
    %150 = arith.addf %148, %149 : vector<8x128xf32>
    %c5 = arith.constant 5 : index
    %c0_81 = arith.constant 0 : index
    %c0_82 = arith.constant 0 : index
    %151 = vector.load %arg4[%c5, %c0_81, %c0_82] : memref<16x8x128xf32, #tpu.memory_space<vmem>>, vector<1x8x128xf32>
    %152 = vector.shape_cast %151 : vector<1x8x128xf32> to vector<8x128xf32>
    %cst_83 = arith.constant dense<0.000000e+00> : vector<8x128xf32>
    %153 = tpu.matmul %1, %152, %cst_83 {dimension_numbers = #tpu.dot_dimension_numbers<[1], [0], [0], [1], [0, 0, 1, 1], [], []>} : vector<8x8xf32>, vector<8x128xf32>, vector<8x128xf32> -> vector<8x128xf32>
    %154 = vector.broadcast %2 : vector<8x1xf32> to vector<8x128xf32>
    %155 = arith.addf %153, %154 : vector<8x128xf32>
    %cst_84 = arith.constant 0.000000e+00 : f32
    %156 = vector.broadcast %cst_84 : f32 to vector<8x128xf32>
    %157 = arith.maximumf %155, %156 : vector<8x128xf32>
    %cst_85 = arith.constant dense<0.000000e+00> : vector<64x128xf32>
    %158 = tpu.matmul %3, %157, %cst_85 {dimension_numbers = #tpu.dot_dimension_numbers<[1], [0], [0], [1], [0, 0, 1, 1], [], []>} : vector<64x8xf32>, vector<8x128xf32>, vector<64x128xf32> -> vector<64x128xf32>
    %159 = vector.broadcast %4 : vector<64x1xf32> to vector<64x128xf32>
    %160 = arith.addf %158, %159 : vector<64x128xf32>
    %c5_86 = arith.constant 5 : index
    %c0_87 = arith.constant 0 : index
    %c0_88 = arith.constant 0 : index
    %161 = vector.load %arg2[%c5_86, %c0_87, %c0_88] : memref<16x64x128xf32, #tpu.memory_space<vmem>>, vector<1x64x128xf32>
    %162 = vector.shape_cast %161 : vector<1x64x128xf32> to vector<64x128xf32>
    %163 = arith.subf %162, %0 : vector<64x128xf32>
    %164 = arith.addf %163, %160 : vector<64x128xf32>
    %165 = vector.broadcast %5 : vector<64x1xf32> to vector<64x128xf32>
    %166 = arith.mulf %165, %164 : vector<64x128xf32>
    %167 = vector.broadcast %6 : vector<64x1xf32> to vector<64x128xf32>
    %168 = arith.addf %166, %167 : vector<64x128xf32>
    %cst_89 = arith.constant 0.000000e+00 : f32
    %169 = vector.broadcast %cst_89 : f32 to vector<64x128xf32>
    %170 = arith.maximumf %168, %169 : vector<64x128xf32>
    %cst_90 = arith.constant dense<0.000000e+00> : vector<8x128xf32>
    %171 = tpu.matmul %7, %170, %cst_90 {dimension_numbers = #tpu.dot_dimension_numbers<[1], [0], [0], [1], [0, 0, 1, 1], [], []>} : vector<8x64xf32>, vector<64x128xf32>, vector<8x128xf32> -> vector<8x128xf32>
    %172 = vector.broadcast %8 : vector<8x1xf32> to vector<8x128xf32>
    %173 = arith.addf %171, %172 : vector<8x128xf32>
    %cst_91 = arith.constant 0.000000e+00 : f32
    %174 = vector.broadcast %cst_91 : f32 to vector<8x128xf32>
    %175 = arith.maximumf %173, %174 : vector<8x128xf32>
    %cst_92 = arith.constant dense<0.000000e+00> : vector<8x128xf32>
    %176 = tpu.matmul %9, %175, %cst_92 {dimension_numbers = #tpu.dot_dimension_numbers<[1], [0], [0], [1], [0, 0, 1, 1], [], []>} : vector<8x8xf32>, vector<8x128xf32>, vector<8x128xf32> -> vector<8x128xf32>
    %177 = vector.broadcast %10 : vector<8x1xf32> to vector<8x128xf32>
    %178 = arith.addf %176, %177 : vector<8x128xf32>
    %c6 = arith.constant 6 : index
    %c0_93 = arith.constant 0 : index
    %c0_94 = arith.constant 0 : index
    %179 = vector.load %arg4[%c6, %c0_93, %c0_94] : memref<16x8x128xf32, #tpu.memory_space<vmem>>, vector<1x8x128xf32>
    %180 = vector.shape_cast %179 : vector<1x8x128xf32> to vector<8x128xf32>
    %cst_95 = arith.constant dense<0.000000e+00> : vector<8x128xf32>
    %181 = tpu.matmul %1, %180, %cst_95 {dimension_numbers = #tpu.dot_dimension_numbers<[1], [0], [0], [1], [0, 0, 1, 1], [], []>} : vector<8x8xf32>, vector<8x128xf32>, vector<8x128xf32> -> vector<8x128xf32>
    %182 = vector.broadcast %2 : vector<8x1xf32> to vector<8x128xf32>
    %183 = arith.addf %181, %182 : vector<8x128xf32>
    %cst_96 = arith.constant 0.000000e+00 : f32
    %184 = vector.broadcast %cst_96 : f32 to vector<8x128xf32>
    %185 = arith.maximumf %183, %184 : vector<8x128xf32>
    %cst_97 = arith.constant dense<0.000000e+00> : vector<64x128xf32>
    %186 = tpu.matmul %3, %185, %cst_97 {dimension_numbers = #tpu.dot_dimension_numbers<[1], [0], [0], [1], [0, 0, 1, 1], [], []>} : vector<64x8xf32>, vector<8x128xf32>, vector<64x128xf32> -> vector<64x128xf32>
    %187 = vector.broadcast %4 : vector<64x1xf32> to vector<64x128xf32>
    %188 = arith.addf %186, %187 : vector<64x128xf32>
    %c6_98 = arith.constant 6 : index
    %c0_99 = arith.constant 0 : index
    %c0_100 = arith.constant 0 : index
    %189 = vector.load %arg2[%c6_98, %c0_99, %c0_100] : memref<16x64x128xf32, #tpu.memory_space<vmem>>, vector<1x64x128xf32>
    %190 = vector.shape_cast %189 : vector<1x64x128xf32> to vector<64x128xf32>
    %191 = arith.subf %190, %0 : vector<64x128xf32>
    %192 = arith.addf %191, %188 : vector<64x128xf32>
    %193 = vector.broadcast %5 : vector<64x1xf32> to vector<64x128xf32>
    %194 = arith.mulf %193, %192 : vector<64x128xf32>
    %195 = vector.broadcast %6 : vector<64x1xf32> to vector<64x128xf32>
    %196 = arith.addf %194, %195 : vector<64x128xf32>
    %cst_101 = arith.constant 0.000000e+00 : f32
    %197 = vector.broadcast %cst_101 : f32 to vector<64x128xf32>
    %198 = arith.maximumf %196, %197 : vector<64x128xf32>
    %cst_102 = arith.constant dense<0.000000e+00> : vector<8x128xf32>
    %199 = tpu.matmul %7, %198, %cst_102 {dimension_numbers = #tpu.dot_dimension_numbers<[1], [0], [0], [1], [0, 0, 1, 1], [], []>} : vector<8x64xf32>, vector<64x128xf32>, vector<8x128xf32> -> vector<8x128xf32>
    %200 = vector.broadcast %8 : vector<8x1xf32> to vector<8x128xf32>
    %201 = arith.addf %199, %200 : vector<8x128xf32>
    %cst_103 = arith.constant 0.000000e+00 : f32
    %202 = vector.broadcast %cst_103 : f32 to vector<8x128xf32>
    %203 = arith.maximumf %201, %202 : vector<8x128xf32>
    %cst_104 = arith.constant dense<0.000000e+00> : vector<8x128xf32>
    %204 = tpu.matmul %9, %203, %cst_104 {dimension_numbers = #tpu.dot_dimension_numbers<[1], [0], [0], [1], [0, 0, 1, 1], [], []>} : vector<8x8xf32>, vector<8x128xf32>, vector<8x128xf32> -> vector<8x128xf32>
    %205 = vector.broadcast %10 : vector<8x1xf32> to vector<8x128xf32>
    %206 = arith.addf %204, %205 : vector<8x128xf32>
    %c7 = arith.constant 7 : index
    %c0_105 = arith.constant 0 : index
    %c0_106 = arith.constant 0 : index
    %207 = vector.load %arg4[%c7, %c0_105, %c0_106] : memref<16x8x128xf32, #tpu.memory_space<vmem>>, vector<1x8x128xf32>
    %208 = vector.shape_cast %207 : vector<1x8x128xf32> to vector<8x128xf32>
    %cst_107 = arith.constant dense<0.000000e+00> : vector<8x128xf32>
    %209 = tpu.matmul %1, %208, %cst_107 {dimension_numbers = #tpu.dot_dimension_numbers<[1], [0], [0], [1], [0, 0, 1, 1], [], []>} : vector<8x8xf32>, vector<8x128xf32>, vector<8x128xf32> -> vector<8x128xf32>
    %210 = vector.broadcast %2 : vector<8x1xf32> to vector<8x128xf32>
    %211 = arith.addf %209, %210 : vector<8x128xf32>
    %cst_108 = arith.constant 0.000000e+00 : f32
    %212 = vector.broadcast %cst_108 : f32 to vector<8x128xf32>
    %213 = arith.maximumf %211, %212 : vector<8x128xf32>
    %cst_109 = arith.constant dense<0.000000e+00> : vector<64x128xf32>
    %214 = tpu.matmul %3, %213, %cst_109 {dimension_numbers = #tpu.dot_dimension_numbers<[1], [0], [0], [1], [0, 0, 1, 1], [], []>} : vector<64x8xf32>, vector<8x128xf32>, vector<64x128xf32> -> vector<64x128xf32>
    %215 = vector.broadcast %4 : vector<64x1xf32> to vector<64x128xf32>
    %216 = arith.addf %214, %215 : vector<64x128xf32>
    %c7_110 = arith.constant 7 : index
    %c0_111 = arith.constant 0 : index
    %c0_112 = arith.constant 0 : index
    %217 = vector.load %arg2[%c7_110, %c0_111, %c0_112] : memref<16x64x128xf32, #tpu.memory_space<vmem>>, vector<1x64x128xf32>
    %218 = vector.shape_cast %217 : vector<1x64x128xf32> to vector<64x128xf32>
    %219 = arith.subf %218, %0 : vector<64x128xf32>
    %220 = arith.addf %219, %216 : vector<64x128xf32>
    %221 = vector.broadcast %5 : vector<64x1xf32> to vector<64x128xf32>
    %222 = arith.mulf %221, %220 : vector<64x128xf32>
    %223 = vector.broadcast %6 : vector<64x1xf32> to vector<64x128xf32>
    %224 = arith.addf %222, %223 : vector<64x128xf32>
    %cst_113 = arith.constant 0.000000e+00 : f32
    %225 = vector.broadcast %cst_113 : f32 to vector<64x128xf32>
    %226 = arith.maximumf %224, %225 : vector<64x128xf32>
    %cst_114 = arith.constant dense<0.000000e+00> : vector<8x128xf32>
    %227 = tpu.matmul %7, %226, %cst_114 {dimension_numbers = #tpu.dot_dimension_numbers<[1], [0], [0], [1], [0, 0, 1, 1], [], []>} : vector<8x64xf32>, vector<64x128xf32>, vector<8x128xf32> -> vector<8x128xf32>
    %228 = vector.broadcast %8 : vector<8x1xf32> to vector<8x128xf32>
    %229 = arith.addf %227, %228 : vector<8x128xf32>
    %cst_115 = arith.constant 0.000000e+00 : f32
    %230 = vector.broadcast %cst_115 : f32 to vector<8x128xf32>
    %231 = arith.maximumf %229, %230 : vector<8x128xf32>
    %cst_116 = arith.constant dense<0.000000e+00> : vector<8x128xf32>
    %232 = tpu.matmul %9, %231, %cst_116 {dimension_numbers = #tpu.dot_dimension_numbers<[1], [0], [0], [1], [0, 0, 1, 1], [], []>} : vector<8x8xf32>, vector<8x128xf32>, vector<8x128xf32> -> vector<8x128xf32>
    %233 = vector.broadcast %10 : vector<8x1xf32> to vector<8x128xf32>
    %234 = arith.addf %232, %233 : vector<8x128xf32>
    %c8 = arith.constant 8 : index
    %c0_117 = arith.constant 0 : index
    %c0_118 = arith.constant 0 : index
    %235 = vector.load %arg4[%c8, %c0_117, %c0_118] : memref<16x8x128xf32, #tpu.memory_space<vmem>>, vector<1x8x128xf32>
    %236 = vector.shape_cast %235 : vector<1x8x128xf32> to vector<8x128xf32>
    %cst_119 = arith.constant dense<0.000000e+00> : vector<8x128xf32>
    %237 = tpu.matmul %1, %236, %cst_119 {dimension_numbers = #tpu.dot_dimension_numbers<[1], [0], [0], [1], [0, 0, 1, 1], [], []>} : vector<8x8xf32>, vector<8x128xf32>, vector<8x128xf32> -> vector<8x128xf32>
    %238 = vector.broadcast %2 : vector<8x1xf32> to vector<8x128xf32>
    %239 = arith.addf %237, %238 : vector<8x128xf32>
    %cst_120 = arith.constant 0.000000e+00 : f32
    %240 = vector.broadcast %cst_120 : f32 to vector<8x128xf32>
    %241 = arith.maximumf %239, %240 : vector<8x128xf32>
    %cst_121 = arith.constant dense<0.000000e+00> : vector<64x128xf32>
    %242 = tpu.matmul %3, %241, %cst_121 {dimension_numbers = #tpu.dot_dimension_numbers<[1], [0], [0], [1], [0, 0, 1, 1], [], []>} : vector<64x8xf32>, vector<8x128xf32>, vector<64x128xf32> -> vector<64x128xf32>
    %243 = vector.broadcast %4 : vector<64x1xf32> to vector<64x128xf32>
    %244 = arith.addf %242, %243 : vector<64x128xf32>
    %c8_122 = arith.constant 8 : index
    %c0_123 = arith.constant 0 : index
    %c0_124 = arith.constant 0 : index
    %245 = vector.load %arg2[%c8_122, %c0_123, %c0_124] : memref<16x64x128xf32, #tpu.memory_space<vmem>>, vector<1x64x128xf32>
    %246 = vector.shape_cast %245 : vector<1x64x128xf32> to vector<64x128xf32>
    %247 = arith.subf %246, %0 : vector<64x128xf32>
    %248 = arith.addf %247, %244 : vector<64x128xf32>
    %249 = vector.broadcast %5 : vector<64x1xf32> to vector<64x128xf32>
    %250 = arith.mulf %249, %248 : vector<64x128xf32>
    %251 = vector.broadcast %6 : vector<64x1xf32> to vector<64x128xf32>
    %252 = arith.addf %250, %251 : vector<64x128xf32>
    %cst_125 = arith.constant 0.000000e+00 : f32
    %253 = vector.broadcast %cst_125 : f32 to vector<64x128xf32>
    %254 = arith.maximumf %252, %253 : vector<64x128xf32>
    %cst_126 = arith.constant dense<0.000000e+00> : vector<8x128xf32>
    %255 = tpu.matmul %7, %254, %cst_126 {dimension_numbers = #tpu.dot_dimension_numbers<[1], [0], [0], [1], [0, 0, 1, 1], [], []>} : vector<8x64xf32>, vector<64x128xf32>, vector<8x128xf32> -> vector<8x128xf32>
    %256 = vector.broadcast %8 : vector<8x1xf32> to vector<8x128xf32>
    %257 = arith.addf %255, %256 : vector<8x128xf32>
    %cst_127 = arith.constant 0.000000e+00 : f32
    %258 = vector.broadcast %cst_127 : f32 to vector<8x128xf32>
    %259 = arith.maximumf %257, %258 : vector<8x128xf32>
    %cst_128 = arith.constant dense<0.000000e+00> : vector<8x128xf32>
    %260 = tpu.matmul %9, %259, %cst_128 {dimension_numbers = #tpu.dot_dimension_numbers<[1], [0], [0], [1], [0, 0, 1, 1], [], []>} : vector<8x8xf32>, vector<8x128xf32>, vector<8x128xf32> -> vector<8x128xf32>
    %261 = vector.broadcast %10 : vector<8x1xf32> to vector<8x128xf32>
    %262 = arith.addf %260, %261 : vector<8x128xf32>
    %c9 = arith.constant 9 : index
    %c0_129 = arith.constant 0 : index
    %c0_130 = arith.constant 0 : index
    %263 = vector.load %arg4[%c9, %c0_129, %c0_130] : memref<16x8x128xf32, #tpu.memory_space<vmem>>, vector<1x8x128xf32>
    %264 = vector.shape_cast %263 : vector<1x8x128xf32> to vector<8x128xf32>
    %cst_131 = arith.constant dense<0.000000e+00> : vector<8x128xf32>
    %265 = tpu.matmul %1, %264, %cst_131 {dimension_numbers = #tpu.dot_dimension_numbers<[1], [0], [0], [1], [0, 0, 1, 1], [], []>} : vector<8x8xf32>, vector<8x128xf32>, vector<8x128xf32> -> vector<8x128xf32>
    %266 = vector.broadcast %2 : vector<8x1xf32> to vector<8x128xf32>
    %267 = arith.addf %265, %266 : vector<8x128xf32>
    %cst_132 = arith.constant 0.000000e+00 : f32
    %268 = vector.broadcast %cst_132 : f32 to vector<8x128xf32>
    %269 = arith.maximumf %267, %268 : vector<8x128xf32>
    %cst_133 = arith.constant dense<0.000000e+00> : vector<64x128xf32>
    %270 = tpu.matmul %3, %269, %cst_133 {dimension_numbers = #tpu.dot_dimension_numbers<[1], [0], [0], [1], [0, 0, 1, 1], [], []>} : vector<64x8xf32>, vector<8x128xf32>, vector<64x128xf32> -> vector<64x128xf32>
    %271 = vector.broadcast %4 : vector<64x1xf32> to vector<64x128xf32>
    %272 = arith.addf %270, %271 : vector<64x128xf32>
    %c9_134 = arith.constant 9 : index
    %c0_135 = arith.constant 0 : index
    %c0_136 = arith.constant 0 : index
    %273 = vector.load %arg2[%c9_134, %c0_135, %c0_136] : memref<16x64x128xf32, #tpu.memory_space<vmem>>, vector<1x64x128xf32>
    %274 = vector.shape_cast %273 : vector<1x64x128xf32> to vector<64x128xf32>
    %275 = arith.subf %274, %0 : vector<64x128xf32>
    %276 = arith.addf %275, %272 : vector<64x128xf32>
    %277 = vector.broadcast %5 : vector<64x1xf32> to vector<64x128xf32>
    %278 = arith.mulf %277, %276 : vector<64x128xf32>
    %279 = vector.broadcast %6 : vector<64x1xf32> to vector<64x128xf32>
    %280 = arith.addf %278, %279 : vector<64x128xf32>
    %cst_137 = arith.constant 0.000000e+00 : f32
    %281 = vector.broadcast %cst_137 : f32 to vector<64x128xf32>
    %282 = arith.maximumf %280, %281 : vector<64x128xf32>
    %cst_138 = arith.constant dense<0.000000e+00> : vector<8x128xf32>
    %283 = tpu.matmul %7, %282, %cst_138 {dimension_numbers = #tpu.dot_dimension_numbers<[1], [0], [0], [1], [0, 0, 1, 1], [], []>} : vector<8x64xf32>, vector<64x128xf32>, vector<8x128xf32> -> vector<8x128xf32>
    %284 = vector.broadcast %8 : vector<8x1xf32> to vector<8x128xf32>
    %285 = arith.addf %283, %284 : vector<8x128xf32>
    %cst_139 = arith.constant 0.000000e+00 : f32
    %286 = vector.broadcast %cst_139 : f32 to vector<8x128xf32>
    %287 = arith.maximumf %285, %286 : vector<8x128xf32>
    %cst_140 = arith.constant dense<0.000000e+00> : vector<8x128xf32>
    %288 = tpu.matmul %9, %287, %cst_140 {dimension_numbers = #tpu.dot_dimension_numbers<[1], [0], [0], [1], [0, 0, 1, 1], [], []>} : vector<8x8xf32>, vector<8x128xf32>, vector<8x128xf32> -> vector<8x128xf32>
    %289 = vector.broadcast %10 : vector<8x1xf32> to vector<8x128xf32>
    %290 = arith.addf %288, %289 : vector<8x128xf32>
    %c10 = arith.constant 10 : index
    %c0_141 = arith.constant 0 : index
    %c0_142 = arith.constant 0 : index
    %291 = vector.load %arg4[%c10, %c0_141, %c0_142] : memref<16x8x128xf32, #tpu.memory_space<vmem>>, vector<1x8x128xf32>
    %292 = vector.shape_cast %291 : vector<1x8x128xf32> to vector<8x128xf32>
    %cst_143 = arith.constant dense<0.000000e+00> : vector<8x128xf32>
    %293 = tpu.matmul %1, %292, %cst_143 {dimension_numbers = #tpu.dot_dimension_numbers<[1], [0], [0], [1], [0, 0, 1, 1], [], []>} : vector<8x8xf32>, vector<8x128xf32>, vector<8x128xf32> -> vector<8x128xf32>
    %294 = vector.broadcast %2 : vector<8x1xf32> to vector<8x128xf32>
    %295 = arith.addf %293, %294 : vector<8x128xf32>
    %cst_144 = arith.constant 0.000000e+00 : f32
    %296 = vector.broadcast %cst_144 : f32 to vector<8x128xf32>
    %297 = arith.maximumf %295, %296 : vector<8x128xf32>
    %cst_145 = arith.constant dense<0.000000e+00> : vector<64x128xf32>
    %298 = tpu.matmul %3, %297, %cst_145 {dimension_numbers = #tpu.dot_dimension_numbers<[1], [0], [0], [1], [0, 0, 1, 1], [], []>} : vector<64x8xf32>, vector<8x128xf32>, vector<64x128xf32> -> vector<64x128xf32>
    %299 = vector.broadcast %4 : vector<64x1xf32> to vector<64x128xf32>
    %300 = arith.addf %298, %299 : vector<64x128xf32>
    %c10_146 = arith.constant 10 : index
    %c0_147 = arith.constant 0 : index
    %c0_148 = arith.constant 0 : index
    %301 = vector.load %arg2[%c10_146, %c0_147, %c0_148] : memref<16x64x128xf32, #tpu.memory_space<vmem>>, vector<1x64x128xf32>
    %302 = vector.shape_cast %301 : vector<1x64x128xf32> to vector<64x128xf32>
    %303 = arith.subf %302, %0 : vector<64x128xf32>
    %304 = arith.addf %303, %300 : vector<64x128xf32>
    %305 = vector.broadcast %5 : vector<64x1xf32> to vector<64x128xf32>
    %306 = arith.mulf %305, %304 : vector<64x128xf32>
    %307 = vector.broadcast %6 : vector<64x1xf32> to vector<64x128xf32>
    %308 = arith.addf %306, %307 : vector<64x128xf32>
    %cst_149 = arith.constant 0.000000e+00 : f32
    %309 = vector.broadcast %cst_149 : f32 to vector<64x128xf32>
    %310 = arith.maximumf %308, %309 : vector<64x128xf32>
    %cst_150 = arith.constant dense<0.000000e+00> : vector<8x128xf32>
    %311 = tpu.matmul %7, %310, %cst_150 {dimension_numbers = #tpu.dot_dimension_numbers<[1], [0], [0], [1], [0, 0, 1, 1], [], []>} : vector<8x64xf32>, vector<64x128xf32>, vector<8x128xf32> -> vector<8x128xf32>
    %312 = vector.broadcast %8 : vector<8x1xf32> to vector<8x128xf32>
    %313 = arith.addf %311, %312 : vector<8x128xf32>
    %cst_151 = arith.constant 0.000000e+00 : f32
    %314 = vector.broadcast %cst_151 : f32 to vector<8x128xf32>
    %315 = arith.maximumf %313, %314 : vector<8x128xf32>
    %cst_152 = arith.constant dense<0.000000e+00> : vector<8x128xf32>
    %316 = tpu.matmul %9, %315, %cst_152 {dimension_numbers = #tpu.dot_dimension_numbers<[1], [0], [0], [1], [0, 0, 1, 1], [], []>} : vector<8x8xf32>, vector<8x128xf32>, vector<8x128xf32> -> vector<8x128xf32>
    %317 = vector.broadcast %10 : vector<8x1xf32> to vector<8x128xf32>
    %318 = arith.addf %316, %317 : vector<8x128xf32>
    %c11 = arith.constant 11 : index
    %c0_153 = arith.constant 0 : index
    %c0_154 = arith.constant 0 : index
    %319 = vector.load %arg4[%c11, %c0_153, %c0_154] : memref<16x8x128xf32, #tpu.memory_space<vmem>>, vector<1x8x128xf32>
    %320 = vector.shape_cast %319 : vector<1x8x128xf32> to vector<8x128xf32>
    %cst_155 = arith.constant dense<0.000000e+00> : vector<8x128xf32>
    %321 = tpu.matmul %1, %320, %cst_155 {dimension_numbers = #tpu.dot_dimension_numbers<[1], [0], [0], [1], [0, 0, 1, 1], [], []>} : vector<8x8xf32>, vector<8x128xf32>, vector<8x128xf32> -> vector<8x128xf32>
    %322 = vector.broadcast %2 : vector<8x1xf32> to vector<8x128xf32>
    %323 = arith.addf %321, %322 : vector<8x128xf32>
    %cst_156 = arith.constant 0.000000e+00 : f32
    %324 = vector.broadcast %cst_156 : f32 to vector<8x128xf32>
    %325 = arith.maximumf %323, %324 : vector<8x128xf32>
    %cst_157 = arith.constant dense<0.000000e+00> : vector<64x128xf32>
    %326 = tpu.matmul %3, %325, %cst_157 {dimension_numbers = #tpu.dot_dimension_numbers<[1], [0], [0], [1], [0, 0, 1, 1], [], []>} : vector<64x8xf32>, vector<8x128xf32>, vector<64x128xf32> -> vector<64x128xf32>
    %327 = vector.broadcast %4 : vector<64x1xf32> to vector<64x128xf32>
    %328 = arith.addf %326, %327 : vector<64x128xf32>
    %c11_158 = arith.constant 11 : index
    %c0_159 = arith.constant 0 : index
    %c0_160 = arith.constant 0 : index
    %329 = vector.load %arg2[%c11_158, %c0_159, %c0_160] : memref<16x64x128xf32, #tpu.memory_space<vmem>>, vector<1x64x128xf32>
    %330 = vector.shape_cast %329 : vector<1x64x128xf32> to vector<64x128xf32>
    %331 = arith.subf %330, %0 : vector<64x128xf32>
    %332 = arith.addf %331, %328 : vector<64x128xf32>
    %333 = vector.broadcast %5 : vector<64x1xf32> to vector<64x128xf32>
    %334 = arith.mulf %333, %332 : vector<64x128xf32>
    %335 = vector.broadcast %6 : vector<64x1xf32> to vector<64x128xf32>
    %336 = arith.addf %334, %335 : vector<64x128xf32>
    %cst_161 = arith.constant 0.000000e+00 : f32
    %337 = vector.broadcast %cst_161 : f32 to vector<64x128xf32>
    %338 = arith.maximumf %336, %337 : vector<64x128xf32>
    %cst_162 = arith.constant dense<0.000000e+00> : vector<8x128xf32>
    %339 = tpu.matmul %7, %338, %cst_162 {dimension_numbers = #tpu.dot_dimension_numbers<[1], [0], [0], [1], [0, 0, 1, 1], [], []>} : vector<8x64xf32>, vector<64x128xf32>, vector<8x128xf32> -> vector<8x128xf32>
    %340 = vector.broadcast %8 : vector<8x1xf32> to vector<8x128xf32>
    %341 = arith.addf %339, %340 : vector<8x128xf32>
    %cst_163 = arith.constant 0.000000e+00 : f32
    %342 = vector.broadcast %cst_163 : f32 to vector<8x128xf32>
    %343 = arith.maximumf %341, %342 : vector<8x128xf32>
    %cst_164 = arith.constant dense<0.000000e+00> : vector<8x128xf32>
    %344 = tpu.matmul %9, %343, %cst_164 {dimension_numbers = #tpu.dot_dimension_numbers<[1], [0], [0], [1], [0, 0, 1, 1], [], []>} : vector<8x8xf32>, vector<8x128xf32>, vector<8x128xf32> -> vector<8x128xf32>
    %345 = vector.broadcast %10 : vector<8x1xf32> to vector<8x128xf32>
    %346 = arith.addf %344, %345 : vector<8x128xf32>
    %c12 = arith.constant 12 : index
    %c0_165 = arith.constant 0 : index
    %c0_166 = arith.constant 0 : index
    %347 = vector.load %arg4[%c12, %c0_165, %c0_166] : memref<16x8x128xf32, #tpu.memory_space<vmem>>, vector<1x8x128xf32>
    %348 = vector.shape_cast %347 : vector<1x8x128xf32> to vector<8x128xf32>
    %cst_167 = arith.constant dense<0.000000e+00> : vector<8x128xf32>
    %349 = tpu.matmul %1, %348, %cst_167 {dimension_numbers = #tpu.dot_dimension_numbers<[1], [0], [0], [1], [0, 0, 1, 1], [], []>} : vector<8x8xf32>, vector<8x128xf32>, vector<8x128xf32> -> vector<8x128xf32>
    %350 = vector.broadcast %2 : vector<8x1xf32> to vector<8x128xf32>
    %351 = arith.addf %349, %350 : vector<8x128xf32>
    %cst_168 = arith.constant 0.000000e+00 : f32
    %352 = vector.broadcast %cst_168 : f32 to vector<8x128xf32>
    %353 = arith.maximumf %351, %352 : vector<8x128xf32>
    %cst_169 = arith.constant dense<0.000000e+00> : vector<64x128xf32>
    %354 = tpu.matmul %3, %353, %cst_169 {dimension_numbers = #tpu.dot_dimension_numbers<[1], [0], [0], [1], [0, 0, 1, 1], [], []>} : vector<64x8xf32>, vector<8x128xf32>, vector<64x128xf32> -> vector<64x128xf32>
    %355 = vector.broadcast %4 : vector<64x1xf32> to vector<64x128xf32>
    %356 = arith.addf %354, %355 : vector<64x128xf32>
    %c12_170 = arith.constant 12 : index
    %c0_171 = arith.constant 0 : index
    %c0_172 = arith.constant 0 : index
    %357 = vector.load %arg2[%c12_170, %c0_171, %c0_172] : memref<16x64x128xf32, #tpu.memory_space<vmem>>, vector<1x64x128xf32>
    %358 = vector.shape_cast %357 : vector<1x64x128xf32> to vector<64x128xf32>
    %359 = arith.subf %358, %0 : vector<64x128xf32>
    %360 = arith.addf %359, %356 : vector<64x128xf32>
    %361 = vector.broadcast %5 : vector<64x1xf32> to vector<64x128xf32>
    %362 = arith.mulf %361, %360 : vector<64x128xf32>
    %363 = vector.broadcast %6 : vector<64x1xf32> to vector<64x128xf32>
    %364 = arith.addf %362, %363 : vector<64x128xf32>
    %cst_173 = arith.constant 0.000000e+00 : f32
    %365 = vector.broadcast %cst_173 : f32 to vector<64x128xf32>
    %366 = arith.maximumf %364, %365 : vector<64x128xf32>
    %cst_174 = arith.constant dense<0.000000e+00> : vector<8x128xf32>
    %367 = tpu.matmul %7, %366, %cst_174 {dimension_numbers = #tpu.dot_dimension_numbers<[1], [0], [0], [1], [0, 0, 1, 1], [], []>} : vector<8x64xf32>, vector<64x128xf32>, vector<8x128xf32> -> vector<8x128xf32>
    %368 = vector.broadcast %8 : vector<8x1xf32> to vector<8x128xf32>
    %369 = arith.addf %367, %368 : vector<8x128xf32>
    %cst_175 = arith.constant 0.000000e+00 : f32
    %370 = vector.broadcast %cst_175 : f32 to vector<8x128xf32>
    %371 = arith.maximumf %369, %370 : vector<8x128xf32>
    %cst_176 = arith.constant dense<0.000000e+00> : vector<8x128xf32>
    %372 = tpu.matmul %9, %371, %cst_176 {dimension_numbers = #tpu.dot_dimension_numbers<[1], [0], [0], [1], [0, 0, 1, 1], [], []>} : vector<8x8xf32>, vector<8x128xf32>, vector<8x128xf32> -> vector<8x128xf32>
    %373 = vector.broadcast %10 : vector<8x1xf32> to vector<8x128xf32>
    %374 = arith.addf %372, %373 : vector<8x128xf32>
    %c13 = arith.constant 13 : index
    %c0_177 = arith.constant 0 : index
    %c0_178 = arith.constant 0 : index
    %375 = vector.load %arg4[%c13, %c0_177, %c0_178] : memref<16x8x128xf32, #tpu.memory_space<vmem>>, vector<1x8x128xf32>
    %376 = vector.shape_cast %375 : vector<1x8x128xf32> to vector<8x128xf32>
    %cst_179 = arith.constant dense<0.000000e+00> : vector<8x128xf32>
    %377 = tpu.matmul %1, %376, %cst_179 {dimension_numbers = #tpu.dot_dimension_numbers<[1], [0], [0], [1], [0, 0, 1, 1], [], []>} : vector<8x8xf32>, vector<8x128xf32>, vector<8x128xf32> -> vector<8x128xf32>
    %378 = vector.broadcast %2 : vector<8x1xf32> to vector<8x128xf32>
    %379 = arith.addf %377, %378 : vector<8x128xf32>
    %cst_180 = arith.constant 0.000000e+00 : f32
    %380 = vector.broadcast %cst_180 : f32 to vector<8x128xf32>
    %381 = arith.maximumf %379, %380 : vector<8x128xf32>
    %cst_181 = arith.constant dense<0.000000e+00> : vector<64x128xf32>
    %382 = tpu.matmul %3, %381, %cst_181 {dimension_numbers = #tpu.dot_dimension_numbers<[1], [0], [0], [1], [0, 0, 1, 1], [], []>} : vector<64x8xf32>, vector<8x128xf32>, vector<64x128xf32> -> vector<64x128xf32>
    %383 = vector.broadcast %4 : vector<64x1xf32> to vector<64x128xf32>
    %384 = arith.addf %382, %383 : vector<64x128xf32>
    %c13_182 = arith.constant 13 : index
    %c0_183 = arith.constant 0 : index
    %c0_184 = arith.constant 0 : index
    %385 = vector.load %arg2[%c13_182, %c0_183, %c0_184] : memref<16x64x128xf32, #tpu.memory_space<vmem>>, vector<1x64x128xf32>
    %386 = vector.shape_cast %385 : vector<1x64x128xf32> to vector<64x128xf32>
    %387 = arith.subf %386, %0 : vector<64x128xf32>
    %388 = arith.addf %387, %384 : vector<64x128xf32>
    %389 = vector.broadcast %5 : vector<64x1xf32> to vector<64x128xf32>
    %390 = arith.mulf %389, %388 : vector<64x128xf32>
    %391 = vector.broadcast %6 : vector<64x1xf32> to vector<64x128xf32>
    %392 = arith.addf %390, %391 : vector<64x128xf32>
    %cst_185 = arith.constant 0.000000e+00 : f32
    %393 = vector.broadcast %cst_185 : f32 to vector<64x128xf32>
    %394 = arith.maximumf %392, %393 : vector<64x128xf32>
    %cst_186 = arith.constant dense<0.000000e+00> : vector<8x128xf32>
    %395 = tpu.matmul %7, %394, %cst_186 {dimension_numbers = #tpu.dot_dimension_numbers<[1], [0], [0], [1], [0, 0, 1, 1], [], []>} : vector<8x64xf32>, vector<64x128xf32>, vector<8x128xf32> -> vector<8x128xf32>
    %396 = vector.broadcast %8 : vector<8x1xf32> to vector<8x128xf32>
    %397 = arith.addf %395, %396 : vector<8x128xf32>
    %cst_187 = arith.constant 0.000000e+00 : f32
    %398 = vector.broadcast %cst_187 : f32 to vector<8x128xf32>
    %399 = arith.maximumf %397, %398 : vector<8x128xf32>
    %cst_188 = arith.constant dense<0.000000e+00> : vector<8x128xf32>
    %400 = tpu.matmul %9, %399, %cst_188 {dimension_numbers = #tpu.dot_dimension_numbers<[1], [0], [0], [1], [0, 0, 1, 1], [], []>} : vector<8x8xf32>, vector<8x128xf32>, vector<8x128xf32> -> vector<8x128xf32>
    %401 = vector.broadcast %10 : vector<8x1xf32> to vector<8x128xf32>
    %402 = arith.addf %400, %401 : vector<8x128xf32>
    %c14 = arith.constant 14 : index
    %c0_189 = arith.constant 0 : index
    %c0_190 = arith.constant 0 : index
    %403 = vector.load %arg4[%c14, %c0_189, %c0_190] : memref<16x8x128xf32, #tpu.memory_space<vmem>>, vector<1x8x128xf32>
    %404 = vector.shape_cast %403 : vector<1x8x128xf32> to vector<8x128xf32>
    %cst_191 = arith.constant dense<0.000000e+00> : vector<8x128xf32>
    %405 = tpu.matmul %1, %404, %cst_191 {dimension_numbers = #tpu.dot_dimension_numbers<[1], [0], [0], [1], [0, 0, 1, 1], [], []>} : vector<8x8xf32>, vector<8x128xf32>, vector<8x128xf32> -> vector<8x128xf32>
    %406 = vector.broadcast %2 : vector<8x1xf32> to vector<8x128xf32>
    %407 = arith.addf %405, %406 : vector<8x128xf32>
    %cst_192 = arith.constant 0.000000e+00 : f32
    %408 = vector.broadcast %cst_192 : f32 to vector<8x128xf32>
    %409 = arith.maximumf %407, %408 : vector<8x128xf32>
    %cst_193 = arith.constant dense<0.000000e+00> : vector<64x128xf32>
    %410 = tpu.matmul %3, %409, %cst_193 {dimension_numbers = #tpu.dot_dimension_numbers<[1], [0], [0], [1], [0, 0, 1, 1], [], []>} : vector<64x8xf32>, vector<8x128xf32>, vector<64x128xf32> -> vector<64x128xf32>
    %411 = vector.broadcast %4 : vector<64x1xf32> to vector<64x128xf32>
    %412 = arith.addf %410, %411 : vector<64x128xf32>
    %c14_194 = arith.constant 14 : index
    %c0_195 = arith.constant 0 : index
    %c0_196 = arith.constant 0 : index
    %413 = vector.load %arg2[%c14_194, %c0_195, %c0_196] : memref<16x64x128xf32, #tpu.memory_space<vmem>>, vector<1x64x128xf32>
    %414 = vector.shape_cast %413 : vector<1x64x128xf32> to vector<64x128xf32>
    %415 = arith.subf %414, %0 : vector<64x128xf32>
    %416 = arith.addf %415, %412 : vector<64x128xf32>
    %417 = vector.broadcast %5 : vector<64x1xf32> to vector<64x128xf32>
    %418 = arith.mulf %417, %416 : vector<64x128xf32>
    %419 = vector.broadcast %6 : vector<64x1xf32> to vector<64x128xf32>
    %420 = arith.addf %418, %419 : vector<64x128xf32>
    %cst_197 = arith.constant 0.000000e+00 : f32
    %421 = vector.broadcast %cst_197 : f32 to vector<64x128xf32>
    %422 = arith.maximumf %420, %421 : vector<64x128xf32>
    %cst_198 = arith.constant dense<0.000000e+00> : vector<8x128xf32>
    %423 = tpu.matmul %7, %422, %cst_198 {dimension_numbers = #tpu.dot_dimension_numbers<[1], [0], [0], [1], [0, 0, 1, 1], [], []>} : vector<8x64xf32>, vector<64x128xf32>, vector<8x128xf32> -> vector<8x128xf32>
    %424 = vector.broadcast %8 : vector<8x1xf32> to vector<8x128xf32>
    %425 = arith.addf %423, %424 : vector<8x128xf32>
    %cst_199 = arith.constant 0.000000e+00 : f32
    %426 = vector.broadcast %cst_199 : f32 to vector<8x128xf32>
    %427 = arith.maximumf %425, %426 : vector<8x128xf32>
    %cst_200 = arith.constant dense<0.000000e+00> : vector<8x128xf32>
    %428 = tpu.matmul %9, %427, %cst_200 {dimension_numbers = #tpu.dot_dimension_numbers<[1], [0], [0], [1], [0, 0, 1, 1], [], []>} : vector<8x8xf32>, vector<8x128xf32>, vector<8x128xf32> -> vector<8x128xf32>
    %429 = vector.broadcast %10 : vector<8x1xf32> to vector<8x128xf32>
    %430 = arith.addf %428, %429 : vector<8x128xf32>
    %c15 = arith.constant 15 : index
    %c0_201 = arith.constant 0 : index
    %c0_202 = arith.constant 0 : index
    %431 = vector.load %arg4[%c15, %c0_201, %c0_202] : memref<16x8x128xf32, #tpu.memory_space<vmem>>, vector<1x8x128xf32>
    %432 = vector.shape_cast %431 : vector<1x8x128xf32> to vector<8x128xf32>
    %cst_203 = arith.constant dense<0.000000e+00> : vector<8x128xf32>
    %433 = tpu.matmul %1, %432, %cst_203 {dimension_numbers = #tpu.dot_dimension_numbers<[1], [0], [0], [1], [0, 0, 1, 1], [], []>} : vector<8x8xf32>, vector<8x128xf32>, vector<8x128xf32> -> vector<8x128xf32>
    %434 = vector.broadcast %2 : vector<8x1xf32> to vector<8x128xf32>
    %435 = arith.addf %433, %434 : vector<8x128xf32>
    %cst_204 = arith.constant 0.000000e+00 : f32
    %436 = vector.broadcast %cst_204 : f32 to vector<8x128xf32>
    %437 = arith.maximumf %435, %436 : vector<8x128xf32>
    %cst_205 = arith.constant dense<0.000000e+00> : vector<64x128xf32>
    %438 = tpu.matmul %3, %437, %cst_205 {dimension_numbers = #tpu.dot_dimension_numbers<[1], [0], [0], [1], [0, 0, 1, 1], [], []>} : vector<64x8xf32>, vector<8x128xf32>, vector<64x128xf32> -> vector<64x128xf32>
    %439 = vector.broadcast %4 : vector<64x1xf32> to vector<64x128xf32>
    %440 = arith.addf %438, %439 : vector<64x128xf32>
    %c15_206 = arith.constant 15 : index
    %c0_207 = arith.constant 0 : index
    %c0_208 = arith.constant 0 : index
    %441 = vector.load %arg2[%c15_206, %c0_207, %c0_208] : memref<16x64x128xf32, #tpu.memory_space<vmem>>, vector<1x64x128xf32>
    %442 = vector.shape_cast %441 : vector<1x64x128xf32> to vector<64x128xf32>
    %443 = arith.subf %442, %0 : vector<64x128xf32>
    %444 = arith.addf %443, %440 : vector<64x128xf32>
    %445 = vector.broadcast %5 : vector<64x1xf32> to vector<64x128xf32>
    %446 = arith.mulf %445, %444 : vector<64x128xf32>
    %447 = vector.broadcast %6 : vector<64x1xf32> to vector<64x128xf32>
    %448 = arith.addf %446, %447 : vector<64x128xf32>
    %cst_209 = arith.constant 0.000000e+00 : f32
    %449 = vector.broadcast %cst_209 : f32 to vector<64x128xf32>
    %450 = arith.maximumf %448, %449 : vector<64x128xf32>
    %cst_210 = arith.constant dense<0.000000e+00> : vector<8x128xf32>
    %451 = tpu.matmul %7, %450, %cst_210 {dimension_numbers = #tpu.dot_dimension_numbers<[1], [0], [0], [1], [0, 0, 1, 1], [], []>} : vector<8x64xf32>, vector<64x128xf32>, vector<8x128xf32> -> vector<8x128xf32>
    %452 = vector.broadcast %8 : vector<8x1xf32> to vector<8x128xf32>
    %453 = arith.addf %451, %452 : vector<8x128xf32>
    %cst_211 = arith.constant 0.000000e+00 : f32
    %454 = vector.broadcast %cst_211 : f32 to vector<8x128xf32>
    %455 = arith.maximumf %453, %454 : vector<8x128xf32>
    %cst_212 = arith.constant dense<0.000000e+00> : vector<8x128xf32>
    %456 = tpu.matmul %9, %455, %cst_212 {dimension_numbers = #tpu.dot_dimension_numbers<[1], [0], [0], [1], [0, 0, 1, 1], [], []>} : vector<8x8xf32>, vector<8x128xf32>, vector<8x128xf32> -> vector<8x128xf32>
    %457 = vector.broadcast %10 : vector<8x1xf32> to vector<8x128xf32>
    %458 = arith.addf %456, %457 : vector<8x128xf32>
    %459 = vector.shape_cast %38 : vector<8x128xf32> to vector<1x8x128xf32>
    %460 = vector.shape_cast %66 : vector<8x128xf32> to vector<1x8x128xf32>
    %461 = vector.shape_cast %94 : vector<8x128xf32> to vector<1x8x128xf32>
    %462 = vector.shape_cast %122 : vector<8x128xf32> to vector<1x8x128xf32>
    %463 = vector.shape_cast %150 : vector<8x128xf32> to vector<1x8x128xf32>
    %464 = vector.shape_cast %178 : vector<8x128xf32> to vector<1x8x128xf32>
    %465 = vector.shape_cast %206 : vector<8x128xf32> to vector<1x8x128xf32>
    %466 = vector.shape_cast %234 : vector<8x128xf32> to vector<1x8x128xf32>
    %467 = vector.shape_cast %262 : vector<8x128xf32> to vector<1x8x128xf32>
    %468 = vector.shape_cast %290 : vector<8x128xf32> to vector<1x8x128xf32>
    %469 = vector.shape_cast %318 : vector<8x128xf32> to vector<1x8x128xf32>
    %470 = vector.shape_cast %346 : vector<8x128xf32> to vector<1x8x128xf32>
    %471 = vector.shape_cast %374 : vector<8x128xf32> to vector<1x8x128xf32>
    %472 = vector.shape_cast %402 : vector<8x128xf32> to vector<1x8x128xf32>
    %473 = vector.shape_cast %430 : vector<8x128xf32> to vector<1x8x128xf32>
    %474 = vector.shape_cast %458 : vector<8x128xf32> to vector<1x8x128xf32>
    %475 = tpu.concatenate %459, %460, %461, %462, %463, %464, %465, %466, %467, %468, %469, %470, %471, %472, %473, %474 in 0 : vector<1x8x128xf32>, vector<1x8x128xf32>, vector<1x8x128xf32>, vector<1x8x128xf32>, vector<1x8x128xf32>, vector<1x8x128xf32>, vector<1x8x128xf32>, vector<1x8x128xf32>, vector<1x8x128xf32>, vector<1x8x128xf32>, vector<1x8x128xf32>, vector<1x8x128xf32>, vector<1x8x128xf32>, vector<1x8x128xf32>, vector<1x8x128xf32>, vector<1x8x128xf32> -> vector<16x8x128xf32>
    %cst_213 = arith.constant dense<0xFF800000> : vector<8x128xf32>
    %476 = vector.multi_reduction <maximumf>, %475, %cst_213 [0] : vector<16x8x128xf32> to vector<8x128xf32>
    %477 = vector.shape_cast %476 : vector<8x128xf32> to vector<1x8x128xf32>
    %478 = vector.broadcast %477 : vector<1x8x128xf32> to vector<16x8x128xf32>
    %479 = arith.subf %475, %478 : vector<16x8x128xf32>
    %480 = math.exp %479 : vector<16x8x128xf32>
    %cst_214 = arith.constant dense<0.000000e+00> : vector<8x128xf32>
    %481 = vector.multi_reduction <add>, %480, %cst_214 [0] : vector<16x8x128xf32> to vector<8x128xf32>
    %482 = vector.shape_cast %481 : vector<8x128xf32> to vector<1x8x128xf32>
    %483 = vector.broadcast %482 : vector<1x8x128xf32> to vector<16x8x128xf32>
    %484 = arith.divf %480, %483 : vector<16x8x128xf32>
    %cst_215 = arith.constant 0.000000e+00 : f32
    %485 = vector.broadcast %cst_215 : f32 to vector<64x128xf32>
    %486 = vector.extract_strided_slice %484 {offsets = [0, 0, 0], sizes = [1, 8, 128], strides = [1, 1, 1]} : vector<16x8x128xf32> to vector<1x8x128xf32>
    %487 = vector.shape_cast %486 : vector<1x8x128xf32> to vector<8x128xf32>
    %488 = tpu.concatenate %487, %487, %487, %487, %487, %487, %487, %487 in 0 : vector<8x128xf32>, vector<8x128xf32>, vector<8x128xf32>, vector<8x128xf32>, vector<8x128xf32>, vector<8x128xf32>, vector<8x128xf32>, vector<8x128xf32> -> vector<64x128xf32>
    %c0_216 = arith.constant 0 : index
    %c0_217 = arith.constant 0 : index
    %c0_218 = arith.constant 0 : index
    %489 = vector.load %arg3[%c0_216, %c0_217, %c0_218] : memref<16x64x128xf32, #tpu.memory_space<vmem>>, vector<1x64x128xf32>
    %490 = vector.shape_cast %489 : vector<1x64x128xf32> to vector<64x128xf32>
    %491 = arith.addf %490, %20 : vector<64x128xf32>
    %492 = arith.mulf %491, %488 : vector<64x128xf32>
    %493 = arith.addf %485, %492 : vector<64x128xf32>
    %494 = vector.extract_strided_slice %484 {offsets = [1, 0, 0], sizes = [1, 8, 128], strides = [1, 1, 1]} : vector<16x8x128xf32> to vector<1x8x128xf32>
    %495 = vector.shape_cast %494 : vector<1x8x128xf32> to vector<8x128xf32>
    %496 = tpu.concatenate %495, %495, %495, %495, %495, %495, %495, %495 in 0 : vector<8x128xf32>, vector<8x128xf32>, vector<8x128xf32>, vector<8x128xf32>, vector<8x128xf32>, vector<8x128xf32>, vector<8x128xf32>, vector<8x128xf32> -> vector<64x128xf32>
    %c1_219 = arith.constant 1 : index
    %c0_220 = arith.constant 0 : index
    %c0_221 = arith.constant 0 : index
    %497 = vector.load %arg3[%c1_219, %c0_220, %c0_221] : memref<16x64x128xf32, #tpu.memory_space<vmem>>, vector<1x64x128xf32>
    %498 = vector.shape_cast %497 : vector<1x64x128xf32> to vector<64x128xf32>
    %499 = arith.addf %498, %48 : vector<64x128xf32>
    %500 = arith.mulf %499, %496 : vector<64x128xf32>
    %501 = arith.addf %493, %500 : vector<64x128xf32>
    %502 = vector.extract_strided_slice %484 {offsets = [2, 0, 0], sizes = [1, 8, 128], strides = [1, 1, 1]} : vector<16x8x128xf32> to vector<1x8x128xf32>
    %503 = vector.shape_cast %502 : vector<1x8x128xf32> to vector<8x128xf32>
    %504 = tpu.concatenate %503, %503, %503, %503, %503, %503, %503, %503 in 0 : vector<8x128xf32>, vector<8x128xf32>, vector<8x128xf32>, vector<8x128xf32>, vector<8x128xf32>, vector<8x128xf32>, vector<8x128xf32>, vector<8x128xf32> -> vector<64x128xf32>
    %c2_222 = arith.constant 2 : index
    %c0_223 = arith.constant 0 : index
    %c0_224 = arith.constant 0 : index
    %505 = vector.load %arg3[%c2_222, %c0_223, %c0_224] : memref<16x64x128xf32, #tpu.memory_space<vmem>>, vector<1x64x128xf32>
    %506 = vector.shape_cast %505 : vector<1x64x128xf32> to vector<64x128xf32>
    %507 = arith.addf %506, %76 : vector<64x128xf32>
    %508 = arith.mulf %507, %504 : vector<64x128xf32>
    %509 = arith.addf %501, %508 : vector<64x128xf32>
    %510 = vector.extract_strided_slice %484 {offsets = [3, 0, 0], sizes = [1, 8, 128], strides = [1, 1, 1]} : vector<16x8x128xf32> to vector<1x8x128xf32>
    %511 = vector.shape_cast %510 : vector<1x8x128xf32> to vector<8x128xf32>
    %512 = tpu.concatenate %511, %511, %511, %511, %511, %511, %511, %511 in 0 : vector<8x128xf32>, vector<8x128xf32>, vector<8x128xf32>, vector<8x128xf32>, vector<8x128xf32>, vector<8x128xf32>, vector<8x128xf32>, vector<8x128xf32> -> vector<64x128xf32>
    %c3_225 = arith.constant 3 : index
    %c0_226 = arith.constant 0 : index
    %c0_227 = arith.constant 0 : index
    %513 = vector.load %arg3[%c3_225, %c0_226, %c0_227] : memref<16x64x128xf32, #tpu.memory_space<vmem>>, vector<1x64x128xf32>
    %514 = vector.shape_cast %513 : vector<1x64x128xf32> to vector<64x128xf32>
    %515 = arith.addf %514, %104 : vector<64x128xf32>
    %516 = arith.mulf %515, %512 : vector<64x128xf32>
    %517 = arith.addf %509, %516 : vector<64x128xf32>
    %518 = vector.extract_strided_slice %484 {offsets = [4, 0, 0], sizes = [1, 8, 128], strides = [1, 1, 1]} : vector<16x8x128xf32> to vector<1x8x128xf32>
    %519 = vector.shape_cast %518 : vector<1x8x128xf32> to vector<8x128xf32>
    %520 = tpu.concatenate %519, %519, %519, %519, %519, %519, %519, %519 in 0 : vector<8x128xf32>, vector<8x128xf32>, vector<8x128xf32>, vector<8x128xf32>, vector<8x128xf32>, vector<8x128xf32>, vector<8x128xf32>, vector<8x128xf32> -> vector<64x128xf32>
    %c4_228 = arith.constant 4 : index
    %c0_229 = arith.constant 0 : index
    %c0_230 = arith.constant 0 : index
    %521 = vector.load %arg3[%c4_228, %c0_229, %c0_230] : memref<16x64x128xf32, #tpu.memory_space<vmem>>, vector<1x64x128xf32>
    %522 = vector.shape_cast %521 : vector<1x64x128xf32> to vector<64x128xf32>
    %523 = arith.addf %522, %132 : vector<64x128xf32>
    %524 = arith.mulf %523, %520 : vector<64x128xf32>
    %525 = arith.addf %517, %524 : vector<64x128xf32>
    %526 = vector.extract_strided_slice %484 {offsets = [5, 0, 0], sizes = [1, 8, 128], strides = [1, 1, 1]} : vector<16x8x128xf32> to vector<1x8x128xf32>
    %527 = vector.shape_cast %526 : vector<1x8x128xf32> to vector<8x128xf32>
    %528 = tpu.concatenate %527, %527, %527, %527, %527, %527, %527, %527 in 0 : vector<8x128xf32>, vector<8x128xf32>, vector<8x128xf32>, vector<8x128xf32>, vector<8x128xf32>, vector<8x128xf32>, vector<8x128xf32>, vector<8x128xf32> -> vector<64x128xf32>
    %c5_231 = arith.constant 5 : index
    %c0_232 = arith.constant 0 : index
    %c0_233 = arith.constant 0 : index
    %529 = vector.load %arg3[%c5_231, %c0_232, %c0_233] : memref<16x64x128xf32, #tpu.memory_space<vmem>>, vector<1x64x128xf32>
    %530 = vector.shape_cast %529 : vector<1x64x128xf32> to vector<64x128xf32>
    %531 = arith.addf %530, %160 : vector<64x128xf32>
    %532 = arith.mulf %531, %528 : vector<64x128xf32>
    %533 = arith.addf %525, %532 : vector<64x128xf32>
    %534 = vector.extract_strided_slice %484 {offsets = [6, 0, 0], sizes = [1, 8, 128], strides = [1, 1, 1]} : vector<16x8x128xf32> to vector<1x8x128xf32>
    %535 = vector.shape_cast %534 : vector<1x8x128xf32> to vector<8x128xf32>
    %536 = tpu.concatenate %535, %535, %535, %535, %535, %535, %535, %535 in 0 : vector<8x128xf32>, vector<8x128xf32>, vector<8x128xf32>, vector<8x128xf32>, vector<8x128xf32>, vector<8x128xf32>, vector<8x128xf32>, vector<8x128xf32> -> vector<64x128xf32>
    %c6_234 = arith.constant 6 : index
    %c0_235 = arith.constant 0 : index
    %c0_236 = arith.constant 0 : index
    %537 = vector.load %arg3[%c6_234, %c0_235, %c0_236] : memref<16x64x128xf32, #tpu.memory_space<vmem>>, vector<1x64x128xf32>
    %538 = vector.shape_cast %537 : vector<1x64x128xf32> to vector<64x128xf32>
    %539 = arith.addf %538, %188 : vector<64x128xf32>
    %540 = arith.mulf %539, %536 : vector<64x128xf32>
    %541 = arith.addf %533, %540 : vector<64x128xf32>
    %542 = vector.extract_strided_slice %484 {offsets = [7, 0, 0], sizes = [1, 8, 128], strides = [1, 1, 1]} : vector<16x8x128xf32> to vector<1x8x128xf32>
    %543 = vector.shape_cast %542 : vector<1x8x128xf32> to vector<8x128xf32>
    %544 = tpu.concatenate %543, %543, %543, %543, %543, %543, %543, %543 in 0 : vector<8x128xf32>, vector<8x128xf32>, vector<8x128xf32>, vector<8x128xf32>, vector<8x128xf32>, vector<8x128xf32>, vector<8x128xf32>, vector<8x128xf32> -> vector<64x128xf32>
    %c7_237 = arith.constant 7 : index
    %c0_238 = arith.constant 0 : index
    %c0_239 = arith.constant 0 : index
    %545 = vector.load %arg3[%c7_237, %c0_238, %c0_239] : memref<16x64x128xf32, #tpu.memory_space<vmem>>, vector<1x64x128xf32>
    %546 = vector.shape_cast %545 : vector<1x64x128xf32> to vector<64x128xf32>
    %547 = arith.addf %546, %216 : vector<64x128xf32>
    %548 = arith.mulf %547, %544 : vector<64x128xf32>
    %549 = arith.addf %541, %548 : vector<64x128xf32>
    %550 = vector.extract_strided_slice %484 {offsets = [8, 0, 0], sizes = [1, 8, 128], strides = [1, 1, 1]} : vector<16x8x128xf32> to vector<1x8x128xf32>
    %551 = vector.shape_cast %550 : vector<1x8x128xf32> to vector<8x128xf32>
    %552 = tpu.concatenate %551, %551, %551, %551, %551, %551, %551, %551 in 0 : vector<8x128xf32>, vector<8x128xf32>, vector<8x128xf32>, vector<8x128xf32>, vector<8x128xf32>, vector<8x128xf32>, vector<8x128xf32>, vector<8x128xf32> -> vector<64x128xf32>
    %c8_240 = arith.constant 8 : index
    %c0_241 = arith.constant 0 : index
    %c0_242 = arith.constant 0 : index
    %553 = vector.load %arg3[%c8_240, %c0_241, %c0_242] : memref<16x64x128xf32, #tpu.memory_space<vmem>>, vector<1x64x128xf32>
    %554 = vector.shape_cast %553 : vector<1x64x128xf32> to vector<64x128xf32>
    %555 = arith.addf %554, %244 : vector<64x128xf32>
    %556 = arith.mulf %555, %552 : vector<64x128xf32>
    %557 = arith.addf %549, %556 : vector<64x128xf32>
    %558 = vector.extract_strided_slice %484 {offsets = [9, 0, 0], sizes = [1, 8, 128], strides = [1, 1, 1]} : vector<16x8x128xf32> to vector<1x8x128xf32>
    %559 = vector.shape_cast %558 : vector<1x8x128xf32> to vector<8x128xf32>
    %560 = tpu.concatenate %559, %559, %559, %559, %559, %559, %559, %559 in 0 : vector<8x128xf32>, vector<8x128xf32>, vector<8x128xf32>, vector<8x128xf32>, vector<8x128xf32>, vector<8x128xf32>, vector<8x128xf32>, vector<8x128xf32> -> vector<64x128xf32>
    %c9_243 = arith.constant 9 : index
    %c0_244 = arith.constant 0 : index
    %c0_245 = arith.constant 0 : index
    %561 = vector.load %arg3[%c9_243, %c0_244, %c0_245] : memref<16x64x128xf32, #tpu.memory_space<vmem>>, vector<1x64x128xf32>
    %562 = vector.shape_cast %561 : vector<1x64x128xf32> to vector<64x128xf32>
    %563 = arith.addf %562, %272 : vector<64x128xf32>
    %564 = arith.mulf %563, %560 : vector<64x128xf32>
    %565 = arith.addf %557, %564 : vector<64x128xf32>
    %566 = vector.extract_strided_slice %484 {offsets = [10, 0, 0], sizes = [1, 8, 128], strides = [1, 1, 1]} : vector<16x8x128xf32> to vector<1x8x128xf32>
    %567 = vector.shape_cast %566 : vector<1x8x128xf32> to vector<8x128xf32>
    %568 = tpu.concatenate %567, %567, %567, %567, %567, %567, %567, %567 in 0 : vector<8x128xf32>, vector<8x128xf32>, vector<8x128xf32>, vector<8x128xf32>, vector<8x128xf32>, vector<8x128xf32>, vector<8x128xf32>, vector<8x128xf32> -> vector<64x128xf32>
    %c10_246 = arith.constant 10 : index
    %c0_247 = arith.constant 0 : index
    %c0_248 = arith.constant 0 : index
    %569 = vector.load %arg3[%c10_246, %c0_247, %c0_248] : memref<16x64x128xf32, #tpu.memory_space<vmem>>, vector<1x64x128xf32>
    %570 = vector.shape_cast %569 : vector<1x64x128xf32> to vector<64x128xf32>
    %571 = arith.addf %570, %300 : vector<64x128xf32>
    %572 = arith.mulf %571, %568 : vector<64x128xf32>
    %573 = arith.addf %565, %572 : vector<64x128xf32>
    %574 = vector.extract_strided_slice %484 {offsets = [11, 0, 0], sizes = [1, 8, 128], strides = [1, 1, 1]} : vector<16x8x128xf32> to vector<1x8x128xf32>
    %575 = vector.shape_cast %574 : vector<1x8x128xf32> to vector<8x128xf32>
    %576 = tpu.concatenate %575, %575, %575, %575, %575, %575, %575, %575 in 0 : vector<8x128xf32>, vector<8x128xf32>, vector<8x128xf32>, vector<8x128xf32>, vector<8x128xf32>, vector<8x128xf32>, vector<8x128xf32>, vector<8x128xf32> -> vector<64x128xf32>
    %c11_249 = arith.constant 11 : index
    %c0_250 = arith.constant 0 : index
    %c0_251 = arith.constant 0 : index
    %577 = vector.load %arg3[%c11_249, %c0_250, %c0_251] : memref<16x64x128xf32, #tpu.memory_space<vmem>>, vector<1x64x128xf32>
    %578 = vector.shape_cast %577 : vector<1x64x128xf32> to vector<64x128xf32>
    %579 = arith.addf %578, %328 : vector<64x128xf32>
    %580 = arith.mulf %579, %576 : vector<64x128xf32>
    %581 = arith.addf %573, %580 : vector<64x128xf32>
    %582 = vector.extract_strided_slice %484 {offsets = [12, 0, 0], sizes = [1, 8, 128], strides = [1, 1, 1]} : vector<16x8x128xf32> to vector<1x8x128xf32>
    %583 = vector.shape_cast %582 : vector<1x8x128xf32> to vector<8x128xf32>
    %584 = tpu.concatenate %583, %583, %583, %583, %583, %583, %583, %583 in 0 : vector<8x128xf32>, vector<8x128xf32>, vector<8x128xf32>, vector<8x128xf32>, vector<8x128xf32>, vector<8x128xf32>, vector<8x128xf32>, vector<8x128xf32> -> vector<64x128xf32>
    %c12_252 = arith.constant 12 : index
    %c0_253 = arith.constant 0 : index
    %c0_254 = arith.constant 0 : index
    %585 = vector.load %arg3[%c12_252, %c0_253, %c0_254] : memref<16x64x128xf32, #tpu.memory_space<vmem>>, vector<1x64x128xf32>
    %586 = vector.shape_cast %585 : vector<1x64x128xf32> to vector<64x128xf32>
    %587 = arith.addf %586, %356 : vector<64x128xf32>
    %588 = arith.mulf %587, %584 : vector<64x128xf32>
    %589 = arith.addf %581, %588 : vector<64x128xf32>
    %590 = vector.extract_strided_slice %484 {offsets = [13, 0, 0], sizes = [1, 8, 128], strides = [1, 1, 1]} : vector<16x8x128xf32> to vector<1x8x128xf32>
    %591 = vector.shape_cast %590 : vector<1x8x128xf32> to vector<8x128xf32>
    %592 = tpu.concatenate %591, %591, %591, %591, %591, %591, %591, %591 in 0 : vector<8x128xf32>, vector<8x128xf32>, vector<8x128xf32>, vector<8x128xf32>, vector<8x128xf32>, vector<8x128xf32>, vector<8x128xf32>, vector<8x128xf32> -> vector<64x128xf32>
    %c13_255 = arith.constant 13 : index
    %c0_256 = arith.constant 0 : index
    %c0_257 = arith.constant 0 : index
    %593 = vector.load %arg3[%c13_255, %c0_256, %c0_257] : memref<16x64x128xf32, #tpu.memory_space<vmem>>, vector<1x64x128xf32>
    %594 = vector.shape_cast %593 : vector<1x64x128xf32> to vector<64x128xf32>
    %595 = arith.addf %594, %384 : vector<64x128xf32>
    %596 = arith.mulf %595, %592 : vector<64x128xf32>
    %597 = arith.addf %589, %596 : vector<64x128xf32>
    %598 = vector.extract_strided_slice %484 {offsets = [14, 0, 0], sizes = [1, 8, 128], strides = [1, 1, 1]} : vector<16x8x128xf32> to vector<1x8x128xf32>
    %599 = vector.shape_cast %598 : vector<1x8x128xf32> to vector<8x128xf32>
    %600 = tpu.concatenate %599, %599, %599, %599, %599, %599, %599, %599 in 0 : vector<8x128xf32>, vector<8x128xf32>, vector<8x128xf32>, vector<8x128xf32>, vector<8x128xf32>, vector<8x128xf32>, vector<8x128xf32>, vector<8x128xf32> -> vector<64x128xf32>
    %c14_258 = arith.constant 14 : index
    %c0_259 = arith.constant 0 : index
    %c0_260 = arith.constant 0 : index
    %601 = vector.load %arg3[%c14_258, %c0_259, %c0_260] : memref<16x64x128xf32, #tpu.memory_space<vmem>>, vector<1x64x128xf32>
    %602 = vector.shape_cast %601 : vector<1x64x128xf32> to vector<64x128xf32>
    %603 = arith.addf %602, %412 : vector<64x128xf32>
    %604 = arith.mulf %603, %600 : vector<64x128xf32>
    %605 = arith.addf %597, %604 : vector<64x128xf32>
    %606 = vector.extract_strided_slice %484 {offsets = [15, 0, 0], sizes = [1, 8, 128], strides = [1, 1, 1]} : vector<16x8x128xf32> to vector<1x8x128xf32>
    %607 = vector.shape_cast %606 : vector<1x8x128xf32> to vector<8x128xf32>
    %608 = tpu.concatenate %607, %607, %607, %607, %607, %607, %607, %607 in 0 : vector<8x128xf32>, vector<8x128xf32>, vector<8x128xf32>, vector<8x128xf32>, vector<8x128xf32>, vector<8x128xf32>, vector<8x128xf32>, vector<8x128xf32> -> vector<64x128xf32>
    %c15_261 = arith.constant 15 : index
    %c0_262 = arith.constant 0 : index
    %c0_263 = arith.constant 0 : index
    %609 = vector.load %arg3[%c15_261, %c0_262, %c0_263] : memref<16x64x128xf32, #tpu.memory_space<vmem>>, vector<1x64x128xf32>
    %610 = vector.shape_cast %609 : vector<1x64x128xf32> to vector<64x128xf32>
    %611 = arith.addf %610, %440 : vector<64x128xf32>
    %612 = arith.mulf %611, %608 : vector<64x128xf32>
    %613 = arith.addf %605, %612 : vector<64x128xf32>
    %c0_264 = arith.constant 0 : index
    %c0_265 = arith.constant 0 : index
    %614 = vector.load %arg16[%c0_264, %c0_265] : memref<64x1xf32, #tpu.memory_space<vmem>>, vector<64x1xf32>
    %615 = vector.broadcast %614 : vector<64x1xf32> to vector<64x128xf32>
    %616 = arith.mulf %615, %613 : vector<64x128xf32>
    %c0_266 = arith.constant 0 : index
    %c0_267 = arith.constant 0 : index
    %617 = vector.load %arg17[%c0_266, %c0_267] : memref<64x1xf32, #tpu.memory_space<vmem>>, vector<64x1xf32>
    %618 = vector.broadcast %617 : vector<64x1xf32> to vector<64x128xf32>
    %619 = arith.addf %616, %618 : vector<64x128xf32>
    %cst_268 = arith.constant 0.000000e+00 : f32
    %620 = vector.broadcast %cst_268 : f32 to vector<64x128xf32>
    %621 = arith.maximumf %619, %620 : vector<64x128xf32>
    %c0_269 = arith.constant 0 : index
    %c0_270 = arith.constant 0 : index
    %622 = vector.load %arg18[%c0_269, %c0_270] : memref<64x64xf32, #tpu.memory_space<vmem>>, vector<64x64xf32>
    %cst_271 = arith.constant dense<0.000000e+00> : vector<64x128xf32>
    %623 = tpu.matmul %622, %621, %cst_271 {dimension_numbers = #tpu.dot_dimension_numbers<[1], [0], [0], [1], [0, 0, 1, 1], [], []>} : vector<64x64xf32>, vector<64x128xf32>, vector<64x128xf32> -> vector<64x128xf32>
    %c0_272 = arith.constant 0 : index
    %c0_273 = arith.constant 0 : index
    %624 = vector.load %arg19[%c0_272, %c0_273] : memref<64x1xf32, #tpu.memory_space<vmem>>, vector<64x1xf32>
    %625 = vector.broadcast %624 : vector<64x1xf32> to vector<64x128xf32>
    %626 = arith.addf %623, %625 : vector<64x128xf32>
    %c0_274 = arith.constant 0 : index
    %c0_275 = arith.constant 0 : index
    %627 = vector.load %arg5[%c0_274, %c0_275] : memref<64x128xf32, #tpu.memory_space<vmem>>, vector<64x128xf32>
    %628 = arith.addf %626, %627 : vector<64x128xf32>
    %c0_276 = arith.constant 0 : index
    %c0_277 = arith.constant 0 : index
    %629 = vector.load %arg20[%c0_276, %c0_277] : memref<64x128xf32, #tpu.memory_space<vmem>>, vector<64x128xf32>
    tpu.vector_store %arg20[%c0_276, %c0_277], %628 {strides = array<i32>} : memref<64x128xf32, #tpu.memory_space<vmem>>, vector<64x128xf32>,
    return
  }
  func.func @transform_0(%arg0: i32) -> (i32, i32) {
    %c0_i32 = arith.constant 0 : i32
    %c0_i32_0 = arith.constant 0 : i32
    return %c0_i32, %arg0 : i32, i32
  }
  func.func @transform_1(%arg0: i32) -> (i32, i32, i32) {
    %c0_i32 = arith.constant 0 : i32
    %c0_i32_0 = arith.constant 0 : i32
    %c0_i32_1 = arith.constant 0 : i32
    return %c0_i32, %c0_i32_0, %arg0 : i32, i32, i32
  }
  func.func @transform_2(%arg0: i32) -> (i32, i32, i32) {
    %c0_i32 = arith.constant 0 : i32
    %c0_i32_0 = arith.constant 0 : i32
    %c0_i32_1 = arith.constant 0 : i32
    return %c0_i32, %c0_i32_0, %arg0 : i32, i32, i32
  }
  func.func @transform_3(%arg0: i32) -> (i32, i32, i32) {
    %c0_i32 = arith.constant 0 : i32
    %c0_i32_0 = arith.constant 0 : i32
    %c0_i32_1 = arith.constant 0 : i32
    return %c0_i32, %c0_i32_0, %arg0 : i32, i32, i32
  }
  func.func @transform_4(%arg0: i32) -> (i32, i32) {
    %c0_i32 = arith.constant 0 : i32
    %c0_i32_0 = arith.constant 0 : i32
    return %c0_i32, %arg0 : i32, i32
  }
  func.func @transform_5(%arg0: i32) -> (i32, i32) {
    %c0_i32 = arith.constant 0 : i32
    %c0_i32_0 = arith.constant 0 : i32
    %c0_i32_1 = arith.constant 0 : i32
    return %c0_i32, %c0_i32_0 : i32, i32
  }
  func.func @transform_6(%arg0: i32) -> (i32, i32) {
    %c0_i32 = arith.constant 0 : i32
    %c0_i32_0 = arith.constant 0 : i32
    %c0_i32_1 = arith.constant 0 : i32
    return %c0_i32, %c0_i32_0 : i32, i32
  }
  func.func @transform_7(%arg0: i32) -> (i32, i32) {
    %c0_i32 = arith.constant 0 : i32
    %c0_i32_0 = arith.constant 0 : i32
    %c0_i32_1 = arith.constant 0 : i32
    return %c0_i32, %c0_i32_0 : i32, i32
  }
  func.func @transform_8(%arg0: i32) -> (i32, i32) {
    %c0_i32 = arith.constant 0 : i32
    %c0_i32_0 = arith.constant 0 : i32
    %c0_i32_1 = arith.constant 0 : i32
    return %c0_i32, %c0_i32_0 : i32, i32
  }
  func.func @transform_9(%arg0: i32) -> (i32, i32) {
    %c0_i32 = arith.constant 0 : i32
    %c0_i32_0 = arith.constant 0 : i32
    %c0_i32_1 = arith.constant 0 : i32
    return %c0_i32, %c0_i32_0 : i32, i32
  }
  func.func @transform_10(%arg0: i32) -> (i32, i32) {
    %c0_i32 = arith.constant 0 : i32
    %c0_i32_0 = arith.constant 0 : i32
    %c0_i32_1 = arith.constant 0 : i32
    return %c0_i32, %c0_i32_0 : i32, i32
  }
  func.func @transform_11(%arg0: i32) -> (i32, i32) {
    %c0_i32 = arith.constant 0 : i32
    %c0_i32_0 = arith.constant 0 : i32
    %c0_i32_1 = arith.constant 0 : i32
    return %c0_i32, %c0_i32_0 : i32, i32
  }
  func.func @transform_12(%arg0: i32) -> (i32, i32) {
    %c0_i32 = arith.constant 0 : i32
    %c0_i32_0 = arith.constant 0 : i32
    %c0_i32_1 = arith.constant 0 : i32
    return %c0_i32, %c0_i32_0 : i32, i32
  }
  func.func @transform_13(%arg0: i32) -> (i32, i32) {
    %c0_i32 = arith.constant 0 : i32
    %c0_i32_0 = arith.constant 0 : i32
    %c0_i32_1 = arith.constant 0 : i32
    return %c0_i32, %c0_i32_0 : i32, i32
  }
  func.func @transform_14(%arg0: i32) -> (i32, i32) {
    %c0_i32 = arith.constant 0 : i32
    %c0_i32_0 = arith.constant 0 : i32
    %c0_i32_1 = arith.constant 0 : i32
    return %c0_i32, %c0_i32_0 : i32, i32
  }
  func.func @transform_15(%arg0: i32) -> (i32, i32) {
    %c0_i32 = arith.constant 0 : i32
    %c0_i32_0 = arith.constant 0 : i32
    %c0_i32_1 = arith.constant 0 : i32
    return %c0_i32, %c0_i32_0 : i32, i32
  }
  func.func @transform_16(%arg0: i32) -> (i32, i32) {
    %c0_i32 = arith.constant 0 : i32
    %c0_i32_0 = arith.constant 0 : i32
    %c0_i32_1 = arith.constant 0 : i32
    return %c0_i32, %c0_i32_0 : i32, i32
  }
  func.func @transform_17(%arg0: i32) -> (i32, i32) {
    %c0_i32 = arith.constant 0 : i32
    %c0_i32_0 = arith.constant 0 : i32
    %c0_i32_1 = arith.constant 0 : i32
    return %c0_i32, %c0_i32_0 : i32, i32
  }
  func.func @transform_18(%arg0: i32) -> (i32, i32) {
    %c0_i32 = arith.constant 0 : i32
    %c0_i32_0 = arith.constant 0 : i32
    %c0_i32_1 = arith.constant 0 : i32
    return %c0_i32, %c0_i32_0 : i32, i32
  }
  func.func @transform_19(%arg0: i32) -> (i32, i32) {
    %c0_i32 = arith.constant 0 : i32
    %c0_i32_0 = arith.constant 0 : i32
    return %c0_i32, %arg0 : i32, i32
  }
}

</mosaic_0001>

<bundles_post_ra>
// kernel: point_transformer_block.2
= control target key start
LH: loop header
LB: loop body
LE: loop exit
PB: predicated region body
PF: predicated region fallthrough
CT: control target
= control target key end

     0   :  { %s2105_s0 = inlined_call_operand.hbm [shape: f32[64,256], index: 0, kind: input, shape index: {}]   ;;  %s2106_s1 = inlined_call_operand.vmem [shape: f32[64,64], index: 1, kind: input, shape index: {}]   ;;  %s2107_s2 = inlined_call_operand.vmem [shape: f32[64,1], index: 2, kind: input, shape index: {}]   ;;  %s2108_s3 = inlined_call_operand.hbm [shape: f32[64,64], index: 3, kind: input, shape index: {}]   ;;  %s2109_s4 = inlined_call_operand.vmem [shape: f32[64,1], index: 4, kind: input, shape index: {}]   ;;  %s2110_s5 = inlined_call_operand.hbm [shape: f32[64,64], index: 5, kind: input, shape index: {}]   ;;  %s2111_s6 = inlined_call_operand.vmem [shape: f32[64,1], index: 6, kind: input, shape index: {}]   ;;  %s2112_s7 = inlined_call_operand.hbm [shape: f32[64,64], index: 7, kind: input, shape index: {}]   ;;  %s2113_s8 = inlined_call_operand.vmem [shape: f32[64,1], index: 8, kind: input, shape index: {}]   ;;  %s2114_s9 = inlined_call_operand.vmem [shape: f32[64,256], index: 9, kind: output, shape index: {0}]   ;;  %s2115_s10 = inlined_call_operand.vmem [shape: f32[64,256], index: 10, kind: output, shape index: {1}]   ;;  %s2116_s11 = inlined_call_operand.vmem [shape: f32[64,256], index: 11, kind: output, shape index: {2}]  }
   0x1   :  { %2119 = sst [smem:[#allocation15_spill]] %s2108_s3 }
   0x2   :  { %2120 = sst [smem:[#allocation16_spill]] %s2110_s5 }
   0x3   :  { %2121 = sst [smem:[#allocation17_spill]] %s2112_s7 }
   0x4   :  { %17 = vsyncpa [#allocation3], 0 }
   0x5   :  { %19 = vsyncpa [#allocation3 + $0x1], 0 }
   0x6   :  { %20 = vsyncpa [#allocation5], 0 }
   0x7   :  { %21 = vsyncpa [#allocation8], 0  ;;  %s1711_s17 = smov 0   ;;  %s1713_s18 = smov 0  }
   0x8   :  { %s1715_s19 = smov 0   ;;  %s1717_s20 = smov 0  }
   0x9 LB: > { %s1730_s21 = sadd.s32 4294967295, %s1642_s20   ;;  %p47_p0 = scmp.ne.s32.totalorder %s1634_s18, %s1630_s17  ;;  %s1642_s20 = sphi %s1717_s20, %s2136_s20   ;;  %s1638_s19 = sphi %s1715_s19, %s2135_s19   ;;  %s1634_s18 = sphi %s1713_s18, %s2134_s18   ;;  %s1630_s17 = sphi %s1711_s17, %s2133_s17  }
   0xa   : > { %p48_p1 = scmp.eq.s32.totalorder %s1730_s21, 0  ;;  %p239_p2 = scmp.eq.s32.totalorder %s1730_s21, 1 }
   0xb   : > { %p1348_p3 = scmp.ge.s32.totalorder %s1642_s20, 1  ;;  %p304_p4 = scmp.lt.s32.totalorder %s1642_s20, 3 }
   0xc   : > { %p1739_p5 = por %p48_p1, %p47_p0  ;;  %s2124_s3 = sld [smem:[#allocation15_spill]] }
   0xd   : > { %p1743_p6 = pnand %p1348_p3, %p304_p4  ;;  %s1644_s27 = smov [#allocation4]  }
   0xe   : > { %s323_s28 = sshll.u32 %s1644_s27, 4  ;;  %s2126_s5 = sld [smem:[#allocation16_spill]]  ;;  %s324_s28 = int_to_ptr.vmem [resolvable:$true] %s323_s28 }
   0xf   : > { %p1417_p7 = pneg %p1743_p6  ;;  %s2117_s14 = smov 128  }
  0x10   : > { %s2118_s15 = smov 8   ;;  %s2127_s7 = sld [smem:[#allocation17_spill]] }
  0x11   : > { %p1754_p8 = pnand %p1417_p7, %p48_p1  ;;  %s1647_s25 = smov [#allocation6]  }
  0x12   : > { %s321_s26 = sshll.u32 %s2124_s3, 4  ;;  %s340_s27 = sshll.u32 %s1647_s25, 4  ;;  %s322_s26 = int_to_ptr.hbm [resolvable:$true] %s321_s26  ;;  %s341_s27 = int_to_ptr.vmem [resolvable:$true] %s340_s27 }
  0x13   : > { %1420 = dma.hbm_to_vmem [thread:$0]  (!%p1754_p8), %s322_s26, 1024, %s324_s28, [#allocation5], %s2117_s14, %s2117_s14, %s2118_s15  }
  0x14   : > { %s338_s13 = sshll.u32 %s2126_s5, 4  ;;  %s1648_s30 = smov [#allocation7]   ;;  %s339_s13 = int_to_ptr.hbm [resolvable:$true] %s338_s13 }
  0x15   : > { %1423 = dma.hbm_to_vmem [thread:$0]  (!%p1754_p8), %s339_s13, 1024, %s341_s27, [#allocation5], %s2117_s14, %s2117_s14, %s2118_s15  }
  0x16   : > { %s355_s24 = sshll.u32 %s2127_s7, 4  ;;  %s357_s26 = sshll.u32 %s1648_s30, 4  ;;  %s356_s24 = int_to_ptr.hbm [resolvable:$true] %s355_s24  ;;  %s358_s26 = int_to_ptr.vmem [resolvable:$true] %s357_s26 }
  0x17   : > { %1426 = dma.hbm_to_vmem [thread:$0]  (!%p1754_p8), %s356_s24, 1024, %s358_s26, [#allocation8], %s2117_s14, %s2117_s14, %s2118_s15  }
  0x18   : > { %s1780_s28 = sadd.s32 1, %s1642_s20   ;;  %s34_s12 = sadd.s32 1, %s1638_s19 }
  0x19   : > { %s31_s16 = ssub.s32 %s1642_s20, %s1780_s28  ;;  %p41_p9 = scmp.ne.s32.totalorder %s1638_s19, %s1634_s18 }
  0x1a   : > { %p32_p10 = scmp.eq.s32.totalorder %s31_s16, 0  ;;  %p42_p11 = scmp.eq.s32.totalorder %s1642_s20, 0 }
  0x1b   : > { %p1790_p12 = por %p239_p2, %p41_p9  ;;  %p1434_p13 = scmp.lt.s32.totalorder %s1642_s20, 2 }
  0x1c   : > { %s1796_s17 = scalar_select %p32_p10, %s1638_s19, %s34_s12  }
  0x1d   : > { %p43_p0 = por %p42_p11, %p41_p9  ;;  %s374_s29 = sand.u32 1, %s1638_s19  }
  0x1e   : > { %s1353_s25 = sshll.u32 %s374_s29, 6  ;;  %s1354_s24 = sshll.u32 %s1642_s20, 3 }
  0x1f   : > { %s382_s26 = scalar_lea.hbm %s2105_s0, %s1354_s24  ;;  %s378_s14 = scalar_lea.vmem [#allocation2], %s1353_s25 }
  0x20   : > { %s385_s15 = sshll.u32 %s378_s14, 4  ;;  %s383_s16 = sshll.u32 %s382_s26, 4  ;;  %s386_s15 = int_to_ptr.vmem [resolvable:$true] %s385_s15  ;;  %s384_s16 = int_to_ptr.hbm [resolvable:$true] %s383_s16 }
  0x21   : > { %p1803_p2 = pnand %p1434_p13, %p43_p0  ;;  %s375_s12 = scalar_lea.sflag [#allocation3], %s374_s29 }
  0x22   : > { %s1570_s5 = sshra.s32 %s384_s16, 4  ;;  %s1577_s14 = scalar_lea.hbm %s2105_s0, 128  ;;  %s1571_s5 = int_to_ptr.hbm [resolvable:$true] %s1570_s5 }
  0x23   : > { %s1572_s7 = scalar_lea.hbm %s1571_s5, 64  ;;  %p1574_p4 = pneg %p1803_p2 }
  0x24   : > { %p1573_p3 = scmp.ne.s32.totalorder %s1571_s5, %s1572_s7  ;;  %p1578_p9 = scmp.lt.s32.totalorder %s1571_s5, %s2105_s0 }
  0x25   : > { %p1579_p10 = scmp.lt.s32.totalorder %s1577_s14, %s1572_s7 }
  0x26   : > { %p1575_p7 = pnand %p1574_p4, %p1573_p3 }
  0x27   : > { %p1580_p11 = por %p1579_p10, %p1578_p9 }
  0x28   : > { %p1576_p8 = pneg %p1575_p7 }
  0x2a   : > { %p1581_p13 = pnand %p1580_p11, %p1576_p8 }
  0x2c   : > { %1584 = shalt.err (!%p1581_p13)
}
  0x2d   : > { %s1649_s29 = smov 256   ;;  %s2130_s30 = smov 8  }
  0x2e   : > { %s2131_s26 = smov 128   ;;  %397 = sbr.rel (%p1743_p6) target bundleno = 489 (0x1e9), region = 56 }
  0x2f   : > { %1430 = dma.hbm_to_vmem [thread:$0]  (!%p1803_p2), %s384_s16, 1024, %s386_s15, %s375_s12, %s1649_s29, %s2131_s26, %s2130_s30  }
  0x30   : > { %s399_s20 = sand.u32 (!%p1743_p6), 1, %s1634_s18  }
  0x31   : > { %s1822_s25 = sshll.u32 (!%p1743_p6), %s399_s20, 6  ;;  %s400_s5 = scalar_lea.sflag (!%p1743_p6), [#allocation3], %s399_s20 }
  0x32   : > { %s1825_s7 = scalar_lea.vmem (!%p1743_p6), [#allocation2], %s1822_s25 }
  0x33   : > { %1617 = dma.done.wait (%p1739_p5), %s400_s5, 1024  }
  0x34   : > { %1619 = vsyncadd (%p1739_p5), %s400_s5, 4294966272 }
  0x35   : > { %1621 = dma.done.wait (%p48_p1), [#allocation5], 2048  }
  0x36   : > { %1623 = vsyncadd (%p48_p1), [#allocation5], 4294965248 }
  0x37   : > { %1625 = dma.done.wait (%p48_p1), [#allocation8], 1024  }
  0x38   : > { %1627 = vsyncadd (%p48_p1), [#allocation8], 4294966272  ;;  %v1650_v0 = vmov 0   ;;  %v488_v1 = vld [vmem:[%s2107_s2 + $0x38] sm:$0xff]  ;;  %v486_v2 = vld [vmem:[%s2107_s2 + $0x28] sm:$0xff]  ;;  %vm529_vm0 = vcmask 523264  }
  0x39   : > { %1478 = vset.pattern.permute.xlu1 %v1650_v0  ;;  %1477 = vset.pattern.permute.xlu0 %v1650_v0  ;;  %v472_v3 = vld [vmem:[%s1825_s7 + $0x38] sm:$0xff]  ;;  %v471_v4 = vld [vmem:[%s1825_s7 + $0x30] sm:$0xff]  ;;  %v470_v5 = vld [vmem:[%s1825_s7 + $0x28] sm:$0xff]  ;;  %s2008_s12 = scalar_lea.vmem [#allocation9], %s1822_s25  ;;  %s2014_s14 = scalar_lea.vmem [#allocation10], %s1822_s25 }
  0x3a   : > { %1479 = vset.pattern.permute.xlu2 %v1650_v0  ;;  %526 = vperm.xlu0 %1477, %v488_v1   ;;  %v469_v6 = vld [vmem:[%s1825_s7 + $0x20] sm:$0xff]  ;;  %v487_v7 = vld [vmem:[%s2107_s2 + $0x30] sm:$0xff]  ;;  %v468_v9 = vld [vmem:[%s1825_s7 + $0x18] sm:$0xff]  ;;  %s2018_s24 = scalar_lea.vmem [#allocation11], %s1822_s25  ;;  %s1398_s25 = sshll.u32 (%p1790_p12), %s1730_s21, 3 }
  0x3b   : > { %516 = vperm.xlu1 %1478, %v486_v2   ;;  %562 = vmatpush.msra.mxu0 %v472_v3  ;;  %v485_v8 = vld [vmem:[%s2107_s2 + $0x20] sm:$0xff]  ;;  %v484_v10 = vld [vmem:[%s2107_s2 + $0x18] sm:$0xff]  ;;  %v467_v11 = vld [vmem:[%s1825_s7 + $0x10] sm:$0xff]  ;;  %s1006_s30 = scalar_lea.vmem (%p1790_p12), %s2114_s9, %s1398_s25 }
  0x3c   : > { %506 = vperm.xlu2 %1479, %v484_v10   ;;  %v466_v12 = vld [vmem:[%s1825_s7 + $0x8] sm:$0xff]  ;;  %v465_v13 = vld [vmem:[%s1825_s7] sm:$0xff]  ;;  %v483_v14 = vld [vmem:[%s2107_s2 + $0x10] sm:$0xff] }
  0x3d   : > { %563 = vmatpush.msra.mxu0 %v471_v4  ;;  %v473_v15 = vld [vmem:[%s2106_s1] sm:$0xff]  ;;  %v482_v16 = vld [vmem:[%s2107_s2 + $0x8] sm:$0xff]  ;;  %v613_v21 = vld [vmem:[%s2109_s4 + $0x10] sm:$0xff] }
  0x3e   : > { %v481_v17 = vld [vmem:[%s2107_s2] sm:$0xff]  ;;  %v474_v19 = vld [vmem:[%s2106_s1 + $0x8] sm:$0xff]  ;;  %v614_v22 = vld [vmem:[%s2109_s4 + $0x18] sm:$0xff] }
  0x3f   : > { %564 = vmatpush.msra.mxu0 %v470_v5  ;;  %v611_v18 = vld [vmem:[%s2109_s4] sm:$0xff]  ;;  %v612_v20 = vld [vmem:[%s2109_s4 + $0x8] sm:$0xff]  ;;  %v475_v23 = vld [vmem:[%s2106_s1 + $0x10] sm:$0xff] }
  0x40   : > { %v615_v24 = vld [vmem:[%s2109_s4 + $0x20] sm:$0xff]  ;;  %v616_v25 = vld [vmem:[%s2109_s4 + $0x28] sm:$0xff]  ;;  %v617_v26 = vld [vmem:[%s2109_s4 + $0x30] sm:$0xff] }
  0x41   : > { %565 = vmatpush.msra.mxu0 %v469_v6  ;;  %v476_v27 = vld [vmem:[%s2106_s1 + $0x18] sm:$0xff]  ;;  %v740_v29 = vld [vmem:[%s2111_s6] sm:$0xff]  ;;  %v741_v30 = vld [vmem:[%s2111_s6 + $0x8] sm:$0xff] }
  0x42   : > { %521 = vperm.xlu0 %1477, %v487_v7   ;;  %v618_v28 = vld [vmem:[%s2109_s4 + $0x38] sm:$0xff]  ;;  %v477_v31 = vld [vmem:[%s2106_s1 + $0x20] sm:$0xff]  ;;  %v742_v32 = vld [vmem:[%s2111_s6 + $0x10] sm:$0xff] }
  0x43   : > { %511 = vperm.xlu1 %1478, %v485_v8   ;;  %566 = vmatpush.msra.mxu0 %v468_v9  ;;  %v743_v33 = vld [vmem:[%s2111_s6 + $0x18] sm:$0xff]  ;;  %v744_v34 = vld [vmem:[%s2111_s6 + $0x20] sm:$0xff]  ;;  %v478_v35 = vld [vmem:[%s2106_s1 + $0x28] sm:$0xff] }
  0x44   : > { %501 = vperm.xlu2 %1479, %v483_v14   ;;  %v745_v36 = vld [vmem:[%s2111_s6 + $0x28] sm:$0xff]  ;;  %v746_v37 = vld [vmem:[%s2111_s6 + $0x30] sm:$0xff]  ;;  %v747_v38 = vld [vmem:[%s2111_s6 + $0x38] sm:$0xff] }
  0x45   : > { %567 = vmatpush.msra.mxu0 %v467_v11  ;;  %v479_v39 = vld [vmem:[%s2106_s1 + $0x30] sm:$0xff]  ;;  %v869_v40 = vld [vmem:[%s2113_s8] sm:$0xff]  ;;  %v870_v41 = vld [vmem:[%s2113_s8 + $0x8] sm:$0xff] }
  0x46   : > { %v871_v42 = vld [vmem:[%s2113_s8 + $0x10] sm:$0xff]  ;;  %v480_v43 = vld [vmem:[%s2106_s1 + $0x38] sm:$0xff]  ;;  %v873_v45 = vld [vmem:[%s2113_s8 + $0x20] sm:$0xff] }
  0x47   : > { %568 = vmatpush.msra.mxu0 %v466_v12  ;;  %v872_v44 = vld [vmem:[%s2113_s8 + $0x18] sm:$0xff]  ;;  %v874_v46 = vld [vmem:[%s2113_s8 + $0x28] sm:$0xff]  ;;  %v875_v47 = vld [vmem:[%s2113_s8 + $0x30] sm:$0xff] }
  0x48   : > { %v876_v48 = vld [vmem:[%s2113_s8 + $0x38] sm:$0xff] }
  0x49   : > { %569 = vmatpush.msra.mxu0 %v465_v13 }
  0x4a   : > { %1363 = vmatmul.msk.f32.vlgmr.msra.gmra.mxu0 %vm529_vm0, %v473_v15  ;;  %496 = vperm.xlu0 %1477, %v482_v16  }
  0x4b   : > { %491 = vperm.xlu1 %1478, %v481_v17   ;;  %v603_v17 = vld [vmem:[#allocation4] sm:$0xff] }
  0x4c   : > { %621 = vperm.xlu2 %1479, %v611_v18   ;;  %v732_v18 = vld [vmem:[#allocation6] sm:$0xff] }
  0x52   : > { %1364 = vmatmul.msk.f32.gmra.mxu0 %vm529_vm0, %v474_v19  ;;  %626 = vperm.xlu0 %1477, %v612_v20   ;;  %v861_v19 = vld [vmem:[#allocation7] sm:$0xff]  ;;  %v604_v20 = vld [vmem:[#allocation4 + $0x8] sm:$0xff] }
  0x53   : > { %631 = vperm.xlu1 %1478, %v613_v21   ;;  %v733_v21 = vld [vmem:[#allocation6 + $0x8] sm:$0xff] }
  0x54   : > { %636 = vperm.xlu2 %1479, %v614_v22   ;;  %v862_v22 = vld [vmem:[#allocation7 + $0x8] sm:$0xff] }
  0x5a   : > { %1365 = vmatmul.msk.f32.gmra.mxu0 %vm529_vm0, %v475_v23  ;;  %641 = vperm.xlu0 %1477, %v615_v24   ;;  %v605_v23 = vld [vmem:[#allocation4 + $0x10] sm:$0xff] }
  0x5b   : > { %646 = vperm.xlu1 %1478, %v616_v25   ;;  %v734_v24 = vld [vmem:[#allocation6 + $0x10] sm:$0xff] }
  0x5c   : > { %651 = vperm.xlu2 %1479, %v617_v26   ;;  %v863_v25 = vld [vmem:[#allocation7 + $0x10] sm:$0xff]  ;;  %v606_v26 = vld [vmem:[#allocation4 + $0x18] sm:$0xff] }
  0x62   : > { %1366 = vmatmul.msk.f32.gmra.mxu0 %vm529_vm0, %v476_v27  ;;  %656 = vperm.xlu0 %1477, %v618_v28   ;;  %v735_v27 = vld [vmem:[#allocation6 + $0x18] sm:$0xff] }
  0x63   : > { %750 = vperm.xlu1 %1478, %v740_v29   ;;  %v864_v28 = vld [vmem:[#allocation7 + $0x18] sm:$0xff]  ;;  %v607_v29 = vld [vmem:[#allocation4 + $0x20] sm:$0xff] }
  0x64   : > { %755 = vperm.xlu2 %1479, %v741_v30   ;;  %v736_v30 = vld [vmem:[#allocation6 + $0x20] sm:$0xff] }
  0x6a   : > { %1367 = vmatmul.msk.f32.gmra.mxu0 %vm529_vm0, %v477_v31  ;;  %760 = vperm.xlu0 %1477, %v742_v32   ;;  %v865_v31 = vld [vmem:[#allocation7 + $0x20] sm:$0xff]  ;;  %v608_v32 = vld [vmem:[#allocation4 + $0x28] sm:$0xff] }
  0x6b   : > { %765 = vperm.xlu1 %1478, %v743_v33   ;;  %v737_v33 = vld [vmem:[#allocation6 + $0x28] sm:$0xff] }
  0x6c   : > { %770 = vperm.xlu2 %1479, %v744_v34   ;;  %v866_v34 = vld [vmem:[#allocation7 + $0x28] sm:$0xff] }
  0x72   : > { %1368 = vmatmul.msk.f32.gmra.mxu0 %vm529_vm0, %v478_v35  ;;  %775 = vperm.xlu0 %1477, %v745_v36   ;;  %v609_v35 = vld [vmem:[#allocation4 + $0x30] sm:$0xff] }
  0x73   : > { %780 = vperm.xlu1 %1478, %v746_v37   ;;  %v738_v36 = vld [vmem:[#allocation6 + $0x30] sm:$0xff] }
  0x74   : > { %785 = vperm.xlu2 %1479, %v747_v38   ;;  %v867_v37 = vld [vmem:[#allocation7 + $0x30] sm:$0xff]  ;;  %v610_v38 = vld [vmem:[#allocation4 + $0x38] sm:$0xff] }
  0x7a   : > { %1369 = vmatmul.msk.f32.gmra.mxu0 %vm529_vm0, %v479_v39  ;;  %879 = vperm.xlu0 %1477, %v869_v40   ;;  %v739_v39 = vld [vmem:[#allocation6 + $0x38] sm:$0xff] }
  0x7b   : > { %884 = vperm.xlu1 %1478, %v870_v41   ;;  %v868_v40 = vld [vmem:[#allocation7 + $0x38] sm:$0xff] }
  0x7c   : > { %889 = vperm.xlu2 %1479, %v871_v42  }
  0x82   : > { %1370 = vmatmul.msk.f32.gmra.mxu0 %vm529_vm0, %v480_v43  ;;  %894 = vperm.xlu0 %1477, %v872_v44  }
  0x83   : > { %899 = vperm.xlu1 %1478, %v873_v45  }
  0x84   : > { %904 = vperm.xlu2 %1479, %v874_v46  }
  0x8a   : > { %909 = vperm.xlu0 %1477, %v875_v47  }
  0x8b   : > { %914 = vperm.xlu1 %1478, %v876_v48  }
  0x96   : > { %v507_v58 = vpop.permute.xlu2 %506 }
  0x9e   : > { %v502_v6 = vpop.permute.xlu2 %501 }
  0xa6   : > { %v622_v42 = vpop.permute.xlu2 %621 }
  0xac   : > { %v527_v55 = vpop.permute.xlu0 %526 }
  0xad   : > { %v517_v56 = vpop.permute.xlu1 %516 }
  0xae   : > { %v637_v45 = vpop.permute.xlu2 %636 }
  0xb4   : > { %v522_v59 = vpop.permute.xlu0 %521 }
  0xb5   : > { %v512_v63 = vpop.permute.xlu1 %511 }
  0xb6   : > { %v2003_v48 = vpop.permute.xlu2 %651 }
  0xbc   : > { %v497_v9 = vpop.permute.xlu0 %496 }
  0xbd   : > { %v492_v12 = vpop.permute.xlu1 %491 }
  0xc4   : > { %v627_v41 = vpop.permute.xlu0 %626 }
  0xc5   : > { %v632_v43 = vpop.permute.xlu1 %631 }
  0xc7   : > { %v571_v49 = vpop.f32.mrf.mxu0 }
  0xc8   : > { %v572_v13 = vadd.f32 %v571_v49, %v492_v12 }
  0xca   : > { %v595_v16 = vmax.f32 %v572_v13, 0.0 }
  0xcc   : > { %v642_v44 = vpop.permute.xlu0 %641 }
  0xcd   : > { %v1999_v46 = vpop.permute.xlu1 %646 }
  0xcf   : > { %v574_v50 = vpop.f32.mrf.mxu0 }
  0xd0   : > { %v575_v10 = vadd.f32 %v574_v50, %v497_v9 }
  0xd2   : > { %v596_v15 = vmax.f32 %v575_v10, 0.0 }
  0xd4   : > { %v2001_v47 = vpop.permute.xlu0 %656 }
  0xd5   : > { %v751_v49 = vpop.permute.xlu1 %750 }
  0xd7   : > { %v577_v51 = vpop.f32.mrf.mxu0 }
  0xd8   : > { %v578_v7 = vadd.f32 %v577_v51, %v502_v6  ;;  %v756_v51 = vpop.permute.xlu2 %755 }
  0xda   : > { %v597_v14 = vmax.f32 %v578_v7, 0.0 }
  0xdc   : > { %v761_v50 = vpop.permute.xlu0 %760 }
  0xdf   : > { %v580_v52 = vpop.f32.mrf.mxu0 }
  0xe0   : > { %v581_v4 = vadd.f32 %v580_v52, %v507_v58  ;;  %v766_v52 = vpop.permute.xlu1 %765 }
  0xe2   : > { %v598_v11 = vmax.f32 %v581_v4, 0.0 }
  0xe7   : > { %v583_v53 = vpop.f32.mrf.mxu0 }
  0xe8   : > { %v584_v2 = vadd.f32 %v583_v53, %v512_v63  ;;  %v2005_v53 = vpop.permute.xlu0 %775 }
  0xea   : > { %v599_v8 = vmax.f32 %v584_v2, 0.0 }
  0xef   : > { %v586_v54 = vpop.f32.mrf.mxu0 }
  0xf0   : > { %v587_v0 = vadd.f32 %v586_v54, %v517_v56  ;;  %v771_v56 = vpop.permute.xlu2 %770  ;;  %v880_v58 = vpop.permute.xlu0 %879 }
  0xf2   : > { %v600_v5 = vmax.f32 %v587_v0, 0.0 }
  0xf7   : > { %v589_v57 = vpop.f32.mrf.mxu0 }
  0xf8   : > { %v590_v61 = vadd.f32 %v589_v57, %v522_v59  ;;  %v2011_v57 = vpop.permute.xlu1 %780 }
  0xfa   : > { %v601_v3 = vmax.f32 %v590_v61, 0.0 }
  0xff   : > { %v592_v60 = vpop.f32.mrf.mxu0 }
 0x100   : > { %v593_v62 = vadd.f32 %v592_v60, %v527_v55  ;;  %v885_v2 = vpop.permute.xlu1 %884 }
 0x102   : > { %v602_v1 = vmax.f32 %v593_v62, 0.0 }
 0x104   : > { %691 = vmatpush.msra.mxu1 %v602_v1  ;;  %820 = vmatpush.msra.mxu2 %v602_v1 }
 0x105   : > { %949 = vmatpush.msra.mxu3 %v602_v1  ;;  %v2021_v1 = vpop.permute.xlu2 %785 }
 0x106   : > { %692 = vmatpush.msra.mxu1 %v601_v3  ;;  %821 = vmatpush.msra.mxu2 %v601_v3 }
 0x107   : > { %950 = vmatpush.msra.mxu3 %v601_v3 }
 0x108   : > { %693 = vmatpush.msra.mxu1 %v600_v5  ;;  %822 = vmatpush.msra.mxu2 %v600_v5 }
 0x109   : > { %951 = vmatpush.msra.mxu3 %v600_v5 }
 0x10a   : > { %694 = vmatpush.msra.mxu1 %v599_v8  ;;  %823 = vmatpush.msra.mxu2 %v599_v8 }
 0x10b   : > { %952 = vmatpush.msra.mxu3 %v599_v8 }
 0x10c   : > { %695 = vmatpush.msra.mxu1 %v598_v11  ;;  %824 = vmatpush.msra.mxu2 %v598_v11 }
 0x10d   : > { %953 = vmatpush.msra.mxu3 %v598_v11  ;;  %v890_v9 = vpop.permute.xlu2 %889 }
 0x10e   : > { %696 = vmatpush.msra.mxu1 %v597_v14  ;;  %825 = vmatpush.msra.mxu2 %v597_v14 }
 0x10f   : > { %954 = vmatpush.msra.mxu3 %v597_v14 }
 0x110   : > { %697 = vmatpush.msra.mxu1 %v596_v15  ;;  %826 = vmatpush.msra.mxu2 %v596_v15 }
 0x111   : > { %955 = vmatpush.msra.mxu3 %v596_v15 }
 0x112   : > { %698 = vmatpush.msra.mxu1 %v595_v16  ;;  %827 = vmatpush.msra.mxu2 %v595_v16 }
 0x113   : > { %956 = vmatpush.msra.mxu3 %v595_v16  ;;  %1371 = vmatmul.msk.f32.vlgmr.msra.gmra.mxu1 %vm529_vm0, %v603_v17  ;;  %v895_v16 = vpop.permute.xlu0 %894 }
 0x114   : > { %1379 = vmatmul.msk.f32.vlgmr.msra.gmra.mxu2 %vm529_vm0, %v732_v18  ;;  %1387 = vmatmul.msk.f32.vlgmr.msra.gmra.mxu3 %vm529_vm0, %v861_v19 }
 0x11b   : > { %1372 = vmatmul.msk.f32.gmra.mxu1 %vm529_vm0, %v604_v20 }
 0x11c   : > { %1380 = vmatmul.msk.f32.gmra.mxu2 %vm529_vm0, %v733_v21  ;;  %1388 = vmatmul.msk.f32.gmra.mxu3 %vm529_vm0, %v862_v22 }
 0x123   : > { %1373 = vmatmul.msk.f32.gmra.mxu1 %vm529_vm0, %v605_v23  ;;  %v900_v23 = vpop.permute.xlu1 %899 }
 0x124   : > { %1381 = vmatmul.msk.f32.gmra.mxu2 %vm529_vm0, %v734_v24  ;;  %1389 = vmatmul.msk.f32.gmra.mxu3 %vm529_vm0, %v863_v25 }
 0x12b   : > { %1374 = vmatmul.msk.f32.gmra.mxu1 %vm529_vm0, %v606_v26 }
 0x12c   : > { %1382 = vmatmul.msk.f32.gmra.mxu2 %vm529_vm0, %v735_v27  ;;  %1390 = vmatmul.msk.f32.gmra.mxu3 %vm529_vm0, %v864_v28 }
 0x133   : > { %1375 = vmatmul.msk.f32.gmra.mxu1 %vm529_vm0, %v607_v29 }
 0x134   : > { %1383 = vmatmul.msk.f32.gmra.mxu2 %vm529_vm0, %v736_v30  ;;  %1391 = vmatmul.msk.f32.gmra.mxu3 %vm529_vm0, %v865_v31  ;;  %v905_v30 = vpop.permute.xlu2 %904 }
 0x13b   : > { %1376 = vmatmul.msk.f32.gmra.mxu1 %vm529_vm0, %v608_v32 }
 0x13c   : > { %1384 = vmatmul.msk.f32.gmra.mxu2 %vm529_vm0, %v737_v33  ;;  %1392 = vmatmul.msk.f32.gmra.mxu3 %vm529_vm0, %v866_v34 }
 0x143   : > { %1377 = vmatmul.msk.f32.gmra.mxu1 %vm529_vm0, %v609_v35 }
 0x144   : > { %1385 = vmatmul.msk.f32.gmra.mxu2 %vm529_vm0, %v738_v36  ;;  %1393 = vmatmul.msk.f32.gmra.mxu3 %vm529_vm0, %v867_v37  ;;  %v910_v37 = vpop.permute.xlu0 %909 }
 0x14b   : > { %1378 = vmatmul.msk.f32.gmra.mxu1 %vm529_vm0, %v610_v38 }
 0x14c   : > { %1386 = vmatmul.msk.f32.gmra.mxu2 %vm529_vm0, %v739_v39  ;;  %1394 = vmatmul.msk.f32.gmra.mxu3 %vm529_vm0, %v868_v40 }
 0x190   : > { %v700_v54 = vpop.f32.mrf.mxu1 }
 0x191   : > { %v701_v55 = vadd.f32 %v700_v54, %v622_v42 }
 0x193   : > { %724 = vst [vmem:[%s2008_s12] sm:$0xff] %v701_v55 }
 0x197   : > { %v829_v59 = vpop.f32.mrf.mxu2  ;;  %v958_v60 = vpop.f32.mrf.mxu3 }
 0x198   : > { %v830_v61 = vadd.f32 %v829_v59, %v751_v49  ;;  %v959_v62 = vadd.f32 %v958_v60, %v880_v58  ;;  %v703_v63 = vpop.f32.mrf.mxu1 }
 0x199   : > { %v704_v0 = vadd.f32 %v703_v63, %v627_v41 }
 0x19a   : > { %853 = vst [vmem:[%s2014_s14] sm:$0xff] %v830_v61 }
 0x19b   : > { %982 = vst [vmem:[%s2018_s24] sm:$0xff] %v959_v62 }
 0x19c   : > { %725 = vst [vmem:[%s2008_s12 + $0x8] sm:$0xff] %v704_v0 }
 0x19f   : > { %v832_v3 = vpop.f32.mrf.mxu2  ;;  %v961_v4 = vpop.f32.mrf.mxu3 }
 0x1a0   : > { %v833_v5 = vadd.f32 %v832_v3, %v756_v51  ;;  %v962_v6 = vadd.f32 %v961_v4, %v885_v2  ;;  %v706_v7 = vpop.f32.mrf.mxu1 }
 0x1a1   : > { %v707_v8 = vadd.f32 %v706_v7, %v632_v43 }
 0x1a2   : > { %854 = vst [vmem:[%s2014_s14 + $0x8] sm:$0xff] %v833_v5 }
 0x1a3   : > { %983 = vst [vmem:[%s2018_s24 + $0x8] sm:$0xff] %v962_v6 }
 0x1a4   : > { %726 = vst [vmem:[%s2008_s12 + $0x10] sm:$0xff] %v707_v8 }
 0x1a7   : > { %v835_v10 = vpop.f32.mrf.mxu2  ;;  %v964_v11 = vpop.f32.mrf.mxu3 }
 0x1a8   : > { %v836_v12 = vadd.f32 %v835_v10, %v761_v50  ;;  %v965_v13 = vadd.f32 %v964_v11, %v890_v9  ;;  %v709_v14 = vpop.f32.mrf.mxu1  ;;  %v1051_v50 = vld [vmem:[%s2008_s12 + $0x8] sm:$0xff] (%p1790_p12) }
 0x1a9   : > { %v710_v15 = vadd.f32 %v709_v14, %v637_v45  ;;  %1052 = vst [vmem:[%s1006_s30 + $0x10] sm:$0xff] (%p1790_p12), %v1051_v50 }
 0x1aa   : > { %855 = vst [vmem:[%s2014_s14 + $0x10] sm:$0xff] %v836_v12 }
 0x1ab   : > { %984 = vst [vmem:[%s2018_s24 + $0x10] sm:$0xff] %v965_v13  ;;  %v1053_v51 = vld [vmem:[%s2008_s12 + $0x10] sm:$0xff] (%p1790_p12) }
 0x1ac   : > { %727 = vst [vmem:[%s2008_s12 + $0x18] sm:$0xff] %v710_v15 }
 0x1ad   : > { %1054 = vst [vmem:[%s1006_s30 + $0x20] sm:$0xff] (%p1790_p12), %v1053_v51 }
 0x1af   : > { %v838_v17 = vpop.f32.mrf.mxu2  ;;  %v967_v18 = vpop.f32.mrf.mxu3 }
 0x1b0   : > { %v839_v19 = vadd.f32 %v838_v17, %v766_v52  ;;  %v968_v20 = vadd.f32 %v967_v18, %v895_v16  ;;  %v712_v21 = vpop.f32.mrf.mxu1 }
 0x1b1   : > { %v713_v22 = vadd.f32 %v712_v21, %v642_v44  ;;  %v915_v44 = vpop.permute.xlu1 %914 }
 0x1b2   : > { %856 = vst [vmem:[%s2014_s14 + $0x18] sm:$0xff] %v839_v19 }
 0x1b3   : > { %985 = vst [vmem:[%s2018_s24 + $0x18] sm:$0xff] %v968_v20  ;;  %v1055_v52 = vld [vmem:[%s2008_s12 + $0x18] sm:$0xff] (%p1790_p12) }
 0x1b4   : > { %728 = vst [vmem:[%s2008_s12 + $0x20] sm:$0xff] %v713_v22 }
 0x1b5   : > { %1056 = vst [vmem:[%s1006_s30 + $0x30] sm:$0xff] (%p1790_p12), %v1055_v52 }
 0x1b7   : > { %v841_v24 = vpop.f32.mrf.mxu2  ;;  %v970_v25 = vpop.f32.mrf.mxu3 }
 0x1b8   : > { %v842_v26 = vadd.f32 %v841_v24, %v771_v56  ;;  %v971_v27 = vadd.f32 %v970_v25, %v900_v23  ;;  %v715_v28 = vpop.f32.mrf.mxu1 }
 0x1b9   : > { %v716_v29 = vadd.f32 %v715_v28, %v1999_v46 }
 0x1ba   : > { %857 = vst [vmem:[%s2014_s14 + $0x20] sm:$0xff] %v842_v26 }
 0x1bb   : > { %986 = vst [vmem:[%s2018_s24 + $0x20] sm:$0xff] %v971_v27 }
 0x1bc   : > { %729 = vst [vmem:[%s2008_s12 + $0x28] sm:$0xff] %v716_v29 }
 0x1bf   : > { %v844_v31 = vpop.f32.mrf.mxu2  ;;  %v973_v32 = vpop.f32.mrf.mxu3 }
 0x1c0   : > { %v845_v33 = vadd.f32 %v844_v31, %v2005_v53  ;;  %v974_v34 = vadd.f32 %v973_v32, %v905_v30  ;;  %v718_v35 = vpop.f32.mrf.mxu1  ;;  %v1057_v53 = vld [vmem:[%s2008_s12 + $0x20] sm:$0xff] (%p1790_p12) }
 0x1c1   : > { %v719_v36 = vadd.f32 %v718_v35, %v2003_v48  ;;  %1058 = vst [vmem:[%s1006_s30 + $0x40] sm:$0xff] (%p1790_p12), %v1057_v53 }
 0x1c2   : > { %858 = vst [vmem:[%s2014_s14 + $0x28] sm:$0xff] %v845_v33 }
 0x1c3   : > { %987 = vst [vmem:[%s2018_s24 + $0x28] sm:$0xff] %v974_v34  ;;  %v1059_v54 = vld [vmem:[%s2008_s12 + $0x28] sm:$0xff] (%p1790_p12) }
 0x1c4   : > { %730 = vst [vmem:[%s2008_s12 + $0x30] sm:$0xff] %v719_v36 }
 0x1c5   : > { %1060 = vst [vmem:[%s1006_s30 + $0x50] sm:$0xff] (%p1790_p12), %v1059_v54 }
 0x1c7   : > { %v847_v38 = vpop.f32.mrf.mxu2  ;;  %v976_v39 = vpop.f32.mrf.mxu3 }
 0x1c8   : > { %v848_v40 = vadd.f32 %v847_v38, %v2011_v57  ;;  %v977_v41 = vadd.f32 %v976_v39, %v910_v37  ;;  %v721_v42 = vpop.f32.mrf.mxu1 }
 0x1c9   : > { %v722_v43 = vadd.f32 %v721_v42, %v2001_v47  ;;  %v1049_v47 = vld [vmem:[%s2008_s12] sm:$0xff] (%p1790_p12) }
 0x1ca   : > { %859 = vst [vmem:[%s2014_s14 + $0x30] sm:$0xff] %v848_v40 }
 0x1cb   : > { %988 = vst [vmem:[%s2018_s24 + $0x30] sm:$0xff] %v977_v41  ;;  %v1061_v55 = vld [vmem:[%s2008_s12 + $0x30] sm:$0xff] (%p1790_p12) }
 0x1cc   : > { %731 = vst [vmem:[%s2008_s12 + $0x38] sm:$0xff] %v722_v43 }
 0x1cd   : > { %1050 = vst [vmem:[%s1006_s30] sm:$0xff] (%p1790_p12), %v1049_v47 }
 0x1ce   : > { %1062 = vst [vmem:[%s1006_s30 + $0x60] sm:$0xff] (%p1790_p12), %v1061_v55 }
 0x1cf   : > { %v850_v45 = vpop.f32.mrf.mxu2  ;;  %v979_v46 = vpop.f32.mrf.mxu3  ;;  %1004 = sbr.rel (!%p1790_p12) target bundleno = 469 (0x1d5), region = 76 }
 0x1d0   : > { %v851_v48 = vadd.f32 %v850_v45, %v2021_v1  ;;  %v980_v49 = vadd.f32 %v979_v46, %v915_v44 }
 0x1d2   : > { %860 = vst [vmem:[%s2014_s14 + $0x38] sm:$0xff] %v851_v48 }
 0x1d3   : > { %989 = vst [vmem:[%s2018_s24 + $0x38] sm:$0xff] %v980_v49  ;;  %v1063_v56 = vld [vmem:[%s2008_s12 + $0x38] sm:$0xff] (%p1790_p12) }
 0x1d4   : > { %1064 = vst [vmem:[%s1006_s30 + $0x70] sm:$0xff] %v1063_v56 }
 0x1d5 PF: > { %1070 = sbr.rel (!%p1790_p12) target bundleno = 479 (0x1df), region = 114  ;;  %s1399_s26 = sshll.u32 (%p1790_p12), %s1730_s21, 3  ;;  %v1115_v57 = vld [vmem:[%s2014_s14] sm:$0xff] (%p1790_p12)  ;;  %v1117_v58 = vld [vmem:[%s2014_s14 + $0x8] sm:$0xff] (%p1790_p12)  ;;  %v1119_v59 = vld [vmem:[%s2014_s14 + $0x10] sm:$0xff] (%p1790_p12) }
 0x1d6   : > { %s1072_s3 = scalar_lea.vmem (%p1790_p12), %s2115_s10, %s1399_s26  ;;  %v1121_v60 = vld [vmem:[%s2014_s14 + $0x18] sm:$0xff] (%p1790_p12)  ;;  %v1123_v61 = vld [vmem:[%s2014_s14 + $0x20] sm:$0xff] (%p1790_p12)  ;;  %v1125_v62 = vld [vmem:[%s2014_s14 + $0x28] sm:$0xff] (%p1790_p12) }
 0x1d7   : > { %1116 = vst [vmem:[%s1072_s3] sm:$0xff] (%p1790_p12), %v1115_v57  ;;  %v1127_v63 = vld [vmem:[%s2014_s14 + $0x30] sm:$0xff] (%p1790_p12) }
 0x1d8   : > { %1118 = vst [vmem:[%s1072_s3 + $0x10] sm:$0xff] (%p1790_p12), %v1117_v58 }
 0x1d9   : > { %1120 = vst [vmem:[%s1072_s3 + $0x20] sm:$0xff] (%p1790_p12), %v1119_v59 }
 0x1da   : > { %1122 = vst [vmem:[%s1072_s3 + $0x30] sm:$0xff] %v1121_v60  ;;  %v1129_v0 = vld [vmem:[%s2014_s14 + $0x38] sm:$0xff] }
 0x1db   : > { %1124 = vst [vmem:[%s1072_s3 + $0x40] sm:$0xff] %v1123_v61 }
 0x1dc   : > { %1126 = vst [vmem:[%s1072_s3 + $0x50] sm:$0xff] %v1125_v62 }
 0x1dd   : > { %1128 = vst [vmem:[%s1072_s3 + $0x60] sm:$0xff] %v1127_v63 }
 0x1de   : > { %1130 = vst [vmem:[%s1072_s3 + $0x70] sm:$0xff] %v1129_v0 }
 0x1df PF: > { %1136 = sbr.rel (!%p1790_p12) target bundleno = 489 (0x1e9), region = 152  ;;  %s1400_s22 = sshll.u32 (%p1790_p12), %s1730_s21, 3  ;;  %v1181_v1 = vld [vmem:[%s2018_s24] sm:$0xff] (%p1790_p12)  ;;  %v1183_v2 = vld [vmem:[%s2018_s24 + $0x8] sm:$0xff] (%p1790_p12)  ;;  %v1185_v3 = vld [vmem:[%s2018_s24 + $0x10] sm:$0xff] (%p1790_p12) }
 0x1e0   : > { %s1138_s7 = scalar_lea.vmem (%p1790_p12), %s2116_s11, %s1400_s22  ;;  %v1187_v4 = vld [vmem:[%s2018_s24 + $0x18] sm:$0xff] (%p1790_p12)  ;;  %v1189_v5 = vld [vmem:[%s2018_s24 + $0x20] sm:$0xff] (%p1790_p12)  ;;  %v1191_v6 = vld [vmem:[%s2018_s24 + $0x28] sm:$0xff] (%p1790_p12) }
 0x1e1   : > { %1182 = vst [vmem:[%s1138_s7] sm:$0xff] (%p1790_p12), %v1181_v1  ;;  %v1193_v7 = vld [vmem:[%s2018_s24 + $0x30] sm:$0xff] (%p1790_p12)  ;;  %v1195_v8 = vld [vmem:[%s2018_s24 + $0x38] sm:$0xff] (%p1790_p12) }
 0x1e2   : > { %1184 = vst [vmem:[%s1138_s7 + $0x10] sm:$0xff] (%p1790_p12), %v1183_v2 }
 0x1e3   : > { %1186 = vst [vmem:[%s1138_s7 + $0x20] sm:$0xff] (%p1790_p12), %v1185_v3 }
 0x1e4   : > { %1188 = vst [vmem:[%s1138_s7 + $0x30] sm:$0xff] %v1187_v4 }
 0x1e5   : > { %1190 = vst [vmem:[%s1138_s7 + $0x40] sm:$0xff] %v1189_v5 }
 0x1e6   : > { %1192 = vst [vmem:[%s1138_s7 + $0x50] sm:$0xff] %v1191_v6 }
 0x1e7   : > { %1194 = vst [vmem:[%s1138_s7 + $0x60] sm:$0xff] %v1193_v7 }
 0x1e8   : > { %1196 = vst [vmem:[%s1138_s7 + $0x70] sm:$0xff] %v1195_v8 }
 0x1e9 PF: > { %s2132_s21 = smov %s1796_s17  ;;  %p24_p1 = scmp.ge.s32.totalorder %s1780_s28, 4  }
 0x1ea   : > { %s2133_s17 = smov %s1634_s18  ;;  %s2134_s18 = smov %s1638_s19 }
 0x1eb   : > { %s2135_s19 = smov %s2132_s21  ;;  %s2136_s20 = smov %s1780_s28 }
 0x1ec   :  { %26 = sbr.rel (!%p24_p1) target bundleno = 9 (0x9), region = 246 }
 0x1f1   :  { %1226 = vsyncpa [#allocation3], 1 }
 0x1f2   :  { %1228 = vsyncpa [#allocation3 + $0x1], 1 }
 0x1f3   :  { %1229 = vsyncpa [#allocation5], 1 }
 0x1f4   :  { %1230 = vsyncpa [#allocation8], 1 }

// kernel: point_transformer_block.3
= control target key start
LH: loop header
LB: loop body
LE: loop exit
PB: predicated region body
PF: predicated region fallthrough
CT: control target
= control target key end

     0   :  { %s10221_s0 = inlined_call_operand.vmem [shape: f32[64,256], index: 0, kind: input, shape index: {}]   ;;  %s10222_s1 = inlined_call_operand.vmem [shape: f32[16,64,256], index: 1, kind: input, shape index: {}]   ;;  %s10223_s2 = inlined_call_operand.vmem [shape: f32[16,64,256], index: 2, kind: input, shape index: {}]   ;;  %s10224_s3 = inlined_call_operand.vmem [shape: f32[16,8,256], index: 3, kind: input, shape index: {}]   ;;  %s10225_s4 = inlined_call_operand.vmem [shape: f32[64,256], index: 4, kind: input, shape index: {}]   ;;  %s10226_s5 = inlined_call_operand.vmem [shape: f32[8,8], index: 5, kind: input, shape index: {}]   ;;  %s10227_s6 = inlined_call_operand.vmem [shape: f32[8,1], index: 6, kind: input, shape index: {}]   ;;  %s10228_s7 = inlined_call_operand.vmem [shape: f32[64,8], index: 7, kind: input, shape index: {}]   ;;  %s10229_s8 = inlined_call_operand.vmem [shape: f32[64,1], index: 8, kind: input, shape index: {}]   ;;  %s10230_s9 = inlined_call_operand.vmem [shape: f32[64,1], index: 9, kind: input, shape index: {}]   ;;  %s10231_s10 = inlined_call_operand.vmem [shape: f32[64,1], index: 10, kind: input, shape index: {}]   ;;  %s10232_s11 = inlined_call_operand.vmem [shape: f32[8,64], index: 11, kind: input, shape index: {}]   ;;  %s10233_s12 = inlined_call_operand.vmem [shape: f32[8,1], index: 12, kind: input, shape index: {}]   ;;  %s10234_s13 = inlined_call_operand.vmem [shape: f32[8,8], index: 13, kind: input, shape index: {}]   ;;  %s10235_s14 = inlined_call_operand.vmem [shape: f32[8,1], index: 14, kind: input, shape index: {}]   ;;  %s10236_s15 = inlined_call_operand.vmem [shape: f32[64,1], index: 15, kind: input, shape index: {}]   ;;  %s10237_s16 = inlined_call_operand.vmem [shape: f32[64,1], index: 16, kind: input, shape index: {}]   ;;  %s10238_s17 = inlined_call_operand.vmem [shape: f32[64,64], index: 17, kind: input, shape index: {}]   ;;  %s10239_s18 = inlined_call_operand.vmem [shape: f32[64,1], index: 18, kind: input, shape index: {}]   ;;  %s10240_s19 = inlined_call_operand.hbm [shape: f32[64,256], index: 19, kind: output, shape index: {}]  }
   0x1   :  { %10426 = sst [smem:[#allocation149_spill]] %s10221_s0 }
   0x2   :  { %10427 = sst [smem:[#allocation150_spill]] %s10222_s1 }
   0x3   :  { %10428 = sst [smem:[#allocation151_spill]] %s10223_s2 }
   0x4   :  { %10429 = sst [smem:[#allocation152_spill]] %s10224_s3 }
   0x5   :  { %10430 = sst [smem:[#allocation153_spill]] %s10225_s4 }
   0x6   :  { %10431 = sst [smem:[#allocation154_spill]] %s10226_s5 }
   0x7   :  { %10432 = sst [smem:[#allocation155_spill]] %s10227_s6 }
   0x8   :  { %10433 = sst [smem:[#allocation156_spill]] %s10228_s7 }
   0x9   :  { %24 = vsyncpa [#allocation8], 0 }
   0xa   :  { %26 = vsyncpa [#allocation8 + $0x1], 0  ;;  %s6471_s0 = smov 0   ;;  %s6473_s30 = smov 0  }
   0xb   :  { %s6475_s20 = smov 0   ;;  %s6477_s21 = smov 0  }
   0xc LB: > { %s10241_s1 = sadd.s32 4294967295, %s6365_s21   ;;  %s5721_s22 = sadd.s32 4294967294, %s6365_s21   ;;  %s6365_s21 = sphi %s6477_s21, %s11036_s21   ;;  %s6361_s20 = sphi %s6475_s20, %s11040_s20   ;;  %s6357_s30 = sphi %s6473_s30, %s11039_s30   ;;  %s6353_s0 = sphi %s6471_s0, %s11038_s0  }
   0xd   : > { %s6494_s2 = sadd.s32 1, %s6365_s21   ;;  %s39_s23 = sadd.s32 1, %s6361_s20 }
   0xe   : > { %10434 = sst [smem:[#allocation10_spill]] %s6494_s2  ;;  %s36_s24 = ssub.s32 %s6365_s21, %s6494_s2 }
   0xf   : > { %p46_p0 = scmp.ne.s32.totalorder %s6361_s20, %s6357_s30  ;;  %p37_p1 = scmp.eq.s32.totalorder %s36_s24, 0 }
  0x10   : > { %p47_p2 = scmp.eq.s32.totalorder %s6365_s21, 0  ;;  %p474_p3 = scmp.eq.s32.totalorder %s10241_s1, 1 }
  0x11   : > { %p479_p4 = scmp.ne.s32.totalorder %s6357_s30, %s6353_s0  ;;  %p480_p7 = scmp.eq.s32.totalorder %s5721_s22, 1 }
  0x12   : > { %s6507_s25 = scalar_select %p37_p1, %s6361_s20, %s39_s23  }
  0x13   : > { %p6509_p5 = por %p47_p2, %p46_p0  ;;  %p6513_p6 = por %p474_p3, %p46_p0 }
  0x14   : > { %10435 = sst [smem:[#allocation11_spill]] %s6507_s25  ;;  %p6517_p8 = por %p480_p7, %p479_p4 }
  0x15   : > { %p5723_p9 = scmp.ge.s32.totalorder %s6365_s21, 2 }
  0x16   : > { %s10438_s27 = scalar_select %p6517_p8, 1, 0 }
  0x17   : > { %538 = sbr.rel (%p5723_p9) target bundleno = 366 (0x16e), region = 72 }
  0x18   : > { %10439 = sst [smem:[#allocation12_spill]] %s10438_s27 }
  0x1c   : > { %541 = sbr.rel (!%p6509_p5) target bundleno = 46 (0x2e), region = 76  ;;  %s543_s28 = sand.u32 (%p6509_p5), 1, %s6361_s20  }
  0x1d   : > { %s5725_s29 = sshll.u32 (%p6509_p5), %s6365_s21, 3  ;;  %s5724_s23 = sshll.u32 (%p6509_p5), %s543_s28, 6 }
  0x1e   : > { %s10440_s22 = sld [smem:[#allocation149_spill]] (%p6509_p5)  ;;  %s545_s2 = scalar_lea.vmem (%p6509_p5), [#allocation2], %s5724_s23 }
  0x24   : > { %s547_s25 = scalar_lea.vmem %s10440_s22, %s5725_s29 }
  0x25   : > { %v590_v0 = vld [vmem:[%s547_s25] sm:$0xff]  ;;  %v592_v1 = vld [vmem:[%s547_s25 + $0x10] sm:$0xff] }
  0x26   : > { %v594_v2 = vld [vmem:[%s547_s25 + $0x20] sm:$0xff]  ;;  %591 = vst [vmem:[%s545_s2] sm:$0xff] %v590_v0  ;;  %v596_v3 = vld [vmem:[%s547_s25 + $0x30] sm:$0xff] }
  0x27   : > { %593 = vst [vmem:[%s545_s2 + $0x8] sm:$0xff] %v592_v1  ;;  %v598_v4 = vld [vmem:[%s547_s25 + $0x40] sm:$0xff]  ;;  %v600_v5 = vld [vmem:[%s547_s25 + $0x50] sm:$0xff] }
  0x28   : > { %595 = vst [vmem:[%s545_s2 + $0x10] sm:$0xff] %v594_v2  ;;  %v602_v6 = vld [vmem:[%s547_s25 + $0x60] sm:$0xff]  ;;  %v604_v7 = vld [vmem:[%s547_s25 + $0x70] sm:$0xff] }
  0x29   : > { %597 = vst [vmem:[%s545_s2 + $0x18] sm:$0xff] %v596_v3 }
  0x2a   : > { %599 = vst [vmem:[%s545_s2 + $0x20] sm:$0xff] %v598_v4 }
  0x2b   : > { %601 = vst [vmem:[%s545_s2 + $0x28] sm:$0xff] %v600_v5 }
  0x2c   : > { %603 = vst [vmem:[%s545_s2 + $0x30] sm:$0xff] %v602_v6 }
  0x2d   : > { %605 = vst [vmem:[%s545_s2 + $0x38] sm:$0xff] %v604_v7 }
  0x2e PF: > { %611 = sbr.rel (!%p6509_p5) target bundleno = 184 (0xb8), region = 114  ;;  %s613_s1 = sand.u32 (%p6509_p5), 1, %s6361_s20  }
  0x2f   : > { %s5727_s28 = sshll.u32 (%p6509_p5), %s6365_s21, 3  ;;  %s5726_s29 = sshll.u32 (%p6509_p5), %s613_s1, 10 }
  0x30   : > { %s10441_s22 = sld [smem:[#allocation150_spill]] (%p6509_p5)  ;;  %s6543_s2 = scalar_lea.vmem (%p6509_p5), [#allocation3], %s5726_s29 }
  0x36   : > { %s6538_s27 = scalar_lea.vmem %s10441_s22, %s5727_s28 }
  0x37   : > { %v900_v8 = vld [vmem:[%s6538_s27] sm:$0xff]  ;;  %v902_v9 = vld [vmem:[%s6538_s27 + $0x10] sm:$0xff] }
  0x38   : > { %v904_v10 = vld [vmem:[%s6538_s27 + $0x20] sm:$0xff]  ;;  %901 = vst [vmem:[%s6543_s2] sm:$0xff] %v900_v8  ;;  %v906_v11 = vld [vmem:[%s6538_s27 + $0x30] sm:$0xff] }
  0x39   : > { %903 = vst [vmem:[%s6543_s2 + $0x8] sm:$0xff] %v902_v9  ;;  %v908_v12 = vld [vmem:[%s6538_s27 + $0x40] sm:$0xff]  ;;  %v910_v13 = vld [vmem:[%s6538_s27 + $0x50] sm:$0xff] }
  0x3a   : > { %905 = vst [vmem:[%s6543_s2 + $0x10] sm:$0xff] %v904_v10  ;;  %v912_v14 = vld [vmem:[%s6538_s27 + $0x60] sm:$0xff]  ;;  %v914_v15 = vld [vmem:[%s6538_s27 + $0x70] sm:$0xff] }
  0x3b   : > { %907 = vst [vmem:[%s6543_s2 + $0x18] sm:$0xff] %v906_v11  ;;  %v916_v16 = vld [vmem:[%s6538_s27 + $0x80] sm:$0xff]  ;;  %v918_v17 = vld [vmem:[%s6538_s27 + $0x90] sm:$0xff] }
  0x3c   : > { %909 = vst [vmem:[%s6543_s2 + $0x20] sm:$0xff] %v908_v12  ;;  %v920_v18 = vld [vmem:[%s6538_s27 + $0xa0] sm:$0xff]  ;;  %v922_v19 = vld [vmem:[%s6538_s27 + $0xb0] sm:$0xff] }
  0x3d   : > { %911 = vst [vmem:[%s6543_s2 + $0x28] sm:$0xff] %v910_v13  ;;  %v924_v20 = vld [vmem:[%s6538_s27 + $0xc0] sm:$0xff]  ;;  %v926_v21 = vld [vmem:[%s6538_s27 + $0xd0] sm:$0xff] }
  0x3e   : > { %913 = vst [vmem:[%s6543_s2 + $0x30] sm:$0xff] %v912_v14  ;;  %v928_v22 = vld [vmem:[%s6538_s27 + $0xe0] sm:$0xff]  ;;  %v930_v23 = vld [vmem:[%s6538_s27 + $0xf0] sm:$0xff] }
  0x3f   : > { %915 = vst [vmem:[%s6543_s2 + $0x38] sm:$0xff] %v914_v15  ;;  %v932_v24 = vld [vmem:[%s6538_s27 + $0x100] sm:$0xff]  ;;  %v934_v25 = vld [vmem:[%s6538_s27 + $0x110] sm:$0xff] }
  0x40   : > { %917 = vst [vmem:[%s6543_s2 + $0x40] sm:$0xff] %v916_v16  ;;  %v936_v26 = vld [vmem:[%s6538_s27 + $0x120] sm:$0xff]  ;;  %v938_v27 = vld [vmem:[%s6538_s27 + $0x130] sm:$0xff] }
  0x41   : > { %919 = vst [vmem:[%s6543_s2 + $0x48] sm:$0xff] %v918_v17  ;;  %v940_v28 = vld [vmem:[%s6538_s27 + $0x140] sm:$0xff]  ;;  %v942_v29 = vld [vmem:[%s6538_s27 + $0x150] sm:$0xff] }
  0x42   : > { %921 = vst [vmem:[%s6543_s2 + $0x50] sm:$0xff] %v920_v18  ;;  %v944_v30 = vld [vmem:[%s6538_s27 + $0x160] sm:$0xff]  ;;  %v946_v31 = vld [vmem:[%s6538_s27 + $0x170] sm:$0xff] }
  0x43   : > { %923 = vst [vmem:[%s6543_s2 + $0x58] sm:$0xff] %v922_v19  ;;  %v948_v32 = vld [vmem:[%s6538_s27 + $0x180] sm:$0xff]  ;;  %v950_v33 = vld [vmem:[%s6538_s27 + $0x190] sm:$0xff] }
  0x44   : > { %925 = vst [vmem:[%s6543_s2 + $0x60] sm:$0xff] %v924_v20  ;;  %v952_v34 = vld [vmem:[%s6538_s27 + $0x1a0] sm:$0xff]  ;;  %v954_v35 = vld [vmem:[%s6538_s27 + $0x1b0] sm:$0xff] }
  0x45   : > { %927 = vst [vmem:[%s6543_s2 + $0x68] sm:$0xff] %v926_v21  ;;  %v956_v36 = vld [vmem:[%s6538_s27 + $0x1c0] sm:$0xff]  ;;  %v958_v37 = vld [vmem:[%s6538_s27 + $0x1d0] sm:$0xff] }
  0x46   : > { %929 = vst [vmem:[%s6543_s2 + $0x70] sm:$0xff] %v928_v22  ;;  %v960_v38 = vld [vmem:[%s6538_s27 + $0x1e0] sm:$0xff]  ;;  %v962_v39 = vld [vmem:[%s6538_s27 + $0x1f0] sm:$0xff] }
  0x47   : > { %931 = vst [vmem:[%s6543_s2 + $0x78] sm:$0xff] %v930_v23  ;;  %v964_v40 = vld [vmem:[%s6538_s27 + $0x200] sm:$0xff]  ;;  %v966_v41 = vld [vmem:[%s6538_s27 + $0x210] sm:$0xff] }
  0x48   : > { %933 = vst [vmem:[%s6543_s2 + $0x80] sm:$0xff] %v932_v24  ;;  %v968_v42 = vld [vmem:[%s6538_s27 + $0x220] sm:$0xff]  ;;  %v970_v43 = vld [vmem:[%s6538_s27 + $0x230] sm:$0xff] }
  0x49   : > { %935 = vst [vmem:[%s6543_s2 + $0x88] sm:$0xff] %v934_v25  ;;  %v972_v44 = vld [vmem:[%s6538_s27 + $0x240] sm:$0xff]  ;;  %v974_v45 = vld [vmem:[%s6538_s27 + $0x250] sm:$0xff] }
  0x4a   : > { %937 = vst [vmem:[%s6543_s2 + $0x90] sm:$0xff] %v936_v26  ;;  %v976_v46 = vld [vmem:[%s6538_s27 + $0x260] sm:$0xff]  ;;  %v978_v47 = vld [vmem:[%s6538_s27 + $0x270] sm:$0xff] }
  0x4b   : > { %939 = vst [vmem:[%s6543_s2 + $0x98] sm:$0xff] %v938_v27  ;;  %v980_v48 = vld [vmem:[%s6538_s27 + $0x280] sm:$0xff]  ;;  %v982_v49 = vld [vmem:[%s6538_s27 + $0x290] sm:$0xff] }
  0x4c   : > { %941 = vst [vmem:[%s6543_s2 + $0xa0] sm:$0xff] %v940_v28  ;;  %v984_v50 = vld [vmem:[%s6538_s27 + $0x2a0] sm:$0xff]  ;;  %v986_v51 = vld [vmem:[%s6538_s27 + $0x2b0] sm:$0xff] }
  0x4d   : > { %943 = vst [vmem:[%s6543_s2 + $0xa8] sm:$0xff] %v942_v29  ;;  %v988_v52 = vld [vmem:[%s6538_s27 + $0x2c0] sm:$0xff]  ;;  %v990_v53 = vld [vmem:[%s6538_s27 + $0x2d0] sm:$0xff] }
  0x4e   : > { %945 = vst [vmem:[%s6543_s2 + $0xb0] sm:$0xff] %v944_v30  ;;  %v992_v54 = vld [vmem:[%s6538_s27 + $0x2e0] sm:$0xff]  ;;  %v994_v55 = vld [vmem:[%s6538_s27 + $0x2f0] sm:$0xff] }
  0x4f   : > { %947 = vst [vmem:[%s6543_s2 + $0xb8] sm:$0xff] %v946_v31  ;;  %v996_v56 = vld [vmem:[%s6538_s27 + $0x300] sm:$0xff]  ;;  %v998_v57 = vld [vmem:[%s6538_s27 + $0x310] sm:$0xff] }
  0x50   : > { %949 = vst [vmem:[%s6543_s2 + $0xc0] sm:$0xff] %v948_v32  ;;  %v1000_v58 = vld [vmem:[%s6538_s27 + $0x320] sm:$0xff]  ;;  %v1002_v59 = vld [vmem:[%s6538_s27 + $0x330] sm:$0xff] }
  0x51   : > { %951 = vst [vmem:[%s6543_s2 + $0xc8] sm:$0xff] %v950_v33  ;;  %v1004_v60 = vld [vmem:[%s6538_s27 + $0x340] sm:$0xff]  ;;  %v1006_v61 = vld [vmem:[%s6538_s27 + $0x350] sm:$0xff] }
  0x52   : > { %953 = vst [vmem:[%s6543_s2 + $0xd0] sm:$0xff] %v952_v34  ;;  %v1008_v62 = vld [vmem:[%s6538_s27 + $0x360] sm:$0xff]  ;;  %v1010_v63 = vld [vmem:[%s6538_s27 + $0x370] sm:$0xff] }
  0x53   : > { %955 = vst [vmem:[%s6543_s2 + $0xd8] sm:$0xff] %v954_v35  ;;  %v1012_v0 = vld [vmem:[%s6538_s27 + $0x380] sm:$0xff]  ;;  %v1014_v1 = vld [vmem:[%s6538_s27 + $0x390] sm:$0xff] }
  0x54   : > { %957 = vst [vmem:[%s6543_s2 + $0xe0] sm:$0xff] %v956_v36  ;;  %v1016_v2 = vld [vmem:[%s6538_s27 + $0x3a0] sm:$0xff]  ;;  %v1018_v3 = vld [vmem:[%s6538_s27 + $0x3b0] sm:$0xff] }
  0x55   : > { %959 = vst [vmem:[%s6543_s2 + $0xe8] sm:$0xff] %v958_v37  ;;  %v1020_v4 = vld [vmem:[%s6538_s27 + $0x3c0] sm:$0xff]  ;;  %v1022_v5 = vld [vmem:[%s6538_s27 + $0x3d0] sm:$0xff] }
  0x56   : > { %961 = vst [vmem:[%s6543_s2 + $0xf0] sm:$0xff] %v960_v38  ;;  %v1024_v6 = vld [vmem:[%s6538_s27 + $0x3e0] sm:$0xff]  ;;  %v1026_v7 = vld [vmem:[%s6538_s27 + $0x3f0] sm:$0xff] }
  0x57   : > { %963 = vst [vmem:[%s6543_s2 + $0xf8] sm:$0xff] %v962_v39  ;;  %v1028_v8 = vld [vmem:[%s6538_s27 + $0x400] sm:$0xff]  ;;  %v1030_v9 = vld [vmem:[%s6538_s27 + $0x410] sm:$0xff] }
  0x58   : > { %965 = vst [vmem:[%s6543_s2 + $0x100] sm:$0xff] %v964_v40  ;;  %v1032_v10 = vld [vmem:[%s6538_s27 + $0x420] sm:$0xff]  ;;  %v1034_v11 = vld [vmem:[%s6538_s27 + $0x430] sm:$0xff] }
  0x59   : > { %967 = vst [vmem:[%s6543_s2 + $0x108] sm:$0xff] %v966_v41  ;;  %v1036_v12 = vld [vmem:[%s6538_s27 + $0x440] sm:$0xff]  ;;  %v1038_v13 = vld [vmem:[%s6538_s27 + $0x450] sm:$0xff] }
  0x5a   : > { %969 = vst [vmem:[%s6543_s2 + $0x110] sm:$0xff] %v968_v42  ;;  %v1040_v14 = vld [vmem:[%s6538_s27 + $0x460] sm:$0xff]  ;;  %v1042_v15 = vld [vmem:[%s6538_s27 + $0x470] sm:$0xff] }
  0x5b   : > { %971 = vst [vmem:[%s6543_s2 + $0x118] sm:$0xff] %v970_v43  ;;  %v1044_v16 = vld [vmem:[%s6538_s27 + $0x480] sm:$0xff]  ;;  %v1046_v17 = vld [vmem:[%s6538_s27 + $0x490] sm:$0xff] }
  0x5c   : > { %973 = vst [vmem:[%s6543_s2 + $0x120] sm:$0xff] %v972_v44  ;;  %v1048_v18 = vld [vmem:[%s6538_s27 + $0x4a0] sm:$0xff]  ;;  %v1050_v19 = vld [vmem:[%s6538_s27 + $0x4b0] sm:$0xff] }
  0x5d   : > { %975 = vst [vmem:[%s6543_s2 + $0x128] sm:$0xff] %v974_v45  ;;  %v1052_v20 = vld [vmem:[%s6538_s27 + $0x4c0] sm:$0xff]  ;;  %v1054_v21 = vld [vmem:[%s6538_s27 + $0x4d0] sm:$0xff] }
  0x5e   : > { %977 = vst [vmem:[%s6543_s2 + $0x130] sm:$0xff] %v976_v46  ;;  %v1056_v22 = vld [vmem:[%s6538_s27 + $0x4e0] sm:$0xff]  ;;  %v1058_v23 = vld [vmem:[%s6538_s27 + $0x4f0] sm:$0xff] }
  0x5f   : > { %979 = vst [vmem:[%s6543_s2 + $0x138] sm:$0xff] %v978_v47  ;;  %v1060_v24 = vld [vmem:[%s6538_s27 + $0x500] sm:$0xff]  ;;  %v1062_v25 = vld [vmem:[%s6538_s27 + $0x510] sm:$0xff] }
  0x60   : > { %981 = vst [vmem:[%s6543_s2 + $0x140] sm:$0xff] %v980_v48  ;;  %v1064_v26 = vld [vmem:[%s6538_s27 + $0x520] sm:$0xff]  ;;  %v1066_v27 = vld [vmem:[%s6538_s27 + $0x530] sm:$0xff] }
  0x61   : > { %983 = vst [vmem:[%s6543_s2 + $0x148] sm:$0xff] %v982_v49  ;;  %v1068_v28 = vld [vmem:[%s6538_s27 + $0x540] sm:$0xff]  ;;  %v1070_v29 = vld [vmem:[%s6538_s27 + $0x550] sm:$0xff] }
  0x62   : > { %985 = vst [vmem:[%s6543_s2 + $0x150] sm:$0xff] %v984_v50  ;;  %v1072_v30 = vld [vmem:[%s6538_s27 + $0x560] sm:$0xff]  ;;  %v1074_v31 = vld [vmem:[%s6538_s27 + $0x570] sm:$0xff] }
  0x63   : > { %987 = vst [vmem:[%s6543_s2 + $0x158] sm:$0xff] %v986_v51  ;;  %v1076_v32 = vld [vmem:[%s6538_s27 + $0x580] sm:$0xff]  ;;  %v1078_v33 = vld [vmem:[%s6538_s27 + $0x590] sm:$0xff] }
  0x64   : > { %989 = vst [vmem:[%s6543_s2 + $0x160] sm:$0xff] %v988_v52  ;;  %v1080_v34 = vld [vmem:[%s6538_s27 + $0x5a0] sm:$0xff]  ;;  %v1082_v35 = vld [vmem:[%s6538_s27 + $0x5b0] sm:$0xff] }
  0x65   : > { %991 = vst [vmem:[%s6543_s2 + $0x168] sm:$0xff] %v990_v53  ;;  %v1084_v36 = vld [vmem:[%s6538_s27 + $0x5c0] sm:$0xff]  ;;  %v1086_v37 = vld [vmem:[%s6538_s27 + $0x5d0] sm:$0xff] }
  0x66   : > { %993 = vst [vmem:[%s6543_s2 + $0x170] sm:$0xff] %v992_v54  ;;  %v1088_v38 = vld [vmem:[%s6538_s27 + $0x5e0] sm:$0xff]  ;;  %v1090_v39 = vld [vmem:[%s6538_s27 + $0x5f0] sm:$0xff] }
  0x67   : > { %995 = vst [vmem:[%s6543_s2 + $0x178] sm:$0xff] %v994_v55  ;;  %v1092_v40 = vld [vmem:[%s6538_s27 + $0x600] sm:$0xff]  ;;  %v1094_v41 = vld [vmem:[%s6538_s27 + $0x610] sm:$0xff] }
  0x68   : > { %997 = vst [vmem:[%s6543_s2 + $0x180] sm:$0xff] %v996_v56  ;;  %v1096_v42 = vld [vmem:[%s6538_s27 + $0x620] sm:$0xff]  ;;  %v1098_v43 = vld [vmem:[%s6538_s27 + $0x630] sm:$0xff] }
  0x69   : > { %999 = vst [vmem:[%s6543_s2 + $0x188] sm:$0xff] %v998_v57  ;;  %v1100_v44 = vld [vmem:[%s6538_s27 + $0x640] sm:$0xff]  ;;  %v1102_v45 = vld [vmem:[%s6538_s27 + $0x650] sm:$0xff] }
  0x6a   : > { %1001 = vst [vmem:[%s6543_s2 + $0x190] sm:$0xff] %v1000_v58  ;;  %v1104_v46 = vld [vmem:[%s6538_s27 + $0x660] sm:$0xff]  ;;  %v1106_v47 = vld [vmem:[%s6538_s27 + $0x670] sm:$0xff] }
  0x6b   : > { %1003 = vst [vmem:[%s6543_s2 + $0x198] sm:$0xff] %v1002_v59  ;;  %v1108_v48 = vld [vmem:[%s6538_s27 + $0x680] sm:$0xff]  ;;  %v1110_v49 = vld [vmem:[%s6538_s27 + $0x690] sm:$0xff] }
  0x6c   : > { %1005 = vst [vmem:[%s6543_s2 + $0x1a0] sm:$0xff] %v1004_v60  ;;  %v1112_v50 = vld [vmem:[%s6538_s27 + $0x6a0] sm:$0xff]  ;;  %v1114_v51 = vld [vmem:[%s6538_s27 + $0x6b0] sm:$0xff] }
  0x6d   : > { %1007 = vst [vmem:[%s6543_s2 + $0x1a8] sm:$0xff] %v1006_v61  ;;  %v1116_v52 = vld [vmem:[%s6538_s27 + $0x6c0] sm:$0xff]  ;;  %v1118_v53 = vld [vmem:[%s6538_s27 + $0x6d0] sm:$0xff] }
  0x6e   : > { %1009 = vst [vmem:[%s6543_s2 + $0x1b0] sm:$0xff] %v1008_v62  ;;  %v1120_v54 = vld [vmem:[%s6538_s27 + $0x6e0] sm:$0xff]  ;;  %v1122_v55 = vld [vmem:[%s6538_s27 + $0x6f0] sm:$0xff] }
  0x6f   : > { %1011 = vst [vmem:[%s6543_s2 + $0x1b8] sm:$0xff] %v1010_v63  ;;  %v1124_v56 = vld [vmem:[%s6538_s27 + $0x700] sm:$0xff]  ;;  %v1126_v57 = vld [vmem:[%s6538_s27 + $0x710] sm:$0xff] }
  0x70   : > { %1013 = vst [vmem:[%s6543_s2 + $0x1c0] sm:$0xff] %v1012_v0  ;;  %v1128_v58 = vld [vmem:[%s6538_s27 + $0x720] sm:$0xff]  ;;  %v1130_v59 = vld [vmem:[%s6538_s27 + $0x730] sm:$0xff] }
  0x71   : > { %1015 = vst [vmem:[%s6543_s2 + $0x1c8] sm:$0xff] %v1014_v1  ;;  %v1132_v60 = vld [vmem:[%s6538_s27 + $0x740] sm:$0xff]  ;;  %v1134_v61 = vld [vmem:[%s6538_s27 + $0x750] sm:$0xff] }
  0x72   : > { %1017 = vst [vmem:[%s6543_s2 + $0x1d0] sm:$0xff] %v1016_v2  ;;  %v1136_v62 = vld [vmem:[%s6538_s27 + $0x760] sm:$0xff]  ;;  %v1138_v63 = vld [vmem:[%s6538_s27 + $0x770] sm:$0xff] }
  0x73   : > { %1019 = vst [vmem:[%s6543_s2 + $0x1d8] sm:$0xff] %v1018_v3  ;;  %v1140_v0 = vld [vmem:[%s6538_s27 + $0x780] sm:$0xff]  ;;  %v1142_v1 = vld [vmem:[%s6538_s27 + $0x790] sm:$0xff] }
  0x74   : > { %1021 = vst [vmem:[%s6543_s2 + $0x1e0] sm:$0xff] %v1020_v4  ;;  %v1144_v2 = vld [vmem:[%s6538_s27 + $0x7a0] sm:$0xff]  ;;  %v1146_v3 = vld [vmem:[%s6538_s27 + $0x7b0] sm:$0xff] }
  0x75   : > { %1023 = vst [vmem:[%s6543_s2 + $0x1e8] sm:$0xff] %v1022_v5  ;;  %v1148_v4 = vld [vmem:[%s6538_s27 + $0x7c0] sm:$0xff]  ;;  %v1150_v5 = vld [vmem:[%s6538_s27 + $0x7d0] sm:$0xff] }
  0x76   : > { %1025 = vst [vmem:[%s6543_s2 + $0x1f0] sm:$0xff] %v1024_v6  ;;  %v1152_v6 = vld [vmem:[%s6538_s27 + $0x7e0] sm:$0xff] }
  0x77   : > { %1027 = vst [vmem:[%s6543_s2 + $0x1f8] sm:$0xff] %v1026_v7  ;;  %v1154_v7 = vld [vmem:[%s6538_s27 + $0x7f0] sm:$0xff] }
  0x78   : > { %1029 = vst [vmem:[%s6543_s2 + $0x200] sm:$0xff] %v1028_v8 }
  0x79   : > { %1031 = vst [vmem:[%s6543_s2 + $0x208] sm:$0xff] %v1030_v9 }
  0x7a   : > { %1033 = vst [vmem:[%s6543_s2 + $0x210] sm:$0xff] %v1032_v10 }
  0x7b   : > { %1035 = vst [vmem:[%s6543_s2 + $0x218] sm:$0xff] %v1034_v11 }
  0x7c   : > { %1037 = vst [vmem:[%s6543_s2 + $0x220] sm:$0xff] %v1036_v12 }
  0x7d   : > { %1039 = vst [vmem:[%s6543_s2 + $0x228] sm:$0xff] %v1038_v13 }
  0x7e   : > { %1041 = vst [vmem:[%s6543_s2 + $0x230] sm:$0xff] %v1040_v14 }
  0x7f   : > { %1043 = vst [vmem:[%s6543_s2 + $0x238] sm:$0xff] %v1042_v15 }
  0x80   : > { %1045 = vst [vmem:[%s6543_s2 + $0x240] sm:$0xff] %v1044_v16 }
  0x81   : > { %1047 = vst [vmem:[%s6543_s2 + $0x248] sm:$0xff] %v1046_v17 }
  0x82   : > { %1049 = vst [vmem:[%s6543_s2 + $0x250] sm:$0xff] %v1048_v18 }
  0x83   : > { %1051 = vst [vmem:[%s6543_s2 + $0x258] sm:$0xff] %v1050_v19 }
  0x84   : > { %1053 = vst [vmem:[%s6543_s2 + $0x260] sm:$0xff] %v1052_v20 }
  0x85   : > { %1055 = vst [vmem:[%s6543_s2 + $0x268] sm:$0xff] %v1054_v21 }
  0x86   : > { %1057 = vst [vmem:[%s6543_s2 + $0x270] sm:$0xff] %v1056_v22 }
  0x87   : > { %1059 = vst [vmem:[%s6543_s2 + $0x278] sm:$0xff] %v1058_v23 }
  0x88   : > { %1061 = vst [vmem:[%s6543_s2 + $0x280] sm:$0xff] %v1060_v24 }
  0x89   : > { %1063 = vst [vmem:[%s6543_s2 + $0x288] sm:$0xff] %v1062_v25 }
  0x8a   : > { %1065 = vst [vmem:[%s6543_s2 + $0x290] sm:$0xff] %v1064_v26 }
  0x8b   : > { %1067 = vst [vmem:[%s6543_s2 + $0x298] sm:$0xff] %v1066_v27 }
  0x8c   : > { %1069 = vst [vmem:[%s6543_s2 + $0x2a0] sm:$0xff] %v1068_v28 }
  0x8d   : > { %1071 = vst [vmem:[%s6543_s2 + $0x2a8] sm:$0xff] %v1070_v29 }
  0x8e   : > { %1073 = vst [vmem:[%s6543_s2 + $0x2b0] sm:$0xff] %v1072_v30 }
  0x8f   : > { %1075 = vst [vmem:[%s6543_s2 + $0x2b8] sm:$0xff] %v1074_v31 }
  0x90   : > { %1077 = vst [vmem:[%s6543_s2 + $0x2c0] sm:$0xff] %v1076_v32 }
  0x91   : > { %1079 = vst [vmem:[%s6543_s2 + $0x2c8] sm:$0xff] %v1078_v33 }
  0x92   : > { %1081 = vst [vmem:[%s6543_s2 + $0x2d0] sm:$0xff] %v1080_v34 }
  0x93   : > { %1083 = vst [vmem:[%s6543_s2 + $0x2d8] sm:$0xff] %v1082_v35 }
  0x94   : > { %1085 = vst [vmem:[%s6543_s2 + $0x2e0] sm:$0xff] %v1084_v36 }
  0x95   : > { %1087 = vst [vmem:[%s6543_s2 + $0x2e8] sm:$0xff] %v1086_v37 }
  0x96   : > { %1089 = vst [vmem:[%s6543_s2 + $0x2f0] sm:$0xff] %v1088_v38 }
  0x97   : > { %1091 = vst [vmem:[%s6543_s2 + $0x2f8] sm:$0xff] %v1090_v39 }
  0x98   : > { %1093 = vst [vmem:[%s6543_s2 + $0x300] sm:$0xff] %v1092_v40 }
  0x99   : > { %1095 = vst [vmem:[%s6543_s2 + $0x308] sm:$0xff] %v1094_v41 }
  0x9a   : > { %1097 = vst [vmem:[%s6543_s2 + $0x310] sm:$0xff] %v1096_v42 }
  0x9b   : > { %1099 = vst [vmem:[%s6543_s2 + $0x318] sm:$0xff] %v1098_v43 }
  0x9c   : > { %1101 = vst [vmem:[%s6543_s2 + $0x320] sm:$0xff] %v1100_v44 }
  0x9d   : > { %1103 = vst [vmem:[%s6543_s2 + $0x328] sm:$0xff] %v1102_v45 }
  0x9e   : > { %1105 = vst [vmem:[%s6543_s2 + $0x330] sm:$0xff] %v1104_v46 }
  0x9f   : > { %1107 = vst [vmem:[%s6543_s2 + $0x338] sm:$0xff] %v1106_v47 }
  0xa0   : > { %1109 = vst [vmem:[%s6543_s2 + $0x340] sm:$0xff] %v1108_v48 }
  0xa1   : > { %1111 = vst [vmem:[%s6543_s2 + $0x348] sm:$0xff] %v1110_v49 }
  0xa2   : > { %1113 = vst [vmem:[%s6543_s2 + $0x350] sm:$0xff] %v1112_v50 }
  0xa3   : > { %1115 = vst [vmem:[%s6543_s2 + $0x358] sm:$0xff] %v1114_v51 }
  0xa4   : > { %1117 = vst [vmem:[%s6543_s2 + $0x360] sm:$0xff] %v1116_v52 }
  0xa5   : > { %1119 = vst [vmem:[%s6543_s2 + $0x368] sm:$0xff] %v1118_v53 }
  0xa6   : > { %1121 = vst [vmem:[%s6543_s2 + $0x370] sm:$0xff] %v1120_v54 }
  0xa7   : > { %1123 = vst [vmem:[%s6543_s2 + $0x378] sm:$0xff] %v1122_v55 }
  0xa8   : > { %1125 = vst [vmem:[%s6543_s2 + $0x380] sm:$0xff] %v1124_v56 }
  0xa9   : > { %1127 = vst [vmem:[%s6543_s2 + $0x388] sm:$0xff] %v1126_v57 }
  0xaa   : > { %1129 = vst [vmem:[%s6543_s2 + $0x390] sm:$0xff] %v1128_v58 }
  0xab   : > { %1131 = vst [vmem:[%s6543_s2 + $0x398] sm:$0xff] %v1130_v59 }
  0xac   : > { %1133 = vst [vmem:[%s6543_s2 + $0x3a0] sm:$0xff] %v1132_v60 }
  0xad   : > { %1135 = vst [vmem:[%s6543_s2 + $0x3a8] sm:$0xff] %v1134_v61 }
  0xae   : > { %1137 = vst [vmem:[%s6543_s2 + $0x3b0] sm:$0xff] %v1136_v62 }
  0xaf   : > { %1139 = vst [vmem:[%s6543_s2 + $0x3b8] sm:$0xff] %v1138_v63 }
  0xb0   : > { %1141 = vst [vmem:[%s6543_s2 + $0x3c0] sm:$0xff] %v1140_v0 }
  0xb1   : > { %1143 = vst [vmem:[%s6543_s2 + $0x3c8] sm:$0xff] %v1142_v1 }
  0xb2   : > { %1145 = vst [vmem:[%s6543_s2 + $0x3d0] sm:$0xff] %v1144_v2 }
  0xb3   : > { %1147 = vst [vmem:[%s6543_s2 + $0x3d8] sm:$0xff] %v1146_v3 }
  0xb4   : > { %1149 = vst [vmem:[%s6543_s2 + $0x3e0] sm:$0xff] %v1148_v4 }
  0xb5   : > { %1151 = vst [vmem:[%s6543_s2 + $0x3e8] sm:$0xff] %v1150_v5 }
  0xb6   : > { %1153 = vst [vmem:[%s6543_s2 + $0x3f0] sm:$0xff] %v1152_v6 }
  0xb7   : > { %1155 = vst [vmem:[%s6543_s2 + $0x3f8] sm:$0xff] %v1154_v7 }
  0xb8 PF: > { %1161 = sbr.rel (!%p6509_p5) target bundleno = 322 (0x142), region = 152  ;;  %s1163_s25 = sand.u32 (%p6509_p5), 1, %s6361_s20  }
  0xb9   : > { %s5729_s1 = sshll.u32 (%p6509_p5), %s6365_s21, 3  ;;  %s5728_s28 = sshll.u32 (%p6509_p5), %s1163_s25, 10 }
  0xba   : > { %s10442_s24 = sld [smem:[#allocation151_spill]] (%p6509_p5)  ;;  %s6810_s27 = scalar_lea.vmem (%p6509_p5), [#allocation4], %s5728_s28 }
  0xc0   : > { %s6805_s22 = scalar_lea.vmem %s10442_s24, %s5729_s1 }
  0xc1   : > { %v1450_v8 = vld [vmem:[%s6805_s22] sm:$0xff]  ;;  %v1452_v9 = vld [vmem:[%s6805_s22 + $0x10] sm:$0xff] }
  0xc2   : > { %v1454_v10 = vld [vmem:[%s6805_s22 + $0x20] sm:$0xff]  ;;  %1451 = vst [vmem:[%s6810_s27] sm:$0xff] %v1450_v8  ;;  %v1456_v11 = vld [vmem:[%s6805_s22 + $0x30] sm:$0xff] }
  0xc3   : > { %1453 = vst [vmem:[%s6810_s27 + $0x8] sm:$0xff] %v1452_v9  ;;  %v1458_v12 = vld [vmem:[%s6805_s22 + $0x40] sm:$0xff]  ;;  %v1460_v13 = vld [vmem:[%s6805_s22 + $0x50] sm:$0xff] }
  0xc4   : > { %1455 = vst [vmem:[%s6810_s27 + $0x10] sm:$0xff] %v1454_v10  ;;  %v1462_v14 = vld [vmem:[%s6805_s22 + $0x60] sm:$0xff]  ;;  %v1464_v15 = vld [vmem:[%s6805_s22 + $0x70] sm:$0xff] }
  0xc5   : > { %1457 = vst [vmem:[%s6810_s27 + $0x18] sm:$0xff] %v1456_v11  ;;  %v1466_v16 = vld [vmem:[%s6805_s22 + $0x80] sm:$0xff]  ;;  %v1468_v17 = vld [vmem:[%s6805_s22 + $0x90] sm:$0xff] }
  0xc6   : > { %1459 = vst [vmem:[%s6810_s27 + $0x20] sm:$0xff] %v1458_v12  ;;  %v1470_v18 = vld [vmem:[%s6805_s22 + $0xa0] sm:$0xff]  ;;  %v1472_v19 = vld [vmem:[%s6805_s22 + $0xb0] sm:$0xff] }
  0xc7   : > { %1461 = vst [vmem:[%s6810_s27 + $0x28] sm:$0xff] %v1460_v13  ;;  %v1474_v20 = vld [vmem:[%s6805_s22 + $0xc0] sm:$0xff]  ;;  %v1476_v21 = vld [vmem:[%s6805_s22 + $0xd0] sm:$0xff] }
  0xc8   : > { %1463 = vst [vmem:[%s6810_s27 + $0x30] sm:$0xff] %v1462_v14  ;;  %v1478_v22 = vld [vmem:[%s6805_s22 + $0xe0] sm:$0xff]  ;;  %v1480_v23 = vld [vmem:[%s6805_s22 + $0xf0] sm:$0xff] }
  0xc9   : > { %1465 = vst [vmem:[%s6810_s27 + $0x38] sm:$0xff] %v1464_v15  ;;  %v1482_v24 = vld [vmem:[%s6805_s22 + $0x100] sm:$0xff]  ;;  %v1484_v25 = vld [vmem:[%s6805_s22 + $0x110] sm:$0xff] }
  0xca   : > { %1467 = vst [vmem:[%s6810_s27 + $0x40] sm:$0xff] %v1466_v16  ;;  %v1486_v26 = vld [vmem:[%s6805_s22 + $0x120] sm:$0xff]  ;;  %v1488_v27 = vld [vmem:[%s6805_s22 + $0x130] sm:$0xff] }
  0xcb   : > { %1469 = vst [vmem:[%s6810_s27 + $0x48] sm:$0xff] %v1468_v17  ;;  %v1490_v28 = vld [vmem:[%s6805_s22 + $0x140] sm:$0xff]  ;;  %v1492_v29 = vld [vmem:[%s6805_s22 + $0x150] sm:$0xff] }
  0xcc   : > { %1471 = vst [vmem:[%s6810_s27 + $0x50] sm:$0xff] %v1470_v18  ;;  %v1494_v30 = vld [vmem:[%s6805_s22 + $0x160] sm:$0xff]  ;;  %v1496_v31 = vld [vmem:[%s6805_s22 + $0x170] sm:$0xff] }
  0xcd   : > { %1473 = vst [vmem:[%s6810_s27 + $0x58] sm:$0xff] %v1472_v19  ;;  %v1498_v32 = vld [vmem:[%s6805_s22 + $0x180] sm:$0xff]  ;;  %v1500_v33 = vld [vmem:[%s6805_s22 + $0x190] sm:$0xff] }
  0xce   : > { %1475 = vst [vmem:[%s6810_s27 + $0x60] sm:$0xff] %v1474_v20  ;;  %v1502_v34 = vld [vmem:[%s6805_s22 + $0x1a0] sm:$0xff]  ;;  %v1504_v35 = vld [vmem:[%s6805_s22 + $0x1b0] sm:$0xff] }
  0xcf   : > { %1477 = vst [vmem:[%s6810_s27 + $0x68] sm:$0xff] %v1476_v21  ;;  %v1506_v36 = vld [vmem:[%s6805_s22 + $0x1c0] sm:$0xff]  ;;  %v1508_v37 = vld [vmem:[%s6805_s22 + $0x1d0] sm:$0xff] }
  0xd0   : > { %1479 = vst [vmem:[%s6810_s27 + $0x70] sm:$0xff] %v1478_v22  ;;  %v1510_v38 = vld [vmem:[%s6805_s22 + $0x1e0] sm:$0xff]  ;;  %v1512_v39 = vld [vmem:[%s6805_s22 + $0x1f0] sm:$0xff] }
  0xd1   : > { %1481 = vst [vmem:[%s6810_s27 + $0x78] sm:$0xff] %v1480_v23  ;;  %v1514_v40 = vld [vmem:[%s6805_s22 + $0x200] sm:$0xff]  ;;  %v1516_v41 = vld [vmem:[%s6805_s22 + $0x210] sm:$0xff] }
  0xd2   : > { %1483 = vst [vmem:[%s6810_s27 + $0x80] sm:$0xff] %v1482_v24  ;;  %v1518_v42 = vld [vmem:[%s6805_s22 + $0x220] sm:$0xff]  ;;  %v1520_v43 = vld [vmem:[%s6805_s22 + $0x230] sm:$0xff] }
  0xd3   : > { %1485 = vst [vmem:[%s6810_s27 + $0x88] sm:$0xff] %v1484_v25  ;;  %v1522_v44 = vld [vmem:[%s6805_s22 + $0x240] sm:$0xff]  ;;  %v1524_v45 = vld [vmem:[%s6805_s22 + $0x250] sm:$0xff] }
  0xd4   : > { %1487 = vst [vmem:[%s6810_s27 + $0x90] sm:$0xff] %v1486_v26  ;;  %v1526_v46 = vld [vmem:[%s6805_s22 + $0x260] sm:$0xff]  ;;  %v1528_v47 = vld [vmem:[%s6805_s22 + $0x270] sm:$0xff] }
  0xd5   : > { %1489 = vst [vmem:[%s6810_s27 + $0x98] sm:$0xff] %v1488_v27  ;;  %v1530_v48 = vld [vmem:[%s6805_s22 + $0x280] sm:$0xff]  ;;  %v1532_v49 = vld [vmem:[%s6805_s22 + $0x290] sm:$0xff] }
  0xd6   : > { %1491 = vst [vmem:[%s6810_s27 + $0xa0] sm:$0xff] %v1490_v28  ;;  %v1534_v50 = vld [vmem:[%s6805_s22 + $0x2a0] sm:$0xff]  ;;  %v1536_v51 = vld [vmem:[%s6805_s22 + $0x2b0] sm:$0xff] }
  0xd7   : > { %1493 = vst [vmem:[%s6810_s27 + $0xa8] sm:$0xff] %v1492_v29  ;;  %v1538_v52 = vld [vmem:[%s6805_s22 + $0x2c0] sm:$0xff]  ;;  %v1540_v53 = vld [vmem:[%s6805_s22 + $0x2d0] sm:$0xff] }
  0xd8   : > { %1495 = vst [vmem:[%s6810_s27 + $0xb0] sm:$0xff] %v1494_v30  ;;  %v1542_v54 = vld [vmem:[%s6805_s22 + $0x2e0] sm:$0xff]  ;;  %v1544_v55 = vld [vmem:[%s6805_s22 + $0x2f0] sm:$0xff] }
  0xd9   : > { %1497 = vst [vmem:[%s6810_s27 + $0xb8] sm:$0xff] %v1496_v31  ;;  %v1546_v56 = vld [vmem:[%s6805_s22 + $0x300] sm:$0xff]  ;;  %v1548_v57 = vld [vmem:[%s6805_s22 + $0x310] sm:$0xff] }
  0xda   : > { %1499 = vst [vmem:[%s6810_s27 + $0xc0] sm:$0xff] %v1498_v32  ;;  %v1550_v58 = vld [vmem:[%s6805_s22 + $0x320] sm:$0xff]  ;;  %v1552_v59 = vld [vmem:[%s6805_s22 + $0x330] sm:$0xff] }
  0xdb   : > { %1501 = vst [vmem:[%s6810_s27 + $0xc8] sm:$0xff] %v1500_v33  ;;  %v1554_v60 = vld [vmem:[%s6805_s22 + $0x340] sm:$0xff]  ;;  %v1556_v61 = vld [vmem:[%s6805_s22 + $0x350] sm:$0xff] }
  0xdc   : > { %1503 = vst [vmem:[%s6810_s27 + $0xd0] sm:$0xff] %v1502_v34  ;;  %v1558_v62 = vld [vmem:[%s6805_s22 + $0x360] sm:$0xff]  ;;  %v1560_v63 = vld [vmem:[%s6805_s22 + $0x370] sm:$0xff] }
  0xdd   : > { %1505 = vst [vmem:[%s6810_s27 + $0xd8] sm:$0xff] %v1504_v35  ;;  %v1562_v0 = vld [vmem:[%s6805_s22 + $0x380] sm:$0xff]  ;;  %v1564_v1 = vld [vmem:[%s6805_s22 + $0x390] sm:$0xff] }
  0xde   : > { %1507 = vst [vmem:[%s6810_s27 + $0xe0] sm:$0xff] %v1506_v36  ;;  %v1566_v2 = vld [vmem:[%s6805_s22 + $0x3a0] sm:$0xff]  ;;  %v1568_v3 = vld [vmem:[%s6805_s22 + $0x3b0] sm:$0xff] }
  0xdf   : > { %1509 = vst [vmem:[%s6810_s27 + $0xe8] sm:$0xff] %v1508_v37  ;;  %v1570_v4 = vld [vmem:[%s6805_s22 + $0x3c0] sm:$0xff]  ;;  %v1572_v5 = vld [vmem:[%s6805_s22 + $0x3d0] sm:$0xff] }
  0xe0   : > { %1511 = vst [vmem:[%s6810_s27 + $0xf0] sm:$0xff] %v1510_v38  ;;  %v1574_v6 = vld [vmem:[%s6805_s22 + $0x3e0] sm:$0xff]  ;;  %v1576_v7 = vld [vmem:[%s6805_s22 + $0x3f0] sm:$0xff] }
  0xe1   : > { %1513 = vst [vmem:[%s6810_s27 + $0xf8] sm:$0xff] %v1512_v39  ;;  %v1578_v8 = vld [vmem:[%s6805_s22 + $0x400] sm:$0xff]  ;;  %v1580_v9 = vld [vmem:[%s6805_s22 + $0x410] sm:$0xff] }
  0xe2   : > { %1515 = vst [vmem:[%s6810_s27 + $0x100] sm:$0xff] %v1514_v40  ;;  %v1582_v10 = vld [vmem:[%s6805_s22 + $0x420] sm:$0xff]  ;;  %v1584_v11 = vld [vmem:[%s6805_s22 + $0x430] sm:$0xff] }
  0xe3   : > { %1517 = vst [vmem:[%s6810_s27 + $0x108] sm:$0xff] %v1516_v41  ;;  %v1586_v12 = vld [vmem:[%s6805_s22 + $0x440] sm:$0xff]  ;;  %v1588_v13 = vld [vmem:[%s6805_s22 + $0x450] sm:$0xff] }
  0xe4   : > { %1519 = vst [vmem:[%s6810_s27 + $0x110] sm:$0xff] %v1518_v42  ;;  %v1590_v14 = vld [vmem:[%s6805_s22 + $0x460] sm:$0xff]  ;;  %v1592_v15 = vld [vmem:[%s6805_s22 + $0x470] sm:$0xff] }
  0xe5   : > { %1521 = vst [vmem:[%s6810_s27 + $0x118] sm:$0xff] %v1520_v43  ;;  %v1594_v16 = vld [vmem:[%s6805_s22 + $0x480] sm:$0xff]  ;;  %v1596_v17 = vld [vmem:[%s6805_s22 + $0x490] sm:$0xff] }
  0xe6   : > { %1523 = vst [vmem:[%s6810_s27 + $0x120] sm:$0xff] %v1522_v44  ;;  %v1598_v18 = vld [vmem:[%s6805_s22 + $0x4a0] sm:$0xff]  ;;  %v1600_v19 = vld [vmem:[%s6805_s22 + $0x4b0] sm:$0xff] }
  0xe7   : > { %1525 = vst [vmem:[%s6810_s27 + $0x128] sm:$0xff] %v1524_v45  ;;  %v1602_v20 = vld [vmem:[%s6805_s22 + $0x4c0] sm:$0xff]  ;;  %v1604_v21 = vld [vmem:[%s6805_s22 + $0x4d0] sm:$0xff] }
  0xe8   : > { %1527 = vst [vmem:[%s6810_s27 + $0x130] sm:$0xff] %v1526_v46  ;;  %v1606_v22 = vld [vmem:[%s6805_s22 + $0x4e0] sm:$0xff]  ;;  %v1608_v23 = vld [vmem:[%s6805_s22 + $0x4f0] sm:$0xff] }
  0xe9   : > { %1529 = vst [vmem:[%s6810_s27 + $0x138] sm:$0xff] %v1528_v47  ;;  %v1610_v24 = vld [vmem:[%s6805_s22 + $0x500] sm:$0xff]  ;;  %v1612_v25 = vld [vmem:[%s6805_s22 + $0x510] sm:$0xff] }
  0xea   : > { %1531 = vst [vmem:[%s6810_s27 + $0x140] sm:$0xff] %v1530_v48  ;;  %v1614_v26 = vld [vmem:[%s6805_s22 + $0x520] sm:$0xff]  ;;  %v1616_v27 = vld [vmem:[%s6805_s22 + $0x530] sm:$0xff] }
  0xeb   : > { %1533 = vst [vmem:[%s6810_s27 + $0x148] sm:$0xff] %v1532_v49  ;;  %v1618_v28 = vld [vmem:[%s6805_s22 + $0x540] sm:$0xff]  ;;  %v1620_v29 = vld [vmem:[%s6805_s22 + $0x550] sm:$0xff] }
  0xec   : > { %1535 = vst [vmem:[%s6810_s27 + $0x150] sm:$0xff] %v1534_v50  ;;  %v1622_v30 = vld [vmem:[%s6805_s22 + $0x560] sm:$0xff]  ;;  %v1624_v31 = vld [vmem:[%s6805_s22 + $0x570] sm:$0xff] }
  0xed   : > { %1537 = vst [vmem:[%s6810_s27 + $0x158] sm:$0xff] %v1536_v51  ;;  %v1626_v32 = vld [vmem:[%s6805_s22 + $0x580] sm:$0xff]  ;;  %v1628_v33 = vld [vmem:[%s6805_s22 + $0x590] sm:$0xff] }
  0xee   : > { %1539 = vst [vmem:[%s6810_s27 + $0x160] sm:$0xff] %v1538_v52  ;;  %v1630_v34 = vld [vmem:[%s6805_s22 + $0x5a0] sm:$0xff]  ;;  %v1632_v35 = vld [vmem:[%s6805_s22 + $0x5b0] sm:$0xff] }
  0xef   : > { %1541 = vst [vmem:[%s6810_s27 + $0x168] sm:$0xff] %v1540_v53  ;;  %v1634_v36 = vld [vmem:[%s6805_s22 + $0x5c0] sm:$0xff]  ;;  %v1636_v37 = vld [vmem:[%s6805_s22 + $0x5d0] sm:$0xff] }
  0xf0   : > { %1543 = vst [vmem:[%s6810_s27 + $0x170] sm:$0xff] %v1542_v54  ;;  %v1638_v38 = vld [vmem:[%s6805_s22 + $0x5e0] sm:$0xff]  ;;  %v1640_v39 = vld [vmem:[%s6805_s22 + $0x5f0] sm:$0xff] }
  0xf1   : > { %1545 = vst [vmem:[%s6810_s27 + $0x178] sm:$0xff] %v1544_v55  ;;  %v1642_v40 = vld [vmem:[%s6805_s22 + $0x600] sm:$0xff]  ;;  %v1644_v41 = vld [vmem:[%s6805_s22 + $0x610] sm:$0xff] }
  0xf2   : > { %1547 = vst [vmem:[%s6810_s27 + $0x180] sm:$0xff] %v1546_v56  ;;  %v1646_v42 = vld [vmem:[%s6805_s22 + $0x620] sm:$0xff]  ;;  %v1648_v43 = vld [vmem:[%s6805_s22 + $0x630] sm:$0xff] }
  0xf3   : > { %1549 = vst [vmem:[%s6810_s27 + $0x188] sm:$0xff] %v1548_v57  ;;  %v1650_v44 = vld [vmem:[%s6805_s22 + $0x640] sm:$0xff]  ;;  %v1652_v45 = vld [vmem:[%s6805_s22 + $0x650] sm:$0xff] }
  0xf4   : > { %1551 = vst [vmem:[%s6810_s27 + $0x190] sm:$0xff] %v1550_v58  ;;  %v1654_v46 = vld [vmem:[%s6805_s22 + $0x660] sm:$0xff]  ;;  %v1656_v47 = vld [vmem:[%s6805_s22 + $0x670] sm:$0xff] }
  0xf5   : > { %1553 = vst [vmem:[%s6810_s27 + $0x198] sm:$0xff] %v1552_v59  ;;  %v1658_v48 = vld [vmem:[%s6805_s22 + $0x680] sm:$0xff]  ;;  %v1660_v49 = vld [vmem:[%s6805_s22 + $0x690] sm:$0xff] }
  0xf6   : > { %1555 = vst [vmem:[%s6810_s27 + $0x1a0] sm:$0xff] %v1554_v60  ;;  %v1662_v50 = vld [vmem:[%s6805_s22 + $0x6a0] sm:$0xff]  ;;  %v1664_v51 = vld [vmem:[%s6805_s22 + $0x6b0] sm:$0xff] }
  0xf7   : > { %1557 = vst [vmem:[%s6810_s27 + $0x1a8] sm:$0xff] %v1556_v61  ;;  %v1666_v52 = vld [vmem:[%s6805_s22 + $0x6c0] sm:$0xff]  ;;  %v1668_v53 = vld [vmem:[%s6805_s22 + $0x6d0] sm:$0xff] }
  0xf8   : > { %1559 = vst [vmem:[%s6810_s27 + $0x1b0] sm:$0xff] %v1558_v62  ;;  %v1670_v54 = vld [vmem:[%s6805_s22 + $0x6e0] sm:$0xff]  ;;  %v1672_v55 = vld [vmem:[%s6805_s22 + $0x6f0] sm:$0xff] }
  0xf9   : > { %1561 = vst [vmem:[%s6810_s27 + $0x1b8] sm:$0xff] %v1560_v63  ;;  %v1674_v56 = vld [vmem:[%s6805_s22 + $0x700] sm:$0xff]  ;;  %v1676_v57 = vld [vmem:[%s6805_s22 + $0x710] sm:$0xff] }
  0xfa   : > { %1563 = vst [vmem:[%s6810_s27 + $0x1c0] sm:$0xff] %v1562_v0  ;;  %v1678_v58 = vld [vmem:[%s6805_s22 + $0x720] sm:$0xff]  ;;  %v1680_v59 = vld [vmem:[%s6805_s22 + $0x730] sm:$0xff] }
  0xfb   : > { %1565 = vst [vmem:[%s6810_s27 + $0x1c8] sm:$0xff] %v1564_v1  ;;  %v1682_v60 = vld [vmem:[%s6805_s22 + $0x740] sm:$0xff]  ;;  %v1684_v61 = vld [vmem:[%s6805_s22 + $0x750] sm:$0xff] }
  0xfc   : > { %1567 = vst [vmem:[%s6810_s27 + $0x1d0] sm:$0xff] %v1566_v2  ;;  %v1686_v62 = vld [vmem:[%s6805_s22 + $0x760] sm:$0xff]  ;;  %v1688_v63 = vld [vmem:[%s6805_s22 + $0x770] sm:$0xff] }
  0xfd   : > { %1569 = vst [vmem:[%s6810_s27 + $0x1d8] sm:$0xff] %v1568_v3  ;;  %v1690_v0 = vld [vmem:[%s6805_s22 + $0x780] sm:$0xff]  ;;  %v1692_v1 = vld [vmem:[%s6805_s22 + $0x790] sm:$0xff] }
  0xfe   : > { %1571 = vst [vmem:[%s6810_s27 + $0x1e0] sm:$0xff] %v1570_v4  ;;  %v1694_v2 = vld [vmem:[%s6805_s22 + $0x7a0] sm:$0xff]  ;;  %v1696_v3 = vld [vmem:[%s6805_s22 + $0x7b0] sm:$0xff] }
  0xff   : > { %1573 = vst [vmem:[%s6810_s27 + $0x1e8] sm:$0xff] %v1572_v5  ;;  %v1698_v4 = vld [vmem:[%s6805_s22 + $0x7c0] sm:$0xff]  ;;  %v1700_v5 = vld [vmem:[%s6805_s22 + $0x7d0] sm:$0xff] }
 0x100   : > { %1575 = vst [vmem:[%s6810_s27 + $0x1f0] sm:$0xff] %v1574_v6  ;;  %v1702_v6 = vld [vmem:[%s6805_s22 + $0x7e0] sm:$0xff] }
 0x101   : > { %1577 = vst [vmem:[%s6810_s27 + $0x1f8] sm:$0xff] %v1576_v7  ;;  %v1704_v7 = vld [vmem:[%s6805_s22 + $0x7f0] sm:$0xff] }
 0x102   : > { %1579 = vst [vmem:[%s6810_s27 + $0x200] sm:$0xff] %v1578_v8 }
 0x103   : > { %1581 = vst [vmem:[%s6810_s27 + $0x208] sm:$0xff] %v1580_v9 }
 0x104   : > { %1583 = vst [vmem:[%s6810_s27 + $0x210] sm:$0xff] %v1582_v10 }
 0x105   : > { %1585 = vst [vmem:[%s6810_s27 + $0x218] sm:$0xff] %v1584_v11 }
 0x106   : > { %1587 = vst [vmem:[%s6810_s27 + $0x220] sm:$0xff] %v1586_v12 }
 0x107   : > { %1589 = vst [vmem:[%s6810_s27 + $0x228] sm:$0xff] %v1588_v13 }
 0x108   : > { %1591 = vst [vmem:[%s6810_s27 + $0x230] sm:$0xff] %v1590_v14 }
 0x109   : > { %1593 = vst [vmem:[%s6810_s27 + $0x238] sm:$0xff] %v1592_v15 }
 0x10a   : > { %1595 = vst [vmem:[%s6810_s27 + $0x240] sm:$0xff] %v1594_v16 }
 0x10b   : > { %1597 = vst [vmem:[%s6810_s27 + $0x248] sm:$0xff] %v1596_v17 }
 0x10c   : > { %1599 = vst [vmem:[%s6810_s27 + $0x250] sm:$0xff] %v1598_v18 }
 0x10d   : > { %1601 = vst [vmem:[%s6810_s27 + $0x258] sm:$0xff] %v1600_v19 }
 0x10e   : > { %1603 = vst [vmem:[%s6810_s27 + $0x260] sm:$0xff] %v1602_v20 }
 0x10f   : > { %1605 = vst [vmem:[%s6810_s27 + $0x268] sm:$0xff] %v1604_v21 }
 0x110   : > { %1607 = vst [vmem:[%s6810_s27 + $0x270] sm:$0xff] %v1606_v22 }
 0x111   : > { %1609 = vst [vmem:[%s6810_s27 + $0x278] sm:$0xff] %v1608_v23 }
 0x112   : > { %1611 = vst [vmem:[%s6810_s27 + $0x280] sm:$0xff] %v1610_v24 }
 0x113   : > { %1613 = vst [vmem:[%s6810_s27 + $0x288] sm:$0xff] %v1612_v25 }
 0x114   : > { %1615 = vst [vmem:[%s6810_s27 + $0x290] sm:$0xff] %v1614_v26 }
 0x115   : > { %1617 = vst [vmem:[%s6810_s27 + $0x298] sm:$0xff] %v1616_v27 }
 0x116   : > { %1619 = vst [vmem:[%s6810_s27 + $0x2a0] sm:$0xff] %v1618_v28 }
 0x117   : > { %1621 = vst [vmem:[%s6810_s27 + $0x2a8] sm:$0xff] %v1620_v29 }
 0x118   : > { %1623 = vst [vmem:[%s6810_s27 + $0x2b0] sm:$0xff] %v1622_v30 }
 0x119   : > { %1625 = vst [vmem:[%s6810_s27 + $0x2b8] sm:$0xff] %v1624_v31 }
 0x11a   : > { %1627 = vst [vmem:[%s6810_s27 + $0x2c0] sm:$0xff] %v1626_v32 }
 0x11b   : > { %1629 = vst [vmem:[%s6810_s27 + $0x2c8] sm:$0xff] %v1628_v33 }
 0x11c   : > { %1631 = vst [vmem:[%s6810_s27 + $0x2d0] sm:$0xff] %v1630_v34 }
 0x11d   : > { %1633 = vst [vmem:[%s6810_s27 + $0x2d8] sm:$0xff] %v1632_v35 }
 0x11e   : > { %1635 = vst [vmem:[%s6810_s27 + $0x2e0] sm:$0xff] %v1634_v36 }
 0x11f   : > { %1637 = vst [vmem:[%s6810_s27 + $0x2e8] sm:$0xff] %v1636_v37 }
 0x120   : > { %1639 = vst [vmem:[%s6810_s27 + $0x2f0] sm:$0xff] %v1638_v38 }
 0x121   : > { %1641 = vst [vmem:[%s6810_s27 + $0x2f8] sm:$0xff] %v1640_v39 }
 0x122   : > { %1643 = vst [vmem:[%s6810_s27 + $0x300] sm:$0xff] %v1642_v40 }
 0x123   : > { %1645 = vst [vmem:[%s6810_s27 + $0x308] sm:$0xff] %v1644_v41 }
 0x124   : > { %1647 = vst [vmem:[%s6810_s27 + $0x310] sm:$0xff] %v1646_v42 }
 0x125   : > { %1649 = vst [vmem:[%s6810_s27 + $0x318] sm:$0xff] %v1648_v43 }
 0x126   : > { %1651 = vst [vmem:[%s6810_s27 + $0x320] sm:$0xff] %v1650_v44 }
 0x127   : > { %1653 = vst [vmem:[%s6810_s27 + $0x328] sm:$0xff] %v1652_v45 }
 0x128   : > { %1655 = vst [vmem:[%s6810_s27 + $0x330] sm:$0xff] %v1654_v46 }
 0x129   : > { %1657 = vst [vmem:[%s6810_s27 + $0x338] sm:$0xff] %v1656_v47 }
 0x12a   : > { %1659 = vst [vmem:[%s6810_s27 + $0x340] sm:$0xff] %v1658_v48 }
 0x12b   : > { %1661 = vst [vmem:[%s6810_s27 + $0x348] sm:$0xff] %v1660_v49 }
 0x12c   : > { %1663 = vst [vmem:[%s6810_s27 + $0x350] sm:$0xff] %v1662_v50 }
 0x12d   : > { %1665 = vst [vmem:[%s6810_s27 + $0x358] sm:$0xff] %v1664_v51 }
 0x12e   : > { %1667 = vst [vmem:[%s6810_s27 + $0x360] sm:$0xff] %v1666_v52 }
 0x12f   : > { %1669 = vst [vmem:[%s6810_s27 + $0x368] sm:$0xff] %v1668_v53 }
 0x130   : > { %1671 = vst [vmem:[%s6810_s27 + $0x370] sm:$0xff] %v1670_v54 }
 0x131   : > { %1673 = vst [vmem:[%s6810_s27 + $0x378] sm:$0xff] %v1672_v55 }
 0x132   : > { %1675 = vst [vmem:[%s6810_s27 + $0x380] sm:$0xff] %v1674_v56 }
 0x133   : > { %1677 = vst [vmem:[%s6810_s27 + $0x388] sm:$0xff] %v1676_v57 }
 0x134   : > { %1679 = vst [vmem:[%s6810_s27 + $0x390] sm:$0xff] %v1678_v58 }
 0x135   : > { %1681 = vst [vmem:[%s6810_s27 + $0x398] sm:$0xff] %v1680_v59 }
 0x136   : > { %1683 = vst [vmem:[%s6810_s27 + $0x3a0] sm:$0xff] %v1682_v60 }
 0x137   : > { %1685 = vst [vmem:[%s6810_s27 + $0x3a8] sm:$0xff] %v1684_v61 }
 0x138   : > { %1687 = vst [vmem:[%s6810_s27 + $0x3b0] sm:$0xff] %v1686_v62 }
 0x139   : > { %1689 = vst [vmem:[%s6810_s27 + $0x3b8] sm:$0xff] %v1688_v63 }
 0x13a   : > { %1691 = vst [vmem:[%s6810_s27 + $0x3c0] sm:$0xff] %v1690_v0 }
 0x13b   : > { %1693 = vst [vmem:[%s6810_s27 + $0x3c8] sm:$0xff] %v1692_v1 }
 0x13c   : > { %1695 = vst [vmem:[%s6810_s27 + $0x3d0] sm:$0xff] %v1694_v2 }
 0x13d   : > { %1697 = vst [vmem:[%s6810_s27 + $0x3d8] sm:$0xff] %v1696_v3 }
 0x13e   : > { %1699 = vst [vmem:[%s6810_s27 + $0x3e0] sm:$0xff] %v1698_v4 }
 0x13f   : > { %1701 = vst [vmem:[%s6810_s27 + $0x3e8] sm:$0xff] %v1700_v5 }
 0x140   : > { %1703 = vst [vmem:[%s6810_s27 + $0x3f0] sm:$0xff] %v1702_v6 }
 0x141   : > { %1705 = vst [vmem:[%s6810_s27 + $0x3f8] sm:$0xff] %v1704_v7 }
 0x142 PF: > { %1711 = sbr.rel (!%p6509_p5) target bundleno = 348 (0x15c), region = 190  ;;  %s1713_s2 = sand.u32 (%p6509_p5), 1, %s6361_s20  }
 0x143   : > { %s5731_s25 = sshll.u32 (%p6509_p5), %s6365_s21, 3  ;;  %s5730_s1 = sshll.u32 (%p6509_p5), %s1713_s2, 7 }
 0x144   : > { %s10443_s23 = sld [smem:[#allocation152_spill]] (%p6509_p5)  ;;  %s1715_s22 = scalar_lea.vmem (%p6509_p5), [#allocation5], %s5730_s1 }
 0x14a   : > { %s7072_s24 = scalar_lea.vmem %s10443_s23, %s5731_s25 }
 0x14b   : > { %v1776_v8 = vld [vmem:[%s7072_s24] sm:$0xff]  ;;  %v1778_v9 = vld [vmem:[%s7072_s24 + $0x10] sm:$0xff] }
 0x14c   : > { %v1780_v10 = vld [vmem:[%s7072_s24 + $0x20] sm:$0xff]  ;;  %1777 = vst [vmem:[%s1715_s22] sm:$0xff] %v1776_v8  ;;  %v1782_v11 = vld [vmem:[%s7072_s24 + $0x30] sm:$0xff] }
 0x14d   : > { %1779 = vst [vmem:[%s1715_s22 + $0x8] sm:$0xff] %v1778_v9  ;;  %v1784_v12 = vld [vmem:[%s7072_s24 + $0x40] sm:$0xff]  ;;  %v1786_v13 = vld [vmem:[%s7072_s24 + $0x50] sm:$0xff] }
 0x14e   : > { %1781 = vst [vmem:[%s1715_s22 + $0x10] sm:$0xff] %v1780_v10  ;;  %v1788_v14 = vld [vmem:[%s7072_s24 + $0x60] sm:$0xff]  ;;  %v1790_v15 = vld [vmem:[%s7072_s24 + $0x70] sm:$0xff] }
 0x14f   : > { %1783 = vst [vmem:[%s1715_s22 + $0x18] sm:$0xff] %v1782_v11  ;;  %v1792_v16 = vld [vmem:[%s7072_s24 + $0x80] sm:$0xff]  ;;  %v1794_v17 = vld [vmem:[%s7072_s24 + $0x90] sm:$0xff] }
 0x150   : > { %1785 = vst [vmem:[%s1715_s22 + $0x20] sm:$0xff] %v1784_v12  ;;  %v1796_v18 = vld [vmem:[%s7072_s24 + $0xa0] sm:$0xff]  ;;  %v1798_v19 = vld [vmem:[%s7072_s24 + $0xb0] sm:$0xff] }
 0x151   : > { %1787 = vst [vmem:[%s1715_s22 + $0x28] sm:$0xff] %v1786_v13  ;;  %v1800_v20 = vld [vmem:[%s7072_s24 + $0xc0] sm:$0xff]  ;;  %v1802_v21 = vld [vmem:[%s7072_s24 + $0xd0] sm:$0xff] }
 0x152   : > { %1789 = vst [vmem:[%s1715_s22 + $0x30] sm:$0xff] %v1788_v14  ;;  %v1804_v22 = vld [vmem:[%s7072_s24 + $0xe0] sm:$0xff]  ;;  %v1806_v23 = vld [vmem:[%s7072_s24 + $0xf0] sm:$0xff] }
 0x153   : > { %1791 = vst [vmem:[%s1715_s22 + $0x38] sm:$0xff] %v1790_v15 }
 0x154   : > { %1793 = vst [vmem:[%s1715_s22 + $0x40] sm:$0xff] %v1792_v16 }
 0x155   : > { %1795 = vst [vmem:[%s1715_s22 + $0x48] sm:$0xff] %v1794_v17 }
 0x156   : > { %1797 = vst [vmem:[%s1715_s22 + $0x50] sm:$0xff] %v1796_v18 }
 0x157   : > { %1799 = vst [vmem:[%s1715_s22 + $0x58] sm:$0xff] %v1798_v19 }
 0x158   : > { %1801 = vst [vmem:[%s1715_s22 + $0x60] sm:$0xff] %v1800_v20 }
 0x159   : > { %1803 = vst [vmem:[%s1715_s22 + $0x68] sm:$0xff] %v1802_v21 }
 0x15a   : > { %1805 = vst [vmem:[%s1715_s22 + $0x70] sm:$0xff] %v1804_v22 }
 0x15b   : > { %1807 = vst [vmem:[%s1715_s22 + $0x78] sm:$0xff] %v1806_v23 }
 0x15c PF: > { %1813 = sbr.rel (!%p6509_p5) target bundleno = 366 (0x16e), region = 228  ;;  %s1815_s27 = sand.u32 (%p6509_p5), 1, %s6361_s20  }
 0x15d   : > { %s5733_s2 = sshll.u32 (%p6509_p5), %s6365_s21, 3  ;;  %s5732_s25 = sshll.u32 (%p6509_p5), %s1815_s27, 6 }
 0x15e   : > { %s10444_s4 = sld [smem:[#allocation153_spill]] (%p6509_p5)  ;;  %s1817_s23 = scalar_lea.vmem (%p6509_p5), [#allocation6], %s5732_s25 }
 0x164   : > { %s1819_s29 = scalar_lea.vmem %s10444_s4, %s5733_s2 }
 0x165   : > { %v1862_v24 = vld [vmem:[%s1819_s29] sm:$0xff]  ;;  %v1864_v25 = vld [vmem:[%s1819_s29 + $0x10] sm:$0xff] }
 0x166   : > { %v1866_v26 = vld [vmem:[%s1819_s29 + $0x20] sm:$0xff]  ;;  %1863 = vst [vmem:[%s1817_s23] sm:$0xff] %v1862_v24  ;;  %v1868_v27 = vld [vmem:[%s1819_s29 + $0x30] sm:$0xff] }
 0x167   : > { %1865 = vst [vmem:[%s1817_s23 + $0x8] sm:$0xff] %v1864_v25  ;;  %v1870_v28 = vld [vmem:[%s1819_s29 + $0x40] sm:$0xff]  ;;  %v1872_v29 = vld [vmem:[%s1819_s29 + $0x50] sm:$0xff] }
 0x168   : > { %1867 = vst [vmem:[%s1817_s23 + $0x10] sm:$0xff] %v1866_v26  ;;  %v1874_v30 = vld [vmem:[%s1819_s29 + $0x60] sm:$0xff]  ;;  %v1876_v31 = vld [vmem:[%s1819_s29 + $0x70] sm:$0xff] }
 0x169   : > { %1869 = vst [vmem:[%s1817_s23 + $0x18] sm:$0xff] %v1868_v27 }
 0x16a   : > { %1871 = vst [vmem:[%s1817_s23 + $0x20] sm:$0xff] %v1870_v28 }
 0x16b   : > { %1873 = vst [vmem:[%s1817_s23 + $0x28] sm:$0xff] %v1872_v29 }
 0x16c   : > { %1875 = vst [vmem:[%s1817_s23 + $0x30] sm:$0xff] %v1874_v30 }
 0x16d   : > { %1877 = vst [vmem:[%s1817_s23 + $0x38] sm:$0xff] %v1876_v31 }
 0x16e PF: > { %p5734_p10 = scmp.ge.s32.totalorder %s6365_s21, 1  ;;  %p1882_p11 = scmp.lt.s32.totalorder %s6365_s21, 3 }
 0x170   : > { %p1883_p12 = pnand %p5734_p10, %p1882_p11 }
 0x172   : > { %1886 = sbr.rel (%p1883_p12) target bundleno = 7056 (0x1b90), region = 266 }
 0x177   : > { %s10445_s6 = sld [smem:[#allocation155_spill]]  ;;  %s7103_s22 = sand.u32 1, %s6357_s30   ;;  %v6367_v33 = vmov 0   ;;  %v2012_v34 = vld [vmem:[%s10229_s8 + $0x30] sm:$0xff]  ;;  %vm2040_vm0 = vcmask 64512   ;;  %v2013_v38 = vld [vmem:[%s10229_s8 + $0x38] sm:$0xff] }
 0x178   : > { %6228 = vset.pattern.permute.xlu0 %v6367_v33  ;;  %6229 = vset.pattern.permute.xlu1 %v6367_v33  ;;  %s5738_s25 = sshll.u32 %s7103_s22, 7  ;;  %s10446_s5 = sld [smem:[#allocation154_spill]]  ;;  %v2011_v39 = vld [vmem:[%s10229_s8 + $0x28] sm:$0xff]  ;;  %v2020_v40 = vld [vmem:[%s10230_s9 + $0x30] sm:$0xff]  ;;  %v2029_v41 = vld [vmem:[%s10231_s10 + $0x38] sm:$0xff]  ;;  %vm2303_vm1 = vcmask 523264  }
 0x179   : > { %6230 = vset.pattern.permute.xlu2 %v6367_v33  ;;  %2097 = vperm.xlu1 %6229, %v2012_v34   ;;  %s7114_s29 = scalar_lea.vmem [#allocation5], %s5738_s25  ;;  %v2019_v42 = vld [vmem:[%s10230_s9 + $0x28] sm:$0xff]  ;;  %v2021_v43 = vld [vmem:[%s10230_s9 + $0x38] sm:$0xff]  ;;  %v2028_v44 = vld [vmem:[%s10231_s10 + $0x30] sm:$0xff]  ;;  %s10448_s7 = sld [smem:[#allocation156_spill]] }
 0x17a   : > { %v2034_v36 = vld [vmem:[%s7114_s29] sm:$0xff]  ;;  %v5752_v37 = vld [vmem:[%s7114_s29 + $0x8] sm:$0xff]  ;;  %2231 = vperm.xlu2 %6230, %v2021_v43   ;;  %v2017_v48 = vld [vmem:[%s10230_s9 + $0x18] sm:$0xff]  ;;  %s7359_s2 = sshll.u32 %s7103_s22, 6  ;;  %s5736_s25 = sshll.u32 %s7103_s22, 10 }
 0x17b   : > { %2059 = vmatpush.msra.mxu0 %v2034_v36  ;;  %v2018_v45 = vld [vmem:[%s10230_s9 + $0x20] sm:$0xff]  ;;  %v2027_v46 = vld [vmem:[%s10231_s10 + $0x28] sm:$0xff]  ;;  %v2009_v50 = vld [vmem:[%s10229_s8 + $0x18] sm:$0xff]  ;;  %s7365_s1 = scalar_lea.vmem [#allocation2], %s7359_s2  ;;  %s7372_s28 = scalar_lea.vmem [#allocation3], %s5736_s25 }
 0x17c   : > { %v2010_v47 = vld [vmem:[%s10229_s8 + $0x20] sm:$0xff]  ;;  %v2016_v51 = vld [vmem:[%s10230_s9 + $0x10] sm:$0xff]  ;;  %v2025_v52 = vld [vmem:[%s10231_s10 + $0x18] sm:$0xff]  ;;  %s10165_s24 = scalar_lea.vmem [#allocation6], %s7359_s2  ;;  %s10169_s4 = scalar_lea.vmem [#allocation7], %s7359_s2 }
 0x17d   : > { %v1997_v32 = vld [vmem:[%s10445_s6] sm:$0xff]  ;;  %2373 = vmatpush.msrb.mxu0 %v5752_v37  ;;  %v2008_v53 = vld [vmem:[%s10229_s8 + $0x10] sm:$0xff]  ;;  %v2007_v56 = vld [vmem:[%s10229_s8 + $0x8] sm:$0xff]  ;;  %s11034_s2 = sadd.s32 4294967295, %s6365_s21   ;;  %s5578_s27 = sshll.u32 %s10169_s4, 4  ;;  %s5579_s27 = int_to_ptr.vmem [resolvable:$true] %s5578_s27 }
 0x17e   : > { %2037 = vperm.xlu0 %6228, %v1997_v32   ;;  %v7112_v35 = vld [vmem:[%s10446_s5] sm:$0xff]  ;;  %v2024_v54 = vld [vmem:[%s10231_s10 + $0x10] sm:$0xff]  ;;  %v5308_v60 = vld [vmem:[%s10236_s15 + $0x38] sm:$0xff]  ;;  %s6181_s6 = sshll.u32 %s11034_s2, 3  ;;  %s5567_s3 = scalar_lea.sflag [#allocation8], %s7103_s22 }
 0x17f   : > { %10447 = vst [vmem:[#allocation13_spill] sm:$0xff] %v7112_v35  ;;  %5741 = vmatmul.msk.f32.vlgmr.msra.gmra.mxu0 %vm2040_vm0, %v7112_v35  ;;  %v2026_v49 = vld [vmem:[%s10231_s10 + $0x20] sm:$0xff]  ;;  %v5307_v61 = vld [vmem:[%s10236_s15 + $0x30] sm:$0xff]  ;;  %v2015_v62 = vld [vmem:[%s10230_s9 + $0x8] sm:$0xff] }
 0x180   : > { %v2014_v55 = vld [vmem:[%s10230_s9] sm:$0xff]  ;;  %v5306_v63 = vld [vmem:[%s10236_s15 + $0x28] sm:$0xff]  ;;  %v5363_v0 = vld [vmem:[%s10237_s16 + $0x30] sm:$0xff] }
 0x181   : > { %2092 = vperm.xlu1 %6229, %v2011_v39   ;;  %v2022_v57 = vld [vmem:[%s10231_s10] sm:$0xff]  ;;  %v2023_v1 = vld [vmem:[%s10231_s10 + $0x8] sm:$0xff]  ;;  %v5304_v3 = vld [vmem:[%s10236_s15 + $0x18] sm:$0xff] }
 0x182   : > { %2087 = vperm.xlu2 %6230, %v2010_v47   ;;  %v2031_v58 = vld [vmem:[%s10233_s12] sm:$0xff]  ;;  %v5362_v2 = vld [vmem:[%s10237_s16 + $0x28] sm:$0xff]  ;;  %v5303_v5 = vld [vmem:[%s10236_s15 + $0x10] sm:$0xff] }
 0x183   : > { %v2006_v59 = vld [vmem:[%s10229_s8] sm:$0xff]  ;;  %v5360_v6 = vld [vmem:[%s10237_s16 + $0x18] sm:$0xff]  ;;  %v5359_v8 = vld [vmem:[%s10237_s16 + $0x10] sm:$0xff] }
 0x184   : > { %v2033_v4 = vld [vmem:[%s10235_s14] sm:$0xff]  ;;  %v5364_v7 = vld [vmem:[%s10237_s16 + $0x38] sm:$0xff]  ;;  %v5431_v14 = vld [vmem:[%s10239_s18 + $0x10] sm:$0xff] }
 0x185   : > { %v5301_v9 = vld [vmem:[%s10236_s15] sm:$0xff]  ;;  %v5432_v15 = vld [vmem:[%s10239_s18 + $0x18] sm:$0xff]  ;;  %v5302_v16 = vld [vmem:[%s10236_s15 + $0x8] sm:$0xff] }
 0x186   : > { %2102 = vperm.xlu0 %6228, %v2013_v38   ;;  %v5305_v10 = vld [vmem:[%s10236_s15 + $0x20] sm:$0xff]  ;;  %v5434_v17 = vld [vmem:[%s10239_s18 + $0x28] sm:$0xff]  ;;  %v5435_v20 = vld [vmem:[%s10239_s18 + $0x30] sm:$0xff] }
 0x187   : > { %5753 = vmatmul.msk.f32.vlgmr.msrb.gmra.mxu0 %vm2040_vm0, %v7112_v35  ;;  %v5357_v11 = vld [vmem:[%s10237_s16] sm:$0xff]  ;;  %v5358_v21 = vld [vmem:[%s10237_s16 + $0x8] sm:$0xff]  ;;  %v7286_v28 = vld [vmem:[%s10448_s7 + $0x10] sm:$0xff] }
 0x188   : > { %v5429_v12 = vld [vmem:[%s10239_s18] sm:$0xff]  ;;  %v5430_v25 = vld [vmem:[%s10239_s18 + $0x8] sm:$0xff]  ;;  %v5436_v29 = vld [vmem:[%s10239_s18 + $0x38] sm:$0xff] }
 0x189   : > { %2279 = vperm.xlu1 %6229, %v2029_v41   ;;  %v5361_v13 = vld [vmem:[%s10237_s16 + $0x20] sm:$0xff]  ;;  %v7276_v26 = vld [vmem:[%s10448_s7 + $0x8] sm:$0xff]  ;;  %v7296_v30 = vld [vmem:[%s10448_s7 + $0x18] sm:$0xff] }
 0x18a   : > { %2082 = vperm.xlu2 %6230, %v2009_v50   ;;  %v7266_v24 = vld [vmem:[%s10448_s7] sm:$0xff]  ;;  %v7310_v32 = vld [vmem:[%s10448_s7 + $0x28] sm:$0xff]  ;;  %v7317_v33 = vld [vmem:[%s10448_s7 + $0x30] sm:$0xff] }
 0x18b   : > { %v5433_v27 = vld [vmem:[%s10239_s18 + $0x20] sm:$0xff]  ;;  %v7324_v34 = vld [vmem:[%s10448_s7 + $0x38] sm:$0xff] }
 0x18c   : > { %v7303_v31 = vld [vmem:[%s10448_s7 + $0x20] sm:$0xff] }
 0x18e   : > { %2226 = vperm.xlu0 %6228, %v2020_v40  }
 0x191   : > { %2274 = vperm.xlu1 %6229, %v2028_v44  }
 0x192   : > { %2077 = vperm.xlu2 %6230, %v2008_v53  }
 0x196   : > { %2221 = vperm.xlu0 %6228, %v2019_v42  }
 0x199   : > { %2269 = vperm.xlu1 %6229, %v2027_v46  }
 0x19a   : > { %2072 = vperm.xlu2 %6230, %v2007_v56  }
 0x19e   : > { %2216 = vperm.xlu0 %6228, %v2018_v45  }
 0x1a1   : > { %2264 = vperm.xlu1 %6229, %v2026_v49  }
 0x1a2   : > { %2067 = vperm.xlu2 %6230, %v2006_v59   ;;  %v2176_v59 = vld [vmem:[%s7372_s28 + $0x30] sm:$0xff] }
 0x1a6   : > { %2211 = vperm.xlu0 %6228, %v2017_v48  }
 0x1a9   : > { %2259 = vperm.xlu1 %6229, %v2025_v52  }
 0x1aa   : > { %2201 = vperm.xlu2 %6230, %v2015_v62   ;;  %v2175_v62 = vld [vmem:[%s7372_s28 + $0x28] sm:$0xff] }
 0x1ae   : > { %2206 = vperm.xlu0 %6228, %v2016_v51  }
 0x1b1   : > { %2196 = vperm.xlu1 %6229, %v2014_v55  }
 0x1b2   : > { %2249 = vperm.xlu2 %6230, %v2023_v1  }
 0x1b6   : > { %2254 = vperm.xlu0 %6228, %v2024_v54  }
 0x1b9   : > { %2300 = vperm.xlu1 %6229, %v2031_v58  }
 0x1ba   : > { %2330 = vperm.xlu2 %6230, %v2033_v4   ;;  %v7392_v4 = vld [vmem:[%s7365_s1 + $0x38] sm:$0xff] }
 0x1be   : > { %2244 = vperm.xlu0 %6228, %v2022_v57   ;;  %v7368_v57 = vld [vmem:[%s7365_s1 + $0x30] sm:$0xff] }
 0x1bf   : > { %10455 = vst [vmem:[#allocation20_spill] sm:$0xff] %v7368_v57  ;;  %v2184_v1 = vsub.f32 %v2176_v59, %v7368_v57 }
 0x1c1   : > { %5341 = vperm.xlu1 %6229, %v5307_v61   ;;  %v7378_v61 = vld [vmem:[%s7365_s1 + $0x28] sm:$0xff] }
 0x1c2   : > { %5402 = vperm.xlu2 %6230, %v5364_v7   ;;  %10456 = vst [vmem:[#allocation21_spill] sm:$0xff] %v7378_v61  ;;  %v2183_v7 = vsub.f32 %v2175_v62, %v7378_v61 }
 0x1c6   : > { %5346 = vperm.xlu0 %6228, %v5308_v60  }
 0x1c9   : > { %5397 = vperm.xlu1 %6229, %v5363_v0  }
 0x1ca   : > { %5331 = vperm.xlu2 %6230, %v5305_v10   ;;  %v2173_v10 = vld [vmem:[%s7372_s28 + $0x18] sm:$0xff] }
 0x1ce   : > { %5336 = vperm.xlu0 %6228, %v5306_v63   ;;  %v7382_v63 = vld [vmem:[%s7365_s1 + $0x20] sm:$0xff] }
 0x1d1   : > { %5326 = vperm.xlu1 %6229, %v5304_v3   ;;  %v2174_v3 = vld [vmem:[%s7372_s28 + $0x20] sm:$0xff] }
 0x1d2   : > { %5387 = vperm.xlu2 %6230, %v5361_v13  }
 0x1d4   : > { %v7332_v38 = vpop.permute.xlu2 %2231 }
 0x1d6   : > { %5392 = vperm.xlu0 %6228, %v5362_v2  }
 0x1d9   : > { %5382 = vperm.xlu1 %6229, %v5360_v6  }
 0x1da   : > { %5316 = vperm.xlu2 %6230, %v5302_v16  }
 0x1dc   : > { %v7338_v42 = vpop.permute.xlu2 %2087 }
 0x1dd   : > { %10452 = vst [vmem:[#allocation17_spill] sm:$0xff] %v7338_v42 }
 0x1de   : > { %5321 = vperm.xlu0 %6228, %v5303_v5   ;;  %v2177_v5 = vld [vmem:[%s7372_s28 + $0x38] sm:$0xff] }
 0x1df   : > { %v2185_v16 = vsub.f32 %v2177_v5, %v7392_v4 }
 0x1e1   : > { %5311 = vperm.xlu1 %6229, %v5301_v9   ;;  %v7402_v9 = vld [vmem:[%s7365_s1 + $0x18] sm:$0xff] }
 0x1e2   : > { %5372 = vperm.xlu2 %6230, %v5358_v21  }
 0x1e4   : > { %v7344_v46 = vpop.permute.xlu2 %2082 }
 0x1e5   : > { %10453 = vst [vmem:[#allocation18_spill] sm:$0xff] %v7344_v46 }
 0x1e6   : > { %5377 = vperm.xlu0 %6228, %v5359_v8  }
 0x1e9   : > { %5439 = vperm.xlu1 %6229, %v5429_v12   ;;  %v2172_v12 = vld [vmem:[%s7372_s28 + $0x10] sm:$0xff] }
 0x1ea   : > { %5444 = vperm.xlu2 %6230, %v5430_v25  }
 0x1eb   : > { %v7328_v36 = vpop.permute.xlu1 %2097 }
 0x1ec   : > { %10449 = vst [vmem:[#allocation14_spill] sm:$0xff] %v7328_v36  ;;  %v7350_v50 = vpop.permute.xlu2 %2077 }
 0x1ed   : > { %10454 = vst [vmem:[#allocation19_spill] sm:$0xff] %v7350_v50 }
 0x1ee   : > { %5367 = vperm.xlu0 %6228, %v5357_v11   ;;  %v7406_v11 = vld [vmem:[%s7365_s1 + $0x10] sm:$0xff] }
 0x1f0   : > { %v7254_v18 = vpop.permute.xlu0 %2037 }
 0x1f1   : > { %5454 = vperm.xlu1 %6229, %v5432_v15  }
 0x1f2   : > { %5459 = vperm.xlu2 %6230, %v5433_v27   ;;  %v2180_v27 = vsub.f32 %v2172_v12, %v7406_v11 }
 0x1f3   : > { %v7336_v41 = vpop.permute.xlu1 %2092 }
 0x1f4   : > { %10451 = vst [vmem:[#allocation16_spill] sm:$0xff] %v7336_v41  ;;  %v7356_v55 = vpop.permute.xlu2 %2072 }
 0x1f6   : > { %5449 = vperm.xlu0 %6228, %v5431_v14   ;;  %v2182_v14 = vsub.f32 %v2174_v3, %v7382_v63 }
 0x1f8   : > { %v7334_v39 = vpop.permute.xlu0 %2102 }
 0x1f9   : > { %5469 = vperm.xlu1 %6229, %v5435_v20   ;;  %10450 = vst [vmem:[#allocation15_spill] sm:$0xff] %v7334_v39  ;;  %v2171_v20 = vld [vmem:[%s7372_s28 + $0x8] sm:$0xff] }
 0x1fa   : > { %5474 = vperm.xlu2 %6230, %v5436_v29   ;;  %v7429_v29 = vld [vmem:[%s7365_s1] sm:$0xff] }
 0x1fb   : > { %v7342_v45 = vpop.permute.xlu1 %2279 }
 0x1fc   : > { %v2061_v19 = vpop.f32.mrf.mxu0  ;;  %v7388_v2 = vpop.permute.xlu2 %2067 }
 0x1fd   : > { %v2062_v22 = vadd.f32 %v2061_v19, %v7254_v18  ;;  %v7416_v19 = vld [vmem:[%s7365_s1 + $0x8] sm:$0xff] }
 0x1fe   : > { %5464 = vperm.xlu0 %6228, %v5434_v17  }
 0x1ff   : > { %v2064_v23 = vmax.f32 %v2062_v22, 0.0  ;;  %v2181_v22 = vsub.f32 %v2173_v10, %v7402_v9 }
 0x200   : > { %v7340_v43 = vpop.permute.xlu0 %2226 }
 0x201   : > { %2144 = vmatpush.msra.mxu1 %v2064_v23 }
 0x202   : > { %5742 = vmatmul.msk.f32.vlgmr.msra.gmra.mxu1 %vm2040_vm0, %v7266_v24 }
 0x203   : > { %v7348_v49 = vpop.permute.xlu1 %2274 }
 0x204   : > { %v7447_v10 = vpop.permute.xlu2 %2201 }
 0x208   : > { %v7346_v47 = vpop.permute.xlu0 %2221 }
 0x20a   : > { %5743 = vmatmul.msk.f32.gmra.mxu1 %vm2040_vm0, %v7276_v26 }
 0x20b   : > { %v7354_v53 = vpop.permute.xlu1 %2269 }
 0x210   : > { %v7352_v52 = vpop.permute.xlu0 %2216 }
 0x212   : > { %5744 = vmatmul.msk.f32.gmra.mxu1 %vm2040_vm0, %v7286_v28 }
 0x213   : > { %v7375_v60 = vpop.permute.xlu1 %2264 }
 0x218   : > { %v7362_v56 = vpop.permute.xlu0 %2211 }
 0x21a   : > { %5745 = vmatmul.msk.f32.gmra.mxu1 %vm2040_vm0, %v7296_v30 }
 0x21b   : > { %v7438_v62 = vpop.permute.xlu1 %2259 }
 0x220   : > { %v7399_v8 = vpop.permute.xlu0 %2206 }
 0x222   : > { %5746 = vmatmul.msk.f32.gmra.mxu1 %vm2040_vm0, %v7303_v31 }
 0x22a   : > { %5747 = vmatmul.msk.f32.gmra.mxu1 %vm2040_vm0, %v7310_v32 }
 0x232   : > { %5748 = vmatmul.msk.f32.gmra.mxu1 %vm2040_vm0, %v7317_v33 }
 0x23a   : > { %5749 = vmatmul.msk.f32.gmra.mxu1 %vm2040_vm0, %v7324_v34 }
 0x27f   : > { %v7330_v37 = vpop.f32.mrf.mxu1 }
 0x280   : > { %v7451_v12 = vadd.f32 %v7330_v37, %v7388_v2 }
 0x282   : > { %10464 = vst [vmem:[#allocation29_spill] sm:$0xff] %v7451_v12 }
 0x287   : > { %v2149_v40 = vpop.f32.mrf.mxu1 }
 0x288   : > { %v7442_v3 = vadd.f32 %v2149_v40, %v7356_v55 }
 0x28a   : > { %10463 = vst [vmem:[#allocation28_spill] sm:$0xff] %v7442_v3 }
 0x28f   : > { %v2152_v44 = vpop.f32.mrf.mxu1 }
 0x297   : > { %v2155_v48 = vpop.f32.mrf.mxu1 }
 0x298   : > { %v7420_v21 = vadd.f32 %v2155_v48, %v7344_v46 }
 0x29a   : > { %10460 = vst [vmem:[#allocation25_spill] sm:$0xff] %v7420_v21  ;;  %v2189_v5 = vadd.f32 %v2181_v22, %v7420_v21 }
 0x29c   : > { %v2237_v37 = vmul.f32 %v7362_v56, %v2189_v5 }
 0x29f   : > { %v2158_v51 = vpop.f32.mrf.mxu1 }
 0x2a0   : > { %v7410_v13 = vadd.f32 %v2158_v51, %v7338_v42  ;;  %v2170_v51 = vld [vmem:[%s7372_s28] sm:$0xff] }
 0x2a2   : > { %10459 = vst [vmem:[#allocation24_spill] sm:$0xff] %v7410_v13 }
 0x2a7   : > { %v2161_v54 = vpop.f32.mrf.mxu1 }
 0x2a8   : > { %v7396_v6 = vadd.f32 %v2161_v54, %v7336_v41  ;;  %v7433_v54 = vadd.f32 %v2152_v44, %v7350_v50 }
 0x2aa   : > { %10458 = vst [vmem:[#allocation23_spill] sm:$0xff] %v7396_v6  ;;  %v2191_v23 = vadd.f32 %v2183_v7, %v7396_v6  ;;  %v5769_v6 = vld [vmem:[%s7372_s28 + $0x78] sm:$0xff] }
 0x2ab   : > { %10462 = vst [vmem:[#allocation27_spill] sm:$0xff] %v7433_v54 }
 0x2ac   : > { %v2239_v44 = vmul.f32 %v7346_v47, %v2191_v23 }
 0x2af   : > { %v2164_v58 = vpop.f32.mrf.mxu1 }
 0x2b0   : > { %v7385_v0 = vadd.f32 %v2164_v58, %v7328_v36  ;;  %v2190_v58 = vadd.f32 %v2182_v14, %v7410_v13  ;;  %v2178_v14 = vsub.f32 %v2170_v51, %v7429_v29 }
 0x2b2   : > { %10457 = vst [vmem:[#allocation22_spill] sm:$0xff] %v7385_v0  ;;  %v2192_v15 = vadd.f32 %v2184_v1, %v7385_v0  ;;  %v2179_v1 = vsub.f32 %v2171_v20, %v7416_v19  ;;  %v7458_v20 = vpop.permute.xlu0 %2254 }
 0x2b4   : > { %v2240_v59 = vmul.f32 %v7340_v43, %v2192_v15  ;;  %v2188_v15 = vadd.f32 %v2180_v27, %v7433_v54  ;;  %v2187_v22 = vadd.f32 %v2179_v1, %v7442_v3  ;;  %v7468_v1 = vpop.permute.xlu1 %2196  ;;  %v5765_v54 = vld [vmem:[%s7372_s28 + $0x58] sm:$0xff]  ;;  %v5764_v3 = vld [vmem:[%s7372_s28 + $0x50] sm:$0xff] }
 0x2b6   : > { %v2288_v40 = vadd.f32 %v7348_v49, %v2240_v59  ;;  %v2235_v0 = vmul.f32 %v7447_v10, %v2187_v22 }
 0x2b7   : > { %v2167_v17 = vpop.f32.mrf.mxu1 }
 0x2b8   : > { %v7425_v25 = vadd.f32 %v2167_v17, %v7334_v39  ;;  %v2238_v17 = vmul.f32 %v7352_v52, %v2190_v58  ;;  %v2296_v51 = vmax.f32 %v2288_v40, 0.0  ;;  %v2285_v58 = vadd.f32 %v7438_v62, %v2237_v37 }
 0x2ba   : > { %10461 = vst [vmem:[#allocation26_spill] sm:$0xff] %v7425_v25  ;;  %v2193_v48 = vadd.f32 %v2185_v16, %v7425_v25  ;;  %v2186_v25 = vadd.f32 %v2178_v14, %v7451_v12  ;;  %v2286_v27 = vadd.f32 %v7375_v60, %v2238_v17  ;;  %v2293_v40 = vmax.f32 %v2285_v58, 0.0  ;;  %v7475_v17 = vpop.permute.xlu0 %2244 }
 0x2bc   : > { %v2241_v7 = vmul.f32 %v7332_v38, %v2193_v48  ;;  %v2287_v48 = vadd.f32 %v7354_v53, %v2239_v44  ;;  %v2294_v44 = vmax.f32 %v2286_v27, 0.0  ;;  %v2234_v14 = vmul.f32 %v7468_v1, %v2186_v25  ;;  %v7481_v25 = vld [vmem:[%s10232_s11] sm:$0xff]  ;;  %v7488_v27 = vpop.permute.xlu1 %2300 }
 0x2be   : > { %v2289_v16 = vadd.f32 %v7342_v45, %v2241_v7  ;;  %v2236_v7 = vmul.f32 %v7399_v8, %v2188_v15  ;;  %v2295_v59 = vmax.f32 %v2287_v48, 0.0  ;;  %v2282_v22 = vadd.f32 %v7475_v17, %v2234_v14 }
 0x2c0   : > { %v2297_v23 = vmax.f32 %v2289_v16, 0.0  ;;  %v2284_v5 = vadd.f32 %v7458_v20, %v2236_v7  ;;  %v7472_v16 = vpop.permute.xlu2 %2249  ;;  %v2290_v37 = vmax.f32 %v2282_v22, 0.0 }
 0x2c1   : > { %v2283_v15 = vadd.f32 %v7472_v16, %v2235_v0  ;;  %v2375_v0 = vpop.f32.mrf.mxu0 }
 0x2c2   : > { %2315 = vmatpush.msra.mxu2 %v2297_v23  ;;  %v2292_v23 = vmax.f32 %v2284_v5, 0.0  ;;  %v7495_v5 = vld [vmem:[%s10234_s13] sm:$0xff] }
 0x2c3   : > { %v2291_v48 = vmax.f32 %v2283_v15, 0.0 }
 0x2c4   : > { %2316 = vmatpush.msra.mxu2 %v2296_v51  ;;  %v5772_v51 = vld [vmem:[%s7114_s29 + $0x10] sm:$0xff] }
 0x2c6   : > { %2317 = vmatpush.msra.mxu2 %v2295_v59  ;;  %v2376_v59 = vadd.f32 %v2375_v0, %v7254_v18 }
 0x2c8   : > { %2318 = vmatpush.msra.mxu2 %v2294_v44  ;;  %v2378_v14 = vmax.f32 %v2376_v59, 0.0  ;;  %v5767_v59 = vld [vmem:[%s7372_s28 + $0x68] sm:$0xff] }
 0x2c9   : > { %v2434_v21 = vsub.f32 %v5767_v59, %v7378_v61 }
 0x2ca   : > { %2319 = vmatpush.msra.mxu2 %v2293_v40 }
 0x2cc   : > { %2320 = vmatpush.msra.mxu2 %v2292_v23 }
 0x2ce   : > { %2321 = vmatpush.msra.mxu2 %v2291_v48 }
 0x2d0   : > { %2322 = vmatpush.msra.mxu2 %v2290_v37 }
 0x2d1   : > { %5750 = vmatmul.msk.f32.vlgmr.msra.gmra.mxu2 %vm2303_vm1, %v7481_v25 }
 0x2d2   : > { %2527 = vmatpush.msrb.mxu2 %v5772_v51 }
 0x2d9   : > { %5773 = vmatmul.msk.f32.vlgmr.msrb.gmra.mxu2 %vm2040_vm0, %v7112_v35  ;;  %v2436_v35 = vsub.f32 %v5769_v6, %v7392_v4 }
 0x354   : > { %v2324_v7 = vpop.f32.mrf.mxu2 }
 0x355   : > { %v2325_v58 = vadd.f32 %v2324_v7, %v7488_v27  ;;  %v5768_v7 = vld [vmem:[%s7372_s28 + $0x70] sm:$0xff] }
 0x357   : > { %v2327_v44 = vmax.f32 %v2325_v58, 0.0 }
 0x359   : > { %2351 = vmatpush.msra.mxu3 %v2327_v44  ;;  %v2435_v44 = vsub.f32 %v5768_v7, %v7368_v57  ;;  %v5763_v57 = vld [vmem:[%s7372_s28 + $0x48] sm:$0xff] }
 0x35a   : > { %5751 = vmatmul.msk.f32.vlgmr.msra.gmra.mxu3 %vm2040_vm0, %v7495_v5 }
 0x35b   : > { %2394 = vmatpush.msrb.mxu3 %v2378_v14  ;;  %v5766_v14 = vld [vmem:[%s7372_s28 + $0x60] sm:$0xff] }
 0x362   : > { %5754 = vmatmul.msk.f32.vlgmr.msrb.gmra.mxu3 %vm2040_vm0, %v7266_v24 }
 0x36a   : > { %5755 = vmatmul.msk.f32.gmra.mxu3 %vm2040_vm0, %v7276_v26 }
 0x372   : > { %5756 = vmatmul.msk.f32.gmra.mxu3 %vm2040_vm0, %v7286_v28 }
 0x37a   : > { %5757 = vmatmul.msk.f32.gmra.mxu3 %vm2040_vm0, %v7296_v30 }
 0x382   : > { %5758 = vmatmul.msk.f32.gmra.mxu3 %vm2040_vm0, %v7303_v31 }
 0x38a   : > { %5759 = vmatmul.msk.f32.gmra.mxu3 %vm2040_vm0, %v7310_v32 }
 0x392   : > { %5760 = vmatmul.msk.f32.gmra.mxu3 %vm2040_vm0, %v7317_v33 }
 0x39a   : > { %5761 = vmatmul.msk.f32.gmra.mxu3 %vm2040_vm0, %v7324_v34 }
 0x3dd   : > { %v7515_v40 = vpop.f32.mrf.mxu3 }
 0x3de   : > { %10465 = vst [vmem:[#allocation30_spill] sm:$0xff] %v7515_v40  ;;  %v2433_v40 = vsub.f32 %v5766_v14, %v7382_v63 }
 0x3e5   : > { %v2396_v15 = vpop.f32.mrf.mxu3 }
 0x3ed   : > { %v2399_v23 = vpop.f32.mrf.mxu3 }
 0x3f5   : > { %v2402_v22 = vpop.f32.mrf.mxu3 }
 0x3f6   : > { %v7549_v14 = vadd.f32 %v2402_v22, %v7350_v50  ;;  %v7562_v22 = vadd.f32 %v2396_v15, %v7388_v2 }
 0x3f8   : > { %10471 = vst [vmem:[#allocation36_spill] sm:$0xff] %v7549_v14 }
 0x3f9   : > { %10473 = vst [vmem:[#allocation38_spill] sm:$0xff] %v7562_v22 }
 0x3fd   : > { %v2405_v48 = vpop.f32.mrf.mxu3 }
 0x405   : > { %v2408_v37 = vpop.f32.mrf.mxu3 }
 0x406   : > { %v7532_v12 = vadd.f32 %v2408_v37, %v7338_v42  ;;  %v2431_v37 = vsub.f32 %v5764_v3, %v7406_v11  ;;  %v5762_v42 = vld [vmem:[%s7372_s28 + $0x40] sm:$0xff] }
 0x408   : > { %10468 = vst [vmem:[#allocation33_spill] sm:$0xff] %v7532_v12  ;;  %v2441_v6 = vadd.f32 %v2433_v40, %v7532_v12  ;;  %v2429_v40 = vsub.f32 %v5762_v42, %v7429_v29  ;;  %v5785_v12 = vld [vmem:[%s7372_s28 + $0x98] sm:$0xff] }
 0x40a   : > { %v2437_v15 = vadd.f32 %v2429_v40, %v7562_v22 }
 0x40d   : > { %v2411_v51 = vpop.f32.mrf.mxu3 }
 0x40e   : > { %v7526_v13 = vadd.f32 %v2411_v51, %v7336_v41  ;;  %v2432_v51 = vsub.f32 %v5765_v54, %v7402_v9  ;;  %v7556_v54 = vadd.f32 %v2399_v23, %v7356_v55 }
 0x410   : > { %10467 = vst [vmem:[#allocation32_spill] sm:$0xff] %v7526_v13  ;;  %v2442_v59 = vadd.f32 %v2434_v21, %v7526_v13 }
 0x411   : > { %10472 = vst [vmem:[#allocation37_spill] sm:$0xff] %v7556_v54 }
 0x415   : > { %v2414_v0 = vpop.f32.mrf.mxu3 }
 0x416   : > { %v7520_v58 = vadd.f32 %v2414_v0, %v7328_v36  ;;  %v7539_v36 = vadd.f32 %v2405_v48, %v7344_v46 }
 0x418   : > { %10466 = vst [vmem:[#allocation31_spill] sm:$0xff] %v7520_v58  ;;  %v2443_v0 = vadd.f32 %v2435_v44, %v7520_v58  ;;  %v2430_v58 = vsub.f32 %v5763_v57, %v7416_v19  ;;  %v2440_v21 = vadd.f32 %v2432_v51, %v7539_v36 }
 0x419   : > { %10469 = vst [vmem:[#allocation34_spill] sm:$0xff] %v7539_v36  ;;  %v5784_v36 = vld [vmem:[%s7372_s28 + $0x90] sm:$0xff] }
 0x41a   : > { %v2451_v44 = vmul.f32 %v2443_v0, %v7340_v43  ;;  %v2439_v0 = vadd.f32 %v2431_v37, %v7549_v14  ;;  %v2448_v51 = vmul.f32 %v2440_v21, %v7362_v56  ;;  %v10480_v14 = vld [vmem:[#allocation17_spill] sm:$0xff] }
 0x41c   : > { %v2459_v23 = vadd.f32 %v2451_v44, %v7348_v49  ;;  %v2447_v13 = vmul.f32 %v2439_v0, %v7399_v8  ;;  %v2456_v44 = vadd.f32 %v2448_v51, %v7438_v62  ;;  %v2529_v51 = vpop.f32.mrf.mxu2 }
 0x41d   : > { %v2417_v7 = vpop.f32.mrf.mxu3 }
 0x41e   : > { %v7544_v61 = vadd.f32 %v2417_v7, %v7334_v39  ;;  %v2450_v7 = vmul.f32 %v2442_v59, %v7346_v47  ;;  %v2467_v42 = vmax.f32 %v2459_v23, 0.0  ;;  %v2464_v40 = vmax.f32 %v2456_v44, 0.0 }
 0x420   : > { %10470 = vst [vmem:[#allocation35_spill] sm:$0xff] %v7544_v61  ;;  %v2444_v48 = vadd.f32 %v2436_v35, %v7544_v61  ;;  %v2449_v35 = vmul.f32 %v2441_v6, %v7352_v52  ;;  %v2438_v61 = vadd.f32 %v2430_v58, %v7556_v54  ;;  %v2445_v58 = vmul.f32 %v2437_v15, %v7468_v1 }
 0x422   : > { %v2452_v3 = vmul.f32 %v2444_v48, %v7332_v38  ;;  %v2458_v48 = vadd.f32 %v2450_v7, %v7354_v53  ;;  %v2457_v37 = vadd.f32 %v2449_v35, %v7375_v60  ;;  %v2446_v6 = vmul.f32 %v2438_v61, %v7447_v10 }
 0x423   : > { %v2455_v7 = vadd.f32 %v2447_v13, %v7458_v20  ;;  %v2453_v35 = vadd.f32 %v2445_v58, %v7475_v17  ;;  %v2530_v13 = vadd.f32 %v2529_v51, %v7254_v18 }
 0x424   : > { %v2460_v57 = vadd.f32 %v2452_v3, %v7342_v45  ;;  %v2466_v3 = vmax.f32 %v2458_v48, 0.0  ;;  %v2465_v21 = vmax.f32 %v2457_v37, 0.0  ;;  %v2454_v0 = vadd.f32 %v2446_v6, %v7472_v16 }
 0x425   : > { %v2461_v23 = vmax.f32 %v2453_v35, 0.0  ;;  %v10475_v35 = vld [vmem:[#allocation14_spill] sm:$0xff] }
 0x426   : > { %v2468_v59 = vmax.f32 %v2460_v57, 0.0  ;;  %v2463_v57 = vmax.f32 %v2455_v7, 0.0  ;;  %v2462_v61 = vmax.f32 %v2454_v0, 0.0  ;;  %v5788_v0 = vld [vmem:[%s7372_s28 + $0xb0] sm:$0xff] }
 0x428   : > { %2477 = vmatpush.msra.mxu0 %v2468_v59 }
 0x42a   : > { %2478 = vmatpush.msra.mxu0 %v2467_v42  ;;  %v2532_v42 = vmax.f32 %v2530_v13, 0.0  ;;  %v5789_v13 = vld [vmem:[%s7372_s28 + $0xb8] sm:$0xff] }
 0x42c   : > { %2479 = vmatpush.msra.mxu0 %v2466_v3 }
 0x42e   : > { %2480 = vmatpush.msra.mxu0 %v2465_v21 }
 0x430   : > { %2481 = vmatpush.msra.mxu0 %v2464_v40 }
 0x432   : > { %2482 = vmatpush.msra.mxu0 %v2463_v57  ;;  %v5787_v57 = vld [vmem:[%s7372_s28 + $0xa8] sm:$0xff] }
 0x434   : > { %2483 = vmatpush.msra.mxu0 %v2462_v61 }
 0x436   : > { %2484 = vmatpush.msra.mxu0 %v2461_v23  ;;  %v10477_v23 = vld [vmem:[#allocation20_spill] sm:$0xff] }
 0x437   : > { %5770 = vmatmul.msk.f32.vlgmr.msra.gmra.mxu0 %vm2303_vm1, %v7481_v25  ;;  %v2589_v51 = vsub.f32 %v5788_v0, %v10477_v23  ;;  %v5783_v23 = vld [vmem:[%s7372_s28 + $0x88] sm:$0xff] }
 0x4b4   : > { %v2486_v59 = vpop.f32.mrf.mxu0 }
 0x4b5   : > { %v2487_v48 = vadd.f32 %v2486_v59, %v7488_v27  ;;  %v5786_v59 = vld [vmem:[%s7372_s28 + $0xa0] sm:$0xff] }
 0x4b6   : > { %v2587_v22 = vsub.f32 %v5786_v59, %v7382_v63 }
 0x4b7   : > { %v2489_v15 = vmax.f32 %v2487_v48, 0.0 }
 0x4b9   : > { %2505 = vmatpush.msrb.mxu0 %v2489_v15  ;;  %v10479_v15 = vld [vmem:[#allocation21_spill] sm:$0xff] }
 0x4ba   : > { %5771 = vmatmul.msk.f32.vlgmr.msrb.gmra.mxu0 %vm2040_vm0, %v7495_v5 }
 0x4bb   : > { %2548 = vmatpush.msra.mxu0 %v2532_v42  ;;  %v2588_v42 = vsub.f32 %v5787_v57, %v10479_v15 }
 0x4c2   : > { %5774 = vmatmul.msk.f32.vlgmr.msra.gmra.mxu0 %vm2040_vm0, %v7266_v24 }
 0x4ca   : > { %5775 = vmatmul.msk.f32.gmra.mxu0 %vm2040_vm0, %v7276_v26 }
 0x4d2   : > { %5776 = vmatmul.msk.f32.gmra.mxu0 %vm2040_vm0, %v7286_v28 }
 0x4da   : > { %5777 = vmatmul.msk.f32.gmra.mxu0 %vm2040_vm0, %v7296_v30 }
 0x4e2   : > { %5778 = vmatmul.msk.f32.gmra.mxu0 %vm2040_vm0, %v7303_v31 }
 0x4ea   : > { %5779 = vmatmul.msk.f32.gmra.mxu0 %vm2040_vm0, %v7310_v32 }
 0x4f2   : > { %5780 = vmatmul.msk.f32.gmra.mxu0 %vm2040_vm0, %v7317_v33 }
 0x4fa   : > { %5781 = vmatmul.msk.f32.gmra.mxu0 %vm2040_vm0, %v7324_v34 }
 0x537   : > { %v7603_v37 = vpop.f32.mrf.mxu0 }
 0x538   : > { %10474 = vst [vmem:[#allocation39_spill] sm:$0xff] %v7603_v37  ;;  %v2590_v37 = vsub.f32 %v5789_v13, %v7392_v4 }
 0x53f   : > { %v2550_v6 = vpop.f32.mrf.mxu0 }
 0x547   : > { %v2553_v3 = vpop.f32.mrf.mxu0 }
 0x54f   : > { %v2556_v44 = vpop.f32.mrf.mxu0 }
 0x550   : > { %v7637_v59 = vadd.f32 %v2556_v44, %v7350_v50  ;;  %v7650_v44 = vadd.f32 %v2550_v6, %v7388_v2 }
 0x552   : > { %10484 = vst [vmem:[#allocation45_spill] sm:$0xff] %v7637_v59 }
 0x553   : > { %10486 = vst [vmem:[#allocation47_spill] sm:$0xff] %v7650_v44 }
 0x557   : > { %v2559_v58 = vpop.f32.mrf.mxu0 }
 0x55f   : > { %v2562_v21 = vpop.f32.mrf.mxu0 }
 0x560   : > { %v7620_v54 = vadd.f32 %v2562_v21, %v10480_v14  ;;  %v2585_v21 = vsub.f32 %v5784_v36, %v7406_v11  ;;  %v5782_v14 = vld [vmem:[%s7372_s28 + $0x80] sm:$0xff] }
 0x562   : > { %10481 = vst [vmem:[#allocation42_spill] sm:$0xff] %v7620_v54 }
 0x567   : > { %v2565_v7 = vpop.f32.mrf.mxu0 }
 0x568   : > { %v7614_v48 = vadd.f32 %v2565_v7, %v7336_v41  ;;  %v2586_v7 = vsub.f32 %v5785_v12, %v7402_v9  ;;  %v7644_v12 = vadd.f32 %v2553_v3, %v7356_v55 }
 0x56a   : > { %10478 = vst [vmem:[#allocation41_spill] sm:$0xff] %v7614_v48  ;;  %v2596_v57 = vadd.f32 %v2588_v42, %v7614_v48 }
 0x56b   : > { %10485 = vst [vmem:[#allocation46_spill] sm:$0xff] %v7644_v12 }
 0x56f   : > { %v2568_v40 = vpop.f32.mrf.mxu0 }
 0x570   : > { %v7608_v61 = vadd.f32 %v2568_v40, %v10475_v35  ;;  %v7627_v35 = vadd.f32 %v2559_v58, %v7344_v46 }
 0x572   : > { %10476 = vst [vmem:[#allocation40_spill] sm:$0xff] %v7608_v61  ;;  %v2597_v40 = vadd.f32 %v2589_v51, %v7608_v61  ;;  %v2595_v51 = vadd.f32 %v2587_v22, %v7620_v54  ;;  %v2584_v61 = vsub.f32 %v5783_v23, %v7416_v19  ;;  %v2594_v42 = vadd.f32 %v2586_v7, %v7627_v35  ;;  %v5805_v54 = vld [vmem:[%s7372_s28 + $0xd8] sm:$0xff] }
 0x573   : > { %10482 = vst [vmem:[#allocation43_spill] sm:$0xff] %v7627_v35  ;;  %v2583_v22 = vsub.f32 %v5782_v14, %v7429_v29  ;;  %v5804_v35 = vld [vmem:[%s7372_s28 + $0xd0] sm:$0xff] }
 0x574   : > { %v2605_v13 = vmul.f32 %v2597_v40, %v7340_v43  ;;  %v2593_v40 = vadd.f32 %v2585_v21, %v7637_v59  ;;  %v2602_v7 = vmul.f32 %v2594_v42, %v7362_v56  ;;  %v10494_v59 = vld [vmem:[#allocation17_spill] sm:$0xff] }
 0x575   : > { %v2591_v6 = vadd.f32 %v2583_v22, %v7650_v44 }
 0x576   : > { %v2613_v3 = vadd.f32 %v2605_v13, %v7348_v49  ;;  %v2601_v48 = vmul.f32 %v2593_v40, %v7399_v8  ;;  %v2610_v13 = vadd.f32 %v2602_v7, %v7438_v62 }
 0x577   : > { %v2571_v0 = vpop.f32.mrf.mxu0 }
 0x578   : > { %v7632_v15 = vadd.f32 %v2571_v0, %v7334_v39  ;;  %v2604_v0 = vmul.f32 %v2596_v57, %v7346_v47  ;;  %v2621_v14 = vmax.f32 %v2613_v3, 0.0  ;;  %v2618_v22 = vmax.f32 %v2610_v13, 0.0  ;;  %v5852_v13 = vld [vmem:[%s7114_s29 + $0x30] sm:$0xff] }
 0x57a   : > { %10483 = vst [vmem:[#allocation44_spill] sm:$0xff] %v7632_v15  ;;  %v2598_v58 = vadd.f32 %v2590_v37, %v7632_v15  ;;  %v2603_v37 = vmul.f32 %v2595_v51, %v7352_v52  ;;  %v2592_v15 = vadd.f32 %v2584_v61, %v7644_v12  ;;  %v2599_v61 = vmul.f32 %v2591_v6, %v7468_v1  ;;  %v10487_v6 = vld [vmem:[#allocation13_spill] sm:$0xff] }
 0x57c   : > { %v2606_v36 = vmul.f32 %v2598_v58, %v7332_v38  ;;  %v2612_v58 = vadd.f32 %v2604_v0, %v7354_v53  ;;  %v2611_v21 = vadd.f32 %v2603_v37, %v7375_v60  ;;  %v2600_v51 = vmul.f32 %v2592_v15, %v7447_v10 }
 0x57d   : > { %v2609_v0 = vadd.f32 %v2601_v48, %v7458_v20  ;;  %v2607_v37 = vadd.f32 %v2599_v61, %v7475_v17 }
 0x57e   : > { %v2614_v23 = vadd.f32 %v2606_v36, %v7342_v45  ;;  %v2620_v36 = vmax.f32 %v2612_v58, 0.0  ;;  %v2619_v42 = vmax.f32 %v2611_v21, 0.0  ;;  %v2608_v40 = vadd.f32 %v2600_v51, %v7472_v16  ;;  %v5792_v58 = vld [vmem:[%s7114_s29 + $0x18] sm:$0xff] }
 0x57f   : > { %v2615_v3 = vmax.f32 %v2607_v37, 0.0 }
 0x580   : > { %v2622_v57 = vmax.f32 %v2614_v23, 0.0  ;;  %v2617_v23 = vmax.f32 %v2609_v0, 0.0  ;;  %v2616_v15 = vmax.f32 %v2608_v40, 0.0 }
 0x582   : > { %2631 = vmatpush.msra.mxu2 %v2622_v57 }
 0x584   : > { %2632 = vmatpush.msra.mxu2 %v2621_v14 }
 0x586   : > { %2633 = vmatpush.msra.mxu2 %v2620_v36 }
 0x588   : > { %2634 = vmatpush.msra.mxu2 %v2619_v42 }
 0x58a   : > { %2635 = vmatpush.msra.mxu2 %v2618_v22 }
 0x58c   : > { %2636 = vmatpush.msra.mxu2 %v2617_v23 }
 0x58e   : > { %2637 = vmatpush.msra.mxu2 %v2616_v15  ;;  %v5808_v15 = vld [vmem:[%s7372_s28 + $0xf0] sm:$0xff] }
 0x590   : > { %2638 = vmatpush.msra.mxu2 %v2615_v3  ;;  %v5807_v3 = vld [vmem:[%s7372_s28 + $0xe8] sm:$0xff] }
 0x591   : > { %5790 = vmatmul.msk.f32.vlgmr.msra.gmra.mxu2 %vm2303_vm1, %v7481_v25 }
 0x614   : > { %v2640_v7 = vpop.f32.mrf.mxu2 }
 0x615   : > { %v2641_v48 = vadd.f32 %v2640_v7, %v7488_v27  ;;  %v10489_v7 = vld [vmem:[#allocation14_spill] sm:$0xff] }
 0x617   : > { %v2643_v57 = vmax.f32 %v2641_v48, 0.0 }
 0x619   : > { %2659 = vmatpush.msrb.mxu2 %v2643_v57  ;;  %v10491_v57 = vld [vmem:[#allocation20_spill] sm:$0xff] }
 0x61a   : > { %5791 = vmatmul.msk.f32.vlgmr.msrb.gmra.mxu2 %vm2040_vm0, %v7495_v5 }
 0x61b   : > { %2681 = vmatpush.msra.mxu2 %v5792_v58  ;;  %v2743_v58 = vsub.f32 %v5808_v15, %v10491_v57  ;;  %v5803_v57 = vld [vmem:[%s7372_s28 + $0xc8] sm:$0xff] }
 0x622   : > { %5793 = vmatmul.msk.f32.vlgmr.msra.gmra.mxu2 %vm2040_vm0, %v10487_v6 }
 0x69d   : > { %v7677_v14 = vpop.f32.mrf.mxu2 }
 0x69e   : > { %10488 = vst [vmem:[#allocation13_spill] sm:$0xff] %v7677_v14 }
 0x6a5   : > { %v2683_v21 = vpop.f32.mrf.mxu2 }
 0x6a6   : > { %v2684_v51 = vadd.f32 %v2683_v21, %v7254_v18  ;;  %v5806_v21 = vld [vmem:[%s7372_s28 + $0xe0] sm:$0xff] }
 0x6a7   : > { %v2741_v44 = vsub.f32 %v5806_v21, %v7382_v63 }
 0x6a8   : > { %v2686_v36 = vmax.f32 %v2684_v51, 0.0  ;;  %v5809_v51 = vld [vmem:[%s7372_s28 + $0xf8] sm:$0xff] }
 0x6a9   : > { %v2744_v14 = vsub.f32 %v5809_v51, %v7392_v4 }
 0x6aa   : > { %2702 = vmatpush.msrb.mxu1 %v2686_v36  ;;  %v10493_v36 = vld [vmem:[#allocation21_spill] sm:$0xff] }
 0x6ab   : > { %5794 = vmatmul.msk.f32.vlgmr.msrb.gmra.mxu1 %vm2040_vm0, %v7266_v24 }
 0x6ac   : > { %3143 = vmatpush.msra.mxu1 %v5852_v13  ;;  %v2742_v13 = vsub.f32 %v5807_v3, %v10493_v36 }
 0x6b3   : > { %5795 = vmatmul.msk.f32.gmra.mxu1 %vm2040_vm0, %v7276_v26 }
 0x6bb   : > { %5796 = vmatmul.msk.f32.gmra.mxu1 %vm2040_vm0, %v7286_v28 }
 0x6c3   : > { %5797 = vmatmul.msk.f32.gmra.mxu1 %vm2040_vm0, %v7296_v30 }
 0x6cb   : > { %5798 = vmatmul.msk.f32.gmra.mxu1 %vm2040_vm0, %v7303_v31 }
 0x6d3   : > { %5799 = vmatmul.msk.f32.gmra.mxu1 %vm2040_vm0, %v7310_v32 }
 0x6db   : > { %5800 = vmatmul.msk.f32.gmra.mxu1 %vm2040_vm0, %v7317_v33 }
 0x6e3   : > { %5801 = vmatmul.msk.f32.gmra.mxu1 %vm2040_vm0, %v7324_v34 }
 0x6eb   : > { %5853 = vmatmul.msk.f32.vlgmr.msra.gmra.mxu1 %vm2040_vm0, %v10487_v6 }
 0x728   : > { %v2704_v61 = vpop.f32.mrf.mxu1 }
 0x730   : > { %v2707_v42 = vpop.f32.mrf.mxu1 }
 0x738   : > { %v2710_v0 = vpop.f32.mrf.mxu1 }
 0x739   : > { %v7731_v21 = vadd.f32 %v2710_v0, %v7350_v50  ;;  %v7744_v0 = vadd.f32 %v2704_v61, %v7388_v2 }
 0x73b   : > { %10498 = vst [vmem:[#allocation53_spill] sm:$0xff] %v7731_v21 }
 0x73c   : > { %10500 = vst [vmem:[#allocation55_spill] sm:$0xff] %v7744_v0 }
 0x740   : > { %v2713_v22 = vpop.f32.mrf.mxu1 }
 0x748   : > { %v2716_v40 = vpop.f32.mrf.mxu1 }
 0x749   : > { %v7714_v12 = vadd.f32 %v2716_v40, %v10494_v59  ;;  %v2739_v40 = vsub.f32 %v5804_v35, %v7406_v11  ;;  %v5802_v59 = vld [vmem:[%s7372_s28 + $0xc0] sm:$0xff] }
 0x74b   : > { %10495 = vst [vmem:[#allocation50_spill] sm:$0xff] %v7714_v12 }
 0x750   : > { %v2719_v23 = vpop.f32.mrf.mxu1 }
 0x751   : > { %v7708_v6 = vadd.f32 %v2719_v23, %v7336_v41  ;;  %v2740_v23 = vsub.f32 %v5805_v54, %v7402_v9  ;;  %v7738_v54 = vadd.f32 %v2707_v42, %v7356_v55 }
 0x753   : > { %10492 = vst [vmem:[#allocation49_spill] sm:$0xff] %v7708_v6  ;;  %v2750_v3 = vadd.f32 %v2742_v13, %v7708_v6 }
 0x754   : > { %10499 = vst [vmem:[#allocation54_spill] sm:$0xff] %v7738_v54 }
 0x758   : > { %v2722_v37 = vpop.f32.mrf.mxu1 }
 0x759   : > { %v7702_v48 = vadd.f32 %v2722_v37, %v10489_v7  ;;  %v7721_v7 = vadd.f32 %v2713_v22, %v7344_v46 }
 0x75b   : > { %10490 = vst [vmem:[#allocation48_spill] sm:$0xff] %v7702_v48  ;;  %v2751_v37 = vadd.f32 %v2743_v58, %v7702_v48  ;;  %v2749_v58 = vadd.f32 %v2741_v44, %v7714_v12  ;;  %v2738_v48 = vsub.f32 %v5803_v57, %v7416_v19  ;;  %v2748_v13 = vadd.f32 %v2740_v23, %v7721_v7  ;;  %v5823_v12 = vld [vmem:[%s7372_s28 + $0x108] sm:$0xff] }
 0x75c   : > { %10496 = vst [vmem:[#allocation51_spill] sm:$0xff] %v7721_v7  ;;  %v2737_v44 = vsub.f32 %v5802_v59, %v7429_v29 }
 0x75d   : > { %v2759_v51 = vmul.f32 %v2751_v37, %v7340_v43  ;;  %v2747_v37 = vadd.f32 %v2739_v40, %v7731_v21  ;;  %v2756_v23 = vmul.f32 %v2748_v13, %v7362_v56 }
 0x75e   : > { %v2745_v61 = vadd.f32 %v2737_v44, %v7744_v0  ;;  %v8009_v0 = vld [vmem:[%s7365_s1 + $0x18] sm:$0xff] }
 0x75f   : > { %v2767_v42 = vadd.f32 %v2759_v51, %v7348_v49  ;;  %v2755_v6 = vmul.f32 %v2747_v37, %v7399_v8  ;;  %v2764_v51 = vadd.f32 %v2756_v23, %v7438_v62 }
 0x760   : > { %v2725_v15 = vpop.f32.mrf.mxu1 }
 0x761   : > { %v7726_v36 = vadd.f32 %v2725_v15, %v7334_v39  ;;  %v2758_v15 = vmul.f32 %v2750_v3, %v7346_v47  ;;  %v2775_v59 = vmax.f32 %v2767_v42, 0.0  ;;  %v2772_v44 = vmax.f32 %v2764_v51, 0.0 }
 0x763   : > { %10497 = vst [vmem:[#allocation52_spill] sm:$0xff] %v7726_v36  ;;  %v2752_v22 = vadd.f32 %v2744_v14, %v7726_v36  ;;  %v2757_v14 = vmul.f32 %v2749_v58, %v7352_v52  ;;  %v2746_v36 = vadd.f32 %v2738_v48, %v7738_v54  ;;  %v2753_v48 = vmul.f32 %v2745_v61, %v7468_v1  ;;  %v7772_v61 = vld [vmem:[%s10446_s5] sm:$0xff] }
 0x764   : > { %v5822_v54 = vld [vmem:[%s7372_s28 + $0x100] sm:$0xff] }
 0x765   : > { %v2760_v35 = vmul.f32 %v2752_v22, %v7332_v38  ;;  %v2766_v22 = vadd.f32 %v2758_v15, %v7354_v53  ;;  %v2765_v40 = vadd.f32 %v2757_v14, %v7375_v60  ;;  %v2754_v58 = vmul.f32 %v2746_v36, %v7447_v10 }
 0x766   : > { %v2763_v15 = vadd.f32 %v2755_v6, %v7458_v20  ;;  %v2761_v14 = vadd.f32 %v2753_v48, %v7475_v17 }
 0x767   : > { %v2768_v57 = vadd.f32 %v2760_v35, %v7342_v45  ;;  %v2774_v35 = vmax.f32 %v2766_v22, 0.0  ;;  %v2773_v13 = vmax.f32 %v2765_v40, 0.0  ;;  %v2762_v37 = vadd.f32 %v2754_v58, %v7472_v16  ;;  %v5812_v22 = vld [vmem:[%s7114_s29 + $0x20] sm:$0xff] }
 0x768   : > { %v2769_v42 = vmax.f32 %v2761_v14, 0.0  ;;  %v3145_v40 = vpop.f32.mrf.mxu1  ;;  %v10502_v14 = vld [vmem:[#allocation14_spill] sm:$0xff] }
 0x769   : > { %v2776_v3 = vmax.f32 %v2768_v57, 0.0  ;;  %v2771_v57 = vmax.f32 %v2763_v15, 0.0  ;;  %v2770_v36 = vmax.f32 %v2762_v37, 0.0 }
 0x76b   : > { %2785 = vmatpush.msra.mxu3 %v2776_v3 }
 0x76d   : > { %2786 = vmatpush.msra.mxu3 %v2775_v59 }
 0x76f   : > { %2787 = vmatpush.msra.mxu3 %v2774_v35  ;;  %v7779_v35 = vadd.f32 %v3145_v40, %v7254_v18  ;;  %v5824_v40 = vld [vmem:[%s7372_s28 + $0x110] sm:$0xff] }
 0x771   : > { %2788 = vmatpush.msra.mxu3 %v2773_v13  ;;  %v10282_v13 = vmax.f32 %v7779_v35, 0.0 }
 0x773   : > { %2789 = vmatpush.msra.mxu3 %v2772_v44 }
 0x775   : > { %2790 = vmatpush.msra.mxu3 %v2771_v57  ;;  %v5827_v57 = vld [vmem:[%s7372_s28 + $0x128] sm:$0xff] }
 0x777   : > { %2791 = vmatpush.msra.mxu3 %v2770_v36  ;;  %v10504_v36 = vld [vmem:[#allocation20_spill] sm:$0xff] }
 0x779   : > { %2792 = vmatpush.msra.mxu3 %v2769_v42  ;;  %v5826_v42 = vld [vmem:[%s7372_s28 + $0x120] sm:$0xff] }
 0x77a   : > { %5810 = vmatmul.msk.f32.vlgmr.msra.gmra.mxu3 %vm2303_vm1, %v7481_v25 }
 0x7fd   : > { %v2794_v23 = vpop.f32.mrf.mxu3 }
 0x7fe   : > { %v2795_v6 = vadd.f32 %v2794_v23, %v7488_v27  ;;  %v5829_v23 = vld [vmem:[%s7372_s28 + $0x138] sm:$0xff] }
 0x800   : > { %v2797_v3 = vmax.f32 %v2795_v6, 0.0  ;;  %v10506_v6 = vld [vmem:[#allocation21_spill] sm:$0xff] }
 0x802   : > { %2813 = vmatpush.msrb.mxu2 %v2797_v3  ;;  %v2896_v3 = vsub.f32 %v5827_v57, %v10506_v6 }
 0x803   : > { %5811 = vmatmul.msk.f32.vlgmr.msrb.gmra.mxu2 %vm2040_vm0, %v7495_v5 }
 0x804   : > { %2835 = vmatpush.msra.mxu2 %v5812_v22  ;;  %v5825_v22 = vld [vmem:[%s7372_s28 + $0x118] sm:$0xff] }
 0x80b   : > { %5813 = vmatmul.msk.f32.vlgmr.msra.gmra.mxu2 %vm2040_vm0, %v7772_v61 }
 0x886   : > { %v7776_v59 = vpop.f32.mrf.mxu2 }
 0x887   : > { %10501 = vst [vmem:[#allocation56_spill] sm:$0xff] %v7776_v59 }
 0x88e   : > { %v2837_v58 = vpop.f32.mrf.mxu2 }
 0x88f   : > { %v2838_v51 = vadd.f32 %v2837_v58, %v7254_v18  ;;  %v10507_v58 = vld [vmem:[#allocation17_spill] sm:$0xff] }
 0x891   : > { %v2840_v48 = vmax.f32 %v2838_v51, 0.0 }
 0x893   : > { %2856 = vmatpush.msrb.mxu3 %v2840_v48  ;;  %v2895_v48 = vsub.f32 %v5826_v42, %v7382_v63 }
 0x894   : > { %5814 = vmatmul.msk.f32.vlgmr.msrb.gmra.mxu3 %vm2040_vm0, %v7266_v24 }
 0x895   : > { %6184 = vmatpush.msra.mxu3 %v10282_v13  ;;  %v2898_v13 = vsub.f32 %v5829_v23, %v7392_v4 }
 0x89c   : > { %5815 = vmatmul.msk.f32.gmra.mxu3 %vm2040_vm0, %v7276_v26 }
 0x8a4   : > { %5816 = vmatmul.msk.f32.gmra.mxu3 %vm2040_vm0, %v7286_v28 }
 0x8ac   : > { %5817 = vmatmul.msk.f32.gmra.mxu3 %vm2040_vm0, %v7296_v30 }
 0x8b4   : > { %5818 = vmatmul.msk.f32.gmra.mxu3 %vm2040_vm0, %v7303_v31 }
 0x8bc   : > { %5819 = vmatmul.msk.f32.gmra.mxu3 %vm2040_vm0, %v7310_v32 }
 0x8c4   : > { %5820 = vmatmul.msk.f32.gmra.mxu3 %vm2040_vm0, %v7317_v33 }
 0x8cc   : > { %5821 = vmatmul.msk.f32.gmra.mxu3 %vm2040_vm0, %v7324_v34 }
 0x8d4   : > { %5858 = vmatmul.msk.f32.vlgmr.msra.gmra.mxu3 %vm2040_vm0, %v7303_v31  ;;  %v5828_v31 = vld [vmem:[%s7372_s28 + $0x130] sm:$0xff] }
 0x8dc   : > { %5859 = vmatmul.msk.f32.gmra.mxu3 %vm2040_vm0, %v7310_v32 }
 0x8e4   : > { %5860 = vmatmul.msk.f32.gmra.mxu3 %vm2040_vm0, %v7317_v33  ;;  %v2897_v33 = vsub.f32 %v5828_v31, %v10504_v36 }
 0x8ec   : > { %5861 = vmatmul.msk.f32.gmra.mxu3 %vm2040_vm0, %v7324_v34 }
 0x917   : > { %v2858_v24 = vpop.f32.mrf.mxu3 }
 0x91f   : > { %v2861_v26 = vpop.f32.mrf.mxu3 }
 0x927   : > { %v2864_v28 = vpop.f32.mrf.mxu3 }
 0x928   : > { %v7841_v42 = vadd.f32 %v2864_v28, %v7350_v50  ;;  %v7854_v28 = vadd.f32 %v2858_v24, %v7388_v2 }
 0x92a   : > { %10511 = vst [vmem:[#allocation60_spill] sm:$0xff] %v7841_v42 }
 0x92b   : > { %10513 = vst [vmem:[#allocation62_spill] sm:$0xff] %v7854_v28 }
 0x92f   : > { %v2867_v30 = vpop.f32.mrf.mxu3 }
 0x930   : > { %v7831_v7 = vadd.f32 %v2867_v30, %v7344_v46 }
 0x932   : > { %10509 = vst [vmem:[#allocation58_spill] sm:$0xff] %v7831_v7 }
 0x937   : > { %v2870_v15 = vpop.f32.mrf.mxu3 }
 0x938   : > { %v7824_v51 = vadd.f32 %v2870_v15, %v10507_v58  ;;  %v2893_v15 = vsub.f32 %v5824_v40, %v7406_v11  ;;  %v2891_v40 = vsub.f32 %v5822_v54, %v7429_v29 }
 0x93a   : > { %10508 = vst [vmem:[#allocation21_spill] sm:$0xff] %v7824_v51  ;;  %v2899_v24 = vadd.f32 %v2891_v40, %v7854_v28 }
 0x93f   : > { %v2873_v44 = vpop.f32.mrf.mxu3 }
 0x940   : > { %v7818_v34 = vadd.f32 %v2873_v44, %v7336_v41  ;;  %v2894_v44 = vsub.f32 %v5825_v22, %v7402_v9  ;;  %v7848_v9 = vadd.f32 %v2861_v26, %v7356_v55 }
 0x942   : > { %10505 = vst [vmem:[#allocation20_spill] sm:$0xff] %v7818_v34  ;;  %v2904_v57 = vadd.f32 %v2896_v3, %v7818_v34  ;;  %v2902_v3 = vadd.f32 %v2894_v44, %v7831_v7  ;;  %v5844_v34 = vld [vmem:[%s7372_s28 + $0x150] sm:$0xff] }
 0x943   : > { %10512 = vst [vmem:[#allocation61_spill] sm:$0xff] %v7848_v9 }
 0x944   : > { %v2912_v22 = vmul.f32 %v2904_v57, %v7346_v47 }
 0x946   : > { %v2920_v57 = vadd.f32 %v2912_v22, %v7354_v53 }
 0x947   : > { %v2876_v37 = vpop.f32.mrf.mxu3 }
 0x948   : > { %v7812_v32 = vadd.f32 %v2876_v37, %v10502_v14 }
 0x94a   : > { %10503 = vst [vmem:[#allocation57_spill] sm:$0xff] %v7812_v32  ;;  %v2905_v37 = vadd.f32 %v2897_v33, %v7812_v32  ;;  %v2903_v33 = vadd.f32 %v2895_v48, %v7824_v51  ;;  %v2892_v32 = vsub.f32 %v5823_v12, %v7416_v19  ;;  %v2901_v48 = vadd.f32 %v2893_v15, %v7841_v42  ;;  %v7996_v51 = vld [vmem:[%s7365_s1 + $0x20] sm:$0xff]  ;;  %v8001_v42 = vld [vmem:[%s7365_s1 + $0x38] sm:$0xff] }
 0x94b   : > { %10524 = vst [vmem:[#allocation73_spill] sm:$0xff] %v7996_v51 }
 0x94c   : > { %v2913_v23 = vmul.f32 %v2905_v37, %v7340_v43  ;;  %v2900_v37 = vadd.f32 %v2892_v32, %v7848_v9  ;;  %v2909_v29 = vmul.f32 %v2901_v48, %v7399_v8  ;;  %v2907_v32 = vmul.f32 %v2899_v24, %v7468_v1  ;;  %v5867_v24 = vld [vmem:[%s7372_s28 + $0x1a8] sm:$0xff]  ;;  %10525 = vst [vmem:[#allocation74_spill] sm:$0xff] %v8001_v42 }
 0x94e   : > { %v2921_v12 = vadd.f32 %v2913_v23, %v7348_v49  ;;  %v2928_v23 = vmax.f32 %v2920_v57, 0.0  ;;  %v2917_v22 = vadd.f32 %v2909_v29, %v7458_v20  ;;  %v5832_v57 = vld [vmem:[%s7114_s29 + $0x28] sm:$0xff] }
 0x94f   : > { %v2879_v31 = vpop.f32.mrf.mxu3 }
 0x950   : > { %v7836_v21 = vadd.f32 %v2879_v31, %v7334_v39  ;;  %v2910_v31 = vmul.f32 %v2902_v3, %v7362_v56  ;;  %v2929_v54 = vmax.f32 %v2921_v12, 0.0 }
 0x952   : > { %10510 = vst [vmem:[#allocation59_spill] sm:$0xff] %v7836_v21  ;;  %v2906_v30 = vadd.f32 %v2898_v13, %v7836_v21  ;;  %v2911_v13 = vmul.f32 %v2903_v33, %v7352_v52  ;;  %v2908_v33 = vmul.f32 %v2900_v37, %v7447_v10  ;;  %v5845_v21 = vld [vmem:[%s7372_s28 + $0x158] sm:$0xff] }
 0x954   : > { %v2914_v11 = vmul.f32 %v2906_v30, %v7332_v38  ;;  %v2919_v15 = vadd.f32 %v2911_v13, %v7375_v60  ;;  %v2918_v30 = vadd.f32 %v2910_v31, %v7438_v62  ;;  %v2916_v48 = vadd.f32 %v2908_v33, %v7472_v16  ;;  %v5869_v33 = vld [vmem:[%s7372_s28 + $0x1b8] sm:$0xff] }
 0x955   : > { %v2925_v13 = vmax.f32 %v2917_v22, 0.0  ;;  %v3206_v22 = vsub.f32 %v5869_v33, %v7392_v4 }
 0x956   : > { %v2922_v19 = vadd.f32 %v2914_v11, %v7342_v45  ;;  %v2927_v3 = vmax.f32 %v2919_v15, 0.0  ;;  %v2926_v40 = vmax.f32 %v2918_v30, 0.0  ;;  %v2924_v12 = vmax.f32 %v2916_v48, 0.0  ;;  %v5866_v15 = vld [vmem:[%s7372_s28 + $0x1a0] sm:$0xff] }
 0x957   : > { %v3178_v26 = vpop.f32.mrf.mxu3  ;;  %v3204_v30 = vsub.f32 %v5867_v24, %v10506_v6 }
 0x958   : > { %v2930_v44 = vmax.f32 %v2922_v19, 0.0  ;;  %v2915_v19 = vadd.f32 %v2907_v32, %v7475_v17  ;;  %v7889_v32 = vadd.f32 %v3178_v26, %v10507_v58 }
 0x95a   : > { %2939 = vmatpush.msrb.mxu2 %v2930_v44  ;;  %v2923_v37 = vmax.f32 %v2915_v19, 0.0  ;;  %v5868_v44 = vld [vmem:[%s7372_s28 + $0x1b0] sm:$0xff]  ;;  %10516 = vst [vmem:[#allocation65_spill] sm:$0xff] %v7889_v32 }
 0x95c   : > { %2940 = vmatpush.msrb.mxu2 %v2929_v54  ;;  %v3205_v54 = vsub.f32 %v5868_v44, %v10504_v36 }
 0x95e   : > { %2941 = vmatpush.msrb.mxu2 %v2928_v23 }
 0x95f   : > { %v3181_v11 = vpop.f32.mrf.mxu3 }
 0x960   : > { %2942 = vmatpush.msrb.mxu2 %v2927_v3  ;;  %v7885_v23 = vadd.f32 %v3181_v11, %v7336_v41  ;;  %v3203_v3 = vsub.f32 %v5866_v15, %v7382_v63 }
 0x962   : > { %2943 = vmatpush.msrb.mxu2 %v2926_v40  ;;  %10515 = vst [vmem:[#allocation64_spill] sm:$0xff] %v7885_v23  ;;  %v3212_v36 = vadd.f32 %v3204_v30, %v7885_v23  ;;  %v3211_v6 = vadd.f32 %v3203_v3, %v7889_v32  ;;  %v7987_v23 = vld [vmem:[%s7365_s1 + $0x28] sm:$0xff] }
 0x963   : > { %10522 = vst [vmem:[#allocation71_spill] sm:$0xff] %v7987_v23 }
 0x964   : > { %2944 = vmatpush.msrb.mxu2 %v2925_v13  ;;  %v3220_v63 = vmul.f32 %v3212_v36, %v7346_v47  ;;  %v3219_v4 = vmul.f32 %v3211_v6, %v7352_v52  ;;  %v7924_v36 = vld [vmem:[%s10448_s7 + $0x8] sm:$0xff]  ;;  %v7931_v6 = vld [vmem:[%s10448_s7 + $0x10] sm:$0xff] }
 0x966   : > { %2945 = vmatpush.msrb.mxu2 %v2924_v12 }
 0x967   : > { %v3184_v31 = vpop.f32.mrf.mxu3 }
 0x968   : > { %2946 = vmatpush.msrb.mxu2 %v2923_v37  ;;  %v7879_v29 = vadd.f32 %v3184_v31, %v10502_v14  ;;  %v3228_v31 = vadd.f32 %v3220_v63, %v7354_v53  ;;  %v7952_v63 = vld [vmem:[%s10448_s7 + $0x28] sm:$0xff] }
 0x969   : > { %5830 = vmatmul.msk.f32.vlgmr.msrb.gmra.mxu2 %vm2303_vm1, %v7481_v25 }
 0x96a   : > { %10514 = vst [vmem:[#allocation63_spill] sm:$0xff] %v7879_v29  ;;  %2989 = vmatpush.msra.mxu2 %v5832_v57  ;;  %v3213_v25 = vadd.f32 %v3205_v54, %v7879_v29  ;;  %v3227_v57 = vadd.f32 %v3219_v4, %v7375_v60  ;;  %v3236_v24 = vmax.f32 %v3228_v31, 0.0  ;;  %v7966_v4 = vld [vmem:[%s10448_s7 + $0x38] sm:$0xff] }
 0x96c   : > { %v3221_v26 = vmul.f32 %v3213_v25, %v7340_v43  ;;  %v3235_v54 = vmax.f32 %v3227_v57, 0.0 }
 0x96e   : > { %v3229_v12 = vadd.f32 %v3221_v26, %v7348_v49  ;;  %v7938_v26 = vld [vmem:[%s10448_s7 + $0x18] sm:$0xff] }
 0x96f   : > { %v3187_v40 = vpop.f32.mrf.mxu3 }
 0x970   : > { %v7896_v48 = vadd.f32 %v3187_v40, %v7334_v39  ;;  %v3237_v44 = vmax.f32 %v3229_v12, 0.0  ;;  %v7917_v40 = vld [vmem:[%s10448_s7] sm:$0xff] }
 0x971   : > { %5833 = vmatmul.msk.f32.vlgmr.msra.gmra.mxu2 %vm2040_vm0, %v7772_v61 }
 0x972   : > { %10517 = vst [vmem:[#allocation66_spill] sm:$0xff] %v7896_v48  ;;  %v3214_v11 = vadd.f32 %v3206_v22, %v7896_v48  ;;  %v5849_v48 = vld [vmem:[%s7372_s28 + $0x178] sm:$0xff] }
 0x974   : > { %v3222_v13 = vmul.f32 %v3214_v11, %v7332_v38  ;;  %v7945_v11 = vld [vmem:[%s10448_s7 + $0x20] sm:$0xff] }
 0x976   : > { %v3230_v19 = vadd.f32 %v3222_v13, %v7342_v45  ;;  %v7959_v13 = vld [vmem:[%s10448_s7 + $0x30] sm:$0xff] }
 0x978   : > { %v3238_v37 = vmax.f32 %v3230_v19, 0.0 }
 0x97a   : > { %3247 = vmatpush.msrb.mxu1 %v3238_v37 }
 0x97c   : > { %3248 = vmatpush.msrb.mxu1 %v3237_v44 }
 0x97e   : > { %3249 = vmatpush.msrb.mxu1 %v3236_v24 }
 0x980   : > { %3250 = vmatpush.msrb.mxu1 %v3235_v54 }
 0x9ec   : > { %v2948_v15 = vpop.f32.mrf.mxu2 }
 0x9ed   : > { %v2949_v33 = vadd.f32 %v2948_v15, %v7488_v27  ;;  %v5848_v15 = vld [vmem:[%s7372_s28 + $0x170] sm:$0xff] }
 0x9ef   : > { %v2951_v30 = vmax.f32 %v2949_v33, 0.0  ;;  %v5847_v33 = vld [vmem:[%s7372_s28 + $0x168] sm:$0xff] }
 0x9f0   : > { %v3050_v32 = vsub.f32 %v5847_v33, %v7987_v23  ;;  %v5843_v33 = vld [vmem:[%s7372_s28 + $0x148] sm:$0xff] }
 0x9f1   : > { %2967 = vmatpush.msrb.mxu0 %v2951_v30 }
 0x9f2   : > { %5831 = vmatmul.msk.f32.vlgmr.msrb.gmra.mxu0 %vm2040_vm0, %v7495_v5 }
 0x9f4   : > { %v2991_v3 = vpop.f32.mrf.mxu2 }
 0x9f5   : > { %v2992_v25 = vadd.f32 %v2991_v3, %v7254_v18  ;;  %v7978_v3 = vld [vmem:[%s7365_s1 + $0x30] sm:$0xff] }
 0x9f6   : > { %10520 = vst [vmem:[#allocation69_spill] sm:$0xff] %v7978_v3 }
 0x9f7   : > { %v2994_v22 = vmax.f32 %v2992_v25, 0.0  ;;  %v3051_v25 = vsub.f32 %v5848_v15, %v7978_v3 }
 0x9f9   : > { %3010 = vmatpush.msra.mxu0 %v2994_v22  ;;  %v5846_v22 = vld [vmem:[%s7372_s28 + $0x160] sm:$0xff] }
 0x9fa   : > { %5834 = vmatmul.msk.f32.vlgmr.msra.gmra.mxu0 %vm2040_vm0, %v7917_v40  ;;  %v3049_v15 = vsub.f32 %v5846_v22, %v7996_v51  ;;  %v8028_v51 = vld [vmem:[%s7365_s1 + $0x8] sm:$0xff] }
 0xa02   : > { %5835 = vmatmul.msk.f32.gmra.mxu0 %vm2040_vm0, %v7924_v36 }
 0xa0a   : > { %5836 = vmatmul.msk.f32.gmra.mxu0 %vm2040_vm0, %v7931_v6 }
 0xa12   : > { %5837 = vmatmul.msk.f32.gmra.mxu0 %vm2040_vm0, %v7938_v26 }
 0xa1a   : > { %5838 = vmatmul.msk.f32.gmra.mxu0 %vm2040_vm0, %v7945_v11 }
 0xa22   : > { %5839 = vmatmul.msk.f32.gmra.mxu0 %vm2040_vm0, %v7952_v63 }
 0xa2a   : > { %5840 = vmatmul.msk.f32.gmra.mxu0 %vm2040_vm0, %v7959_v13 }
 0xa32   : > { %5841 = vmatmul.msk.f32.gmra.mxu0 %vm2040_vm0, %v7966_v4 }
 0xa6f   : > { %v7970_v19 = vpop.f32.mrf.mxu0 }
 0xa70   : > { %10518 = vst [vmem:[#allocation67_spill] sm:$0xff] %v7970_v19 }
 0xa77   : > { %v3012_v12 = vpop.f32.mrf.mxu0 }
 0xa7f   : > { %v3015_v37 = vpop.f32.mrf.mxu0 }
 0xa87   : > { %v3018_v31 = vpop.f32.mrf.mxu0 }
 0xa88   : > { %v8022_v59 = vadd.f32 %v3018_v31, %v7350_v50 }
 0xa8a   : > { %10528 = vst [vmem:[#allocation77_spill] sm:$0xff] %v8022_v59 }
 0xa8f   : > { %v3021_v44 = vpop.f32.mrf.mxu0 }
 0xa90   : > { %v8006_v28 = vadd.f32 %v3021_v44, %v7344_v46 }
 0xa92   : > { %10526 = vst [vmem:[#allocation75_spill] sm:$0xff] %v8006_v28 }
 0xa97   : > { %v3024_v57 = vpop.f32.mrf.mxu0 }
 0xa9f   : > { %v3027_v24 = vpop.f32.mrf.mxu0 }
 0xaa0   : > { %v7984_v29 = vadd.f32 %v3027_v24, %v7336_v41  ;;  %v3052_v24 = vsub.f32 %v5849_v48, %v8001_v42  ;;  %v5842_v48 = vld [vmem:[%s7372_s28 + $0x140] sm:$0xff] }
 0xaa2   : > { %10521 = vst [vmem:[#allocation70_spill] sm:$0xff] %v7984_v29  ;;  %v3058_v19 = vadd.f32 %v3050_v32, %v7984_v29  ;;  %v3046_v32 = vsub.f32 %v5843_v33, %v8028_v51 }
 0xaa7   : > { %v3030_v54 = vpop.f32.mrf.mxu0 }
 0xaa8   : > { %v7975_v30 = vadd.f32 %v3030_v54, %v10502_v14  ;;  %v7993_v54 = vadd.f32 %v3024_v57, %v10507_v58  ;;  %v3048_v57 = vsub.f32 %v5845_v21, %v8009_v0 }
 0xaaa   : > { %10519 = vst [vmem:[#allocation68_spill] sm:$0xff] %v7975_v30  ;;  %v3059_v7 = vadd.f32 %v3051_v25, %v7975_v30  ;;  %v8017_v25 = vld [vmem:[%s7365_s1 + $0x10] sm:$0xff]  ;;  %v3057_v44 = vadd.f32 %v3049_v15, %v7993_v54  ;;  %v3056_v29 = vadd.f32 %v3048_v57, %v8006_v28  ;;  %v8041_v15 = vld [vmem:[%s7365_s1] sm:$0xff] }
 0xaab   : > { %10523 = vst [vmem:[#allocation72_spill] sm:$0xff] %v7993_v54  ;;  %v3047_v30 = vsub.f32 %v5844_v34, %v8017_v25  ;;  %v3066_v34 = vmul.f32 %v3058_v19, %v7346_v47 }
 0xaac   : > { %v3067_v42 = vmul.f32 %v3059_v7, %v7340_v43  ;;  %v3045_v7 = vsub.f32 %v5842_v48, %v8041_v15  ;;  %v3065_v33 = vmul.f32 %v3057_v44, %v7352_v52  ;;  %v3064_v19 = vmul.f32 %v3056_v29, %v7362_v56 }
 0xaaf   : > { %v3033_v9 = vpop.f32.mrf.mxu0 }
 0xab0   : > { %v8014_v22 = vadd.f32 %v3033_v9, %v7334_v39  ;;  %v8032_v9 = vadd.f32 %v3015_v37, %v7356_v55  ;;  %v8038_v39 = vadd.f32 %v3012_v12, %v7388_v2  ;;  %v3074_v12 = vadd.f32 %v3066_v34, %v7354_v53 }
 0xab2   : > { %10527 = vst [vmem:[#allocation76_spill] sm:$0xff] %v8014_v22  ;;  %v3060_v21 = vadd.f32 %v3052_v24, %v8014_v22  ;;  %v3055_v24 = vadd.f32 %v3047_v30, %v8022_v59  ;;  %v3075_v22 = vadd.f32 %v3067_v42, %v7348_v49  ;;  %v3054_v57 = vadd.f32 %v3046_v32, %v8032_v9 }
 0xab3   : > { %10529 = vst [vmem:[#allocation78_spill] sm:$0xff] %v8032_v9  ;;  %v3053_v54 = vadd.f32 %v3045_v7, %v8038_v39  ;;  %v3073_v30 = vadd.f32 %v3065_v33, %v7375_v60  ;;  %v3072_v42 = vadd.f32 %v3064_v19, %v7438_v62  ;;  %v10541_v9 = vld [vmem:[#allocation73_spill] sm:$0xff] }
 0xab4   : > { %v3068_v31 = vmul.f32 %v3060_v21, %v7332_v38  ;;  %10530 = vst [vmem:[#allocation79_spill] sm:$0xff] %v8038_v39  ;;  %v3063_v28 = vmul.f32 %v3055_v24, %v7399_v8  ;;  %v3083_v48 = vmax.f32 %v3075_v22, 0.0  ;;  %v3062_v44 = vmul.f32 %v3054_v57, %v7447_v10 }
 0xab5   : > { %v3061_v32 = vmul.f32 %v3053_v54, %v7468_v1  ;;  %v3081_v29 = vmax.f32 %v3073_v30, 0.0  ;;  %v3080_v7 = vmax.f32 %v3072_v42, 0.0  ;;  %v8063_v54 = vld [vmem:[%s10232_s11] sm:$0xff]  ;;  %v5863_v42 = vld [vmem:[%s7372_s28 + $0x188] sm:$0xff] }
 0xab6   : > { %v3076_v37 = vadd.f32 %v3068_v31, %v7342_v45  ;;  %v3082_v31 = vmax.f32 %v3074_v12, 0.0  ;;  %v3071_v34 = vadd.f32 %v3063_v28, %v7458_v20  ;;  %v3070_v24 = vadd.f32 %v3062_v44, %v7472_v16  ;;  %v5912_v12 = vld [vmem:[%s7114_s29 + $0x48] sm:$0xff] }
 0xab7   : > { %v3069_v33 = vadd.f32 %v3061_v32, %v7475_v17 }
 0xab8   : > { %v3084_v21 = vmax.f32 %v3076_v37, 0.0  ;;  %v3079_v22 = vmax.f32 %v3071_v34, 0.0  ;;  %v3078_v37 = vmax.f32 %v3070_v24, 0.0  ;;  %v5862_v34 = vld [vmem:[%s7372_s28 + $0x180] sm:$0xff] }
 0xab9   : > { %v3077_v57 = vmax.f32 %v3069_v33, 0.0 }
 0xaba   : > { %3093 = vmatpush.msrb.mxu2 %v3084_v21 }
 0xabc   : > { %3094 = vmatpush.msrb.mxu2 %v3083_v48  ;;  %v10531_v48 = vmax.f32 %v7779_v35, 0.0 }
 0xabe   : > { %3095 = vmatpush.msrb.mxu2 %v3082_v31  ;;  %v5864_v31 = vld [vmem:[%s7372_s28 + $0x190] sm:$0xff] }
 0xac0   : > { %3096 = vmatpush.msrb.mxu2 %v3081_v29  ;;  %v3201_v29 = vsub.f32 %v5864_v31, %v8017_v25 }
 0xac2   : > { %3097 = vmatpush.msrb.mxu2 %v3080_v7  ;;  %v5865_v7 = vld [vmem:[%s7372_s28 + $0x198] sm:$0xff] }
 0xac4   : > { %3098 = vmatpush.msrb.mxu2 %v3079_v22  ;;  %v3200_v22 = vsub.f32 %v5863_v42, %v8028_v51 }
 0xac6   : > { %3099 = vmatpush.msrb.mxu2 %v3078_v37  ;;  %v3199_v37 = vsub.f32 %v5862_v34, %v8041_v15 }
 0xac8   : > { %3100 = vmatpush.msrb.mxu2 %v3077_v57 }
 0xac9   : > { %5850 = vmatmul.msk.f32.vlgmr.msrb.gmra.mxu2 %vm2303_vm1, %v8063_v54 }
 0xb4c   : > { %v3102_v28 = vpop.f32.mrf.mxu2 }
 0xb4d   : > { %v3103_v19 = vadd.f32 %v3102_v28, %v7488_v27  ;;  %v3202_v28 = vsub.f32 %v5865_v7, %v8009_v0 }
 0xb4f   : > { %v3105_v21 = vmax.f32 %v3103_v19, 0.0 }
 0xb51   : > { %3121 = vmatpush.msra.mxu2 %v3105_v21 }
 0xb52   : > { %5851 = vmatmul.msk.f32.vlgmr.msra.gmra.mxu2 %vm2040_vm0, %v7495_v5 }
 0xb53   : > { %3164 = vmatpush.msrb.mxu2 %v10531_v48 }
 0xb55   : > { %3605 = vmatpush.msra.mxu2 %v5912_v12 }
 0xb5a   : > { %5854 = vmatmul.msk.f32.vlgmr.msrb.gmra.mxu2 %vm2040_vm0, %v7917_v40 }
 0xb62   : > { %5855 = vmatmul.msk.f32.gmra.mxu2 %vm2040_vm0, %v7924_v36 }
 0xb6a   : > { %5856 = vmatmul.msk.f32.gmra.mxu2 %vm2040_vm0, %v7931_v6 }
 0xb72   : > { %5857 = vmatmul.msk.f32.gmra.mxu2 %vm2040_vm0, %v7938_v26 }
 0xb7a   : > { %5913 = vmatmul.msk.f32.vlgmr.msra.gmra.mxu2 %vm2040_vm0, %v7772_v61 }
 0xbd5   : > { %v8083_v5 = vpop.f32.mrf.mxu2 }
 0xbd6   : > { %10532 = vst [vmem:[#allocation80_spill] sm:$0xff] %v8083_v5 }
 0xbdd   : > { %v3166_v35 = vpop.f32.mrf.mxu2 }
 0xbde   : > { %v8098_v33 = vadd.f32 %v3166_v35, %v7388_v2 }
 0xbe0   : > { %10535 = vst [vmem:[#allocation83_spill] sm:$0xff] %v8098_v33  ;;  %v3207_v48 = vadd.f32 %v3199_v37, %v8098_v33  ;;  %v5884_v33 = vld [vmem:[%s7372_s28 + $0x1d0] sm:$0xff] }
 0xbe2   : > { %v3215_v42 = vmul.f32 %v3207_v48, %v7468_v1 }
 0xbe5   : > { %v3169_v30 = vpop.f32.mrf.mxu2 }
 0xbe6   : > { %v8094_v24 = vadd.f32 %v3169_v30, %v7356_v55 }
 0xbe8   : > { %10534 = vst [vmem:[#allocation82_spill] sm:$0xff] %v8094_v24  ;;  %v3208_v21 = vadd.f32 %v3200_v22, %v8094_v24  ;;  %v5885_v24 = vld [vmem:[%s7372_s28 + $0x1d8] sm:$0xff] }
 0xbed   : > { %v3172_v44 = vpop.f32.mrf.mxu2 }
 0xbee   : > { %v8088_v32 = vadd.f32 %v3172_v44, %v7350_v50  ;;  %v3216_v44 = vmul.f32 %v3208_v21, %v7447_v10  ;;  %v5872_v21 = vld [vmem:[%s7114_s29 + $0x38] sm:$0xff] }
 0xbf0   : > { %10533 = vst [vmem:[#allocation81_spill] sm:$0xff] %v8088_v32  ;;  %v3209_v57 = vadd.f32 %v3201_v29, %v8088_v32  ;;  %v3224_v22 = vadd.f32 %v3216_v44, %v7472_v16  ;;  %v8126_v44 = vld [vmem:[%s10234_s13] sm:$0xff] }
 0xbf2   : > { %v3217_v30 = vmul.f32 %v3209_v57, %v7399_v8  ;;  %v3223_v57 = vadd.f32 %v3215_v42, %v7475_v17 }
 0xbf4   : > { %v3225_v34 = vadd.f32 %v3217_v30, %v7458_v20 }
 0xbf5   : > { %v3175_v19 = vpop.f32.mrf.mxu2 }
 0xbf6   : > { %v8105_v12 = vadd.f32 %v3175_v19, %v7344_v46  ;;  %v3233_v37 = vmax.f32 %v3225_v34, 0.0  ;;  %v3232_v19 = vmax.f32 %v3224_v22, 0.0 }
 0xbf8   : > { %10536 = vst [vmem:[#allocation84_spill] sm:$0xff] %v8105_v12  ;;  %v3210_v35 = vadd.f32 %v3202_v28, %v8105_v12  ;;  %v3231_v28 = vmax.f32 %v3223_v57, 0.0 }
 0xbfa   : > { %v3218_v31 = vmul.f32 %v3210_v35, %v7362_v56 }
 0xbfc   : > { %v3226_v29 = vadd.f32 %v3218_v31, %v7438_v62 }
 0xbfe   : > { %v3234_v7 = vmax.f32 %v3226_v29, 0.0 }
 0xc00   : > { %3251 = vmatpush.msrb.mxu1 %v3234_v7 }
 0xc02   : > { %3252 = vmatpush.msrb.mxu1 %v3233_v37 }
 0xc04   : > { %3253 = vmatpush.msrb.mxu1 %v3232_v19 }
 0xc06   : > { %3254 = vmatpush.msrb.mxu1 %v3231_v28 }
 0xc07   : > { %5870 = vmatmul.msk.f32.vlgmr.msrb.gmra.mxu1 %vm2303_vm1, %v8063_v54 }
 0xc08   : > { %3297 = vmatpush.msra.mxu1 %v5872_v21 }
 0xc0f   : > { %5873 = vmatmul.msk.f32.vlgmr.msra.gmra.mxu1 %vm2040_vm0, %v7772_v61 }
 0xc84   : > { %v3256_v48 = vpop.f32.mrf.mxu1 }
 0xc85   : > { %v3257_v30 = vadd.f32 %v3256_v48, %v7488_v27  ;;  %v5888_v48 = vld [vmem:[%s7372_s28 + $0x1f0] sm:$0xff] }
 0xc87   : > { %v3259_v35 = vmax.f32 %v3257_v30, 0.0  ;;  %v5887_v30 = vld [vmem:[%s7372_s28 + $0x1e8] sm:$0xff] }
 0xc88   : > { %v3358_v32 = vsub.f32 %v5887_v30, %v7987_v23  ;;  %v10544_v23 = vld [vmem:[#allocation15_spill] sm:$0xff] }
 0xc89   : > { %3275 = vmatpush.msrb.mxu3 %v3259_v35 }
 0xc8a   : > { %5871 = vmatmul.msk.f32.vlgmr.msrb.gmra.mxu3 %vm2040_vm0, %v8126_v44 }
 0xc8c   : > { %v3299_v31 = vpop.f32.mrf.mxu1 }
 0xc8d   : > { %v3300_v42 = vadd.f32 %v3299_v31, %v7254_v18  ;;  %v3359_v31 = vsub.f32 %v5888_v48, %v7978_v3  ;;  %v5883_v3 = vld [vmem:[%s7372_s28 + $0x1c8] sm:$0xff] }
 0xc8f   : > { %v3302_v29 = vmax.f32 %v3300_v42, 0.0  ;;  %v5886_v42 = vld [vmem:[%s7372_s28 + $0x1e0] sm:$0xff] }
 0xc90   : > { %v3357_v39 = vsub.f32 %v5886_v42, %v10541_v9 }
 0xc91   : > { %3318 = vmatpush.msra.mxu3 %v3302_v29  ;;  %v5889_v29 = vld [vmem:[%s7372_s28 + $0x1f8] sm:$0xff] }
 0xc92   : > { %5874 = vmatmul.msk.f32.vlgmr.msra.gmra.mxu3 %vm2040_vm0, %v7917_v40 }
 0xc9a   : > { %5875 = vmatmul.msk.f32.gmra.mxu3 %vm2040_vm0, %v7924_v36 }
 0xca2   : > { %5876 = vmatmul.msk.f32.gmra.mxu3 %vm2040_vm0, %v7931_v6 }
 0xcaa   : > { %5877 = vmatmul.msk.f32.gmra.mxu3 %vm2040_vm0, %v7938_v26 }
 0xcb2   : > { %5878 = vmatmul.msk.f32.gmra.mxu3 %vm2040_vm0, %v7945_v11 }
 0xcba   : > { %5879 = vmatmul.msk.f32.gmra.mxu3 %vm2040_vm0, %v7952_v63 }
 0xcc2   : > { %5880 = vmatmul.msk.f32.gmra.mxu3 %vm2040_vm0, %v7959_v13 }
 0xcca   : > { %5881 = vmatmul.msk.f32.gmra.mxu3 %vm2040_vm0, %v7966_v4 }
 0xd0d   : > { %v8147_v34 = vpop.f32.mrf.mxu3 }
 0xd0e   : > { %10537 = vst [vmem:[#allocation85_spill] sm:$0xff] %v8147_v34  ;;  %v10542_v34 = vld [vmem:[#allocation74_spill] sm:$0xff] }
 0xd0f   : > { %v3360_v5 = vsub.f32 %v5889_v29, %v10542_v34 }
 0xd15   : > { %v3320_v7 = vpop.f32.mrf.mxu3 }
 0xd1d   : > { %v3323_v22 = vpop.f32.mrf.mxu3 }
 0xd25   : > { %v3326_v37 = vpop.f32.mrf.mxu3 }
 0xd26   : > { %v8181_v42 = vadd.f32 %v3326_v37, %v7350_v50  ;;  %v8194_v37 = vadd.f32 %v3320_v7, %v7388_v2 }
 0xd28   : > { %10546 = vst [vmem:[#allocation15_spill] sm:$0xff] %v8181_v42 }
 0xd29   : > { %10548 = vst [vmem:[#allocation90_spill] sm:$0xff] %v8194_v37 }
 0xd2d   : > { %v3329_v57 = vpop.f32.mrf.mxu3 }
 0xd35   : > { %v3332_v19 = vpop.f32.mrf.mxu3 }
 0xd36   : > { %v8164_v59 = vadd.f32 %v3332_v19, %v10507_v58  ;;  %v3355_v19 = vsub.f32 %v5884_v33, %v8017_v25  ;;  %v5882_v58 = vld [vmem:[%s7372_s28 + $0x1c0] sm:$0xff] }
 0xd38   : > { %10540 = vst [vmem:[#allocation88_spill] sm:$0xff] %v8164_v59 }
 0xd3d   : > { %v3335_v28 = vpop.f32.mrf.mxu3 }
 0xd3e   : > { %v8158_v12 = vadd.f32 %v3335_v28, %v7336_v41  ;;  %v3356_v28 = vsub.f32 %v5885_v24, %v8009_v0  ;;  %v8188_v24 = vadd.f32 %v3323_v22, %v7356_v55 }
 0xd40   : > { %10539 = vst [vmem:[#allocation87_spill] sm:$0xff] %v8158_v12  ;;  %v3366_v30 = vadd.f32 %v3358_v32, %v8158_v12 }
 0xd41   : > { %10547 = vst [vmem:[#allocation89_spill] sm:$0xff] %v8188_v24 }
 0xd45   : > { %v3338_v21 = vpop.f32.mrf.mxu3 }
 0xd46   : > { %v8152_v35 = vadd.f32 %v3338_v21, %v10502_v14  ;;  %v8171_v14 = vadd.f32 %v3329_v57, %v7344_v46 }
 0xd48   : > { %10538 = vst [vmem:[#allocation86_spill] sm:$0xff] %v8152_v35  ;;  %v3367_v21 = vadd.f32 %v3359_v31, %v8152_v35  ;;  %v3365_v31 = vadd.f32 %v3357_v39, %v8164_v59  ;;  %v3354_v35 = vsub.f32 %v5883_v3, %v8028_v51  ;;  %v3364_v32 = vadd.f32 %v3356_v28, %v8171_v14  ;;  %v5905_v59 = vld [vmem:[%s7372_s28 + $0x218] sm:$0xff] }
 0xd49   : > { %10543 = vst [vmem:[#allocation73_spill] sm:$0xff] %v8171_v14  ;;  %v3353_v39 = vsub.f32 %v5882_v58, %v8041_v15  ;;  %v5904_v14 = vld [vmem:[%s7372_s28 + $0x210] sm:$0xff] }
 0xd4a   : > { %v3375_v29 = vmul.f32 %v3367_v21, %v7340_v43  ;;  %v3363_v21 = vadd.f32 %v3355_v19, %v8181_v42  ;;  %v3372_v28 = vmul.f32 %v3364_v32, %v7362_v56  ;;  %v10556_v42 = vld [vmem:[#allocation17_spill] sm:$0xff] }
 0xd4b   : > { %v3361_v7 = vadd.f32 %v3353_v39, %v8194_v37 }
 0xd4c   : > { %v3383_v22 = vadd.f32 %v3375_v29, %v7348_v49  ;;  %v3371_v12 = vmul.f32 %v3363_v21, %v7399_v8  ;;  %v3380_v29 = vadd.f32 %v3372_v28, %v7438_v62 }
 0xd4d   : > { %v3341_v48 = vpop.f32.mrf.mxu3 }
 0xd4e   : > { %v8176_v41 = vadd.f32 %v3341_v48, %v10544_v23  ;;  %v3374_v48 = vmul.f32 %v3366_v30, %v7346_v47  ;;  %v3391_v58 = vmax.f32 %v3383_v22, 0.0  ;;  %v3388_v39 = vmax.f32 %v3380_v29, 0.0 }
 0xd50   : > { %10545 = vst [vmem:[#allocation74_spill] sm:$0xff] %v8176_v41  ;;  %v3368_v57 = vadd.f32 %v3360_v5, %v8176_v41  ;;  %v3373_v5 = vmul.f32 %v3365_v31, %v7352_v52  ;;  %v3362_v41 = vadd.f32 %v3354_v35, %v8188_v24  ;;  %v3369_v35 = vmul.f32 %v3361_v7, %v7468_v1 }
 0xd52   : > { %v3376_v33 = vmul.f32 %v3368_v57, %v7332_v38  ;;  %v3382_v57 = vadd.f32 %v3374_v48, %v7354_v53  ;;  %v3381_v19 = vadd.f32 %v3373_v5, %v7375_v60  ;;  %v3370_v31 = vmul.f32 %v3362_v41, %v7447_v10 }
 0xd53   : > { %v3379_v48 = vadd.f32 %v3371_v12, %v7458_v20  ;;  %v3377_v5 = vadd.f32 %v3369_v35, %v7475_v17 }
 0xd54   : > { %v3384_v3 = vadd.f32 %v3376_v33, %v7342_v45  ;;  %v3390_v33 = vmax.f32 %v3382_v57, 0.0  ;;  %v3389_v32 = vmax.f32 %v3381_v19, 0.0  ;;  %v3378_v21 = vadd.f32 %v3370_v31, %v7472_v16  ;;  %v5892_v57 = vld [vmem:[%s7114_s29 + $0x40] sm:$0xff] }
 0xd55   : > { %v3385_v22 = vmax.f32 %v3377_v5, 0.0  ;;  %v10550_v5 = vld [vmem:[#allocation14_spill] sm:$0xff] }
 0xd56   : > { %v3392_v30 = vmax.f32 %v3384_v3, 0.0  ;;  %v3387_v3 = vmax.f32 %v3379_v48, 0.0  ;;  %v3386_v41 = vmax.f32 %v3378_v21, 0.0  ;;  %v5908_v21 = vld [vmem:[%s7372_s28 + $0x230] sm:$0xff] }
 0xd58   : > { %3401 = vmatpush.msrb.mxu0 %v3392_v30 }
 0xd5a   : > { %3402 = vmatpush.msrb.mxu0 %v3391_v58 }
 0xd5c   : > { %3403 = vmatpush.msrb.mxu0 %v3390_v33 }
 0xd5e   : > { %3404 = vmatpush.msrb.mxu0 %v3389_v32 }
 0xd60   : > { %3405 = vmatpush.msrb.mxu0 %v3388_v39 }
 0xd62   : > { %3406 = vmatpush.msrb.mxu0 %v3387_v3  ;;  %v5907_v3 = vld [vmem:[%s7372_s28 + $0x228] sm:$0xff] }
 0xd64   : > { %3407 = vmatpush.msrb.mxu0 %v3386_v41 }
 0xd66   : > { %3408 = vmatpush.msrb.mxu0 %v3385_v22  ;;  %v10552_v22 = vld [vmem:[#allocation69_spill] sm:$0xff] }
 0xd67   : > { %5890 = vmatmul.msk.f32.vlgmr.msrb.gmra.mxu0 %vm2303_vm1, %v8063_v54 }
 0xde4   : > { %v3410_v28 = vpop.f32.mrf.mxu0 }
 0xde5   : > { %v3411_v12 = vadd.f32 %v3410_v28, %v7488_v27  ;;  %v3513_v28 = vsub.f32 %v5908_v21, %v10552_v22  ;;  %v5903_v22 = vld [vmem:[%s7372_s28 + $0x208] sm:$0xff] }
 0xde7   : > { %v3413_v30 = vmax.f32 %v3411_v12, 0.0  ;;  %v5906_v12 = vld [vmem:[%s7372_s28 + $0x220] sm:$0xff] }
 0xde8   : > { %v3511_v37 = vsub.f32 %v5906_v12, %v10541_v9 }
 0xde9   : > { %3429 = vmatpush.msrb.mxu1 %v3413_v30  ;;  %v5909_v30 = vld [vmem:[%s7372_s28 + $0x238] sm:$0xff] }
 0xdea   : > { %5891 = vmatmul.msk.f32.vlgmr.msrb.gmra.mxu1 %vm2040_vm0, %v8126_v44 }
 0xdeb   : > { %3451 = vmatpush.msra.mxu1 %v5892_v57  ;;  %v10553_v57 = vld [vmem:[#allocation16_spill] sm:$0xff] }
 0xdf2   : > { %5893 = vmatmul.msk.f32.vlgmr.msra.gmra.mxu1 %vm2040_vm0, %v7772_v61 }
 0xe67   : > { %v8221_v7 = vpop.f32.mrf.mxu1 }
 0xe68   : > { %10549 = vst [vmem:[#allocation91_spill] sm:$0xff] %v8221_v7  ;;  %v3514_v7 = vsub.f32 %v5909_v30, %v10542_v34 }
 0xe6f   : > { %v3453_v58 = vpop.f32.mrf.mxu1 }
 0xe70   : > { %v3454_v19 = vadd.f32 %v3453_v58, %v7254_v18 }
 0xe72   : > { %v3456_v31 = vmax.f32 %v3454_v19, 0.0  ;;  %v10555_v19 = vld [vmem:[#allocation71_spill] sm:$0xff] }
 0xe74   : > { %3472 = vmatpush.msra.mxu0 %v3456_v31  ;;  %v3512_v31 = vsub.f32 %v5907_v3, %v10555_v19 }
 0xe75   : > { %5894 = vmatmul.msk.f32.vlgmr.msra.gmra.mxu0 %vm2040_vm0, %v7917_v40 }
 0xe7d   : > { %5895 = vmatmul.msk.f32.gmra.mxu0 %vm2040_vm0, %v7924_v36 }
 0xe85   : > { %5896 = vmatmul.msk.f32.gmra.mxu0 %vm2040_vm0, %v7931_v6 }
 0xe8d   : > { %5897 = vmatmul.msk.f32.gmra.mxu0 %vm2040_vm0, %v7938_v26 }
 0xe95   : > { %5898 = vmatmul.msk.f32.gmra.mxu0 %vm2040_vm0, %v7945_v11 }
 0xe9d   : > { %5899 = vmatmul.msk.f32.gmra.mxu0 %vm2040_vm0, %v7952_v63 }
 0xea5   : > { %5900 = vmatmul.msk.f32.gmra.mxu0 %vm2040_vm0, %v7959_v13 }
 0xead   : > { %5901 = vmatmul.msk.f32.gmra.mxu0 %vm2040_vm0, %v7966_v4 }
 0xef2   : > { %v3474_v61 = vpop.f32.mrf.mxu0 }
 0xefa   : > { %v3477_v33 = vpop.f32.mrf.mxu0 }
 0xf02   : > { %v3480_v29 = vpop.f32.mrf.mxu0 }
 0xf03   : > { %v8272_v12 = vadd.f32 %v3480_v29, %v7350_v50  ;;  %v8285_v29 = vadd.f32 %v3474_v61, %v7388_v2 }
 0xf05   : > { %10560 = vst [vmem:[#allocation97_spill] sm:$0xff] %v8272_v12 }
 0xf06   : > { %10562 = vst [vmem:[#allocation99_spill] sm:$0xff] %v8285_v29 }
 0xf0a   : > { %v3483_v35 = vpop.f32.mrf.mxu0 }
 0xf12   : > { %v3486_v32 = vpop.f32.mrf.mxu0 }
 0xf13   : > { %v8255_v24 = vadd.f32 %v3486_v32, %v10556_v42  ;;  %v3509_v32 = vsub.f32 %v5904_v14, %v8017_v25  ;;  %v5902_v42 = vld [vmem:[%s7372_s28 + $0x200] sm:$0xff] }
 0xf15   : > { %10557 = vst [vmem:[#allocation94_spill] sm:$0xff] %v8255_v24 }
 0xf1a   : > { %v3489_v48 = vpop.f32.mrf.mxu0 }
 0xf1b   : > { %v8249_v58 = vadd.f32 %v3489_v48, %v10553_v57  ;;  %v3510_v48 = vsub.f32 %v5905_v59, %v8009_v0  ;;  %v8279_v59 = vadd.f32 %v3477_v33, %v7356_v55 }
 0xf1d   : > { %10554 = vst [vmem:[#allocation93_spill] sm:$0xff] %v8249_v58  ;;  %v3520_v3 = vadd.f32 %v3512_v31, %v8249_v58 }
 0xf1e   : > { %10561 = vst [vmem:[#allocation98_spill] sm:$0xff] %v8279_v59 }
 0xf22   : > { %v3492_v39 = vpop.f32.mrf.mxu0 }
 0xf23   : > { %v8243_v41 = vadd.f32 %v3492_v39, %v10550_v5  ;;  %v8262_v5 = vadd.f32 %v3483_v35, %v7344_v46 }
 0xf25   : > { %10551 = vst [vmem:[#allocation92_spill] sm:$0xff] %v8243_v41  ;;  %v3521_v39 = vadd.f32 %v3513_v28, %v8243_v41  ;;  %v3519_v28 = vadd.f32 %v3511_v37, %v8255_v24  ;;  %v3508_v41 = vsub.f32 %v5903_v22, %v8028_v51  ;;  %v3518_v31 = vadd.f32 %v3510_v48, %v8262_v5  ;;  %v5925_v24 = vld [vmem:[%s7372_s28 + $0x258] sm:$0xff] }
 0xf26   : > { %10558 = vst [vmem:[#allocation95_spill] sm:$0xff] %v8262_v5  ;;  %v3507_v37 = vsub.f32 %v5902_v42, %v8041_v15  ;;  %v5924_v5 = vld [vmem:[%s7372_s28 + $0x250] sm:$0xff] }
 0xf27   : > { %v3529_v30 = vmul.f32 %v3521_v39, %v7340_v43  ;;  %v3517_v39 = vadd.f32 %v3509_v32, %v8272_v12  ;;  %v3526_v48 = vmul.f32 %v3518_v31, %v7362_v56  ;;  %v10569_v12 = vld [vmem:[#allocation17_spill] sm:$0xff] }
 0xf28   : > { %v3515_v61 = vadd.f32 %v3507_v37, %v8285_v29 }
 0xf29   : > { %v3537_v33 = vadd.f32 %v3529_v30, %v7348_v49  ;;  %v3525_v58 = vmul.f32 %v3517_v39, %v7399_v8  ;;  %v3534_v30 = vadd.f32 %v3526_v48, %v7438_v62  ;;  %v3607_v48 = vpop.f32.mrf.mxu2 }
 0xf2a   : > { %v3495_v21 = vpop.f32.mrf.mxu0 }
 0xf2b   : > { %v8267_v19 = vadd.f32 %v3495_v21, %v10544_v23  ;;  %v3528_v21 = vmul.f32 %v3520_v3, %v7346_v47  ;;  %v3545_v42 = vmax.f32 %v3537_v33, 0.0  ;;  %v3542_v37 = vmax.f32 %v3534_v30, 0.0 }
 0xf2d   : > { %10559 = vst [vmem:[#allocation96_spill] sm:$0xff] %v8267_v19  ;;  %v3522_v35 = vadd.f32 %v3514_v7, %v8267_v19  ;;  %v3527_v7 = vmul.f32 %v3519_v28, %v7352_v52  ;;  %v3516_v19 = vadd.f32 %v3508_v41, %v8279_v59  ;;  %v3523_v41 = vmul.f32 %v3515_v61, %v7468_v1 }
 0xf2f   : > { %v3530_v14 = vmul.f32 %v3522_v35, %v7332_v38  ;;  %v3536_v35 = vadd.f32 %v3528_v21, %v7354_v53  ;;  %v3535_v32 = vadd.f32 %v3527_v7, %v7375_v60  ;;  %v3524_v28 = vmul.f32 %v3516_v19, %v7447_v10 }
 0xf30   : > { %v3533_v21 = vadd.f32 %v3525_v58, %v7458_v20  ;;  %v3531_v7 = vadd.f32 %v3523_v41, %v7475_v17  ;;  %v3608_v58 = vadd.f32 %v3607_v48, %v7254_v18 }
 0xf31   : > { %v3538_v22 = vadd.f32 %v3530_v14, %v7342_v45  ;;  %v3544_v14 = vmax.f32 %v3536_v35, 0.0  ;;  %v3543_v31 = vmax.f32 %v3535_v32, 0.0  ;;  %v3532_v39 = vadd.f32 %v3524_v28, %v7472_v16 }
 0xf32   : > { %v3539_v33 = vmax.f32 %v3531_v7, 0.0  ;;  %v10564_v7 = vld [vmem:[#allocation14_spill] sm:$0xff] }
 0xf33   : > { %v3546_v3 = vmax.f32 %v3538_v22, 0.0  ;;  %v3541_v22 = vmax.f32 %v3533_v21, 0.0  ;;  %v3540_v19 = vmax.f32 %v3532_v39, 0.0  ;;  %v5928_v39 = vld [vmem:[%s7372_s28 + $0x270] sm:$0xff] }
 0xf35   : > { %3555 = vmatpush.msrb.mxu0 %v3546_v3 }
 0xf37   : > { %3556 = vmatpush.msrb.mxu0 %v3545_v42  ;;  %v3610_v42 = vmax.f32 %v3608_v58, 0.0  ;;  %v5929_v58 = vld [vmem:[%s7372_s28 + $0x278] sm:$0xff] }
 0xf39   : > { %3557 = vmatpush.msrb.mxu0 %v3544_v14 }
 0xf3b   : > { %3558 = vmatpush.msrb.mxu0 %v3543_v31 }
 0xf3d   : > { %3559 = vmatpush.msrb.mxu0 %v3542_v37 }
 0xf3f   : > { %3560 = vmatpush.msrb.mxu0 %v3541_v22  ;;  %v5927_v22 = vld [vmem:[%s7372_s28 + $0x268] sm:$0xff] }
 0xf41   : > { %3561 = vmatpush.msrb.mxu0 %v3540_v19 }
 0xf43   : > { %3562 = vmatpush.msrb.mxu0 %v3539_v33  ;;  %v10566_v33 = vld [vmem:[#allocation69_spill] sm:$0xff] }
 0xf44   : > { %5910 = vmatmul.msk.f32.vlgmr.msrb.gmra.mxu0 %vm2303_vm1, %v8063_v54  ;;  %v3667_v48 = vsub.f32 %v5928_v39, %v10566_v33  ;;  %v5923_v33 = vld [vmem:[%s7372_s28 + $0x248] sm:$0xff] }
 0xfc1   : > { %v3564_v3 = vpop.f32.mrf.mxu0 }
 0xfc2   : > { %v3565_v35 = vadd.f32 %v3564_v3, %v7488_v27  ;;  %v5926_v3 = vld [vmem:[%s7372_s28 + $0x260] sm:$0xff] }
 0xfc3   : > { %v3665_v29 = vsub.f32 %v5926_v3, %v10541_v9 }
 0xfc4   : > { %v3567_v61 = vmax.f32 %v3565_v35, 0.0 }
 0xfc6   : > { %3583 = vmatpush.msrb.mxu1 %v3567_v61  ;;  %v10568_v61 = vld [vmem:[#allocation71_spill] sm:$0xff] }
 0xfc7   : > { %5911 = vmatmul.msk.f32.vlgmr.msrb.gmra.mxu1 %vm2040_vm0, %v8126_v44 }
 0xfc8   : > { %3626 = vmatpush.msra.mxu1 %v3610_v42  ;;  %v3666_v42 = vsub.f32 %v5927_v22, %v10568_v61 }
 0xfcf   : > { %5914 = vmatmul.msk.f32.vlgmr.msra.gmra.mxu1 %vm2040_vm0, %v7917_v40 }
 0xfd7   : > { %5915 = vmatmul.msk.f32.gmra.mxu1 %vm2040_vm0, %v7924_v36 }
 0xfdf   : > { %5916 = vmatmul.msk.f32.gmra.mxu1 %vm2040_vm0, %v7931_v6 }
 0xfe7   : > { %5917 = vmatmul.msk.f32.gmra.mxu1 %vm2040_vm0, %v7938_v26 }
 0xfef   : > { %5918 = vmatmul.msk.f32.gmra.mxu1 %vm2040_vm0, %v7945_v11 }
 0xff7   : > { %5919 = vmatmul.msk.f32.gmra.mxu1 %vm2040_vm0, %v7952_v63 }
 0xfff   : > { %5920 = vmatmul.msk.f32.gmra.mxu1 %vm2040_vm0, %v7959_v13 }
0x1007   : > { %5921 = vmatmul.msk.f32.gmra.mxu1 %vm2040_vm0, %v7966_v4 }
0x1044   : > { %v8326_v32 = vpop.f32.mrf.mxu1 }
0x1045   : > { %10563 = vst [vmem:[#allocation100_spill] sm:$0xff] %v8326_v32  ;;  %v3668_v32 = vsub.f32 %v5929_v58, %v10542_v34 }
0x104c   : > { %v3628_v28 = vpop.f32.mrf.mxu1 }
0x1054   : > { %v3631_v14 = vpop.f32.mrf.mxu1 }
0x105c   : > { %v3634_v30 = vpop.f32.mrf.mxu1 }
0x105d   : > { %v8360_v3 = vadd.f32 %v3634_v30, %v7350_v50  ;;  %v8373_v30 = vadd.f32 %v3628_v28, %v7388_v2 }
0x105f   : > { %10573 = vst [vmem:[#allocation106_spill] sm:$0xff] %v8360_v3 }
0x1060   : > { %10575 = vst [vmem:[#allocation108_spill] sm:$0xff] %v8373_v30 }
0x1064   : > { %v3637_v41 = vpop.f32.mrf.mxu1 }
0x106c   : > { %v3640_v31 = vpop.f32.mrf.mxu1 }
0x106d   : > { %v8343_v59 = vadd.f32 %v3640_v31, %v10569_v12  ;;  %v3663_v31 = vsub.f32 %v5924_v5, %v8017_v25  ;;  %v5922_v12 = vld [vmem:[%s7372_s28 + $0x240] sm:$0xff] }
0x106f   : > { %10570 = vst [vmem:[#allocation103_spill] sm:$0xff] %v8343_v59 }
0x1074   : > { %v3643_v21 = vpop.f32.mrf.mxu1 }
0x1075   : > { %v8337_v35 = vadd.f32 %v3643_v21, %v10553_v57  ;;  %v3664_v21 = vsub.f32 %v5925_v24, %v8009_v0  ;;  %v8367_v24 = vadd.f32 %v3631_v14, %v7356_v55 }
0x1077   : > { %10567 = vst [vmem:[#allocation102_spill] sm:$0xff] %v8337_v35  ;;  %v3674_v22 = vadd.f32 %v3666_v42, %v8337_v35 }
0x1078   : > { %10574 = vst [vmem:[#allocation107_spill] sm:$0xff] %v8367_v24 }
0x107c   : > { %v3646_v37 = vpop.f32.mrf.mxu1 }
0x107d   : > { %v8331_v19 = vadd.f32 %v3646_v37, %v10564_v7  ;;  %v8350_v7 = vadd.f32 %v3637_v41, %v7344_v46 }
0x107f   : > { %10565 = vst [vmem:[#allocation101_spill] sm:$0xff] %v8331_v19  ;;  %v3675_v37 = vadd.f32 %v3667_v48, %v8331_v19  ;;  %v3673_v48 = vadd.f32 %v3665_v29, %v8343_v59  ;;  %v3662_v19 = vsub.f32 %v5923_v33, %v8028_v51  ;;  %v3672_v42 = vadd.f32 %v3664_v21, %v8350_v7  ;;  %v5942_v59 = vld [vmem:[%s7372_s28 + $0x280] sm:$0xff] }
0x1080   : > { %10571 = vst [vmem:[#allocation104_spill] sm:$0xff] %v8350_v7  ;;  %v3661_v29 = vsub.f32 %v5922_v12, %v8041_v15  ;;  %v8617_v7 = vld [vmem:[%s7365_s1 + $0x30] sm:$0xff] }
0x1081   : > { %v3683_v58 = vmul.f32 %v3675_v37, %v7340_v43  ;;  %v3671_v37 = vadd.f32 %v3663_v31, %v8360_v3  ;;  %v3680_v21 = vmul.f32 %v3672_v42, %v7362_v56  ;;  %10612 = vst [vmem:[#allocation121_spill] sm:$0xff] %v8617_v7  ;;  %v5966_v3 = vld [vmem:[%s7372_s28 + $0x2e0] sm:$0xff] }
0x1082   : > { %v3669_v28 = vadd.f32 %v3661_v29, %v8373_v30 }
0x1083   : > { %v3691_v14 = vadd.f32 %v3683_v58, %v7348_v49  ;;  %v3679_v35 = vmul.f32 %v3671_v37, %v7399_v8 }
0x1084   : > { %v3649_v39 = vpop.f32.mrf.mxu1  ;;  %v3677_v58 = vmul.f32 %v3669_v28, %v7468_v1 }
0x1085   : > { %v8355_v61 = vadd.f32 %v3649_v39, %v10544_v23  ;;  %v3682_v39 = vmul.f32 %v3674_v22, %v7346_v47  ;;  %v3699_v12 = vmax.f32 %v3691_v14, 0.0 }
0x1087   : > { %10572 = vst [vmem:[#allocation105_spill] sm:$0xff] %v8355_v61  ;;  %v3676_v41 = vadd.f32 %v3668_v32, %v8355_v61  ;;  %v3681_v32 = vmul.f32 %v3673_v48, %v7352_v52  ;;  %v3670_v61 = vadd.f32 %v3662_v19, %v8367_v24  ;;  %v3688_v19 = vadd.f32 %v3680_v21, %v7438_v62  ;;  %v5969_v24 = vld [vmem:[%s7372_s28 + $0x2f8] sm:$0xff] }
0x1089   : > { %v3684_v5 = vmul.f32 %v3676_v41, %v7332_v38  ;;  %v3690_v41 = vadd.f32 %v3682_v39, %v7354_v53  ;;  %v3689_v31 = vadd.f32 %v3681_v32, %v7375_v60  ;;  %v3678_v48 = vmul.f32 %v3670_v61, %v7447_v10 }
0x108a   : > { %v3687_v39 = vadd.f32 %v3679_v35, %v7458_v20  ;;  %v3696_v29 = vmax.f32 %v3688_v19, 0.0  ;;  %v3685_v32 = vadd.f32 %v3677_v58, %v7475_v17  ;;  %v8398_v35 = vld [vmem:[%s10446_s5] sm:$0xff] }
0x108b   : > { %v3692_v33 = vadd.f32 %v3684_v5, %v7342_v45  ;;  %v3698_v5 = vmax.f32 %v3690_v41, 0.0  ;;  %v3697_v42 = vmax.f32 %v3689_v31, 0.0  ;;  %v3686_v37 = vadd.f32 %v3678_v48, %v7472_v16 }
0x108c   : > { %v3693_v14 = vmax.f32 %v3685_v32, 0.0 }
0x108d   : > { %v3700_v22 = vmax.f32 %v3692_v33, 0.0  ;;  %v3695_v33 = vmax.f32 %v3687_v39, 0.0  ;;  %v3694_v61 = vmax.f32 %v3686_v37, 0.0  ;;  %v10576_v39 = vld [vmem:[#allocation14_spill] sm:$0xff] }
0x108f   : > { %3709 = vmatpush.msrb.mxu2 %v3700_v22  ;;  %v5932_v22 = vld [vmem:[%s7114_s29 + $0x50] sm:$0xff] }
0x1091   : > { %3710 = vmatpush.msrb.mxu2 %v3699_v12 }
0x1093   : > { %3711 = vmatpush.msrb.mxu2 %v3698_v5 }
0x1095   : > { %3712 = vmatpush.msrb.mxu2 %v3697_v42  ;;  %v5947_v42 = vld [vmem:[%s7372_s28 + $0x2a8] sm:$0xff] }
0x1097   : > { %3713 = vmatpush.msrb.mxu2 %v3696_v29 }
0x1099   : > { %3714 = vmatpush.msrb.mxu2 %v3695_v33  ;;  %v5949_v33 = vld [vmem:[%s7372_s28 + $0x2b8] sm:$0xff] }
0x109b   : > { %3715 = vmatpush.msrb.mxu2 %v3694_v61  ;;  %v10580_v61 = vld [vmem:[#allocation71_spill] sm:$0xff] }
0x109d   : > { %3716 = vmatpush.msrb.mxu2 %v3693_v14  ;;  %v3820_v14 = vsub.f32 %v5947_v42, %v10580_v61 }
0x109e   : > { %5930 = vmatmul.msk.f32.vlgmr.msrb.gmra.mxu2 %vm2303_vm1, %v8063_v54 }
0x109f   : > { %3759 = vmatpush.msra.mxu2 %v5932_v22  ;;  %v5945_v22 = vld [vmem:[%s7372_s28 + $0x298] sm:$0xff] }
0x10a6   : > { %5933 = vmatmul.msk.f32.vlgmr.msra.gmra.mxu2 %vm2040_vm0, %v8398_v35 }
0x1121   : > { %v3718_v21 = vpop.f32.mrf.mxu2 }
0x1122   : > { %v3719_v41 = vadd.f32 %v3718_v21, %v7488_v27  ;;  %v5944_v21 = vld [vmem:[%s7372_s28 + $0x290] sm:$0xff] }
0x1124   : > { %v3721_v28 = vmax.f32 %v3719_v41, 0.0  ;;  %v10581_v41 = vld [vmem:[#allocation17_spill] sm:$0xff] }
0x1126   : > { %3737 = vmatpush.msrb.mxu3 %v3721_v28 }
0x1127   : > { %5931 = vmatmul.msk.f32.vlgmr.msrb.gmra.mxu3 %vm2040_vm0, %v8126_v44 }
0x1129   : > { %v3761_v12 = vpop.f32.mrf.mxu2 }
0x112a   : > { %v3762_v31 = vadd.f32 %v3761_v12, %v7254_v18 }
0x112c   : > { %v3764_v48 = vmax.f32 %v3762_v31, 0.0 }
0x112e   : > { %3780 = vmatpush.msra.mxu3 %v3764_v48  ;;  %v3822_v48 = vsub.f32 %v5949_v33, %v10542_v34 }
0x112f   : > { %5934 = vmatmul.msk.f32.vlgmr.msra.gmra.mxu3 %vm2040_vm0, %v7917_v40 }
0x1137   : > { %5935 = vmatmul.msk.f32.gmra.mxu3 %vm2040_vm0, %v7924_v36 }
0x113f   : > { %5936 = vmatmul.msk.f32.gmra.mxu3 %vm2040_vm0, %v7931_v6 }
0x1147   : > { %5937 = vmatmul.msk.f32.gmra.mxu3 %vm2040_vm0, %v7938_v26 }
0x114f   : > { %5938 = vmatmul.msk.f32.gmra.mxu3 %vm2040_vm0, %v7945_v11 }
0x1157   : > { %5939 = vmatmul.msk.f32.gmra.mxu3 %vm2040_vm0, %v7952_v63  ;;  %v5948_v63 = vld [vmem:[%s7372_s28 + $0x2b0] sm:$0xff] }
0x115f   : > { %5940 = vmatmul.msk.f32.gmra.mxu3 %vm2040_vm0, %v7959_v13  ;;  %v10578_v13 = vld [vmem:[#allocation69_spill] sm:$0xff] }
0x1160   : > { %v3821_v37 = vsub.f32 %v5948_v63, %v10578_v13  ;;  %v5943_v63 = vld [vmem:[%s7372_s28 + $0x288] sm:$0xff] }
0x1167   : > { %5941 = vmatmul.msk.f32.gmra.mxu3 %vm2040_vm0, %v7966_v4  ;;  %v5946_v4 = vld [vmem:[%s7372_s28 + $0x2a0] sm:$0xff] }
0x1168   : > { %v3819_v12 = vsub.f32 %v5946_v4, %v10541_v9  ;;  %v3816_v4 = vsub.f32 %v5943_v63, %v8028_v51 }
0x11aa   : > { %v8422_v40 = vpop.f32.mrf.mxu3 }
0x11b2   : > { %v3782_v36 = vpop.f32.mrf.mxu3 }
0x11ba   : > { %v3785_v6 = vpop.f32.mrf.mxu3 }
0x11c2   : > { %v3788_v26 = vpop.f32.mrf.mxu3 }
0x11c3   : > { %v8456_v9 = vadd.f32 %v3788_v26, %v7350_v50  ;;  %v8469_v26 = vadd.f32 %v3782_v36, %v7388_v2 }
0x11c5   : > { %10585 = vst [vmem:[#allocation112_spill] sm:$0xff] %v8456_v9 }
0x11c6   : > { %10587 = vst [vmem:[#allocation114_spill] sm:$0xff] %v8469_v26 }
0x11ca   : > { %v3791_v5 = vpop.f32.mrf.mxu3 }
0x11cb   : > { %v8446_v13 = vadd.f32 %v3791_v5, %v7344_v46 }
0x11cd   : > { %10583 = vst [vmem:[#allocation110_spill] sm:$0xff] %v8446_v13 }
0x11d2   : > { %v3794_v11 = vpop.f32.mrf.mxu3 }
0x11d3   : > { %v8439_v28 = vadd.f32 %v3794_v11, %v10581_v41  ;;  %v3817_v11 = vsub.f32 %v5944_v21, %v8017_v25 }
0x11d5   : > { %10582 = vst [vmem:[#allocation71_spill] sm:$0xff] %v8439_v28  ;;  %v3827_v34 = vadd.f32 %v3819_v12, %v8439_v28  ;;  %v3825_v21 = vadd.f32 %v3817_v11, %v8456_v9 }
0x11d7   : > { %v3835_v12 = vmul.f32 %v3827_v34, %v7352_v52 }
0x11da   : > { %v3797_v19 = vpop.f32.mrf.mxu3 }
0x11db   : > { %v8433_v32 = vadd.f32 %v3797_v19, %v10553_v57  ;;  %v3818_v19 = vsub.f32 %v5945_v22, %v8009_v0  ;;  %v8463_v0 = vadd.f32 %v3785_v6, %v7356_v55  ;;  %v3815_v22 = vsub.f32 %v5942_v59, %v8041_v15 }
0x11dc   : > { %v3843_v59 = vadd.f32 %v3835_v12, %v7375_v60 }
0x11dd   : > { %10579 = vst [vmem:[#allocation69_spill] sm:$0xff] %v8433_v32  ;;  %v3828_v42 = vadd.f32 %v3820_v14, %v8433_v32  ;;  %v3826_v33 = vadd.f32 %v3818_v19, %v8446_v13  ;;  %v3823_v36 = vadd.f32 %v3815_v22, %v8469_v26  ;;  %v3833_v19 = vmul.f32 %v3825_v21, %v7399_v8  ;;  %v5968_v26 = vld [vmem:[%s7372_s28 + $0x2f0] sm:$0xff] }
0x11de   : > { %10586 = vst [vmem:[#allocation113_spill] sm:$0xff] %v8463_v0 }
0x11df   : > { %v3836_v14 = vmul.f32 %v3828_v42, %v7346_v47 }
0x11e1   : > { %v3844_v63 = vadd.f32 %v3836_v14, %v7354_v53 }
0x11e2   : > { %v3800_v58 = vpop.f32.mrf.mxu3 }
0x11e3   : > { %v8427_v29 = vadd.f32 %v3800_v58, %v10576_v39  ;;  %v3852_v11 = vmax.f32 %v3844_v63, 0.0 }
0x11e5   : > { %10577 = vst [vmem:[#allocation109_spill] sm:$0xff] %v8427_v29  ;;  %v3829_v31 = vadd.f32 %v3821_v37, %v8427_v29 }
0x11e7   : > { %v3837_v37 = vmul.f32 %v3829_v31, %v7340_v43  ;;  %v3824_v31 = vadd.f32 %v3816_v4, %v8463_v0  ;;  %v3841_v4 = vadd.f32 %v3833_v19, %v7458_v20  ;;  %v8507_v19 = vld [vmem:[%s10448_s7 + $0x8] sm:$0xff] }
0x11e9   : > { %v3845_v6 = vadd.f32 %v3837_v37, %v7348_v49  ;;  %v3832_v42 = vmul.f32 %v3824_v31, %v7447_v10  ;;  %v3831_v37 = vmul.f32 %v3823_v36, %v7468_v1 }
0x11ea   : > { %v3803_v58 = vpop.f32.mrf.mxu3 }
0x11eb   : > { %v8451_v61 = vadd.f32 %v3803_v58, %v10544_v23  ;;  %v3853_v15 = vmax.f32 %v3845_v6, 0.0  ;;  %v3840_v14 = vadd.f32 %v3832_v42, %v7472_v16  ;;  %v3839_v22 = vadd.f32 %v3831_v37, %v7475_v17  ;;  %v8528_v42 = vld [vmem:[%s10448_s7 + $0x20] sm:$0xff]  ;;  %v8549_v37 = vld [vmem:[%s10448_s7 + $0x38] sm:$0xff] }
0x11ec   : > { %10588 = vst [vmem:[#allocation115_spill] sm:$0xff] %v8549_v37 }
0x11ed   : > { %10584 = vst [vmem:[#allocation111_spill] sm:$0xff] %v8451_v61  ;;  %v3830_v5 = vadd.f32 %v3822_v48, %v8451_v61  ;;  %v3834_v48 = vmul.f32 %v3826_v33, %v7362_v56  ;;  %v3848_v21 = vmax.f32 %v3840_v14, 0.0  ;;  %v3847_v12 = vmax.f32 %v3839_v22, 0.0  ;;  %v10592_v14 = vld [vmem:[#allocation30_spill] sm:$0xff]  ;;  %v10594_v22 = vld [vmem:[#allocation13_spill] sm:$0xff] }
0x11ef   : > { %v3838_v25 = vmul.f32 %v3830_v5, %v7332_v38  ;;  %v3842_v34 = vadd.f32 %v3834_v48, %v7438_v62  ;;  %v3851_v5 = vmax.f32 %v3843_v59, 0.0  ;;  %v8521_v59 = vld [vmem:[%s10448_s7 + $0x18] sm:$0xff] }
0x11f1   : > { %v3846_v51 = vadd.f32 %v3838_v25, %v7342_v45  ;;  %v3850_v33 = vmax.f32 %v3842_v34, 0.0  ;;  %v3849_v25 = vmax.f32 %v3841_v4, 0.0  ;;  %v8542_v34 = vld [vmem:[%s10448_s7 + $0x30] sm:$0xff] }
0x11f2   : > { %v10590_v4 = vld [vmem:[#allocation39_spill] sm:$0xff] }
0x11f3   : > { %v3854_v58 = vmax.f32 %v3846_v51, 0.0  ;;  %v5952_v51 = vld [vmem:[%s7114_s29 + $0x58] sm:$0xff] }
0x11f5   : > { %3863 = vmatpush.msrb.mxu2 %v3854_v58 }
0x11f7   : > { %3864 = vmatpush.msrb.mxu2 %v3853_v15  ;;  %v8514_v15 = vld [vmem:[%s10448_s7 + $0x10] sm:$0xff] }
0x11f9   : > { %3865 = vmatpush.msrb.mxu2 %v3852_v11  ;;  %v8535_v11 = vld [vmem:[%s10448_s7 + $0x28] sm:$0xff] }
0x11fb   : > { %3866 = vmatpush.msrb.mxu2 %v3851_v5  ;;  %v8553_v5 = vpop.permute.xlu2 %2330 }
0x11fc   : > { %10589 = vst [vmem:[#allocation116_spill] sm:$0xff] %v8553_v5 }
0x11fd   : > { %3867 = vmatpush.msrb.mxu2 %v3850_v33  ;;  %v8557_v33 = vadd.f32 %v10590_v4, %v8553_v5 }
0x11ff   : > { %3868 = vmatpush.msrb.mxu2 %v3849_v25  ;;  %10591 = vst [vmem:[#allocation39_spill] sm:$0xff] %v8557_v33  ;;  %v8561_v25 = vadd.f32 %v10592_v14, %v8553_v5 }
0x1201   : > { %3869 = vmatpush.msrb.mxu2 %v3848_v21  ;;  %10593 = vst [vmem:[#allocation30_spill] sm:$0xff] %v8561_v25  ;;  %v8565_v21 = vadd.f32 %v10594_v22, %v8553_v5  ;;  %v10602_v22 = vld [vmem:[#allocation85_spill] sm:$0xff] }
0x1202   : > { %v8586_v61 = vadd.f32 %v10602_v22, %v8553_v5 }
0x1203   : > { %3870 = vmatpush.msrb.mxu2 %v3847_v12  ;;  %10595 = vst [vmem:[#allocation13_spill] sm:$0xff] %v8565_v21  ;;  %v4666_v12 = vmax.f32 %v8561_v25, %v8557_v33  ;;  %v8648_v33 = vld [vmem:[%s7365_s1 + $0x18] sm:$0xff] }
0x1204   : > { %5950 = vmatmul.msk.f32.vlgmr.msrb.gmra.mxu2 %vm2303_vm1, %v8063_v54  ;;  %v8500_v54 = vld [vmem:[%s10448_s7] sm:$0xff]  ;;  %10603 = vst [vmem:[#allocation85_spill] sm:$0xff] %v8586_v61 }
0x1205   : > { %3913 = vmatpush.msra.mxu2 %v5952_v51  ;;  %v10596_v51 = vld [vmem:[#allocation56_spill] sm:$0xff]  ;;  %10619 = vst [vmem:[#allocation128_spill] sm:$0xff] %v8648_v33 }
0x120c   : > { %5953 = vmatmul.msk.f32.vlgmr.msra.gmra.mxu2 %vm2040_vm0, %v8398_v35 }
0x1287   : > { %v3872_v6 = vpop.f32.mrf.mxu2 }
0x1288   : > { %v3873_v31 = vadd.f32 %v3872_v6, %v7488_v27  ;;  %v8571_v6 = vadd.f32 %v10596_v51, %v8553_v5 }
0x128a   : > { %v3875_v48 = vmax.f32 %v3873_v31, 0.0  ;;  %10597 = vst [vmem:[#allocation56_spill] sm:$0xff] %v8571_v6  ;;  %v4667_v31 = vmax.f32 %v8565_v21, %v4666_v12  ;;  %v10604_v12 = vld [vmem:[#allocation91_spill] sm:$0xff] }
0x128b   : > { %v8591_v29 = vadd.f32 %v10604_v12, %v8553_v5 }
0x128c   : > { %3891 = vmatpush.msra.mxu0 %v3875_v48  ;;  %v10598_v48 = vld [vmem:[#allocation67_spill] sm:$0xff] }
0x128d   : > { %5951 = vmatmul.msk.f32.vlgmr.msra.gmra.mxu0 %vm2040_vm0, %v8126_v44  ;;  %10605 = vst [vmem:[#allocation91_spill] sm:$0xff] %v8591_v29 }
0x128f   : > { %v3915_v58 = vpop.f32.mrf.mxu2 }
0x1290   : > { %v3916_v63 = vadd.f32 %v3915_v58, %v7254_v18  ;;  %v8576_v58 = vadd.f32 %v10598_v48, %v8553_v5 }
0x1292   : > { %v3918_v36 = vmax.f32 %v3916_v63, 0.0  ;;  %10599 = vst [vmem:[#allocation67_spill] sm:$0xff] %v8576_v58  ;;  %v4668_v63 = vmax.f32 %v8571_v6, %v4667_v31  ;;  %v10606_v31 = vld [vmem:[#allocation100_spill] sm:$0xff] }
0x1293   : > { %v8596_v32 = vadd.f32 %v10606_v31, %v8553_v5 }
0x1294   : > { %3934 = vmatpush.msrb.mxu0 %v3918_v36  ;;  %v10600_v36 = vld [vmem:[#allocation80_spill] sm:$0xff]  ;;  %v4669_v14 = vmax.f32 %v8576_v58, %v4668_v63  ;;  %v8635_v58 = vld [vmem:[%s7365_s1 + $0x20] sm:$0xff] }
0x1295   : > { %5954 = vmatmul.msk.f32.vlgmr.msrb.gmra.mxu0 %vm2040_vm0, %v8500_v54  ;;  %v8581_v4 = vadd.f32 %v10600_v36, %v8553_v5  ;;  %10607 = vst [vmem:[#allocation100_spill] sm:$0xff] %v8596_v32  ;;  %v8601_v36 = vadd.f32 %v8422_v40, %v8553_v5 }
0x1296   : > { %10616 = vst [vmem:[#allocation125_spill] sm:$0xff] %v8635_v58 }
0x1297   : > { %10601 = vst [vmem:[#allocation80_spill] sm:$0xff] %v8581_v4  ;;  %v4670_v51 = vmax.f32 %v8581_v4, %v4669_v14  ;;  %v5964_v4 = vld [vmem:[%s7372_s28 + $0x2d0] sm:$0xff] }
0x1298   : > { %10608 = vst [vmem:[#allocation117_spill] sm:$0xff] %v8601_v36 }
0x1299   : > { %v4671_v48 = vmax.f32 %v8586_v61, %v4670_v51  ;;  %v5965_v61 = vld [vmem:[%s7372_s28 + $0x2d8] sm:$0xff] }
0x129b   : > { %v4672_v63 = vmax.f32 %v8591_v29, %v4671_v48 }
0x129d   : > { %5955 = vmatmul.msk.f32.gmra.mxu0 %vm2040_vm0, %v8507_v19  ;;  %v4673_v14 = vmax.f32 %v8596_v32, %v4672_v63  ;;  %v8626_v32 = vld [vmem:[%s7365_s1 + $0x28] sm:$0xff] }
0x129e   : > { %10614 = vst [vmem:[#allocation123_spill] sm:$0xff] %v8626_v32 }
0x129f   : > { %v4674_v12 = vmax.f32 %v8601_v36, %v4673_v14  ;;  %v5967_v14 = vld [vmem:[%s7372_s28 + $0x2e8] sm:$0xff] }
0x12a0   : > { %v3974_v29 = vsub.f32 %v5967_v14, %v8626_v32  ;;  %v5963_v14 = vld [vmem:[%s7372_s28 + $0x2c8] sm:$0xff] }
0x12a5   : > { %5956 = vmatmul.msk.f32.gmra.mxu0 %vm2040_vm0, %v8514_v15 }
0x12ad   : > { %5957 = vmatmul.msk.f32.gmra.mxu0 %vm2040_vm0, %v8521_v59 }
0x12b5   : > { %5958 = vmatmul.msk.f32.gmra.mxu0 %vm2040_vm0, %v8528_v42 }
0x12bd   : > { %5959 = vmatmul.msk.f32.gmra.mxu0 %vm2040_vm0, %v8535_v11 }
0x12c5   : > { %5960 = vmatmul.msk.f32.gmra.mxu0 %vm2040_vm0, %v8542_v34 }
0x12cd   : > { %5961 = vmatmul.msk.f32.gmra.mxu0 %vm2040_vm0, %v8549_v37 }
0x130a   : > { %v3893_v22 = vpop.f32.mrf.mxu0 }
0x130b   : > { %v8606_v51 = vadd.f32 %v3893_v22, %v8553_v5 }
0x130d   : > { %10609 = vst [vmem:[#allocation118_spill] sm:$0xff] %v8606_v51  ;;  %v8609_v31 = vmax.f32 %v8606_v51, %v4674_v12  ;;  %v3975_v12 = vsub.f32 %v5968_v26, %v8617_v7  ;;  %v3973_v26 = vsub.f32 %v5966_v3, %v8635_v58  ;;  %v8640_v51 = vld [vmem:[%s7365_s1 + $0x38] sm:$0xff] }
0x130e   : > { %10617 = vst [vmem:[#allocation126_spill] sm:$0xff] %v8640_v51 }
0x130f   : > { %10610 = vst [vmem:[#allocation119_spill] sm:$0xff] %v8609_v31 }
0x1312   : > { %v3936_v48 = vpop.f32.mrf.mxu0 }
0x131a   : > { %v3939_v28 = vpop.f32.mrf.mxu0 }
0x1322   : > { %v3942_v40 = vpop.f32.mrf.mxu0 }
0x132a   : > { %v3945_v13 = vpop.f32.mrf.mxu0 }
0x132b   : > { %v8645_v21 = vadd.f32 %v3945_v13, %v7344_v46 }
0x132d   : > { %10618 = vst [vmem:[#allocation127_spill] sm:$0xff] %v8645_v21 }
0x1332   : > { %v3948_v9 = vpop.f32.mrf.mxu0 }
0x133a   : > { %v3951_v63 = vpop.f32.mrf.mxu0 }
0x133b   : > { %v8623_v30 = vadd.f32 %v3951_v63, %v10553_v57  ;;  %v3976_v63 = vsub.f32 %v5969_v24, %v8640_v51  ;;  %v5962_v24 = vld [vmem:[%s7372_s28 + $0x2c0] sm:$0xff]  ;;  %v8661_v51 = vadd.f32 %v3942_v40, %v7350_v50  ;;  %v8677_v50 = vadd.f32 %v3936_v48, %v7388_v2 }
0x133d   : > { %10613 = vst [vmem:[#allocation122_spill] sm:$0xff] %v8623_v30  ;;  %v3982_v25 = vadd.f32 %v3974_v29, %v8623_v30 }
0x133e   : > { %10621 = vst [vmem:[#allocation130_spill] sm:$0xff] %v8661_v51 }
0x133f   : > { %10623 = vst [vmem:[#allocation132_spill] sm:$0xff] %v8677_v50 }
0x1342   : > { %v3954_v0 = vpop.f32.mrf.mxu0 }
0x1343   : > { %v8614_v22 = vadd.f32 %v3954_v0, %v10576_v39  ;;  %v8632_v0 = vadd.f32 %v3948_v9, %v10581_v41  ;;  %v3972_v9 = vsub.f32 %v5965_v61, %v8648_v33  ;;  %v8667_v33 = vld [vmem:[%s7365_s1 + $0x8] sm:$0xff] }
0x1344   : > { %v3970_v29 = vsub.f32 %v5963_v14, %v8667_v33 }
0x1345   : > { %10611 = vst [vmem:[#allocation120_spill] sm:$0xff] %v8614_v22  ;;  %v3983_v6 = vadd.f32 %v3975_v12, %v8614_v22  ;;  %v8656_v12 = vld [vmem:[%s7365_s1 + $0x10] sm:$0xff]  ;;  %v3981_v13 = vadd.f32 %v3973_v26, %v8632_v0  ;;  %v3980_v30 = vadd.f32 %v3972_v9, %v8645_v21  ;;  %v8680_v26 = vld [vmem:[%s7365_s1] sm:$0xff] }
0x1346   : > { %10615 = vst [vmem:[#allocation124_spill] sm:$0xff] %v8632_v0  ;;  %v3971_v22 = vsub.f32 %v5964_v4, %v8656_v12  ;;  %v3990_v4 = vmul.f32 %v3982_v25, %v7346_v47 }
0x1347   : > { %v3991_v46 = vmul.f32 %v3983_v6, %v7340_v43  ;;  %v3969_v6 = vsub.f32 %v5962_v24, %v8680_v26  ;;  %v3989_v14 = vmul.f32 %v3981_v13, %v7352_v52  ;;  %v3988_v25 = vmul.f32 %v3980_v30, %v7362_v56 }
0x1348   : > { %v3998_v48 = vadd.f32 %v3990_v4, %v7354_v53 }
0x1349   : > { %v3977_v0 = vadd.f32 %v3969_v6, %v8677_v50 }
0x134a   : > { %v3957_v36 = vpop.f32.mrf.mxu0 }
0x134b   : > { %v8653_v3 = vadd.f32 %v3957_v36, %v10544_v23  ;;  %v8671_v36 = vadd.f32 %v3939_v28, %v7356_v55  ;;  %v3985_v30 = vmul.f32 %v3977_v0, %v7468_v1  ;;  %v8703_v0 = vld [vmem:[%s10232_s11] sm:$0xff] }
0x134d   : > { %10620 = vst [vmem:[#allocation129_spill] sm:$0xff] %v8653_v3  ;;  %v3984_v61 = vadd.f32 %v3976_v63, %v8653_v3  ;;  %v3979_v63 = vadd.f32 %v3971_v22, %v8661_v51  ;;  %v3999_v3 = vadd.f32 %v3991_v46, %v7348_v49  ;;  %v3978_v9 = vadd.f32 %v3970_v29, %v8671_v36 }
0x134e   : > { %10622 = vst [vmem:[#allocation131_spill] sm:$0xff] %v8671_v36  ;;  %v3997_v22 = vadd.f32 %v3989_v14, %v7375_v60  ;;  %v3996_v46 = vadd.f32 %v3988_v25, %v7438_v62  ;;  %v3993_v14 = vadd.f32 %v3985_v30, %v7475_v17  ;;  %v10628_v36 = vld [vmem:[#allocation126_spill] sm:$0xff] }
0x134f   : > { %v3992_v40 = vmul.f32 %v3984_v61, %v7332_v38  ;;  %v3987_v21 = vmul.f32 %v3979_v63, %v7399_v8  ;;  %v4007_v24 = vmax.f32 %v3999_v3, 0.0  ;;  %v3986_v13 = vmul.f32 %v3978_v9, %v7447_v10 }
0x1350   : > { %v4005_v29 = vmax.f32 %v3997_v22, 0.0  ;;  %v4004_v6 = vmax.f32 %v3996_v46, 0.0  ;;  %v4001_v9 = vmax.f32 %v3993_v14, 0.0 }
0x1351   : > { %v4000_v28 = vadd.f32 %v3992_v40, %v7342_v45  ;;  %v4006_v40 = vmax.f32 %v3998_v48, 0.0  ;;  %v3995_v4 = vadd.f32 %v3987_v21, %v7458_v20  ;;  %v3994_v63 = vadd.f32 %v3986_v13, %v7472_v16 }
0x1353   : > { %v4008_v61 = vmax.f32 %v4000_v28, 0.0  ;;  %v4003_v3 = vmax.f32 %v3995_v4, 0.0  ;;  %v4002_v28 = vmax.f32 %v3994_v63, 0.0 }
0x1355   : > { %4017 = vmatpush.msrb.mxu2 %v4008_v61  ;;  %v5972_v61 = vld [vmem:[%s7114_s29 + $0x60] sm:$0xff] }
0x1357   : > { %4018 = vmatpush.msrb.mxu2 %v4007_v24 }
0x1359   : > { %4019 = vmatpush.msrb.mxu2 %v4006_v40 }
0x135b   : > { %4020 = vmatpush.msrb.mxu2 %v4005_v29 }
0x135d   : > { %4021 = vmatpush.msrb.mxu2 %v4004_v6 }
0x135f   : > { %4022 = vmatpush.msrb.mxu2 %v4003_v3 }
0x1361   : > { %4023 = vmatpush.msrb.mxu2 %v4002_v28  ;;  %v5988_v28 = vld [vmem:[%s7372_s28 + $0x330] sm:$0xff] }
0x1363   : > { %4024 = vmatpush.msrb.mxu2 %v4001_v9  ;;  %v5987_v9 = vld [vmem:[%s7372_s28 + $0x328] sm:$0xff] }
0x1364   : > { %5970 = vmatmul.msk.f32.vlgmr.msrb.gmra.mxu2 %vm2303_vm1, %v8703_v0 }
0x1365   : > { %4067 = vmatpush.msra.mxu2 %v5972_v61 }
0x136c   : > { %5973 = vmatmul.msk.f32.vlgmr.msra.gmra.mxu2 %vm2040_vm0, %v8398_v35 }
0x13e7   : > { %v4026_v21 = vpop.f32.mrf.mxu2 }
0x13e8   : > { %v4027_v25 = vadd.f32 %v4026_v21, %v7488_v27  ;;  %v4129_v21 = vsub.f32 %v5988_v28, %v8617_v7  ;;  %v5983_v7 = vld [vmem:[%s7372_s28 + $0x308] sm:$0xff] }
0x13ea   : > { %v4029_v48 = vmax.f32 %v4027_v25, 0.0  ;;  %v5986_v25 = vld [vmem:[%s7372_s28 + $0x320] sm:$0xff] }
0x13eb   : > { %v4127_v51 = vsub.f32 %v5986_v25, %v8635_v58  ;;  %v10633_v25 = vld [vmem:[#allocation19_spill] sm:$0xff] }
0x13ec   : > { %4045 = vmatpush.msrb.mxu1 %v4029_v48  ;;  %v5989_v48 = vld [vmem:[%s7372_s28 + $0x338] sm:$0xff] }
0x13ed   : > { %5971 = vmatmul.msk.f32.vlgmr.msrb.gmra.mxu1 %vm2040_vm0, %v8126_v44  ;;  %v4130_v50 = vsub.f32 %v5989_v48, %v10628_v36 }
0x13ef   : > { %v4069_v24 = vpop.f32.mrf.mxu2 }
0x13f0   : > { %v4070_v22 = vadd.f32 %v4069_v24, %v7254_v18 }
0x13f2   : > { %v4072_v13 = vmax.f32 %v4070_v22, 0.0  ;;  %v4128_v22 = vsub.f32 %v5987_v9, %v8626_v32 }
0x13f4   : > { %4088 = vmatpush.msra.mxu1 %v4072_v13  ;;  %v5985_v13 = vld [vmem:[%s7372_s28 + $0x318] sm:$0xff] }
0x13f5   : > { %5974 = vmatmul.msk.f32.vlgmr.msra.gmra.mxu1 %vm2040_vm0, %v8500_v54 }
0x13fd   : > { %5975 = vmatmul.msk.f32.gmra.mxu1 %vm2040_vm0, %v8507_v19 }
0x1405   : > { %5976 = vmatmul.msk.f32.gmra.mxu1 %vm2040_vm0, %v8514_v15 }
0x140d   : > { %5977 = vmatmul.msk.f32.gmra.mxu1 %vm2040_vm0, %v8521_v59 }
0x1415   : > { %5978 = vmatmul.msk.f32.gmra.mxu1 %vm2040_vm0, %v8528_v42 }
0x141d   : > { %5979 = vmatmul.msk.f32.gmra.mxu1 %vm2040_vm0, %v8535_v11 }
0x1425   : > { %5980 = vmatmul.msk.f32.gmra.mxu1 %vm2040_vm0, %v8542_v34 }
0x142d   : > { %5981 = vmatmul.msk.f32.gmra.mxu1 %vm2040_vm0, %v8549_v37 }
0x146a   : > { %v4047_v44 = vpop.f32.mrf.mxu1 }
0x146b   : > { %v8730_v40 = vadd.f32 %v4047_v44, %v8553_v5  ;;  %v5984_v44 = vld [vmem:[%s7372_s28 + $0x310] sm:$0xff] }
0x146d   : > { %10624 = vst [vmem:[#allocation133_spill] sm:$0xff] %v8730_v40 }
0x1472   : > { %v4090_v30 = vpop.f32.mrf.mxu1 }
0x147a   : > { %v4093_v29 = vpop.f32.mrf.mxu1 }
0x1482   : > { %v4096_v4 = vpop.f32.mrf.mxu1 }
0x1483   : > { %v8766_v58 = vadd.f32 %v4096_v4, %v10633_v25  ;;  %v8779_v4 = vadd.f32 %v4090_v30, %v7388_v2 }
0x1485   : > { %10636 = vst [vmem:[#allocation137_spill] sm:$0xff] %v8779_v4 }
0x148a   : > { %v4099_v6 = vpop.f32.mrf.mxu1 }
0x1492   : > { %v4102_v63 = vpop.f32.mrf.mxu1 }
0x1493   : > { %v8749_v46 = vadd.f32 %v4102_v63, %v10581_v41  ;;  %v4125_v63 = vsub.f32 %v5984_v44, %v8656_v12  ;;  %v5982_v41 = vld [vmem:[%s7372_s28 + $0x300] sm:$0xff] }
0x1495   : > { %10627 = vst [vmem:[#allocation136_spill] sm:$0xff] %v8749_v46 }
0x149a   : > { %v4105_v3 = vpop.f32.mrf.mxu1 }
0x149b   : > { %v8743_v24 = vadd.f32 %v4105_v3, %v10553_v57  ;;  %v10631_v3 = vld [vmem:[#allocation128_spill] sm:$0xff] }
0x149c   : > { %v4126_v57 = vsub.f32 %v5985_v13, %v10631_v3  ;;  %10634 = vst [vmem:[#allocation128_spill] sm:$0xff] %v8766_v58  ;;  %v8773_v13 = vadd.f32 %v4093_v29, %v7356_v55 }
0x149d   : > { %10626 = vst [vmem:[#allocation135_spill] sm:$0xff] %v8743_v24  ;;  %v4136_v9 = vadd.f32 %v4128_v22, %v8743_v24 }
0x149e   : > { %10635 = vst [vmem:[#allocation19_spill] sm:$0xff] %v8773_v13 }
0x14a2   : > { %v4108_v14 = vpop.f32.mrf.mxu1 }
0x14a3   : > { %v8737_v61 = vadd.f32 %v4108_v14, %v10576_v39  ;;  %v10629_v39 = vld [vmem:[#allocation18_spill] sm:$0xff] }
0x14a4   : > { %v8756_v31 = vadd.f32 %v4099_v6, %v10629_v39 }
0x14a5   : > { %10625 = vst [vmem:[#allocation134_spill] sm:$0xff] %v8737_v61  ;;  %v4137_v14 = vadd.f32 %v4129_v21, %v8737_v61  ;;  %v4135_v21 = vadd.f32 %v4127_v51, %v8749_v46  ;;  %v4124_v61 = vsub.f32 %v5983_v7, %v8667_v33  ;;  %v4123_v51 = vsub.f32 %v5982_v41, %v8680_v26 }
0x14a6   : > { %10630 = vst [vmem:[#allocation126_spill] sm:$0xff] %v8756_v31  ;;  %v4134_v22 = vadd.f32 %v4126_v57, %v8756_v31  ;;  %v10646_v31 = vld [vmem:[#allocation123_spill] sm:$0xff] }
0x14a7   : > { %v4145_v48 = vmul.f32 %v4137_v14, %v7340_v43  ;;  %v4133_v14 = vadd.f32 %v4125_v63, %v8766_v58  ;;  %v4131_v30 = vadd.f32 %v4123_v51, %v8779_v4  ;;  %v6004_v4 = vld [vmem:[%s7372_s28 + $0x350] sm:$0xff] }
0x14a8   : > { %v4142_v57 = vmul.f32 %v4134_v22, %v7362_v56 }
0x14a9   : > { %v4153_v29 = vadd.f32 %v4145_v48, %v7348_v49  ;;  %v4141_v24 = vmul.f32 %v4133_v14, %v7399_v8  ;;  %v4139_v48 = vmul.f32 %v4131_v30, %v7468_v1  ;;  %v8807_v30 = vld [vmem:[%s10234_s13] sm:$0xff] }
0x14aa   : > { %v4111_v28 = vpop.f32.mrf.mxu1 }
0x14ab   : > { %v8761_v32 = vadd.f32 %v4111_v28, %v10544_v23  ;;  %v4144_v28 = vmul.f32 %v4136_v9, %v7346_v47  ;;  %v4161_v41 = vmax.f32 %v4153_v29, 0.0 }
0x14ad   : > { %10632 = vst [vmem:[#allocation18_spill] sm:$0xff] %v8761_v32  ;;  %v4138_v6 = vadd.f32 %v4130_v50, %v8761_v32  ;;  %v4143_v50 = vmul.f32 %v4135_v21, %v7352_v52  ;;  %v4132_v32 = vadd.f32 %v4124_v61, %v8773_v13  ;;  %v4150_v61 = vadd.f32 %v4142_v57, %v7438_v62  ;;  %v6005_v13 = vld [vmem:[%s7372_s28 + $0x358] sm:$0xff] }
0x14af   : > { %v4146_v44 = vmul.f32 %v4138_v6, %v7332_v38  ;;  %v4152_v6 = vadd.f32 %v4144_v28, %v7354_v53  ;;  %v4151_v63 = vadd.f32 %v4143_v50, %v7375_v60  ;;  %v4140_v21 = vmul.f32 %v4132_v32, %v7447_v10 }
0x14b0   : > { %v4149_v28 = vadd.f32 %v4141_v24, %v7458_v20  ;;  %v4158_v51 = vmax.f32 %v4150_v61, 0.0  ;;  %v4147_v50 = vadd.f32 %v4139_v48, %v7475_v17  ;;  %v10638_v48 = vld [vmem:[#allocation119_spill] sm:$0xff] }
0x14b1   : > { %v4154_v7 = vadd.f32 %v4146_v44, %v7342_v45  ;;  %v4160_v44 = vmax.f32 %v4152_v6, 0.0  ;;  %v4159_v22 = vmax.f32 %v4151_v63, 0.0  ;;  %v4148_v14 = vadd.f32 %v4140_v21, %v7472_v16 }
0x14b2   : > { %v4155_v29 = vmax.f32 %v4147_v50, 0.0 }
0x14b3   : > { %v4162_v9 = vmax.f32 %v4154_v7, 0.0  ;;  %v4157_v7 = vmax.f32 %v4149_v28, 0.0  ;;  %v4156_v32 = vmax.f32 %v4148_v14, 0.0 }
0x14b5   : > { %4171 = vmatpush.msrb.mxu2 %v4162_v9  ;;  %v5992_v9 = vld [vmem:[%s7114_s29 + $0x68] sm:$0xff] }
0x14b7   : > { %4172 = vmatpush.msrb.mxu2 %v4161_v41 }
0x14b9   : > { %4173 = vmatpush.msrb.mxu2 %v4160_v44 }
0x14bb   : > { %4174 = vmatpush.msrb.mxu2 %v4159_v22  ;;  %v10639_v22 = vmax.f32 %v8730_v40, %v10638_v48  ;;  %v6009_v48 = vld [vmem:[%s7372_s28 + $0x378] sm:$0xff] }
0x14bd   : > { %4175 = vmatpush.msrb.mxu2 %v4158_v51 }
0x14bf   : > { %4176 = vmatpush.msrb.mxu2 %v4157_v7 }
0x14c1   : > { %4177 = vmatpush.msrb.mxu2 %v4156_v32 }
0x14c3   : > { %4178 = vmatpush.msrb.mxu2 %v4155_v29 }
0x14c4   : > { %5990 = vmatmul.msk.f32.vlgmr.msrb.gmra.mxu2 %vm2303_vm1, %v8703_v0 }
0x14c5   : > { %4221 = vmatpush.msra.mxu2 %v5992_v9 }
0x14cc   : > { %5993 = vmatmul.msk.f32.vlgmr.msra.gmra.mxu2 %vm2040_vm0, %v8398_v35 }
0x1547   : > { %v4180_v24 = vpop.f32.mrf.mxu2 }
0x1548   : > { %v4181_v57 = vadd.f32 %v4180_v24, %v7488_v27  ;;  %v6008_v24 = vld [vmem:[%s7372_s28 + $0x370] sm:$0xff] }
0x154a   : > { %v4183_v6 = vmax.f32 %v4181_v57, 0.0  ;;  %v6007_v57 = vld [vmem:[%s7372_s28 + $0x368] sm:$0xff] }
0x154b   : > { %v4282_v58 = vsub.f32 %v6007_v57, %v10646_v31 }
0x154c   : > { %4199 = vmatpush.msrb.mxu3 %v4183_v6  ;;  %v10641_v6 = vld [vmem:[#allocation14_spill] sm:$0xff] }
0x154d   : > { %5991 = vmatmul.msk.f32.vlgmr.msrb.gmra.mxu3 %vm2040_vm0, %v8807_v30 }
0x154f   : > { %v4223_v41 = vpop.f32.mrf.mxu2 }
0x1550   : > { %v4224_v63 = vadd.f32 %v4223_v41, %v7254_v18 }
0x1552   : > { %v4226_v21 = vmax.f32 %v4224_v63, 0.0  ;;  %v10643_v63 = vld [vmem:[#allocation121_spill] sm:$0xff] }
0x1554   : > { %4242 = vmatpush.msra.mxu3 %v4226_v21  ;;  %v4283_v21 = vsub.f32 %v6008_v24, %v10643_v63  ;;  %v6003_v63 = vld [vmem:[%s7372_s28 + $0x348] sm:$0xff] }
0x1555   : > { %5994 = vmatmul.msk.f32.vlgmr.msra.gmra.mxu3 %vm2040_vm0, %v8500_v54 }
0x155d   : > { %5995 = vmatmul.msk.f32.gmra.mxu3 %vm2040_vm0, %v8507_v19 }
0x1565   : > { %5996 = vmatmul.msk.f32.gmra.mxu3 %vm2040_vm0, %v8514_v15 }
0x156d   : > { %5997 = vmatmul.msk.f32.gmra.mxu3 %vm2040_vm0, %v8521_v59 }
0x1575   : > { %5998 = vmatmul.msk.f32.gmra.mxu3 %vm2040_vm0, %v8528_v42 }
0x157d   : > { %5999 = vmatmul.msk.f32.gmra.mxu3 %vm2040_vm0, %v8535_v11 }
0x1585   : > { %6000 = vmatmul.msk.f32.gmra.mxu3 %vm2040_vm0, %v8542_v34 }
0x158d   : > { %6001 = vmatmul.msk.f32.gmra.mxu3 %vm2040_vm0, %v8549_v37 }
0x15d0   : > { %v4201_v44 = vpop.f32.mrf.mxu3 }
0x15d1   : > { %v8829_v61 = vadd.f32 %v4201_v44, %v8553_v5  ;;  %v6006_v44 = vld [vmem:[%s7372_s28 + $0x360] sm:$0xff] }
0x15d3   : > { %10637 = vst [vmem:[#allocation138_spill] sm:$0xff] %v8829_v61  ;;  %v8835_v28 = vmax.f32 %v8829_v61, %v10639_v22  ;;  %v10644_v22 = vld [vmem:[#allocation16_spill] sm:$0xff]  ;;  %v10647_v61 = vld [vmem:[#allocation17_spill] sm:$0xff] }
0x15d5   : > { %10640 = vst [vmem:[#allocation119_spill] sm:$0xff] %v8835_v28  ;;  %v10649_v28 = vld [vmem:[#allocation125_spill] sm:$0xff] }
0x15d6   : > { %v4281_v5 = vsub.f32 %v6006_v44, %v10649_v28 }
0x15d8   : > { %v4244_v51 = vpop.f32.mrf.mxu3 }
0x15e0   : > { %v4247_v14 = vpop.f32.mrf.mxu3 }
0x15e8   : > { %v4250_v7 = vpop.f32.mrf.mxu3 }
0x15e9   : > { %v8869_v44 = vadd.f32 %v4250_v7, %v10633_v25  ;;  %v8882_v7 = vadd.f32 %v4244_v51, %v7388_v2 }
0x15eb   : > { %10652 = vst [vmem:[#allocation142_spill] sm:$0xff] %v8869_v44 }
0x15ec   : > { %10654 = vst [vmem:[#allocation144_spill] sm:$0xff] %v8882_v7 }
0x15f0   : > { %v4253_v50 = vpop.f32.mrf.mxu3 }
0x15f1   : > { %v8859_v37 = vadd.f32 %v4253_v50, %v10629_v39 }
0x15f3   : > { %10650 = vst [vmem:[#allocation125_spill] sm:$0xff] %v8859_v37 }
0x15f8   : > { %v4256_v32 = vpop.f32.mrf.mxu3 }
0x15f9   : > { %v8852_v40 = vadd.f32 %v4256_v32, %v10647_v61  ;;  %v4279_v32 = vsub.f32 %v6004_v4, %v8656_v12  ;;  %v6002_v61 = vld [vmem:[%s7372_s28 + $0x340] sm:$0xff] }
0x15fb   : > { %10648 = vst [vmem:[#allocation140_spill] sm:$0xff] %v8852_v40 }
0x1600   : > { %v4259_v29 = vpop.f32.mrf.mxu3 }
0x1601   : > { %v8846_v46 = vadd.f32 %v4259_v29, %v10644_v22  ;;  %v4280_v29 = vsub.f32 %v6005_v13, %v10631_v3  ;;  %v8876_v13 = vadd.f32 %v4247_v14, %v7356_v55 }
0x1603   : > { %10645 = vst [vmem:[#allocation16_spill] sm:$0xff] %v8846_v46  ;;  %v4290_v57 = vadd.f32 %v4282_v58, %v8846_v46  ;;  %v4288_v58 = vadd.f32 %v4280_v29, %v8859_v37  ;;  %v10663_v37 = vld [vmem:[#allocation123_spill] sm:$0xff] }
0x1604   : > { %10653 = vst [vmem:[#allocation143_spill] sm:$0xff] %v8876_v13 }
0x1605   : > { %v4296_v29 = vmul.f32 %v4288_v58, %v7362_v56 }
0x1608   : > { %v4262_v9 = vpop.f32.mrf.mxu3 }
0x1609   : > { %v8840_v41 = vadd.f32 %v4262_v9, %v10641_v6  ;;  %v4284_v6 = vsub.f32 %v6009_v48, %v10628_v36 }
0x160b   : > { %10642 = vst [vmem:[#allocation139_spill] sm:$0xff] %v8840_v41  ;;  %v4291_v9 = vadd.f32 %v4283_v21, %v8840_v41  ;;  %v4289_v21 = vadd.f32 %v4281_v5, %v8852_v40  ;;  %v4278_v41 = vsub.f32 %v6003_v63, %v8667_v33  ;;  %v4277_v5 = vsub.f32 %v6002_v61, %v8680_v26  ;;  %v6029_v40 = vld [vmem:[%s7372_s28 + $0x3b8] sm:$0xff] }
0x160d   : > { %v4299_v48 = vmul.f32 %v4291_v9, %v7340_v43  ;;  %v4287_v9 = vadd.f32 %v4279_v32, %v8869_v44  ;;  %v4285_v51 = vadd.f32 %v4277_v5, %v8882_v7  ;;  %v6024_v7 = vld [vmem:[%s7372_s28 + $0x390] sm:$0xff] }
0x160f   : > { %v4307_v14 = vadd.f32 %v4299_v48, %v7348_v49  ;;  %v4295_v46 = vmul.f32 %v4287_v9, %v7399_v8  ;;  %v4293_v48 = vmul.f32 %v4285_v51, %v7468_v1 }
0x1610   : > { %v4265_v24 = vpop.f32.mrf.mxu3 }
0x1611   : > { %v8864_v31 = vadd.f32 %v4265_v24, %v10544_v23  ;;  %v4298_v24 = vmul.f32 %v4290_v57, %v7346_v47  ;;  %v4315_v61 = vmax.f32 %v4307_v14, 0.0 }
0x1613   : > { %10651 = vst [vmem:[#allocation141_spill] sm:$0xff] %v8864_v31  ;;  %v4292_v50 = vadd.f32 %v4284_v6, %v8864_v31  ;;  %v4297_v6 = vmul.f32 %v4289_v21, %v7352_v52  ;;  %v4286_v31 = vadd.f32 %v4278_v41, %v8876_v13  ;;  %v4304_v41 = vadd.f32 %v4296_v29, %v7438_v62  ;;  %v6025_v13 = vld [vmem:[%s7372_s28 + $0x398] sm:$0xff] }
0x1615   : > { %v4300_v4 = vmul.f32 %v4292_v50, %v7332_v38  ;;  %v4306_v50 = vadd.f32 %v4298_v24, %v7354_v53  ;;  %v4305_v32 = vadd.f32 %v4297_v6, %v7375_v60  ;;  %v4294_v21 = vmul.f32 %v4286_v31, %v7447_v10 }
0x1616   : > { %v4303_v24 = vadd.f32 %v4295_v46, %v7458_v20  ;;  %v4312_v5 = vmax.f32 %v4304_v41, 0.0  ;;  %v4301_v6 = vadd.f32 %v4293_v48, %v7475_v17  ;;  %v10656_v41 = vld [vmem:[#allocation116_spill] sm:$0xff] }
0x1617   : > { %v4308_v63 = vadd.f32 %v4300_v4, %v7342_v45  ;;  %v4314_v4 = vmax.f32 %v4306_v50, 0.0  ;;  %v4313_v58 = vmax.f32 %v4305_v32, 0.0  ;;  %v4302_v9 = vadd.f32 %v4294_v21, %v7472_v16  ;;  %v10655_v21 = vld [vmem:[#allocation115_spill] sm:$0xff] }
0x1618   : > { %v4309_v14 = vmax.f32 %v4301_v6, 0.0 }
0x1619   : > { %v4316_v57 = vmax.f32 %v4308_v63, 0.0  ;;  %v4311_v63 = vmax.f32 %v4303_v24, 0.0  ;;  %v4310_v31 = vmax.f32 %v4302_v9, 0.0 }
0x161b   : > { %4325 = vmatpush.msrb.mxu2 %v4316_v57  ;;  %v6012_v57 = vld [vmem:[%s7114_s29 + $0x70] sm:$0xff] }
0x161d   : > { %4326 = vmatpush.msrb.mxu2 %v4315_v61 }
0x161f   : > { %4327 = vmatpush.msrb.mxu2 %v4314_v4 }
0x1621   : > { %4328 = vmatpush.msrb.mxu2 %v4313_v58  ;;  %v10664_v58 = vld [vmem:[#allocation17_spill] sm:$0xff] }
0x1623   : > { %4329 = vmatpush.msrb.mxu2 %v4312_v5 }
0x1625   : > { %4330 = vmatpush.msrb.mxu2 %v4311_v63 }
0x1627   : > { %4331 = vmatpush.msrb.mxu2 %v4310_v31 }
0x1629   : > { %4332 = vmatpush.msrb.mxu2 %v4309_v14 }
0x162a   : > { %6010 = vmatmul.msk.f32.vlgmr.msrb.gmra.mxu2 %vm2303_vm1, %v8703_v0 }
0x162b   : > { %4375 = vmatpush.msra.mxu2 %v6012_v57 }
0x1632   : > { %6013 = vmatmul.msk.f32.vlgmr.msra.gmra.mxu2 %vm2040_vm0, %v8398_v35 }
0x16ad   : > { %v4334_v46 = vpop.f32.mrf.mxu2 }
0x16ae   : > { %v4335_v29 = vadd.f32 %v4334_v46, %v7488_v27  ;;  %v6028_v46 = vld [vmem:[%s7372_s28 + $0x3b0] sm:$0xff] }
0x16b0   : > { %v4337_v50 = vmax.f32 %v4335_v29, 0.0  ;;  %v6027_v29 = vld [vmem:[%s7372_s28 + $0x3a8] sm:$0xff] }
0x16b1   : > { %v4436_v44 = vsub.f32 %v6027_v29, %v10663_v37 }
0x16b2   : > { %4353 = vmatpush.msra.mxu0 %v4337_v50  ;;  %v10659_v50 = vld [vmem:[#allocation14_spill] sm:$0xff] }
0x16b3   : > { %6011 = vmatmul.msk.f32.vlgmr.msra.gmra.mxu0 %vm2040_vm0, %v8807_v30 }
0x16b5   : > { %v4377_v51 = vpop.f32.mrf.mxu2 }
0x16b6   : > { %v4378_v61 = vadd.f32 %v4377_v51, %v7254_v18 }
0x16b8   : > { %v4380_v32 = vmax.f32 %v4378_v61, 0.0  ;;  %v10661_v61 = vld [vmem:[#allocation121_spill] sm:$0xff] }
0x16ba   : > { %4396 = vmatpush.msrb.mxu0 %v4380_v32  ;;  %v4437_v32 = vsub.f32 %v6028_v46, %v10661_v61  ;;  %v6023_v61 = vld [vmem:[%s7372_s28 + $0x388] sm:$0xff] }
0x16bb   : > { %6014 = vmatmul.msk.f32.vlgmr.msrb.gmra.mxu0 %vm2040_vm0, %v8500_v54 }
0x16c3   : > { %6015 = vmatmul.msk.f32.gmra.mxu0 %vm2040_vm0, %v8507_v19 }
0x16cb   : > { %6016 = vmatmul.msk.f32.gmra.mxu0 %vm2040_vm0, %v8514_v15 }
0x16d3   : > { %6017 = vmatmul.msk.f32.gmra.mxu0 %vm2040_vm0, %v8521_v59 }
0x16db   : > { %6018 = vmatmul.msk.f32.gmra.mxu0 %vm2040_vm0, %v8528_v42 }
0x16e3   : > { %6019 = vmatmul.msk.f32.gmra.mxu0 %vm2040_vm0, %v8535_v11 }
0x16eb   : > { %6020 = vmatmul.msk.f32.gmra.mxu0 %vm2040_vm0, %v8542_v34 }
0x16f3   : > { %6021 = vmatmul.msk.f32.gmra.mxu0 %vm2040_vm0, %v10655_v21 }
0x1730   : > { %v4355_v4 = vpop.f32.mrf.mxu0 }
0x1731   : > { %v8927_v48 = vadd.f32 %v4355_v4, %v10656_v41  ;;  %v6026_v4 = vld [vmem:[%s7372_s28 + $0x3a0] sm:$0xff] }
0x1732   : > { %v4435_v41 = vsub.f32 %v6026_v4, %v10649_v28 }
0x1733   : > { %10657 = vst [vmem:[#allocation145_spill] sm:$0xff] %v8927_v48 }
0x1738   : > { %v4398_v5 = vpop.f32.mrf.mxu0 }
0x1740   : > { %v4401_v9 = vpop.f32.mrf.mxu0 }
0x1748   : > { %v4404_v63 = vpop.f32.mrf.mxu0 }
0x1749   : > { %v8963_v4 = vadd.f32 %v4404_v63, %v10633_v25  ;;  %v8976_v63 = vadd.f32 %v4398_v5, %v7388_v2 }
0x1750   : > { %v4407_v6 = vpop.f32.mrf.mxu0 }
0x1751   : > { %v8953_v21 = vadd.f32 %v4407_v6, %v10629_v39 }
0x1758   : > { %v4410_v31 = vpop.f32.mrf.mxu0 }
0x1759   : > { %v8946_v48 = vadd.f32 %v4410_v31, %v10664_v58  ;;  %v4433_v31 = vsub.f32 %v6024_v7, %v8656_v12  ;;  %v6022_v58 = vld [vmem:[%s7372_s28 + $0x380] sm:$0xff] }
0x1760   : > { %v4413_v14 = vpop.f32.mrf.mxu0 }
0x1761   : > { %v8940_v24 = vadd.f32 %v4413_v14, %v10644_v22  ;;  %v4434_v14 = vsub.f32 %v6025_v13, %v10631_v3  ;;  %v8970_v13 = vadd.f32 %v4401_v9, %v7356_v55 }
0x1763   : > { %10662 = vst [vmem:[#allocation147_spill] sm:$0xff] %v8940_v24  ;;  %v4444_v29 = vadd.f32 %v4436_v44, %v8940_v24  ;;  %v4442_v44 = vadd.f32 %v4434_v14, %v8953_v21 }
0x1765   : > { %v4450_v14 = vmul.f32 %v4442_v44, %v7362_v56 }
0x1768   : > { %v4416_v57 = vpop.f32.mrf.mxu0 }
0x1769   : > { %v8934_v51 = vadd.f32 %v4416_v57, %v10659_v50  ;;  %v4438_v50 = vsub.f32 %v6029_v40, %v10628_v36  ;;  %v4443_v40 = vadd.f32 %v4435_v41, %v8946_v48  ;;  %v4431_v41 = vsub.f32 %v6022_v58, %v8680_v26 }
0x176b   : > { %10660 = vst [vmem:[#allocation146_spill] sm:$0xff] %v8934_v51  ;;  %v4445_v57 = vadd.f32 %v4437_v32, %v8934_v51  ;;  %v4432_v51 = vsub.f32 %v6023_v61, %v8667_v33  ;;  %v4439_v5 = vadd.f32 %v4431_v41, %v8976_v63 }
0x176d   : > { %v4453_v32 = vmul.f32 %v4445_v57, %v7340_v43  ;;  %v4441_v57 = vadd.f32 %v4433_v31, %v8963_v4 }
0x176f   : > { %v4461_v9 = vadd.f32 %v4453_v32, %v7348_v49  ;;  %v4449_v24 = vmul.f32 %v4441_v57, %v7399_v8  ;;  %v4447_v32 = vmul.f32 %v4439_v5, %v7468_v1 }
0x1770   : > { %v4419_v46 = vpop.f32.mrf.mxu0 }
0x1771   : > { %v8958_v37 = vadd.f32 %v4419_v46, %v10544_v23  ;;  %v4452_v46 = vmul.f32 %v4444_v29, %v7346_v47  ;;  %v4469_v58 = vmax.f32 %v4461_v9, 0.0 }
0x1773   : > { %10665 = vst [vmem:[#allocation148_spill] sm:$0xff] %v8958_v37  ;;  %v4446_v6 = vadd.f32 %v4438_v50, %v8958_v37  ;;  %v4451_v50 = vmul.f32 %v4443_v40, %v7352_v52  ;;  %v4440_v37 = vadd.f32 %v4432_v51, %v8970_v13  ;;  %v4458_v51 = vadd.f32 %v4450_v14, %v7438_v62 }
0x1775   : > { %v4454_v7 = vmul.f32 %v4446_v6, %v7332_v38  ;;  %v4460_v6 = vadd.f32 %v4452_v46, %v7354_v53  ;;  %v4459_v31 = vadd.f32 %v4451_v50, %v7375_v60  ;;  %v4448_v40 = vmul.f32 %v4440_v37, %v7447_v10 }
0x1776   : > { %v4457_v46 = vadd.f32 %v4449_v24, %v7458_v20  ;;  %v4466_v41 = vmax.f32 %v4458_v51, 0.0  ;;  %v4455_v50 = vadd.f32 %v4447_v32, %v7475_v17 }
0x1777   : > { %v4462_v61 = vadd.f32 %v4454_v7, %v7342_v45  ;;  %v4468_v7 = vmax.f32 %v4460_v6, 0.0  ;;  %v4467_v44 = vmax.f32 %v4459_v31, 0.0  ;;  %v4456_v57 = vadd.f32 %v4448_v40, %v7472_v16 }
0x1778   : > { %v4463_v9 = vmax.f32 %v4455_v50, 0.0 }
0x1779   : > { %v4470_v29 = vmax.f32 %v4462_v61, 0.0  ;;  %v4465_v61 = vmax.f32 %v4457_v46, 0.0  ;;  %v4464_v37 = vmax.f32 %v4456_v57, 0.0  ;;  %v6047_v57 = vld [vmem:[%s7372_s28 + $0x3e8] sm:$0xff] }
0x177b   : > { %4479 = vmatpush.msrb.mxu2 %v4470_v29  ;;  %v6032_v29 = vld [vmem:[%s7114_s29 + $0x78] sm:$0xff]  ;;  %s9145_s29 = scalar_lea.vmem [#allocation4], %s5736_s25  ;;  %s6323_s25 = scalar_lea.hbm %s10240_s19, 128 }
0x177d   : > { %4480 = vmatpush.msrb.mxu2 %v4469_v58 }
0x177f   : > { %4481 = vmatpush.msrb.mxu2 %v4468_v7 }
0x1781   : > { %4482 = vmatpush.msrb.mxu2 %v4467_v44 }
0x1783   : > { %4483 = vmatpush.msrb.mxu2 %v4466_v41  ;;  %v6048_v41 = vld [vmem:[%s7372_s28 + $0x3f0] sm:$0xff] }
0x1785   : > { %4484 = vmatpush.msrb.mxu2 %v4465_v61  ;;  %v10671_v61 = vld [vmem:[#allocation14_spill] sm:$0xff] }
0x1787   : > { %4485 = vmatpush.msrb.mxu2 %v4464_v37  ;;  %v10672_v37 = vld [vmem:[#allocation121_spill] sm:$0xff] }
0x1789   : > { %4486 = vmatpush.msrb.mxu2 %v4463_v9  ;;  %v4591_v9 = vsub.f32 %v6048_v41, %v10672_v37 }
0x178a   : > { %6030 = vmatmul.msk.f32.vlgmr.msrb.gmra.mxu2 %vm2303_vm1, %v8703_v0 }
0x178b   : > { %4529 = vmatpush.msra.mxu2 %v6032_v29  ;;  %v6046_v29 = vld [vmem:[%s7372_s28 + $0x3e0] sm:$0xff] }
0x1792   : > { %6033 = vmatmul.msk.f32.vlgmr.msra.gmra.mxu2 %vm2040_vm0, %v8398_v35 }
0x180d   : > { %v4488_v24 = vpop.f32.mrf.mxu2 }
0x180e   : > { %v4489_v14 = vadd.f32 %v4488_v24, %v7488_v27  ;;  %v6049_v24 = vld [vmem:[%s7372_s28 + $0x3f8] sm:$0xff] }
0x1810   : > { %v4491_v6 = vmax.f32 %v4489_v14, 0.0 }
0x1812   : > { %4507 = vmatpush.msrb.mxu1 %v4491_v6  ;;  %v10673_v6 = vld [vmem:[#allocation123_spill] sm:$0xff] }
0x1813   : > { %6031 = vmatmul.msk.f32.vlgmr.msrb.gmra.mxu1 %vm2040_vm0, %v8807_v30 }
0x1815   : > { %v4531_v5 = vpop.f32.mrf.mxu2 }
0x1816   : > { %v4532_v58 = vadd.f32 %v4531_v5, %v7254_v18  ;;  %v10666_v18 = vld [vmem:[#allocation115_spill] sm:$0xff]  ;;  %v4590_v5 = vsub.f32 %v6047_v57, %v10673_v6  ;;  %v6042_v6 = vld [vmem:[%s7372_s28 + $0x3c0] sm:$0xff] }
0x1818   : > { %v4534_v31 = vmax.f32 %v4532_v58, 0.0  ;;  %v6045_v58 = vld [vmem:[%s7372_s28 + $0x3d8] sm:$0xff] }
0x181a   : > { %4550 = vmatpush.msra.mxu1 %v4534_v31  ;;  %v6044_v31 = vld [vmem:[%s7372_s28 + $0x3d0] sm:$0xff] }
0x181b   : > { %6034 = vmatmul.msk.f32.vlgmr.msra.gmra.mxu1 %vm2040_vm0, %v8500_v54  ;;  %v10667_v54 = vld [vmem:[#allocation116_spill] sm:$0xff] }
0x1823   : > { %6035 = vmatmul.msk.f32.gmra.mxu1 %vm2040_vm0, %v8507_v19 }
0x182b   : > { %6036 = vmatmul.msk.f32.gmra.mxu1 %vm2040_vm0, %v8514_v15  ;;  %v10668_v15 = vld [vmem:[#allocation145_spill] sm:$0xff] }
0x1833   : > { %6037 = vmatmul.msk.f32.gmra.mxu1 %vm2040_vm0, %v8521_v59  ;;  %v10669_v59 = vld [vmem:[#allocation119_spill] sm:$0xff] }
0x1834   : > { %v10670_v40 = vmax.f32 %v10668_v15, %v10669_v59  ;;  %v4589_v59 = vsub.f32 %v6046_v29, %v10649_v28 }
0x183b   : > { %6038 = vmatmul.msk.f32.gmra.mxu1 %vm2040_vm0, %v8528_v42 }
0x1843   : > { %6039 = vmatmul.msk.f32.gmra.mxu1 %vm2040_vm0, %v8535_v11 }
0x184b   : > { %6040 = vmatmul.msk.f32.gmra.mxu1 %vm2040_vm0, %v8542_v34 }
0x1853   : > { %6041 = vmatmul.msk.f32.gmra.mxu1 %vm2040_vm0, %v10666_v18  ;;  %v10674_v18 = vld [vmem:[#allocation17_spill] sm:$0xff] }
0x1890   : > { %v4509_v35 = vpop.f32.mrf.mxu1 }
0x1891   : > { %v9021_v19 = vadd.f32 %v4509_v35, %v10667_v54 }
0x1893   : > { %v9027_v42 = vmax.f32 %v9021_v19, %v10670_v40 }
0x1898   : > { %v4552_v11 = vpop.f32.mrf.mxu1 }
0x18a0   : > { %v4555_v7 = vpop.f32.mrf.mxu1 }
0x18a8   : > { %v4558_v34 = vpop.f32.mrf.mxu1 }
0x18a9   : > { %v9061_v28 = vadd.f32 %v4558_v34, %v10633_v25  ;;  %v9074_v25 = vadd.f32 %v4552_v11, %v7388_v2  ;;  %v4585_v34 = vsub.f32 %v6042_v6, %v8680_v26  ;;  %v10679_v6 = vld [vmem:[#allocation118_spill] sm:$0xff] }
0x18ab   : > { %v4593_v2 = vadd.f32 %v4585_v34, %v9074_v25 }
0x18b0   : > { %v4561_v51 = vpop.f32.mrf.mxu1 }
0x18b1   : > { %v9051_v37 = vadd.f32 %v4561_v51, %v10629_v39 }
0x18b8   : > { %v4564_v32 = vpop.f32.mrf.mxu1 }
0x18b9   : > { %v9044_v35 = vadd.f32 %v4564_v32, %v10674_v18  ;;  %v4587_v32 = vsub.f32 %v6044_v31, %v8656_v12  ;;  %v4601_v31 = vmul.f32 %v4593_v2, %v7468_v1 }
0x18c0   : > { %v4567_v44 = vpop.f32.mrf.mxu1 }
0x18c1   : > { %v9038_v14 = vadd.f32 %v4567_v44, %v10644_v22  ;;  %v4588_v22 = vsub.f32 %v6045_v58, %v10631_v3  ;;  %v9068_v3 = vadd.f32 %v4555_v7, %v7356_v55 }
0x18c3   : > { %v4598_v44 = vadd.f32 %v4590_v5, %v9038_v14 }
0x18c5   : > { %v4606_v29 = vmul.f32 %v4598_v44, %v7346_v47 }
0x18c8   : > { %v4570_v46 = vpop.f32.mrf.mxu1 }
0x18c9   : > { %v9032_v50 = vadd.f32 %v4570_v46, %v10671_v61  ;;  %v4592_v46 = vsub.f32 %v6049_v24, %v10628_v36  ;;  %v6043_v61 = vld [vmem:[%s7372_s28 + $0x3c8] sm:$0xff]  ;;  %v4597_v36 = vadd.f32 %v4589_v59, %v9044_v35  ;;  %s5577_s28 = scalar_lea.hbm %s10240_s19, %s6181_s6 }
0x18ca   : > { %v4586_v51 = vsub.f32 %v6043_v61, %v8667_v33  ;;  %s5580_s23 = sshll.u32 %s5577_s28, 4  ;;  %s5581_s23 = int_to_ptr.hbm [resolvable:$true] %s5580_s23 }
0x18cb   : > { %v4599_v40 = vadd.f32 %v4591_v9, %v9032_v50  ;;  %v4605_v24 = vmul.f32 %v4597_v36, %v7352_v52  ;;  %v10680_v36 = vld [vmem:[#allocation133_spill] sm:$0xff]  ;;  %s6317_s1 = sshra.s32 %s5581_s23, 4  ;;  %s6318_s1 = int_to_ptr.hbm [resolvable:$true] %s6317_s1 }
0x18cc   : > { %v4594_v7 = vadd.f32 %v4586_v51, %v9068_v3  ;;  %v10682_v51 = vld [vmem:[#allocation138_spill] sm:$0xff]  ;;  %s6319_s2 = scalar_lea.hbm %s6318_s1, 64  ;;  %p6324_p2 = scmp.lt.s32.totalorder %s6318_s1, %s10240_s19 }
0x18cd   : > { %v4607_v9 = vmul.f32 %v4599_v40, %v7340_v43  ;;  %v4595_v43 = vadd.f32 %v4587_v32, %v9061_v28  ;;  %v4613_v58 = vadd.f32 %v4605_v24, %v7375_v60  ;;  %v4609_v60 = vadd.f32 %v4601_v31, %v7475_v17  ;;  %v10678_v32 = vld [vmem:[#allocation117_spill] sm:$0xff]  ;;  %v10683_v24 = vld [vmem:[#allocation67_spill] sm:$0xff]  ;;  %v10687_v31 = vld [vmem:[#allocation100_spill] sm:$0xff]  ;;  %p6320_p13 = scmp.ne.s32.totalorder %s6318_s1, %s6319_s2  ;;  %p6325_p3 = scmp.lt.s32.totalorder %s6323_s25, %s6319_s2 }
0x18ce   : > { %v4602_v52 = vmul.f32 %v4594_v7, %v7447_v10  ;;  %v10684_v7 = vld [vmem:[#allocation80_spill] sm:$0xff] }
0x18cf   : > { %v4615_v55 = vadd.f32 %v4607_v9, %v7348_v49  ;;  %v4603_v11 = vmul.f32 %v4595_v43, %v7399_v8  ;;  %v4617_v40 = vmax.f32 %v4609_v60, 0.0  ;;  %v4775_v60 = vld [vmem:[%s9145_s29 + $0x8] sm:$0xff]  ;;  %p6321_p0 = pnand %p6320_p13, %p6513_p6  ;;  %p6326_p4 = por %p6325_p3, %p6324_p2 }
0x18d0   : > { %v4573_v41 = vpop.f32.mrf.mxu1  ;;  %v4610_v8 = vadd.f32 %v4602_v52, %v7472_v16 }
0x18d1   : > { %v9056_v57 = vadd.f32 %v4573_v41, %v10544_v23  ;;  %v4596_v23 = vadd.f32 %v4588_v22, %v9051_v37  ;;  %v4623_v26 = vmax.f32 %v4615_v55, 0.0  ;;  %v10675_v41 = vld [vmem:[#allocation30_spill] sm:$0xff]  ;;  %p6322_p1 = pneg %p6321_p0 }
0x18d2   : > { %v4618_v10 = vmax.f32 %v4610_v8, 0.0 }
0x18d3   : > { %v4600_v39 = vadd.f32 %v4592_v46, %v9056_v57  ;;  %v4604_v5 = vmul.f32 %v4596_v23, %v7362_v56  ;;  %v4621_v56 = vmax.f32 %v4613_v58, 0.0  ;;  %v6070_v23 = vld [vmem:[%s9145_s29 + $0xd0] sm:$0xff]  ;;  %p6327_p5 = pnand %p6326_p4, %p6322_p1 }
0x18d5   : > { %v4608_v12 = vmul.f32 %v4600_v39, %v7332_v38  ;;  %v4614_v38 = vadd.f32 %v4606_v29, %v7354_v53  ;;  %v4612_v49 = vadd.f32 %v4604_v5, %v7438_v62  ;;  %v4611_v53 = vadd.f32 %v4603_v11, %v7458_v20  ;;  %v6069_v29 = vld [vmem:[%s9145_s29 + $0xc8] sm:$0xff] }
0x18d7   : > { %v4616_v33 = vadd.f32 %v4608_v12, %v7342_v45  ;;  %v4622_v45 = vmax.f32 %v4614_v38, 0.0  ;;  %v4620_v18 = vmax.f32 %v4612_v49, 0.0  ;;  %v4619_v59 = vmax.f32 %v4611_v53, 0.0  ;;  %v10685_v38 = vld [vmem:[#allocation85_spill] sm:$0xff]  ;;  %v10717_v12 = vld [vmem:[#allocation35_spill] sm:$0xff] }
0x18d9   : > { %v4624_v47 = vmax.f32 %v4616_v33, 0.0 }
0x18db   : > { %4633 = vmatpush.msrb.mxu2 %v4624_v47 }
0x18dd   : > { %4634 = vmatpush.msrb.mxu2 %v4623_v26  ;;  %v10686_v26 = vld [vmem:[#allocation91_spill] sm:$0xff] }
0x18df   : > { %4635 = vmatpush.msrb.mxu2 %v4622_v45 }
0x18e1   : > { %4636 = vmatpush.msrb.mxu2 %v4621_v56 }
0x18e3   : > { %4637 = vmatpush.msrb.mxu2 %v4620_v18 }
0x18e5   : > { %4638 = vmatpush.msrb.mxu2 %v4619_v59  ;;  %v4774_v59 = vld [vmem:[%s9145_s29] sm:$0xff] }
0x18e7   : > { %4639 = vmatpush.msrb.mxu2 %v4618_v10 }
0x18e9   : > { %4640 = vmatpush.msrb.mxu2 %v4617_v40  ;;  %v4776_v40 = vld [vmem:[%s9145_s29 + $0x10] sm:$0xff] }
0x18ea   : > { %6050 = vmatmul.msk.f32.vlgmr.msrb.gmra.mxu2 %vm2303_vm1, %v8703_v0  ;;  %v10676_v0 = vld [vmem:[#allocation39_spill] sm:$0xff] }
0x196d   : > { %v4642_v62 = vpop.f32.mrf.mxu2 }
0x196e   : > { %v4643_v1 = vadd.f32 %v4642_v62, %v7488_v27  ;;  %v10677_v27 = vld [vmem:[#allocation13_spill] sm:$0xff]  ;;  %v4777_v62 = vld [vmem:[%s9145_s29 + $0x18] sm:$0xff] }
0x1970   : > { %v4645_v20 = vmax.f32 %v4643_v1, 0.0 }
0x1972   : > { %4661 = vmatpush.msrb.mxu3 %v4645_v20 }
0x1973   : > { %6051 = vmatmul.msk.f32.vlgmr.msrb.gmra.mxu3 %vm2040_vm0, %v8807_v30 }
0x19f6   : > { %v4663_v16 = vpop.f32.mrf.mxu3 }
0x19f7   : > { %v9099_v46 = vadd.f32 %v4663_v16, %v10667_v54  ;;  %v4778_v16 = vld [vmem:[%s9145_s29 + $0x20] sm:$0xff] }
0x19f9   : > { %v9103_v17 = vmax.f32 %v9099_v46, %v9027_v42  ;;  %v10681_v42 = vld [vmem:[#allocation56_spill] sm:$0xff] }
0x19fb   : > { %v4681_v61 = vsub.f32 %v10675_v41, %v9103_v17  ;;  %v4682_v22 = vsub.f32 %v10676_v0, %v9103_v17  ;;  %v4683_v44 = vsub.f32 %v10677_v27, %v9103_v17  ;;  %v4690_v30 = vsub.f32 %v10678_v32, %v9103_v17  ;;  %v4779_v41 = vld [vmem:[%s9145_s29 + $0x28] sm:$0xff] }
0x19fc   : > { %v4691_v54 = vsub.f32 %v10679_v6, %v9103_v17  ;;  %v4692_v9 = vsub.f32 %v10680_v36, %v9103_v17  ;;  %v4684_v39 = vsub.f32 %v10681_v42, %v9103_v17  ;;  %v4685_v33 = vsub.f32 %v10683_v24, %v9103_v17  ;;  %v4781_v42 = vld [vmem:[%s9145_s29 + $0x38] sm:$0xff]  ;;  %v10692_v24 = vld [vmem:[#allocation27_spill] sm:$0xff]  ;;  %v10711_v6 = vld [vmem:[#allocation33_spill] sm:$0xff] }
0x19fd   : > { %v4697_v34 = vmul.f32 1.442695, %v4681_v61  ;;  %v4699_v43 = vmul.f32 1.442695, %v4682_v22  ;;  %v4701_v55 = vmul.f32 1.442695, %v4683_v44  ;;  %v4686_v5 = vsub.f32 %v10684_v7, %v9103_v17 }
0x19fe   : > { %v4703_v47 = vmul.f32 1.442695, %v4684_v39  ;;  %v4687_v2 = vsub.f32 %v10685_v38, %v9103_v17  ;;  %v4705_v11 = vmul.f32 1.442695, %v4685_v33  ;;  %v4688_v58 = vsub.f32 %v10686_v26, %v9103_v17  ;;  %v4780_v61 = vld [vmem:[%s9145_s29 + $0x30] sm:$0xff]  ;;  %v10688_v22 = vld [vmem:[#allocation29_spill] sm:$0xff] }
0x19ff   : > { %6231 = vpow2.f32 %v4697_v34  ;;  %v4707_v52 = vmul.f32 1.442695, %v4686_v5  ;;  %v4689_v56 = vsub.f32 %v10687_v31, %v9103_v17  ;;  %v9158_v27 = vadd.f32 %v4774_v59, %v10688_v22  ;;  %v10690_v44 = vld [vmem:[#allocation28_spill] sm:$0xff]  ;;  %v6052_v39 = vld [vmem:[%s9145_s29 + $0x40] sm:$0xff]  ;;  %v6053_v5 = vld [vmem:[%s9145_s29 + $0x48] sm:$0xff] }
0x1a00   : > { %6233 = vpow2.f32 %v4699_v43  ;;  %v4709_v53 = vmul.f32 1.442695, %v4687_v2  ;;  %v4711_v10 = vmul.f32 1.442695, %v4688_v58  ;;  %v9161_v32 = vadd.f32 %v4775_v60, %v10690_v44  ;;  %v6055_v38 = vld [vmem:[%s9145_s29 + $0x58] sm:$0xff]  ;;  %v10698_v58 = vld [vmem:[#allocation23_spill] sm:$0xff] }
0x1a01   : > { %6235 = vpow2.f32 %v4701_v55  ;;  %v4713_v0 = vmul.f32 1.442695, %v4689_v56  ;;  %10689 = vst [vmem:[#allocation115_spill] sm:$0xff] %v9158_v27  ;;  %v9169_v33 = vadd.f32 %v4776_v40, %v10692_v24  ;;  %v10694_v55 = vld [vmem:[#allocation25_spill] sm:$0xff]  ;;  %v4715_v2 = vmul.f32 1.442695, %v4690_v30 }
0x1a02   : > { %6237 = vpow2.f32 %v4703_v47  ;;  %10691 = vst [vmem:[#allocation116_spill] sm:$0xff] %v9161_v32  ;;  %v9172_v7 = vadd.f32 %v4777_v62, %v10694_v55  ;;  %v6054_v47 = vld [vmem:[%s9145_s29 + $0x50] sm:$0xff]  ;;  %v10700_v31 = vld [vmem:[#allocation22_spill] sm:$0xff]  ;;  %v4717_v22 = vmul.f32 1.442695, %v4691_v54  ;;  %v10705_v44 = vld [vmem:[#allocation37_spill] sm:$0xff] }
0x1a03   : > { %6239 = vpow2.f32 %v4705_v11  ;;  %10693 = vst [vmem:[#allocation145_spill] sm:$0xff] %v9169_v33  ;;  %v10696_v11 = vld [vmem:[#allocation24_spill] sm:$0xff]  ;;  %v9184_v56 = vadd.f32 %v4780_v61, %v10700_v31  ;;  %v6058_v59 = vld [vmem:[%s9145_s29 + $0x70] sm:$0xff]  ;;  %v10702_v30 = vld [vmem:[#allocation26_spill] sm:$0xff] }
0x1a04   : > { %6241 = vpow2.f32 %v4707_v52  ;;  %10695 = vst [vmem:[#allocation119_spill] sm:$0xff] %v9172_v7  ;;  %v9178_v26 = vadd.f32 %v4778_v16, %v10696_v11  ;;  %v9181_v52 = vadd.f32 %v4779_v41, %v10698_v58  ;;  %v10703_v62 = vld [vmem:[#allocation38_spill] sm:$0xff]  ;;  %v6059_v16 = vld [vmem:[%s9145_s29 + $0x78] sm:$0xff]  ;;  %v6060_v41 = vld [vmem:[%s9145_s29 + $0x80] sm:$0xff] }
0x1a05   : > { %v9133_v45 = vpop.eup %6231  ;;  %6243 = vpow2.f32 %v4709_v53  ;;  %10701 = vst [vmem:[#allocation123_spill] sm:$0xff] %v9184_v56  ;;  %v6056_v53 = vld [vmem:[%s9145_s29 + $0x60] sm:$0xff]  ;;  %v6061_v61 = vld [vmem:[%s9145_s29 + $0x88] sm:$0xff]  ;;  %v10707_v24 = vld [vmem:[#allocation36_spill] sm:$0xff] }
0x1a06   : > { %v9135_v49 = vpop.eup %6233  ;;  %6245 = vpow2.f32 %v4711_v10  ;;  %10697 = vst [vmem:[#allocation14_spill] sm:$0xff] %v9178_v26  ;;  %v9193_v10 = vadd.f32 %v4781_v42, %v10702_v30  ;;  %v9208_v42 = vadd.f32 %v6054_v47, %v10707_v24  ;;  %v10709_v55 = vld [vmem:[#allocation34_spill] sm:$0xff]  ;;  %v6062_v11 = vld [vmem:[%s9145_s29 + $0x90] sm:$0xff]  ;;  %v6063_v58 = vld [vmem:[%s9145_s29 + $0x98] sm:$0xff]  ;;  %v9220_v54 = vadd.f32 %v6056_v53, %v10711_v6 }
0x1a07   : > { %v4729_v18 = vadd.f32 %v9135_v49, %v9133_v45  ;;  %v9141_v8 = vpop.eup %6235  ;;  %10699 = vst [vmem:[#allocation121_spill] sm:$0xff] %v9181_v52  ;;  %6247 = vpow2.f32 %v4713_v0  ;;  %v6064_v31 = vld [vmem:[%s9145_s29 + $0xa0] sm:$0xff]  ;;  %v6065_v47 = vld [vmem:[%s9145_s29 + $0xa8] sm:$0xff]  ;;  %v4719_v24 = vmul.f32 1.442695, %v4692_v9  ;;  %v9235_v53 = vadd.f32 %v6059_v16, %v10717_v12  ;;  %v10718_v6 = vld [vmem:[#allocation47_spill] sm:$0xff] }
0x1a08   : > { %v9152_v20 = vpop.eup %6237  ;;  %10708 = vst [vmem:[#allocation39_spill] sm:$0xff] %v9208_v42  ;;  %6249 = vpow2.f32 %v4715_v2  ;;  %v10720_v36 = vld [vmem:[#allocation46_spill] sm:$0xff]  ;;  %v6071_v16 = vld [vmem:[%s9145_s29 + $0xd8] sm:$0xff]  ;;  %v6076_v32 = vld [vmem:[%s9145_s29 + $0x100] sm:$0xff] }
0x1a09   : > { %v4730_v1 = vadd.f32 %v9141_v8, %v4729_v18  ;;  %v9166_v43 = vpop.eup %6239  ;;  %v6057_v18 = vld [vmem:[%s9145_s29 + $0x68] sm:$0xff]  ;;  %10712 = vst [vmem:[#allocation117_spill] sm:$0xff] %v9220_v54  ;;  %v9247_v9 = vadd.f32 %v6061_v61, %v10720_v36  ;;  %6251 = vpow2.f32 %v4717_v22  ;;  %v10729_v36 = vld [vmem:[#allocation41_spill] sm:$0xff]  ;;  %v10735_v33 = vld [vmem:[#allocation55_spill] sm:$0xff] }
0x1a0a   : > { %v9190_v40 = vpop.eup %6241  ;;  %6253 = vpow2.f32 %v4719_v24  ;;  %v6081_v7 = vld [vmem:[%s9145_s29 + $0x128] sm:$0xff]  ;;  %v10746_v54 = vld [vmem:[#allocation49_spill] sm:$0xff] }
0x1a0b   : > { %v4731_v34 = vadd.f32 %v9152_v20, %v4730_v1  ;;  %v9196_v1 = vadd.f32 %v6052_v39, %v10703_v62  ;;  %v9211_v39 = vadd.f32 %v6055_v38, %v10709_v55  ;;  %v9217_v30 = vpop.eup %6243  ;;  %v6066_v38 = vld [vmem:[%s9145_s29 + $0xb0] sm:$0xff]  ;;  %10721 = vst [vmem:[#allocation138_spill] sm:$0xff] %v9247_v9  ;;  %v9265_v9 = vadd.f32 %v6065_v47, %v10729_v36  ;;  %v10768_v52 = vld [vmem:[#allocation65_spill] sm:$0xff] }
0x1a0c   : > { %v4696_v47 = vsub.f32 %v9099_v46, %v9103_v17  ;;  %v6082_v46 = vld [vmem:[%s9145_s29 + $0x130] sm:$0xff]  ;;  %v6112_v56 = vld [vmem:[%s9145_s29 + $0x220] sm:$0xff] }
0x1a0d   : > { %v4732_v60 = vadd.f32 %v9166_v43, %v4731_v34  ;;  %10704 = vst [vmem:[#allocation17_spill] sm:$0xff] %v9196_v1  ;;  %v9205_v34 = vadd.f32 %v6053_v5, %v10705_v44  ;;  %v10713_v5 = vld [vmem:[#allocation32_spill] sm:$0xff]  ;;  %v9244_v1 = vpop.eup %6245 }
0x1a0e   : > { %10710 = vst [vmem:[#allocation13_spill] sm:$0xff] %v9211_v39  ;;  %v9223_v62 = vadd.f32 %v6057_v18, %v10713_v5  ;;  %v6067_v44 = vld [vmem:[%s9145_s29 + $0xb8] sm:$0xff]  ;;  %v9238_v18 = vadd.f32 %v6060_v41, %v10718_v6  ;;  %v6068_v5 = vld [vmem:[%s9145_s29 + $0xc0] sm:$0xff]  ;;  %v10724_v6 = vsub.f32 %v10682_v51, %v9103_v17 }
0x1a0f   : > { %10706 = vst [vmem:[#allocation30_spill] sm:$0xff] %v9205_v34  ;;  %v4733_v0 = vadd.f32 %v9190_v40, %v4732_v60  ;;  %v10715_v60 = vld [vmem:[#allocation31_spill] sm:$0xff]  ;;  %v6072_v41 = vld [vmem:[%s9145_s29 + $0xe0] sm:$0xff]  ;;  %v10727_v34 = vld [vmem:[#allocation42_spill] sm:$0xff] }
0x1a10   : > { %10714 = vst [vmem:[#allocation118_spill] sm:$0xff] %v9223_v62  ;;  %v9232_v55 = vadd.f32 %v6058_v59, %v10715_v60  ;;  %v10722_v59 = vld [vmem:[#allocation45_spill] sm:$0xff]  ;;  %v6073_v60 = vld [vmem:[%s9145_s29 + $0xe8] sm:$0xff]  ;;  %v9262_v61 = vadd.f32 %v6064_v31, %v10727_v34  ;;  %v10731_v51 = vld [vmem:[#allocation40_spill] sm:$0xff] }
0x1a11   : > { %10719 = vst [vmem:[#allocation56_spill] sm:$0xff] %v9238_v18  ;;  %v4734_v2 = vadd.f32 %v9217_v30, %v4733_v0  ;;  %v9250_v12 = vadd.f32 %v6062_v11, %v10722_v59  ;;  %v4721_v18 = vmul.f32 1.442695, %v10724_v6  ;;  %v10725_v0 = vld [vmem:[#allocation43_spill] sm:$0xff]  ;;  %v6075_v59 = vld [vmem:[%s9145_s29 + $0xf8] sm:$0xff]  ;;  %v9274_v6 = vadd.f32 %v6066_v38, %v10731_v51  ;;  %v10737_v51 = vld [vmem:[#allocation54_spill] sm:$0xff] }
0x1a12   : > { %10716 = vst [vmem:[#allocation133_spill] sm:$0xff] %v9232_v55  ;;  %v9259_v27 = vadd.f32 %v6063_v58, %v10725_v0  ;;  %v6074_v11 = vld [vmem:[%s9145_s29 + $0xf0] sm:$0xff]  ;;  %v6077_v58 = vld [vmem:[%s9145_s29 + $0x108] sm:$0xff]  ;;  %v6079_v31 = vld [vmem:[%s9145_s29 + $0x118] sm:$0xff]  ;;  %v10733_v0 = vsub.f32 %v10668_v15, %v9103_v17  ;;  %v9288_v38 = vadd.f32 %v6068_v5, %v10735_v33 }
0x1a13   : > { %10723 = vst [vmem:[#allocation67_spill] sm:$0xff] %v9250_v12  ;;  %v4735_v22 = vadd.f32 %v9244_v1, %v4734_v2  ;;  %v9271_v12 = vpop.eup %6247  ;;  %v6078_v34 = vld [vmem:[%s9145_s29 + $0x110] sm:$0xff]  ;;  %v10734_v2 = vld [vmem:[#allocation44_spill] sm:$0xff]  ;;  %v6080_v39 = vld [vmem:[%s9145_s29 + $0x120] sm:$0xff]  ;;  %6255 = vpow2.f32 %v4721_v18 }
0x1a14   : > { %10726 = vst [vmem:[#allocation80_spill] sm:$0xff] %v9259_v27  ;;  %v4723_v36 = vmul.f32 1.442695, %v10733_v0  ;;  %v9285_v42 = vadd.f32 %v6067_v44, %v10734_v2  ;;  %v9291_v27 = vadd.f32 %v6069_v29, %v10737_v51  ;;  %v10739_v15 = vld [vmem:[#allocation53_spill] sm:$0xff]  ;;  %v10741_v44 = vld [vmem:[#allocation51_spill] sm:$0xff]  ;;  %v6083_v33 = vld [vmem:[%s9145_s29 + $0x138] sm:$0xff]  ;;  %v10743_v51 = vsub.f32 %v9021_v19, %v9103_v17 }
0x1a15   : > { %10728 = vst [vmem:[#allocation85_spill] sm:$0xff] %v9262_v61  ;;  %v4736_v24 = vadd.f32 %v9271_v12, %v4735_v22  ;;  %v9297_v61 = vpop.eup %6249  ;;  %v9300_v0 = vadd.f32 %v6070_v23, %v10739_v15  ;;  %v9303_v2 = vadd.f32 %v6071_v16, %v10741_v44  ;;  %v6096_v29 = vld [vmem:[%s9145_s29 + $0x1a0] sm:$0xff]  ;;  %v6097_v5 = vld [vmem:[%s9145_s29 + $0x1a8] sm:$0xff]  ;;  %v9315_v23 = vadd.f32 %v6073_v60, %v10746_v54  ;;  %v10748_v15 = vld [vmem:[#allocation48_spill] sm:$0xff] }
0x1a16   : > { %10730 = vst [vmem:[#allocation91_spill] sm:$0xff] %v9265_v9  ;;  %v10744_v22 = vld [vmem:[#allocation50_spill] sm:$0xff]  ;;  %v9318_v16 = vadd.f32 %v6074_v11, %v10748_v15  ;;  %v6098_v44 = vld [vmem:[%s9145_s29 + $0x1b0] sm:$0xff]  ;;  %v9324_v19 = vpop.eup %6251  ;;  %v10750_v17 = vld [vmem:[#allocation52_spill] sm:$0xff]  ;;  %6257 = vpow2.f32 %v4723_v36  ;;  %v4727_v15 = vmul.f32 1.442695, %v4696_v47 }
0x1a17   : > { %10732 = vst [vmem:[#allocation100_spill] sm:$0xff] %v9274_v6  ;;  %v4737_v18 = vadd.f32 %v9297_v61, %v4736_v24  ;;  %v6085_v60 = vld [vmem:[%s9145_s29 + $0x148] sm:$0xff]  ;;  %v6086_v11 = vld [vmem:[%s9145_s29 + $0x150] sm:$0xff]  ;;  %v10756_v24 = vld [vmem:[#allocation60_spill] sm:$0xff]  ;;  %v9349_v47 = vpop.eup %6253 }
0x1a18   : > { %10736 = vst [vmem:[#allocation29_spill] sm:$0xff] %v9288_v38  ;;  %v4725_v38 = vmul.f32 1.442695, %v10743_v51  ;;  %v10752_v51 = vld [vmem:[#allocation62_spill] sm:$0xff]  ;;  %v10766_v62 = vld [vmem:[#allocation59_spill] sm:$0xff]  ;;  %v10780_v6 = vld [vmem:[#allocation77_spill] sm:$0xff] }
0x1a19   : > { %10738 = vst [vmem:[#allocation28_spill] sm:$0xff] %v9291_v27  ;;  %v9312_v27 = vadd.f32 %v6072_v41, %v10744_v22  ;;  %v9327_v41 = vadd.f32 %v6075_v59, %v10750_v17  ;;  %v9330_v54 = vadd.f32 %v6076_v32, %v10752_v51  ;;  %v6087_v22 = vld [vmem:[%s9145_s29 + $0x158] sm:$0xff]  ;;  %v10758_v9 = vld [vmem:[#allocation58_spill] sm:$0xff]  ;;  %v6088_v17 = vld [vmem:[%s9145_s29 + $0x160] sm:$0xff]  ;;  %v4738_v36 = vadd.f32 %v9324_v19, %v4737_v18 }
0x1a1a   : > { %10740 = vst [vmem:[#allocation27_spill] sm:$0xff] %v9300_v0  ;;  %v6099_v0 = vld [vmem:[%s9145_s29 + $0x1b8] sm:$0xff]  ;;  %v9342_v59 = vadd.f32 %v6079_v31, %v10758_v9  ;;  %v6089_v32 = vld [vmem:[%s9145_s29 + $0x168] sm:$0xff]  ;;  %v6090_v51 = vld [vmem:[%s9145_s29 + $0x170] sm:$0xff]  ;;  %6259 = vpow2.f32 %v4725_v38  ;;  %v9364_v18 = vadd.f32 %v6083_v33, %v10766_v62  ;;  %v9377_v38 = vpop.eup %6255  ;;  %v9395_v55 = vadd.f32 %v6086_v11, %v10780_v6 }
0x1a1b   : > { %10742 = vst [vmem:[#allocation25_spill] sm:$0xff] %v9303_v2  ;;  %v6084_v2 = vld [vmem:[%s9145_s29 + $0x140] sm:$0xff]  ;;  %v10772_v62 = vld [vmem:[#allocation63_spill] sm:$0xff]  ;;  %6261 = vpow2.f32 %v4727_v15  ;;  %v10786_v6 = vld [vmem:[#allocation70_spill] sm:$0xff] }
0x1a1c   : > { %10745 = vst [vmem:[#allocation24_spill] sm:$0xff] %v9312_v27  ;;  %v10754_v27 = vld [vmem:[#allocation61_spill] sm:$0xff]  ;;  %v9380_v33 = vadd.f32 %v6098_v44, %v10772_v62  ;;  %v10782_v44 = vld [vmem:[#allocation75_spill] sm:$0xff]  ;;  %v9411_v11 = vadd.f32 %v6089_v32, %v10786_v6 }
0x1a1d   : > { %10747 = vst [vmem:[#allocation23_spill] sm:$0xff] %v9315_v23  ;;  %v9336_v26 = vadd.f32 %v6077_v58, %v10754_v27  ;;  %v9339_v23 = vadd.f32 %v6078_v34, %v10756_v24  ;;  %v10760_v27 = vld [vmem:[#allocation21_spill] sm:$0xff]  ;;  %v10762_v34 = vld [vmem:[#allocation20_spill] sm:$0xff]  ;;  %v9398_v62 = vadd.f32 %v6087_v22, %v10782_v44 }
0x1a1e   : > { %10749 = vst [vmem:[#allocation22_spill] sm:$0xff] %v9318_v16  ;;  %v9352_v58 = vadd.f32 %v6080_v39, %v10760_v27  ;;  %v9355_v24 = vadd.f32 %v6081_v7, %v10762_v34  ;;  %v10764_v9 = vld [vmem:[#allocation57_spill] sm:$0xff]  ;;  %v9367_v16 = vadd.f32 %v6096_v29, %v10768_v52  ;;  %v10770_v39 = vld [vmem:[#allocation64_spill] sm:$0xff]  ;;  %v6101_v34 = vld [vmem:[%s9145_s29 + $0x1c8] sm:$0xff] }
0x1a1f   : > { %10751 = vst [vmem:[#allocation26_spill] sm:$0xff] %v9327_v41  ;;  %v9358_v31 = vadd.f32 %v6082_v46, %v10764_v9  ;;  %v9370_v27 = vadd.f32 %v6097_v5, %v10770_v39  ;;  %v6095_v7 = vld [vmem:[%s9145_s29 + $0x198] sm:$0xff]  ;;  %v6100_v46 = vld [vmem:[%s9145_s29 + $0x1c0] sm:$0xff]  ;;  %v6102_v9 = vld [vmem:[%s9145_s29 + $0x1d0] sm:$0xff] }
0x1a20   : > { %10753 = vst [vmem:[#allocation38_spill] sm:$0xff] %v9330_v54  ;;  %v6091_v54 = vld [vmem:[%s9145_s29 + $0x178] sm:$0xff]  ;;  %v10774_v52 = vld [vmem:[#allocation66_spill] sm:$0xff]  ;;  %v10776_v5 = vld [vmem:[#allocation79_spill] sm:$0xff] }
0x1a21   : > { %10755 = vst [vmem:[#allocation37_spill] sm:$0xff] %v9336_v26  ;;  %v6092_v26 = vld [vmem:[%s9145_s29 + $0x180] sm:$0xff]  ;;  %v9383_v29 = vadd.f32 %v6099_v0, %v10774_v52  ;;  %v9386_v39 = vadd.f32 %v6084_v2, %v10776_v5  ;;  %v6106_v0 = vld [vmem:[%s9145_s29 + $0x1f0] sm:$0xff]  ;;  %v6107_v2 = vld [vmem:[%s9145_s29 + $0x1f8] sm:$0xff] }
0x1a22   : > { %10757 = vst [vmem:[#allocation36_spill] sm:$0xff] %v9339_v23  ;;  %v6093_v23 = vld [vmem:[%s9145_s29 + $0x188] sm:$0xff]  ;;  %v6108_v52 = vld [vmem:[%s9145_s29 + $0x200] sm:$0xff]  ;;  %v10788_v22 = vld [vmem:[#allocation68_spill] sm:$0xff] }
0x1a23   : > { %10759 = vst [vmem:[#allocation34_spill] sm:$0xff] %v9342_v59  ;;  %v6094_v59 = vld [vmem:[%s9145_s29 + $0x190] sm:$0xff]  ;;  %v6109_v5 = vld [vmem:[%s9145_s29 + $0x208] sm:$0xff]  ;;  %v9414_v44 = vadd.f32 %v6090_v51, %v10788_v22  ;;  %v10796_v32 = vld [vmem:[#allocation81_spill] sm:$0xff] }
0x1a24   : > { %10761 = vst [vmem:[#allocation33_spill] sm:$0xff] %v9352_v58  ;;  %v4739_v58 = vadd.f32 %v9349_v47, %v4738_v36  ;;  %v9429_v6 = vadd.f32 %v6094_v59, %v10796_v32  ;;  %v6113_v51 = vld [vmem:[%s9145_s29 + $0x228] sm:$0xff]  ;;  %v6114_v22 = vld [vmem:[%s9145_s29 + $0x230] sm:$0xff]  ;;  %v10802_v59 = vld [vmem:[#allocation89_spill] sm:$0xff] }
0x1a25   : > { %10763 = vst [vmem:[#allocation32_spill] sm:$0xff] %v9355_v24  ;;  %v6105_v24 = vld [vmem:[%s9145_s29 + $0x1e8] sm:$0xff]  ;;  %v9445_v32 = vadd.f32 %v6101_v34, %v10802_v59  ;;  %v6120_v34 = vld [vmem:[%s9145_s29 + $0x260] sm:$0xff] }
0x1a26   : > { %10765 = vst [vmem:[#allocation31_spill] sm:$0xff] %v9358_v31  ;;  %v10778_v31 = vld [vmem:[#allocation78_spill] sm:$0xff]  ;;  %v4740_v15 = vadd.f32 %v9377_v38, %v4739_v58  ;;  %v10792_v58 = vld [vmem:[#allocation83_spill] sm:$0xff] }
0x1a27   : > { %10767 = vst [vmem:[#allocation35_spill] sm:$0xff] %v9364_v18  ;;  %v9392_v36 = vadd.f32 %v6085_v60, %v10778_v31  ;;  %v10784_v60 = vld [vmem:[#allocation72_spill] sm:$0xff]  ;;  %v6121_v59 = vld [vmem:[%s9145_s29 + $0x268] sm:$0xff] }
0x1a28   : > { %10769 = vst [vmem:[#allocation47_spill] sm:$0xff] %v9367_v16  ;;  %v6103_v16 = vld [vmem:[%s9145_s29 + $0x1d8] sm:$0xff]  ;;  %v9408_v31 = vadd.f32 %v6088_v17, %v10784_v60  ;;  %v10794_v17 = vld [vmem:[#allocation82_spill] sm:$0xff] }
0x1a29   : > { %10771 = vst [vmem:[#allocation46_spill] sm:$0xff] %v9370_v27  ;;  %v6104_v27 = vld [vmem:[%s9145_s29 + $0x1e0] sm:$0xff]  ;;  %v9426_v60 = vadd.f32 %v6093_v23, %v10794_v17  ;;  %v10800_v23 = vld [vmem:[#allocation90_spill] sm:$0xff] }
0x1a2a   : > { %10773 = vst [vmem:[#allocation45_spill] sm:$0xff] %v9380_v33  ;;  %v6111_v33 = vld [vmem:[%s9145_s29 + $0x218] sm:$0xff]  ;;  %v9442_v17 = vadd.f32 %v6100_v46, %v10800_v23  ;;  %v10810_v46 = vld [vmem:[#allocation87_spill] sm:$0xff] }
0x1a2b   : > { %10775 = vst [vmem:[#allocation43_spill] sm:$0xff] %v9383_v29  ;;  %v9423_v29 = vadd.f32 %v6092_v26, %v10792_v58  ;;  %v10798_v26 = vld [vmem:[#allocation84_spill] sm:$0xff]  ;;  %v9460_v23 = vadd.f32 %v6105_v24, %v10810_v46  ;;  %v10817_v46 = vld [vmem:[#allocation98_spill] sm:$0xff] }
0x1a2c   : > { %10777 = vst [vmem:[#allocation42_spill] sm:$0xff] %v9386_v39  ;;  %v9405_v39 = vpop.eup %6257  ;;  %v9439_v58 = vadd.f32 %v6095_v7, %v10798_v26  ;;  %v10808_v7 = vld [vmem:[#allocation88_spill] sm:$0xff] }
0x1a2d   : > { %10779 = vst [vmem:[#allocation41_spill] sm:$0xff] %v9392_v36  ;;  %v10790_v36 = vld [vmem:[#allocation76_spill] sm:$0xff]  ;;  %v9457_v26 = vadd.f32 %v6104_v27, %v10808_v7  ;;  %v10815_v7 = vld [vmem:[#allocation99_spill] sm:$0xff] }
0x1a2e   : > { %10781 = vst [vmem:[#allocation40_spill] sm:$0xff] %v9395_v55  ;;  %v9417_v55 = vadd.f32 %v6091_v54, %v10790_v36  ;;  %v6115_v54 = vld [vmem:[%s9145_s29 + $0x238] sm:$0xff]  ;;  %v6116_v36 = vld [vmem:[%s9145_s29 + $0x240] sm:$0xff]  ;;  %v9476_v24 = vadd.f32 %v6108_v52, %v10815_v7  ;;  %v6129_v7 = vld [vmem:[%s9145_s29 + $0x2a8] sm:$0xff] }
0x1a2f   : > { %10783 = vst [vmem:[#allocation44_spill] sm:$0xff] %v9398_v62  ;;  %v6110_v62 = vld [vmem:[%s9145_s29 + $0x210] sm:$0xff]  ;;  %v6127_v52 = vld [vmem:[%s9145_s29 + $0x298] sm:$0xff] }
0x1a30   : > { %10785 = vst [vmem:[#allocation55_spill] sm:$0xff] %v9408_v31  ;;  %v4741_v31 = vadd.f32 %v9405_v39, %v4740_v15  ;;  %v10806_v15 = vld [vmem:[#allocation73_spill] sm:$0xff] }
0x1a31   : > { %10787 = vst [vmem:[#allocation54_spill] sm:$0xff] %v9411_v11  ;;  %v9436_v11 = vpop.eup %6259  ;;  %v9454_v18 = vadd.f32 %v6103_v16, %v10806_v15  ;;  %v10814_v15 = vld [vmem:[#allocation74_spill] sm:$0xff] }
0x1a32   : > { %10789 = vst [vmem:[#allocation53_spill] sm:$0xff] %v9414_v44  ;;  %v6118_v44 = vld [vmem:[%s9145_s29 + $0x250] sm:$0xff]  ;;  %v9473_v27 = vadd.f32 %v6107_v2, %v10814_v15  ;;  %v10823_v2 = vld [vmem:[#allocation94_spill] sm:$0xff] }
0x1a33   : > { %10791 = vst [vmem:[#allocation51_spill] sm:$0xff] %v9417_v55  ;;  %v6119_v55 = vld [vmem:[%s9145_s29 + $0x258] sm:$0xff]  ;;  %v9491_v15 = vadd.f32 %v6112_v56, %v10823_v2  ;;  %v6130_v2 = vld [vmem:[%s9145_s29 + $0x2b0] sm:$0xff] }
0x1a34   : > { %10793 = vst [vmem:[#allocation50_spill] sm:$0xff] %v9423_v29  ;;  %v10804_v29 = vld [vmem:[#allocation15_spill] sm:$0xff] }
0x1a35   : > { %10795 = vst [vmem:[#allocation49_spill] sm:$0xff] %v9426_v60  ;;  %v9448_v60 = vadd.f32 %v6102_v9, %v10804_v29  ;;  %v6122_v9 = vld [vmem:[%s9145_s29 + $0x270] sm:$0xff]  ;;  %v6123_v29 = vld [vmem:[%s9145_s29 + $0x278] sm:$0xff] }
0x1a36   : > { %10797 = vst [vmem:[#allocation48_spill] sm:$0xff] %v9429_v6  ;;  %v6117_v6 = vld [vmem:[%s9145_s29 + $0x248] sm:$0xff] }
0x1a37   : > { %10799 = vst [vmem:[#allocation52_spill] sm:$0xff] %v9439_v58  ;;  %v6124_v58 = vld [vmem:[%s9145_s29 + $0x280] sm:$0xff] }
0x1a38   : > { %10801 = vst [vmem:[#allocation62_spill] sm:$0xff] %v9442_v17  ;;  %v4742_v17 = vadd.f32 %v9436_v11, %v4741_v31  ;;  %v6126_v31 = vld [vmem:[%s9145_s29 + $0x290] sm:$0xff] }
0x1a39   : > { %10803 = vst [vmem:[#allocation61_spill] sm:$0xff] %v9445_v32  ;;  %v9467_v32 = vpop.eup %6261 }
0x1a3a   : > { %10805 = vst [vmem:[#allocation60_spill] sm:$0xff] %v9448_v60  ;;  %v10812_v60 = vld [vmem:[#allocation86_spill] sm:$0xff] }
0x1a3b   : > { %10807 = vst [vmem:[#allocation58_spill] sm:$0xff] %v9454_v18  ;;  %v9470_v16 = vadd.f32 %v6106_v0, %v10812_v60  ;;  %v9479_v18 = vadd.f32 %v6109_v5, %v10817_v46  ;;  %v10821_v0 = vld [vmem:[#allocation95_spill] sm:$0xff]  ;;  %v6128_v5 = vld [vmem:[%s9145_s29 + $0x2a0] sm:$0xff]  ;;  %v9497_v46 = vadd.f32 %v9467_v32, %v4742_v17 }
0x1a3c   : > { %10809 = vst [vmem:[#allocation21_spill] sm:$0xff] %v9457_v26  ;;  %v6125_v26 = vld [vmem:[%s9145_s29 + $0x288] sm:$0xff]  ;;  %v9488_v60 = vadd.f32 %v6111_v33, %v10821_v0  ;;  %v10829_v33 = vld [vmem:[#allocation96_spill] sm:$0xff]  ;;  %v10832_v17 = vld [vmem:[#allocation107_spill] sm:$0xff] }
0x1a3d   : > { %10811 = vst [vmem:[#allocation20_spill] sm:$0xff] %v9460_v23  ;;  %v10819_v23 = vld [vmem:[#allocation97_spill] sm:$0xff]  ;;  %v9506_v0 = vadd.f32 %v6115_v54, %v10829_v33  ;;  %v6133_v54 = vld [vmem:[%s9145_s29 + $0x2c8] sm:$0xff]  ;;  %v6134_v33 = vld [vmem:[%s9145_s29 + $0x2d0] sm:$0xff]  ;;  %6263 = vrcp.f32 %v9497_v46  ;;  %vm4749_vm3 = vweird.f32 %v9497_v46 }
0x1a3e   : > { %10813 = vst [vmem:[#allocation57_spill] sm:$0xff] %v9470_v16  ;;  %v9485_v41 = vadd.f32 %v6110_v62, %v10819_v23  ;;  %v10827_v62 = vld [vmem:[#allocation92_spill] sm:$0xff]  ;;  %v9515_v16 = vadd.f32 %v6117_v6, %v10832_v17  ;;  %v10842_v17 = vld [vmem:[#allocation101_spill] sm:$0xff] }
0x1a3f   : > { %10816 = vst [vmem:[#allocation59_spill] sm:$0xff] %v9476_v24  ;;  %v10825_v24 = vld [vmem:[#allocation93_spill] sm:$0xff]  ;;  %v9503_v23 = vadd.f32 %v6114_v22, %v10827_v62  ;;  %v10836_v22 = vld [vmem:[#allocation104_spill] sm:$0xff] }
0x1a40   : > { %10818 = vst [vmem:[#allocation65_spill] sm:$0xff] %v9479_v18  ;;  %v9500_v18 = vadd.f32 %v6113_v51, %v10825_v24  ;;  %v10834_v51 = vld [vmem:[#allocation106_spill] sm:$0xff]  ;;  %v9521_v62 = vadd.f32 %v6119_v55, %v10836_v22  ;;  %v6136_v22 = vld [vmem:[%s9145_s29 + $0x2e0] sm:$0xff] }
0x1a41   : > { %10820 = vst [vmem:[#allocation64_spill] sm:$0xff] %v9485_v41  ;;  %v10830_v41 = vld [vmem:[#allocation108_spill] sm:$0xff]  ;;  %v9518_v24 = vadd.f32 %v6118_v44, %v10834_v51  ;;  %v9534_v44 = vadd.f32 %v6122_v9, %v10842_v17  ;;  %v10844_v51 = vld [vmem:[#allocation105_spill] sm:$0xff]  ;;  %v10851_v9 = vld [vmem:[#allocation110_spill] sm:$0xff] }
0x1a42   : > { %10822 = vst [vmem:[#allocation63_spill] sm:$0xff] %v9488_v60  ;;  %v9509_v56 = vadd.f32 %v6116_v36, %v10830_v41  ;;  %v6131_v60 = vld [vmem:[%s9145_s29 + $0x2b8] sm:$0xff]  ;;  %v10838_v36 = vld [vmem:[#allocation103_spill] sm:$0xff]  ;;  %v9537_v55 = vadd.f32 %v6123_v29, %v10844_v51  ;;  %v9552_v17 = vadd.f32 %v6127_v52, %v10851_v9  ;;  %v6140_v51 = vld [vmem:[%s9145_s29 + $0x300] sm:$0xff] }
0x1a43   : > { %10824 = vst [vmem:[#allocation66_spill] sm:$0xff] %v9491_v15  ;;  %v6132_v15 = vld [vmem:[%s9145_s29 + $0x2c0] sm:$0xff]  ;;  %v6135_v41 = vld [vmem:[%s9145_s29 + $0x2d8] sm:$0xff]  ;;  %v6142_v52 = vld [vmem:[%s9145_s29 + $0x310] sm:$0xff] }
0x1a44   : > { %10826 = vst [vmem:[#allocation79_spill] sm:$0xff] %v9500_v18  ;;  %v10840_v18 = vld [vmem:[#allocation102_spill] sm:$0xff]  ;;  %v6139_v29 = vld [vmem:[%s9145_s29 + $0x2f8] sm:$0xff] }
0x1a45   : > { %10828 = vst [vmem:[#allocation78_spill] sm:$0xff] %v9503_v23  ;;  %v9531_v6 = vadd.f32 %v6121_v59, %v10840_v18  ;;  %v10849_v18 = vld [vmem:[#allocation112_spill] sm:$0xff] }
0x1a46   : > { %10831 = vst [vmem:[#allocation77_spill] sm:$0xff] %v9509_v56  ;;  %v9528_v56 = vadd.f32 %v6120_v34, %v10838_v36  ;;  %v10847_v34 = vld [vmem:[#allocation113_spill] sm:$0xff]  ;;  %v9549_v59 = vadd.f32 %v6126_v31, %v10849_v18  ;;  %v10859_v31 = vld [vmem:[#allocation111_spill] sm:$0xff]  ;;  %v6143_v9 = vld [vmem:[%s9145_s29 + $0x318] sm:$0xff] }
0x1a47   : > { %10833 = vst [vmem:[#allocation75_spill] sm:$0xff] %v9515_v16  ;;  %v6137_v16 = vld [vmem:[%s9145_s29 + $0x2e8] sm:$0xff]  ;;  %v9546_v36 = vadd.f32 %v6125_v26, %v10847_v34  ;;  %v10857_v26 = vld [vmem:[#allocation109_spill] sm:$0xff]  ;;  %v9567_v18 = vadd.f32 %v6131_v60, %v10859_v31  ;;  %v6146_v31 = vld [vmem:[%s9145_s29 + $0x330] sm:$0xff] }
0x1a48   : > { %10835 = vst [vmem:[#allocation72_spill] sm:$0xff] %v9518_v24  ;;  %v6138_v24 = vld [vmem:[%s9145_s29 + $0x2f0] sm:$0xff]  ;;  %v9564_v34 = vadd.f32 %v6130_v2, %v10857_v26  ;;  %v6145_v60 = vld [vmem:[%s9145_s29 + $0x328] sm:$0xff] }
0x1a49   : > { %10837 = vst [vmem:[#allocation70_spill] sm:$0xff] %v9521_v62  ;;  %v10845_v62 = vld [vmem:[#allocation114_spill] sm:$0xff]  ;;  %v10866_v2 = vld [vmem:[#allocation127_spill] sm:$0xff] }
0x1a4a   : > { %10839 = vst [vmem:[#allocation68_spill] sm:$0xff] %v9528_v56  ;;  %v9543_v23 = vadd.f32 %v6124_v58, %v10845_v62  ;;  %v6141_v56 = vld [vmem:[%s9145_s29 + $0x308] sm:$0xff]  ;;  %v10855_v58 = vld [vmem:[#allocation69_spill] sm:$0xff]  ;;  %v9582_v26 = vadd.f32 %v6135_v41, %v10866_v2 }
0x1a4b   : > { %10841 = vst [vmem:[#allocation76_spill] sm:$0xff] %v9531_v6  ;;  %v10853_v6 = vld [vmem:[#allocation71_spill] sm:$0xff]  ;;  %v9561_v62 = vadd.f32 %v6129_v7, %v10855_v58  ;;  %v10864_v7 = vld [vmem:[#allocation130_spill] sm:$0xff]  ;;  %v6148_v41 = vld [vmem:[%s9145_s29 + $0x340] sm:$0xff] }
0x1a4c   : > { %10843 = vst [vmem:[#allocation83_spill] sm:$0xff] %v9534_v44  ;;  %v9558_v44 = vadd.f32 %v6128_v5, %v10853_v6  ;;  %v10862_v5 = vld [vmem:[#allocation131_spill] sm:$0xff]  ;;  %v9579_v58 = vadd.f32 %v6134_v33, %v10864_v7  ;;  %v10874_v33 = vld [vmem:[#allocation129_spill] sm:$0xff]  ;;  %v6149_v2 = vld [vmem:[%s9145_s29 + $0x348] sm:$0xff] }
0x1a4d   : > { %10846 = vst [vmem:[#allocation82_spill] sm:$0xff] %v9543_v23  ;;  %v6144_v23 = vld [vmem:[%s9145_s29 + $0x320] sm:$0xff]  ;;  %v9576_v6 = vadd.f32 %v6133_v54, %v10862_v5  ;;  %v10872_v54 = vld [vmem:[#allocation120_spill] sm:$0xff]  ;;  %v9597_v7 = vadd.f32 %v6139_v29, %v10874_v33 }
0x1a4e   : > { %10848 = vst [vmem:[#allocation81_spill] sm:$0xff] %v9546_v36  ;;  %v10860_v36 = vld [vmem:[#allocation132_spill] sm:$0xff]  ;;  %v9594_v5 = vadd.f32 %v6138_v24, %v10872_v54  ;;  %v10881_v54 = vld [vmem:[#allocation126_spill] sm:$0xff] }
0x1a4f   : > { %10850 = vst [vmem:[#allocation84_spill] sm:$0xff] %v9549_v59  ;;  %v9573_v59 = vadd.f32 %v6132_v15, %v10860_v36  ;;  %v10870_v15 = vld [vmem:[#allocation122_spill] sm:$0xff]  ;;  %v9614_v29 = vadd.f32 %v6143_v9, %v10881_v54  ;;  %v6151_v33 = vld [vmem:[%s9145_s29 + $0x358] sm:$0xff]  ;;  %v6156_v9 = vld [vmem:[%s9145_s29 + $0x380] sm:$0xff] }
0x1a50   : > { %10852 = vst [vmem:[#allocation90_spill] sm:$0xff] %v9552_v17  ;;  %v6147_v17 = vld [vmem:[%s9145_s29 + $0x338] sm:$0xff]  ;;  %v9591_v36 = vadd.f32 %v6137_v16, %v10870_v15  ;;  %v10889_v54 = vld [vmem:[#allocation18_spill] sm:$0xff] }
0x1a51   : > { %10854 = vst [vmem:[#allocation89_spill] sm:$0xff] %v9558_v44  ;;  %v10868_v44 = vld [vmem:[#allocation124_spill] sm:$0xff] }
0x1a52   : > { %10856 = vst [vmem:[#allocation15_spill] sm:$0xff] %v9561_v62  ;;  %v9588_v62 = vadd.f32 %v6136_v22, %v10868_v44  ;;  %v10877_v22 = vld [vmem:[#allocation19_spill] sm:$0xff]  ;;  %v10879_v15 = vld [vmem:[#allocation128_spill] sm:$0xff] }
0x1a53   : > { %10858 = vst [vmem:[#allocation73_spill] sm:$0xff] %v9564_v34  ;;  %v9608_v16 = vadd.f32 %v6141_v56, %v10877_v22  ;;  %v9611_v24 = vadd.f32 %v6142_v52, %v10879_v15  ;;  %v10885_v34 = vld [vmem:[#allocation135_spill] sm:$0xff]  ;;  %v10887_v56 = vld [vmem:[#allocation134_spill] sm:$0xff]  ;;  %v6155_v22 = vld [vmem:[%s9145_s29 + $0x378] sm:$0xff] }
0x1a54   : > { %10861 = vst [vmem:[#allocation88_spill] sm:$0xff] %v9573_v59  ;;  %v6150_v59 = vld [vmem:[%s9145_s29 + $0x350] sm:$0xff] }
0x1a55   : > { %10863 = vst [vmem:[#allocation87_spill] sm:$0xff] %v9576_v6  ;;  %v9602_v6 = vpop.eup %6263  ;;  %v6154_v52 = vld [vmem:[%s9145_s29 + $0x370] sm:$0xff] }
0x1a56   : > { %10865 = vst [vmem:[#allocation86_spill] sm:$0xff] %v9579_v58  ;;  %v10875_v58 = vld [vmem:[#allocation137_spill] sm:$0xff]  ;;  %v4745_v15 = vmul.f32 %v9602_v6, %v9497_v46  ;;  %vm4750_vm2 = vweird.f32 %v9602_v6 }
0x1a57   : > { %10867 = vst [vmem:[#allocation74_spill] sm:$0xff] %v9582_v26  ;;  %v9605_v44 = vadd.f32 %v6140_v51, %v10875_v58  ;;  %v6152_v26 = vld [vmem:[%s9145_s29 + $0x360] sm:$0xff]  ;;  %v9623_v51 = vadd.f32 %v6145_v60, %v10885_v34  ;;  %v9626_v58 = vadd.f32 %v6146_v31, %v10887_v56  ;;  %v10892_v34 = vld [vmem:[#allocation143_spill] sm:$0xff]  ;;  %v10894_v31 = vld [vmem:[#allocation142_spill] sm:$0xff] }
0x1a58   : > { %10869 = vst [vmem:[#allocation99_spill] sm:$0xff] %v9588_v62  ;;  %v6153_v62 = vld [vmem:[%s9145_s29 + $0x368] sm:$0xff]  ;;  %v9640_v60 = vadd.f32 %v6149_v2, %v10892_v34  ;;  %v9643_v56 = vadd.f32 %v6150_v59, %v10894_v31  ;;  %v6160_v2 = vld [vmem:[%s9145_s29 + $0x3a0] sm:$0xff]  ;;  %v10902_v59 = vld [vmem:[#allocation139_spill] sm:$0xff] }
0x1a59   : > { %10871 = vst [vmem:[#allocation98_spill] sm:$0xff] %v9591_v36  ;;  %v10883_v36 = vld [vmem:[#allocation136_spill] sm:$0xff]  ;;  %v6161_v34 = vld [vmem:[%s9145_s29 + $0x3a8] sm:$0xff]  ;;  %v9660_v31 = vadd.f32 %v6154_v52, %v10902_v59  ;;  %vm4751_vm4 = vmor %vm4749_vm3, %vm4750_vm2 }
0x1a5a   : > { %10873 = vst [vmem:[#allocation97_spill] sm:$0xff] %v9594_v5  ;;  %v9620_v5 = vadd.f32 %v6144_v23, %v10883_v36  ;;  %v10890_v23 = vld [vmem:[#allocation144_spill] sm:$0xff]  ;;  %v6165_v52 = vld [vmem:[%s9145_s29 + $0x3c8] sm:$0xff] }
0x1a5b   : > { %10876 = vst [vmem:[#allocation95_spill] sm:$0xff] %v9605_v44  ;;  %v9634_v44 = vadd.f32 %v6147_v17, %v10889_v54  ;;  %v9637_v36 = vadd.f32 %v6148_v41, %v10890_v23  ;;  %v10898_v17 = vld [vmem:[#allocation140_spill] sm:$0xff] }
0x1a5c   : > { %10878 = vst [vmem:[#allocation94_spill] sm:$0xff] %v9608_v16  ;;  %v6157_v16 = vld [vmem:[%s9145_s29 + $0x388] sm:$0xff]  ;;  %v9651_v54 = vadd.f32 %v6152_v26, %v10898_v17  ;;  %v10900_v41 = vld [vmem:[#allocation16_spill] sm:$0xff]  ;;  %v6162_v26 = vld [vmem:[%s9145_s29 + $0x3b0] sm:$0xff] }
0x1a5d   : > { %10880 = vst [vmem:[#allocation93_spill] sm:$0xff] %v9611_v24  ;;  %v6158_v24 = vld [vmem:[%s9145_s29 + $0x390] sm:$0xff]  ;;  %v9654_v23 = vadd.f32 %v6153_v62, %v10900_v41  ;;  %v4755_v62 = vand.u32 2147483648, %v9497_v46  ;;  %v9672_v17 = vadd.f32 %v6157_v16, %v8970_v13  ;;  %v9687_v13 = vadd.f32 %v6160_v2, %v8946_v48 }
0x1a5e   : > { %10882 = vst [vmem:[#allocation92_spill] sm:$0xff] %v9614_v29  ;;  %v10896_v29 = vld [vmem:[#allocation125_spill] sm:$0xff]  ;;  %v6166_v41 = vld [vmem:[%s9145_s29 + $0x3d0] sm:$0xff]  ;;  %v9707_v48 = vadd.f32 %v6165_v52, %v9068_v3 }
0x1a5f   : > { %10884 = vst [vmem:[#allocation96_spill] sm:$0xff] %v9620_v5  ;;  %v9648_v5 = vadd.f32 %v6151_v33, %v10896_v29  ;;  %v9666_v29 = vadd.f32 %v6156_v9, %v8976_v63  ;;  %v6163_v33 = vld [vmem:[%s9145_s29 + $0x3b8] sm:$0xff]  ;;  %v4753_v63 = vand.u32 2147483647, %v9497_v46  ;;  %v9681_v9 = vadd.f32 %v6158_v24, %v8963_v4  ;;  %v10908_v16 = vld [vmem:[#allocation147_spill] sm:$0xff] }
0x1a60   : > { %10886 = vst [vmem:[#allocation108_spill] sm:$0xff] %v9623_v51  ;;  %v9690_v59 = vadd.f32 %v6161_v34, %v10908_v16  ;;  %v6171_v4 = vld [vmem:[%s9145_s29 + $0x3f8] sm:$0xff] }
0x1a61   : > { %10888 = vst [vmem:[#allocation107_spill] sm:$0xff] %v9626_v58  ;;  %v6170_v58 = vld [vmem:[%s9145_s29 + $0x3f0] sm:$0xff]  ;;  %vm4754_vm5 = vcmp.eq.f32.partialorder %v4753_v63, 8.507059e+37 }
0x1a62   : > { %10891 = vst [vmem:[#allocation106_spill] sm:$0xff] %v9637_v36  ;;  %v6159_v36 = vld [vmem:[%s9145_s29 + $0x398] sm:$0xff]  ;;  %v5283_v3 = vadd.f32 %v6170_v58, %v9032_v50 }
0x1a63   : > { %10893 = vst [vmem:[#allocation104_spill] sm:$0xff] %v9640_v60  ;;  %v4746_v60 = vsub.f32 1.0, %v4745_v15  ;;  %v6164_v15 = vld [vmem:[%s9145_s29 + $0x3c0] sm:$0xff] }
0x1a64   : > { %10895 = vst [vmem:[#allocation103_spill] sm:$0xff] %v9643_v56  ;;  %v10904_v56 = vld [vmem:[#allocation141_spill] sm:$0xff] }
0x1a65   : > { %10897 = vst [vmem:[#allocation102_spill] sm:$0xff] %v9648_v5  ;;  %v9663_v51 = vadd.f32 %v6155_v22, %v10904_v56  ;;  %v4747_v22 = vmul.f32 %v9602_v6, %v4746_v60  ;;  %v9684_v56 = vadd.f32 %v6159_v36, %v8953_v21  ;;  %v10909_v5 = vld [vmem:[#allocation146_spill] sm:$0xff]  ;;  %v9704_v21 = vadd.f32 %v6164_v15, %v9074_v25 }
0x1a66   : > { %10899 = vst [vmem:[#allocation101_spill] sm:$0xff] %v9651_v54  ;;  %v9695_v60 = vadd.f32 %v6162_v26, %v10909_v5  ;;  %v10910_v54 = vld [vmem:[#allocation148_spill] sm:$0xff]  ;;  %v9710_v36 = vadd.f32 %v6166_v41, %v9061_v28  ;;  %v4756_v5 = vor.u32 1.1754944e-38, %v4755_v62  ;;  %v5284_v28 = vadd.f32 %v6171_v4, %v9056_v57  ;;  %v10922_v4 = vld [vmem:[#allocation22_spill] sm:$0xff] }
0x1a67   : > { %10901 = vst [vmem:[#allocation105_spill] sm:$0xff] %v9654_v23  ;;  %v5251_v23 = vadd.f32 %v6163_v33, %v10910_v54  ;;  %v4748_v24 = vadd.f32 %v9602_v6, %v4747_v22 }
0x1a68   : > { %10903 = vst [vmem:[#allocation114_spill] sm:$0xff] %v9660_v31  ;;  %v6169_v31 = vld [vmem:[%s9145_s29 + $0x3e8] sm:$0xff] }
0x1a69   : > { %10905 = vst [vmem:[#allocation113_spill] sm:$0xff] %v9666_v29  ;;  %v6167_v29 = vld [vmem:[%s9145_s29 + $0x3d8] sm:$0xff]  ;;  %v4752_v46 = vsel %vm4751_vm4, %v9602_v6, %v4748_v24  ;;  %v9722_v25 = vadd.f32 %v6169_v31, %v9038_v14  ;;  %v10923_v24 = vld [vmem:[#allocation31_spill] sm:$0xff] }
0x1a6a   : > { %10906 = vst [vmem:[#allocation112_spill] sm:$0xff] %v9672_v17  ;;  %v6168_v17 = vld [vmem:[%s9145_s29 + $0x3e0] sm:$0xff]  ;;  %v9715_v54 = vadd.f32 %v6167_v29, %v9051_v37  ;;  %v4757_v34 = vsel %vm4754_vm5, %v4756_v5, %v4752_v46 }
0x1a6b   : > { %10907 = vst [vmem:[#allocation110_spill] sm:$0xff] %v9681_v9  ;;  %v9718_v2 = vadd.f32 %v6168_v17, %v9044_v35  ;;  %v9727_v26 = vmul.f32 %v9133_v45, %v4757_v34  ;;  %v9730_v37 = vmul.f32 %v9135_v49, %v4757_v34  ;;  %v9733_v35 = vmul.f32 %v9141_v8, %v4757_v34  ;;  %v10924_v5 = vld [vmem:[#allocation53_spill] sm:$0xff] }
0x1a6c   : > { %10911 = vst [vmem:[#allocation71_spill] sm:$0xff] %v9704_v21  ;;  %v9736_v6 = vmul.f32 %v9152_v20, %v4757_v34  ;;  %v9739_v14 = vmul.f32 %v9166_v43, %v4757_v34  ;;  %v9742_v50 = vmul.f32 %v9190_v40, %v4757_v34  ;;  %v9745_v57 = vmul.f32 %v9217_v30, %v4757_v34 }
0x1a6d   : > { %10912 = vst [vmem:[#allocation69_spill] sm:$0xff] %v9707_v48  ;;  %v9748_v45 = vmul.f32 %v9244_v1, %v4757_v34  ;;  %v9751_v49 = vmul.f32 %v9271_v12, %v4757_v34  ;;  %v9754_v8 = vmul.f32 %v9297_v61, %v4757_v34  ;;  %v9757_v20 = vmul.f32 %v9324_v19, %v4757_v34 }
0x1a6e   : > { %10913 = vst [vmem:[#allocation109_spill] sm:$0xff] %v9710_v36  ;;  %v9760_v43 = vmul.f32 %v9349_v47, %v4757_v34  ;;  %v9763_v40 = vmul.f32 %v9377_v38, %v4757_v34  ;;  %v9766_v30 = vmul.f32 %v9405_v39, %v4757_v34  ;;  %v9769_v1 = vmul.f32 %v9436_v11, %v4757_v34  ;;  %v10915_v38 = vld [vmem:[#allocation26_spill] sm:$0xff]  ;;  %v10916_v39 = vld [vmem:[#allocation35_spill] sm:$0xff] }
0x1a6f   : > { %10914 = vst [vmem:[#allocation111_spill] sm:$0xff] %v9715_v54  ;;  %v9772_v12 = vmul.f32 %v9467_v32, %v4757_v34  ;;  %v4797_v61 = vmul.f32 %v9193_v10, %v9727_v26  ;;  %v4830_v19 = vmul.f32 %v9235_v53, %v9730_v37  ;;  %v4863_v47 = vmul.f32 %v9285_v42, %v9733_v35  ;;  %v10917_v11 = vld [vmem:[#allocation51_spill] sm:$0xff] }
0x1a70   : > { %v4896_v58 = vmul.f32 %v10915_v38, %v9736_v6  ;;  %v4929_v31 = vmul.f32 %v10916_v39, %v9739_v14  ;;  %v4962_v29 = vmul.f32 %v10917_v11, %v9742_v50  ;;  %v10918_v32 = vld [vmem:[#allocation43_spill] sm:$0xff]  ;;  %v5028_v10 = vmul.f32 %v9473_v27, %v9748_v45  ;;  %v10927_v39 = vld [vmem:[#allocation78_spill] sm:$0xff] }
0x1a71   : > { %v4995_v33 = vmul.f32 %v10918_v32, %v9745_v57  ;;  %v4838_v62 = vadd.f32 %v4830_v19, %v4797_v61  ;;  %v5061_v53 = vmul.f32 %v9506_v0, %v9751_v49  ;;  %v5094_v42 = vmul.f32 %v9537_v55, %v9754_v8  ;;  %v10925_v61 = vld [vmem:[#allocation45_spill] sm:$0xff]  ;;  %v10928_v32 = vld [vmem:[#allocation83_spill] sm:$0xff] }
0x1a72   : > { %v9796_v17 = vmul.f32 %v9567_v18, %v9757_v20  ;;  %v9800_v15 = vmul.f32 %v9597_v7, %v9760_v43  ;;  %v9804_v52 = vmul.f32 %v9634_v44, %v9763_v40  ;;  %v9808_v27 = vmul.f32 %v9663_v51, %v9766_v30  ;;  %v10919_v18 = vld [vmem:[#allocation123_spill] sm:$0xff]  ;;  %v10920_v7 = vld [vmem:[#allocation133_spill] sm:$0xff]  ;;  %v10921_v44 = vld [vmem:[#allocation100_spill] sm:$0xff] }
0x1a73   : > { %v9811_v0 = vmul.f32 %v5251_v23, %v9769_v1  ;;  %v4871_v55 = vadd.f32 %v4863_v47, %v4838_v62  ;;  %v9814_v41 = vmul.f32 %v5284_v28, %v9772_v12  ;;  %v4796_v22 = vmul.f32 %v10919_v18, %v9727_v26  ;;  %v10926_v47 = vld [vmem:[#allocation57_spill] sm:$0xff] }
0x1a74   : > { %v4829_v63 = vmul.f32 %v10920_v7, %v9730_v37  ;;  %v4862_v16 = vmul.f32 %v10921_v44, %v9733_v35  ;;  %v4895_v51 = vmul.f32 %v10922_v4, %v9736_v6  ;;  %v4928_v23 = vmul.f32 %v10923_v24, %v9739_v14  ;;  %v10929_v18 = vld [vmem:[#allocation73_spill] sm:$0xff]  ;;  %v10932_v24 = vld [vmem:[#allocation114_spill] sm:$0xff] }
0x1a75   : > { %v4961_v46 = vmul.f32 %v10924_v5, %v9742_v50  ;;  %v4904_v28 = vadd.f32 %v4896_v58, %v4871_v55  ;;  %v4994_v19 = vmul.f32 %v10925_v61, %v9745_v57  ;;  %v5027_v38 = vmul.f32 %v10926_v47, %v9748_v45  ;;  %v10930_v44 = vld [vmem:[#allocation97_spill] sm:$0xff] }
0x1a76   : > { %v4837_v34 = vadd.f32 %v4829_v63, %v4796_v22  ;;  %v5060_v11 = vmul.f32 %v10927_v39, %v9751_v49  ;;  %v5093_v62 = vmul.f32 %v10928_v32, %v9754_v8  ;;  %v9838_v7 = vmul.f32 %v10929_v18, %v9757_v20  ;;  %v10931_v63 = vld [vmem:[#allocation107_spill] sm:$0xff]  ;;  %v10934_v39 = vld [vmem:[#allocation121_spill] sm:$0xff] }
0x1a77   : > { %v9842_v58 = vmul.f32 %v10930_v44, %v9760_v43  ;;  %v4937_v55 = vadd.f32 %v4929_v31, %v4904_v28  ;;  %v9846_v4 = vmul.f32 %v10931_v63, %v9763_v40  ;;  %v9850_v5 = vmul.f32 %v10932_v24, %v9766_v30  ;;  %v10935_v31 = vld [vmem:[#allocation118_spill] sm:$0xff]  ;;  %v10936_v18 = vld [vmem:[#allocation91_spill] sm:$0xff] }
0x1a78   : > { %v4870_v22 = vadd.f32 %v4862_v16, %v4837_v34  ;;  %v9854_v61 = vmul.f32 %v9695_v60, %v9769_v1  ;;  %v9857_v47 = vmul.f32 %v5283_v3, %v9772_v12  ;;  %v4795_v32 = vmul.f32 %v10934_v39, %v9727_v26  ;;  %v10937_v63 = vld [vmem:[#allocation23_spill] sm:$0xff]  ;;  %v10938_v60 = vld [vmem:[#allocation32_spill] sm:$0xff]  ;;  %v10939_v3 = vld [vmem:[#allocation54_spill] sm:$0xff] }
0x1a79   : > { %v4828_v16 = vmul.f32 %v10935_v31, %v9730_v37  ;;  %v4970_v28 = vadd.f32 %v4962_v29, %v4937_v55  ;;  %v4861_v44 = vmul.f32 %v10936_v18, %v9733_v35  ;;  %v4894_v24 = vmul.f32 %v10937_v63, %v9736_v6  ;;  %v10940_v39 = vld [vmem:[#allocation46_spill] sm:$0xff]  ;;  %v10941_v29 = vld [vmem:[#allocation20_spill] sm:$0xff]  ;;  %v10942_v55 = vld [vmem:[#allocation79_spill] sm:$0xff] }
0x1a7a   : > { %10933 = vst [vmem:[#allocation132_spill] sm:$0xff] %v9857_v47  ;;  %v4903_v34 = vadd.f32 %v4895_v51, %v4870_v22  ;;  %v4927_v48 = vmul.f32 %v10938_v60, %v9739_v14  ;;  %v4960_v36 = vmul.f32 %v10939_v3, %v9742_v50  ;;  %v4993_v9 = vmul.f32 %v10940_v39, %v9745_v57  ;;  %v10944_v63 = vld [vmem:[#allocation15_spill] sm:$0xff]  ;;  %v10945_v3 = vld [vmem:[#allocation98_spill] sm:$0xff]  ;;  %v10948_v39 = vld [vmem:[#allocation105_spill] sm:$0xff] }
0x1a7b   : > { %v4836_v21 = vadd.f32 %v4828_v16, %v4795_v32  ;;  %v5003_v47 = vadd.f32 %v4995_v33, %v4970_v28  ;;  %v5026_v51 = vmul.f32 %v10941_v29, %v9748_v45  ;;  %v5059_v22 = vmul.f32 %v10942_v55, %v9751_v49  ;;  %v10943_v32 = vld [vmem:[#allocation76_spill] sm:$0xff] }
0x1a7c   : > { %v4936_v31 = vadd.f32 %v4928_v23, %v4903_v34  ;;  %v5092_v16 = vmul.f32 %v10943_v32, %v9754_v8  ;;  %v9881_v60 = vmul.f32 %v10944_v63, %v9757_v20  ;;  %v9885_v54 = vmul.f32 %v10945_v3, %v9760_v43  ;;  %v10946_v28 = vld [vmem:[#allocation108_spill] sm:$0xff]  ;;  %v10953_v32 = vld [vmem:[#allocation117_spill] sm:$0xff] }
0x1a7d   : > { %v4869_v18 = vadd.f32 %v4861_v44, %v4836_v21  ;;  %v5036_v33 = vadd.f32 %v5028_v10, %v5003_v47  ;;  %v9889_v34 = vmul.f32 %v10946_v28, %v9763_v40  ;;  %v9893_v21 = vmul.f32 %v10948_v39, %v9766_v30  ;;  %v10952_v10 = vld [vmem:[#allocation14_spill] sm:$0xff]  ;;  %v10954_v3 = vld [vmem:[#allocation85_spill] sm:$0xff] }
0x1a7e   : > { %v4969_v23 = vadd.f32 %v4961_v46, %v4936_v31  ;;  %v9897_v29 = vmul.f32 %v9690_v59, %v9769_v1  ;;  %v9901_v55 = vmul.f32 %v9722_v25, %v9772_v12  ;;  %v4794_v46 = vmul.f32 %v10952_v10, %v9727_v26  ;;  %v10956_v39 = vld [vmem:[#allocation33_spill] sm:$0xff]  ;;  %v10957_v25 = vld [vmem:[#allocation55_spill] sm:$0xff] }
0x1a7f   : > { %10947 = vst [vmem:[#allocation131_spill] sm:$0xff] %v9889_v34  ;;  %v4902_v44 = vadd.f32 %v4894_v24, %v4869_v18  ;;  %v5069_v47 = vadd.f32 %v5061_v53, %v5036_v33  ;;  %v4827_v63 = vmul.f32 %v10953_v32, %v9730_v37  ;;  %v4860_v28 = vmul.f32 %v10954_v3, %v9733_v35  ;;  %v10955_v18 = vld [vmem:[#allocation24_spill] sm:$0xff]  ;;  %v10959_v32 = vld [vmem:[#allocation21_spill] sm:$0xff] }
0x1a80   : > { %10949 = vst [vmem:[#allocation130_spill] sm:$0xff] %v9893_v21  ;;  %v5002_v31 = vadd.f32 %v4994_v19, %v4969_v23  ;;  %v4893_v59 = vmul.f32 %v10955_v18, %v9736_v6  ;;  %v10958_v19 = vld [vmem:[#allocation47_spill] sm:$0xff]  ;;  %v5025_v3 = vmul.f32 %v10959_v32, %v9748_v45  ;;  %v10961_v18 = vld [vmem:[#allocation68_spill] sm:$0xff] }
0x1a81   : > { %10950 = vst [vmem:[#allocation127_spill] sm:$0xff] %v9897_v29  ;;  %v4935_v24 = vadd.f32 %v4927_v48, %v4902_v44  ;;  %v4926_v29 = vmul.f32 %v10956_v39, %v9739_v14  ;;  %v5102_v21 = vadd.f32 %v5094_v42, %v5069_v47  ;;  %v4835_v53 = vadd.f32 %v4827_v63, %v4794_v46  ;;  %v10960_v48 = vld [vmem:[#allocation66_spill] sm:$0xff]  ;;  %v10964_v63 = vld [vmem:[#allocation96_spill] sm:$0xff] }
0x1a82   : > { %10951 = vst [vmem:[#allocation124_spill] sm:$0xff] %v9901_v55  ;;  %v4959_v55 = vmul.f32 %v10957_v25, %v9742_v50  ;;  %v5035_v10 = vadd.f32 %v5027_v38, %v5002_v31  ;;  %v4992_v33 = vmul.f32 %v10958_v19, %v9745_v57  ;;  %v5058_v44 = vmul.f32 %v10960_v48, %v9751_v49  ;;  %v10962_v38 = vld [vmem:[#allocation89_spill] sm:$0xff] }
0x1a83   : > { %v4968_v23 = vadd.f32 %v4960_v36, %v4935_v24  ;;  %v9923_v34 = vmul.f32 %v10961_v18, %v9754_v8  ;;  %v5135_v39 = vadd.f32 %v9796_v17, %v5102_v21  ;;  %v4868_v42 = vadd.f32 %v4860_v28, %v4835_v53  ;;  %v10963_v36 = vld [vmem:[#allocation99_spill] sm:$0xff]  ;;  %v10965_v19 = vld [vmem:[#allocation101_spill] sm:$0xff]  ;;  %v5347_v17 = vpop.permute.xlu0 %5346 }
0x1a84   : > { %v5068_v25 = vadd.f32 %v5060_v11, %v5035_v10  ;;  %v9928_v46 = vmul.f32 %v10962_v38, %v9757_v20  ;;  %v9932_v31 = vmul.f32 %v10963_v36, %v9760_v43  ;;  %v9936_v24 = vmul.f32 %v10964_v63, %v9763_v40  ;;  %v10967_v18 = vld [vmem:[#allocation13_spill] sm:$0xff]  ;;  %v5342_v63 = vpop.permute.xlu1 %5341 }
0x1a85   : > { %v5001_v47 = vadd.f32 %v4993_v9, %v4968_v23  ;;  %v9940_v32 = vmul.f32 %v10965_v19, %v9766_v30  ;;  %v5168_v11 = vadd.f32 %v9800_v15, %v5135_v39  ;;  %v4901_v28 = vadd.f32 %v4893_v59, %v4868_v42  ;;  %v10966_v23 = vld [vmem:[#allocation119_spill] sm:$0xff]  ;;  %v10968_v59 = vld [vmem:[#allocation80_spill] sm:$0xff]  ;;  %v10970_v42 = vld [vmem:[#allocation34_spill] sm:$0xff] }
0x1a86   : > { %v5101_v21 = vadd.f32 %v5093_v62, %v5068_v25  ;;  %v9945_v9 = vmul.f32 %v9687_v13, %v9769_v1  ;;  %v9949_v53 = vmul.f32 %v9718_v2, %v9772_v12  ;;  %v4793_v48 = vmul.f32 %v10966_v23, %v9727_v26  ;;  %v10969_v25 = vld [vmem:[#allocation25_spill] sm:$0xff] }
0x1a87   : > { %v5034_v10 = vadd.f32 %v5026_v51, %v5001_v47  ;;  %v4826_v38 = vmul.f32 %v10967_v18, %v9730_v37  ;;  %v5201_v36 = vadd.f32 %v9804_v52, %v5168_v11  ;;  %v4934_v62 = vadd.f32 %v4926_v29, %v4901_v28 }
0x1a88   : > { %v5134_v15 = vadd.f32 %v9838_v7, %v5101_v21  ;;  %v4859_v13 = vmul.f32 %v10968_v59, %v9733_v35  ;;  %v4892_v2 = vmul.f32 %v10969_v25, %v9736_v6  ;;  %v4925_v47 = vmul.f32 %v10970_v42, %v9739_v14  ;;  %v10971_v7 = vld [vmem:[#allocation44_spill] sm:$0xff] }
0x1a89   : > { %v5067_v39 = vadd.f32 %v5059_v22, %v5034_v10  ;;  %v4834_v51 = vadd.f32 %v4826_v38, %v4793_v48  ;;  %v5234_v19 = vadd.f32 %v9808_v27, %v5201_v36  ;;  %v4967_v52 = vadd.f32 %v4959_v55, %v4934_v62  ;;  %v10972_v22 = vld [vmem:[#allocation52_spill] sm:$0xff]  ;;  %v10973_v10 = vld [vmem:[#allocation58_spill] sm:$0xff]  ;;  %v10974_v27 = vld [vmem:[#allocation63_spill] sm:$0xff]  ;;  %v5403_v55 = vpop.permute.xlu2 %5402 }
0x1a8a   : > { %v5167_v23 = vadd.f32 %v9842_v58, %v5134_v15  ;;  %v4958_v29 = vmul.f32 %v10971_v7, %v9742_v50  ;;  %v4991_v28 = vmul.f32 %v10972_v22, %v9745_v57  ;;  %v5024_v48 = vmul.f32 %v10973_v10, %v9748_v45  ;;  %v10981_v22 = vld [vmem:[#allocation111_spill] sm:$0xff] }
0x1a8b   : > { %v5100_v11 = vadd.f32 %v5092_v16, %v5067_v39  ;;  %v4867_v21 = vadd.f32 %v4859_v13, %v4834_v51  ;;  %v5267_v18 = vadd.f32 %v9811_v0, %v5234_v19  ;;  %v5000_v59 = vadd.f32 %v4992_v33, %v4967_v52  ;;  %v10975_v16 = vld [vmem:[#allocation70_spill] sm:$0xff]  ;;  %v5337_v7 = vpop.permute.xlu0 %5336 }
0x1a8c   : > { %v5200_v38 = vadd.f32 %v9846_v4, %v5167_v23  ;;  %v5057_v58 = vmul.f32 %v10974_v27, %v9751_v49  ;;  %v5090_v62 = vmul.f32 %v10975_v16, %v9754_v8  ;;  %v10976_v13 = vld [vmem:[#allocation90_spill] sm:$0xff]  ;;  %v10003_v10 = vmul.f32 %v10981_v22, %v9772_v12  ;;  %v10983_v27 = vld [vmem:[#allocation132_spill] sm:$0xff] }
0x1a8d   : > { %v5133_v36 = vadd.f32 %v9881_v60, %v5100_v11  ;;  %v4900_v15 = vadd.f32 %v4892_v2, %v4867_v21  ;;  %v5123_v39 = vmul.f32 %v10976_v13, %v9757_v20  ;;  %v5300_v51 = vadd.f32 %v9814_v41, %v5267_v18  ;;  %v10977_v4 = vld [vmem:[#allocation74_spill] sm:$0xff]  ;;  %v10978_v60 = vld [vmem:[#allocation92_spill] sm:$0xff]  ;;  %v10980_v21 = vld [vmem:[#allocation131_spill] sm:$0xff] }
0x1a8e   : > { %v5233_v0 = vadd.f32 %v9850_v5, %v5200_v38  ;;  %v5033_v25 = vadd.f32 %v5025_v3, %v5000_v59  ;;  %v9984_v33 = vmul.f32 %v10977_v4, %v9760_v43  ;;  %v9989_v2 = vmul.f32 %v10978_v60, %v9763_v40  ;;  %v10979_v23 = vld [vmem:[#allocation102_spill] sm:$0xff]  ;;  %v10982_v18 = vld [vmem:[#allocation145_spill] sm:$0xff]  ;;  %v10988_v60 = vld [vmem:[#allocation127_spill] sm:$0xff] }
0x1a8f   : > { %v5166_v42 = vadd.f32 %v9885_v54, %v5133_v36  ;;  %v4933_v19 = vadd.f32 %v4925_v47, %v4900_v15  ;;  %v9993_v52 = vmul.f32 %v10979_v23, %v9766_v30  ;;  %v5356_v41 = vmul.f32 %v5347_v17, %v5300_v51  ;;  %v10987_v51 = vld [vmem:[#allocation27_spill] sm:$0xff]  ;;  %v10991_v22 = vld [vmem:[#allocation48_spill] sm:$0xff] }
0x1a90   : > { %v5266_v5 = vadd.f32 %v9854_v61, %v5233_v0  ;;  %v5066_v3 = vadd.f32 %v5058_v44, %v5033_v25  ;;  %v9998_v11 = vmul.f32 %v9684_v56, %v9769_v1  ;;  %v4792_v38 = vmul.f32 %v10982_v18, %v9727_v26  ;;  %v10984_v44 = vld [vmem:[#allocation39_spill] sm:$0xff]  ;;  %v10985_v56 = vld [vmem:[#allocation130_spill] sm:$0xff]  ;;  %v5398_v25 = vpop.permute.xlu1 %5397 }
0x1a91   : > { %v5199_v54 = vadd.f32 %v10980_v21, %v5166_v42  ;;  %v4966_v47 = vadd.f32 %v4958_v29, %v4933_v19  ;;  %v5412_v59 = vadd.f32 %v5403_v55, %v5356_v41  ;;  %v4825_v36 = vmul.f32 %v10984_v44, %v9730_v37  ;;  %v10986_v29 = vld [vmem:[#allocation67_spill] sm:$0xff]  ;;  %v10989_v41 = vld [vmem:[#allocation36_spill] sm:$0xff]  ;;  %v5332_v18 = vpop.permute.xlu2 %5331 }
0x1a92   : > { %v5299_v17 = vadd.f32 %v10983_v27, %v5266_v5  ;;  %v5099_v61 = vadd.f32 %v9923_v34, %v5066_v3  ;;  %v4858_v13 = vmul.f32 %v10986_v29, %v9733_v35  ;;  %v4891_v0 = vmul.f32 %v10987_v51, %v9736_v6 }
0x1a93   : > { %v5232_v15 = vadd.f32 %v10985_v56, %v5199_v54  ;;  %v4999_v16 = vadd.f32 %v4991_v28, %v4966_v47  ;;  %v5420_v4 = vmax.f32 %v5412_v59, 0.0  ;;  %v4833_v19 = vadd.f32 %v4825_v36, %v4792_v38  ;;  %v10990_v28 = vld [vmem:[#allocation40_spill] sm:$0xff] }
0x1a94   : > { %v5355_v42 = vmul.f32 %v5342_v63, %v5299_v17  ;;  %v5132_v55 = vadd.f32 %v9928_v46, %v5099_v61  ;;  %v4924_v5 = vmul.f32 %v10989_v41, %v9739_v14  ;;  %v4957_v3 = vmul.f32 %v10990_v28, %v9742_v50  ;;  %v10992_v46 = vld [vmem:[#allocation124_spill] sm:$0xff]  ;;  %v11001_v41 = vld [vmem:[#allocation109_spill] sm:$0xff] }
0x1a95   : > { %v5265_v34 = vadd.f32 %v10988_v60, %v5232_v15  ;;  %v5032_v23 = vadd.f32 %v5024_v48, %v4999_v16  ;;  %5509 = vmatpush.msra.mxu2 %v5420_v4  ;;  %v4866_v47 = vadd.f32 %v4858_v13, %v4833_v19  ;;  %v4990_v63 = vmul.f32 %v10991_v22, %v9745_v57  ;;  %v10993_v48 = vld [vmem:[#allocation60_spill] sm:$0xff]  ;;  %v5393_v4 = vpop.permute.xlu0 %5392  ;;  %v10999_v19 = vld [vmem:[#allocation103_spill] sm:$0xff] }
0x1a96   : > { %v5411_v21 = vadd.f32 %v5398_v25, %v5355_v42  ;;  %v5165_v54 = vadd.f32 %v9932_v31, %v5132_v55  ;;  %v5023_v27 = vmul.f32 %v10993_v48, %v9748_v45  ;;  %v10994_v17 = vld [vmem:[#allocation64_spill] sm:$0xff]  ;;  %v10054_v28 = vmul.f32 %v11001_v41, %v9772_v12  ;;  %v11012_v41 = vld [vmem:[#allocation81_spill] sm:$0xff] }
0x1a97   : > { %v5298_v38 = vadd.f32 %v10992_v46, %v5265_v34  ;;  %v5065_v59 = vadd.f32 %v5057_v58, %v5032_v23  ;;  %v5056_v61 = vmul.f32 %v10994_v17, %v9751_v49  ;;  %v4899_v56 = vadd.f32 %v4891_v0, %v4866_v47  ;;  %v10995_v31 = vld [vmem:[#allocation72_spill] sm:$0xff]  ;;  %v10997_v58 = vld [vmem:[#allocation86_spill] sm:$0xff] }
0x1a98   : > { %v5419_v44 = vmax.f32 %v5411_v21, 0.0  ;;  %v5198_v36 = vadd.f32 %v9936_v24, %v5165_v54  ;;  %v5089_v15 = vmul.f32 %v10995_v31, %v9754_v8  ;;  %v10996_v13 = vld [vmem:[#allocation84_spill] sm:$0xff]  ;;  %v10037_v25 = vmul.f32 %v10997_v58, %v9760_v43  ;;  %v10998_v24 = vld [vmem:[#allocation93_spill] sm:$0xff]  ;;  %v11000_v34 = vld [vmem:[#allocation110_spill] sm:$0xff] }
0x1a99   : > { %v5354_v16 = vmul.f32 %v5337_v7, %v5298_v38  ;;  %v5098_v29 = vadd.f32 %v5090_v62, %v5065_v59  ;;  %v5122_v51 = vmul.f32 %v10996_v13, %v9757_v20  ;;  %v4932_v55 = vadd.f32 %v4924_v5, %v4899_v56  ;;  %v11002_v21 = vld [vmem:[#allocation116_spill] sm:$0xff]  ;;  %v11003_v47 = vld [vmem:[#allocation30_spill] sm:$0xff]  ;;  %v11006_v56 = vld [vmem:[#allocation37_spill] sm:$0xff] }
0x1a9a   : > { %5510 = vmatpush.msra.mxu2 %v5419_v44  ;;  %v5231_v42 = vadd.f32 %v9940_v32, %v5198_v36  ;;  %v10042_v0 = vmul.f32 %v10998_v24, %v9763_v40  ;;  %v10046_v7 = vmul.f32 %v10999_v19, %v9766_v30  ;;  %v10050_v23 = vmul.f32 %v11000_v34, %v9769_v1  ;;  %v11004_v38 = vld [vmem:[#allocation138_spill] sm:$0xff]  ;;  %v11005_v48 = vld [vmem:[#allocation28_spill] sm:$0xff]  ;;  %v5327_v44 = vpop.permute.xlu1 %5326  ;;  %v11008_v13 = vld [vmem:[#allocation49_spill] sm:$0xff] }
0x1a9b   : > { %v5410_v62 = vadd.f32 %v5393_v4, %v5354_v16  ;;  %v5131_v60 = vadd.f32 %v5123_v39, %v5098_v29  ;;  %v4965_v5 = vadd.f32 %v4957_v3, %v4932_v55  ;;  %v4791_v54 = vmul.f32 %v11002_v21, %v9727_v26  ;;  %v11007_v29 = vld [vmem:[#allocation41_spill] sm:$0xff] }
0x1a9c   : > { %v5264_v32 = vadd.f32 %v9945_v9, %v5231_v42  ;;  %v4824_v22 = vmul.f32 %v11003_v47, %v9730_v37  ;;  %v4857_v59 = vmul.f32 %v11004_v38, %v9733_v35  ;;  %v4890_v17 = vmul.f32 %v11005_v48, %v9736_v6  ;;  %v11009_v4 = vld [vmem:[#allocation61_spill] sm:$0xff]  ;;  %v11016_v38 = vld [vmem:[#allocation112_spill] sm:$0xff] }
0x1a9d   : > { %v5418_v46 = vmax.f32 %v5410_v62, 0.0  ;;  %v5164_v39 = vadd.f32 %v9984_v33, %v5131_v60  ;;  %v4998_v9 = vadd.f32 %v4990_v63, %v4965_v5  ;;  %v4923_v31 = vmul.f32 %v11006_v56, %v9739_v14  ;;  %v11010_v63 = vld [vmem:[#allocation65_spill] sm:$0xff]  ;;  %v5388_v62 = vpop.permute.xlu2 %5387  ;;  %v11013_v5 = vld [vmem:[#allocation87_spill] sm:$0xff] }
0x1a9e   : > { %v5297_v36 = vadd.f32 %v9949_v53, %v5264_v32  ;;  %v4832_v3 = vadd.f32 %v4824_v22, %v4791_v54  ;;  %v4956_v33 = vmul.f32 %v11007_v29, %v9742_v50  ;;  %v4989_v58 = vmul.f32 %v11008_v13, %v9745_v57  ;;  %v11017_v48 = vld [vmem:[#allocation69_spill] sm:$0xff]  ;;  %v11020_v13 = vld [vmem:[#allocation56_spill] sm:$0xff] }
0x1a9f   : > { %5511 = vmatpush.msra.mxu2 %v5418_v46  ;;  %v5197_v16 = vadd.f32 %v9989_v2, %v5164_v39  ;;  %v5022_v42 = vmul.f32 %v11009_v4, %v9748_v45  ;;  %v5031_v24 = vadd.f32 %v5023_v27, %v4998_v9  ;;  %v5055_v19 = vmul.f32 %v11010_v63, %v9751_v49  ;;  %v11011_v2 = vld [vmem:[#allocation75_spill] sm:$0xff]  ;;  %v11014_v27 = vld [vmem:[#allocation94_spill] sm:$0xff]  ;;  %v11015_v39 = vld [vmem:[#allocation104_spill] sm:$0xff] }
0x1aa0   : > { %v5353_v55 = vmul.f32 %v5332_v18, %v5297_v36  ;;  %v4865_v53 = vadd.f32 %v4857_v59, %v4832_v3  ;;  %v5088_v34 = vmul.f32 %v11011_v2, %v9754_v8  ;;  %v5121_v32 = vmul.f32 %v11012_v41, %v9757_v20  ;;  %v11019_v29 = vld [vmem:[#allocation17_spill] sm:$0xff]  ;;  %v11024_v2 = vld [vmem:[#allocation50_spill] sm:$0xff] }
0x1aa1   : > { %v5230_v60 = vadd.f32 %v9993_v52, %v5197_v16  ;;  %v5154_v21 = vmul.f32 %v11013_v5, %v9760_v43  ;;  %v5064_v47 = vadd.f32 %v5056_v61, %v5031_v24  ;;  %v5187_v22 = vmul.f32 %v11014_v27, %v9763_v40  ;;  %v11018_v61 = vld [vmem:[#allocation115_spill] sm:$0xff]  ;;  %v11025_v41 = vld [vmem:[#allocation62_spill] sm:$0xff] }
0x1aa2   : > { %v5409_v54 = vadd.f32 %v5388_v62, %v5353_v55  ;;  %v4898_v18 = vadd.f32 %v4890_v17, %v4865_v53  ;;  %v5220_v52 = vmul.f32 %v11015_v39, %v9766_v30  ;;  %v5253_v59 = vmul.f32 %v11016_v38, %v9769_v1  ;;  %v11021_v55 = vld [vmem:[#allocation29_spill] sm:$0xff]  ;;  %v11023_v62 = vld [vmem:[#allocation42_spill] sm:$0xff]  ;;  %v5383_v5 = vpop.permute.xlu1 %5382 }
0x1aa3   : > { %v5263_v46 = vadd.f32 %v9998_v11, %v5230_v60  ;;  %v5286_v36 = vmul.f32 %v11017_v48, %v9772_v12  ;;  %v5097_v3 = vadd.f32 %v5089_v15, %v5064_v47  ;;  %v4790_v17 = vmul.f32 %v11018_v61, %v9727_v26  ;;  %v11022_v15 = vld [vmem:[#allocation38_spill] sm:$0xff]  ;;  %v11033_v61 = vld [vmem:[#allocation71_spill] sm:$0xff] }
0x1aa4   : > { %v5417_v9 = vmax.f32 %v5409_v54, 0.0  ;;  %v4931_v56 = vadd.f32 %v4923_v31, %v4898_v18  ;;  %v4823_v11 = vmul.f32 %v11019_v29, %v9730_v37  ;;  %v4856_v4 = vmul.f32 %v11020_v13, %v9733_v35  ;;  %v5322_v18 = vpop.permute.xlu0 %5321  ;;  %v11028_v27 = vld [vmem:[#allocation82_spill] sm:$0xff] }
0x1aa5   : > { %v5296_v16 = vadd.f32 %v10003_v10, %v5263_v46  ;;  %v4889_v24 = vmul.f32 %v11021_v55, %v9736_v6  ;;  %v5130_v53 = vadd.f32 %v5122_v51, %v5097_v3  ;;  %v4922_v31 = vmul.f32 %v11022_v15, %v9739_v14  ;;  %v11026_v51 = vld [vmem:[#allocation59_spill] sm:$0xff]  ;;  %v11027_v14 = vld [vmem:[#allocation77_spill] sm:$0xff] }
0x1aa6   : > { %5512 = vmatpush.msra.mxu2 %v5417_v9  ;;  %v4964_v63 = vadd.f32 %v4956_v33, %v4931_v56  ;;  %v4955_v26 = vmul.f32 %v11023_v62, %v9742_v50  ;;  %v4831_v10 = vadd.f32 %v4823_v11, %v4790_v17  ;;  %v4988_v37 = vmul.f32 %v11024_v2, %v9745_v57  ;;  %v11029_v57 = vld [vmem:[#allocation88_spill] sm:$0xff]  ;;  %v11032_v3 = vld [vmem:[#allocation113_spill] sm:$0xff] }
0x1aa7   : > { %v5352_v60 = vmul.f32 %v5327_v44, %v5296_v16  ;;  %v5021_v35 = vmul.f32 %v11025_v41, %v9748_v45  ;;  %v5163_v6 = vadd.f32 %v10037_v25, %v5130_v53  ;;  %v5054_v33 = vmul.f32 %v11026_v51, %v9751_v49  ;;  %v11030_v25 = vld [vmem:[#allocation95_spill] sm:$0xff]  ;;  %v11031_v49 = vld [vmem:[#allocation106_spill] sm:$0xff]  ;;  %v5425_v51 = vld [vmem:[%s10238_s17 + $0x20] sm:$0xff] }
0x1aa8   : > { %v4997_v54 = vadd.f32 %v4989_v58, %v4964_v63  ;;  %v5087_v47 = vmul.f32 %v11027_v14, %v9754_v8  ;;  %v4864_v44 = vadd.f32 %v4856_v4, %v4831_v10  ;;  %v5120_v46 = vmul.f32 %v11028_v27, %v9757_v20  ;;  %v5427_v14 = vld [vmem:[%s10238_s17 + $0x30] sm:$0xff] }
0x1aa9   : > { %v5408_v50 = vadd.f32 %v5383_v5, %v5352_v60  ;;  %v5153_v39 = vmul.f32 %v11029_v57, %v9760_v43  ;;  %v5196_v45 = vadd.f32 %v10042_v0, %v5163_v6  ;;  %v5186_v58 = vmul.f32 %v11030_v25, %v9763_v40  ;;  %v5423_v6 = vld [vmem:[%s10238_s17 + $0x10] sm:$0xff] }
0x1aaa   : > { %v5030_v38 = vadd.f32 %v5022_v42, %v4997_v54  ;;  %v5219_v48 = vmul.f32 %v11031_v49, %v9766_v30  ;;  %v4897_v8 = vadd.f32 %v4889_v24, %v4864_v44  ;;  %v5252_v56 = vmul.f32 %v11032_v3, %v9769_v1  ;;  %v5317_v1 = vpop.permute.xlu2 %5316  ;;  %v5312_v41 = vpop.permute.xlu1 %5311  ;;  %v5424_v54 = vld [vmem:[%s10238_s17 + $0x18] sm:$0xff]  ;;  %v5542_v44 = vld [vmem:[%s10165_s24] sm:$0xff] }
0x1aab   : > { %v5416_v9 = vmax.f32 %v5408_v50, 0.0  ;;  %v5285_v20 = vmul.f32 %v11033_v61, %v9772_v12  ;;  %v5229_v17 = vadd.f32 %v10046_v7, %v5196_v45  ;;  %v5543_v45 = vld [vmem:[%s10165_s24 + $0x8] sm:$0xff]  ;;  %v5545_v61 = vld [vmem:[%s10165_s24 + $0x18] sm:$0xff] }
0x1aac   : > { %v5063_v43 = vadd.f32 %v5055_v19, %v5030_v38  ;;  %v4930_v0 = vadd.f32 %v4922_v31, %v4897_v8  ;;  %v5378_v55 = vpop.permute.xlu0 %5377 }
0x1aad   : > { %5513 = vmatpush.msra.mxu2 %v5416_v9  ;;  %v5262_v42 = vadd.f32 %v10050_v23, %v5229_v17 }
0x1aae   : > { %v5096_v16 = vadd.f32 %v5088_v34, %v5063_v43  ;;  %v4963_v40 = vadd.f32 %v4955_v26, %v4930_v0 }
0x1aaf   : > { %v5295_v29 = vadd.f32 %v10054_v28, %v5262_v42  ;;  %v5546_v42 = vld [vmem:[%s10165_s24 + $0x20] sm:$0xff] }
0x1ab0   : > { %v5129_v30 = vadd.f32 %v5121_v32, %v5096_v16  ;;  %v4996_v11 = vadd.f32 %v4988_v37, %v4963_v40 }
0x1ab1   : > { %v5351_v13 = vmul.f32 %v5322_v18, %v5295_v29 }
0x1ab2   : > { %v5162_v4 = vadd.f32 %v5154_v21, %v5129_v30  ;;  %v5029_v24 = vadd.f32 %v5021_v35, %v4996_v11  ;;  %v5373_v28 = vpop.permute.xlu2 %5372  ;;  %v5440_v18 = vpop.permute.xlu1 %5439  ;;  %v5547_v11 = vld [vmem:[%s10165_s24 + $0x28] sm:$0xff] }
0x1ab3   : > { %v5407_v53 = vadd.f32 %v5378_v55, %v5351_v13 }
0x1ab4   : > { %v5195_v12 = vadd.f32 %v5187_v22, %v5162_v4  ;;  %v5062_v63 = vadd.f32 %v5054_v33, %v5029_v24  ;;  %v5368_v35 = vpop.permute.xlu0 %5367  ;;  %v5426_v33 = vld [vmem:[%s10238_s17 + $0x28] sm:$0xff]  ;;  %v5548_v24 = vld [vmem:[%s10165_s24 + $0x30] sm:$0xff] }
0x1ab5   : > { %v5415_v7 = vmax.f32 %v5407_v53, 0.0 }
0x1ab6   : > { %v5228_v19 = vadd.f32 %v5220_v52, %v5195_v12  ;;  %v5095_v15 = vadd.f32 %v5087_v47, %v5062_v63  ;;  %v5428_v47 = vld [vmem:[%s10238_s17 + $0x38] sm:$0xff] }
0x1ab7   : > { %5514 = vmatpush.msra.mxu2 %v5415_v7 }
0x1ab8   : > { %v5261_v31 = vadd.f32 %v5253_v59, %v5228_v19  ;;  %v5128_v23 = vadd.f32 %v5120_v46, %v5095_v15  ;;  %v5421_v59 = vld [vmem:[%s10238_s17] sm:$0xff]  ;;  %v5549_v19 = vld [vmem:[%s10165_s24 + $0x38] sm:$0xff] }
0x1aba   : > { %v5294_v34 = vadd.f32 %v5286_v36, %v5261_v31  ;;  %v5161_v62 = vadd.f32 %v5153_v39, %v5128_v23  ;;  %v5422_v36 = vld [vmem:[%s10238_s17 + $0x8] sm:$0xff]  ;;  %v5445_v57 = vpop.permute.xlu2 %5444  ;;  %v5455_v3 = vpop.permute.xlu1 %5454 }
0x1abc   : > { %v5350_v26 = vmul.f32 %v5317_v1, %v5294_v34  ;;  %v5194_v32 = vadd.f32 %v5186_v58, %v5161_v62  ;;  %v5450_v58 = vpop.permute.xlu0 %5449 }
0x1abe   : > { %v5406_v60 = vadd.f32 %v5373_v28, %v5350_v26  ;;  %v5227_v10 = vadd.f32 %v5219_v48, %v5194_v32  ;;  %v5544_v48 = vld [vmem:[%s10165_s24 + $0x10] sm:$0xff] }
0x1ac0   : > { %v5414_v21 = vmax.f32 %v5406_v60, 0.0  ;;  %v5260_v2 = vadd.f32 %v5252_v56, %v5227_v10 }
0x1ac2   : > { %5515 = vmatpush.msra.mxu2 %v5414_v21  ;;  %v5293_v37 = vadd.f32 %v5285_v20, %v5260_v2  ;;  %v5460_v43 = vpop.permute.xlu2 %5459  ;;  %v5470_v55 = vpop.permute.xlu1 %5469 }
0x1ac4   : > { %v5349_v22 = vmul.f32 %v5312_v41, %v5293_v37  ;;  %v5465_v29 = vpop.permute.xlu0 %5464 }
0x1ac6   : > { %v5405_v5 = vadd.f32 %v5368_v35, %v5349_v22 }
0x1ac8   : > { %v5413_v52 = vmax.f32 %v5405_v5, 0.0 }
0x1aca   : > { %5516 = vmatpush.msra.mxu2 %v5413_v52  ;;  %v5475_v63 = vpop.permute.xlu2 %5474 }
0x1acb   : > { %6172 = vmatmul.msk.f32.vlgmr.msra.gmra.mxu2 %vm2303_vm1, %v5421_v59 }
0x1ad3   : > { %6173 = vmatmul.msk.f32.gmra.mxu2 %vm2303_vm1, %v5422_v36 }
0x1adb   : > { %6174 = vmatmul.msk.f32.gmra.mxu2 %vm2303_vm1, %v5423_v6 }
0x1ae3   : > { %6175 = vmatmul.msk.f32.gmra.mxu2 %vm2303_vm1, %v5424_v54 }
0x1aeb   : > { %6176 = vmatmul.msk.f32.gmra.mxu2 %vm2303_vm1, %v5425_v51 }
0x1af3   : > { %6177 = vmatmul.msk.f32.gmra.mxu2 %vm2303_vm1, %v5426_v33 }
0x1afb   : > { %6178 = vmatmul.msk.f32.gmra.mxu2 %vm2303_vm1, %v5427_v14 }
0x1b03   : > { %6179 = vmatmul.msk.f32.gmra.mxu2 %vm2303_vm1, %v5428_v47 }
0x1b4e   : > { %v5518_v50 = vpop.f32.mrf.mxu2 }
0x1b4f   : > { %v5519_v27 = vadd.f32 %v5518_v50, %v5440_v18 }
0x1b51   : > { %v5550_v46 = vadd.f32 %v5542_v44, %v5519_v27 }
0x1b53   : > { %5558 = vst [vmem:[%s10169_s4] sm:$0xff] %v5550_v46 }
0x1b56   : > { %v5521_v39 = vpop.f32.mrf.mxu2 }
0x1b57   : > { %v5522_v38 = vadd.f32 %v5521_v39, %v5445_v57 }
0x1b59   : > { %v5551_v25 = vadd.f32 %v5543_v45, %v5522_v38 }
0x1b5b   : > { %5559 = vst [vmem:[%s10169_s4 + $0x8] sm:$0xff] %v5551_v25 }
0x1b5e   : > { %v5524_v49 = vpop.f32.mrf.mxu2 }
0x1b5f   : > { %v5525_v9 = vadd.f32 %v5524_v49, %v5450_v58 }
0x1b61   : > { %v5552_v8 = vadd.f32 %v5544_v48, %v5525_v9 }
0x1b63   : > { %5560 = vst [vmem:[%s10169_s4 + $0x10] sm:$0xff] %v5552_v8 }
0x1b66   : > { %v5527_v56 = vpop.f32.mrf.mxu2 }
0x1b67   : > { %v5528_v20 = vadd.f32 %v5527_v56, %v5455_v3 }
0x1b69   : > { %v5553_v17 = vadd.f32 %v5545_v61, %v5528_v20 }
0x1b6b   : > { %5561 = vst [vmem:[%s10169_s4 + $0x18] sm:$0xff] %v5553_v17 }
0x1b6e   : > { %v5530_v0 = vpop.f32.mrf.mxu2 }
0x1b6f   : > { %v5531_v16 = vadd.f32 %v5530_v0, %v5460_v43 }
0x1b71   : > { %v5554_v40 = vadd.f32 %v5546_v42, %v5531_v16 }
0x1b73   : > { %5562 = vst [vmem:[%s10169_s4 + $0x20] sm:$0xff] %v5554_v40 }
0x1b76   : > { %v5533_v30 = vpop.f32.mrf.mxu2 }
0x1b77   : > { %v5534_v13 = vadd.f32 %v5533_v30, %v5465_v29 }
0x1b79   : > { %v5555_v4 = vadd.f32 %v5547_v11, %v5534_v13 }
0x1b7b   : > { %5563 = vst [vmem:[%s10169_s4 + $0x28] sm:$0xff] %v5555_v4 }
0x1b7e   : > { %v5536_v1 = vpop.f32.mrf.mxu2 }
0x1b7f   : > { %v5537_v53 = vadd.f32 %v5536_v1, %v5470_v55 }
0x1b81   : > { %v5556_v12 = vadd.f32 %v5548_v24, %v5537_v53 }
0x1b83   : > { %5564 = vst [vmem:[%s10169_s4 + $0x30] sm:$0xff] %v5556_v12 }
0x1b86   : > { %v5539_v7 = vpop.f32.mrf.mxu2 }
0x1b87   : > { %v5540_v15 = vadd.f32 %v5539_v7, %v5475_v63 }
0x1b89   : > { %v5557_v31 = vadd.f32 %v5549_v19, %v5540_v15 }
0x1b8b   : > { %5565 = vst [vmem:[%s10169_s4 + $0x38] sm:$0xff] %v5557_v31 }
0x1b8c   : > { %6330 = shalt.err (!%p6327_p5)
}
0x1b8d   : > { %s6368_s22 = smov 128   ;;  %s6369_s4 = smov 256  }
0x1b8e   : > { %s6370_s28 = smov 8  }
0x1b8f   : > { %6185 = dma.vmem_to_hbm [thread:$0]  (%p6513_p6), %s5579_s27, 1024, %s5581_s23, %s5567_s3, %s6368_s22, %s6369_s4, %s6370_s28  }
0x1b90 PF: > { %s5595_s6 = sand.u32 1, %s6353_s0   ;;  %p6188_p7 = pnand %p5723_p9, %p6517_p8 }
0x1b91   : > { %s5596_s5 = scalar_lea.sflag [#allocation8], %s5595_s6 }
0x1b92   : > { %p6189_p10 = pneg %p6188_p7 }
0x1b94   : > { %6348 = dma.done.wait (%p6189_p10), %s5596_s5, 1024  }
0x1b95   : > { %6350 = vsyncadd (%p6189_p10), %s5596_s5, 4294966272  ;;  %s11036_s21 = sld [smem:[#allocation10_spill]]  ;;  %s11038_s0 = smov %s6357_s30 }
0x1b96   : > { %s11037_s1 = sld [smem:[#allocation11_spill]]  ;;  %s11039_s30 = smov %s6361_s20 }
0x1b9b   : > { %p29_p11 = scmp.ge.s32.totalorder %s11036_s21, 4  }
0x1b9c   : > { %s11040_s20 = smov %s11037_s1 }
0x1b9d   :  { %31 = sbr.rel (!%p29_p11) target bundleno = 12 (0xc), region = 403 }
0x1ba2   :  { %5602 = vsyncpa [#allocation8], 1 }
0x1ba3   :  { %5604 = vsyncpa [#allocation8 + $0x1], 1 }

</bundles_post_ra>
